<compile_context>
chip_gen: v7x
topology: tpu7x:2x2x1
jax: 0.10.0
libtpu: 0.0.40
codegen_flags: <defaults>
</compile_context>

<pallas_src>
import math
import functools

import jax
import jax.numpy as jnp
from jax import lax
from jax.experimental import pallas as pl
from jax.experimental.pallas import tpu as pltpu


_NUM_ENC_PARAMS = 18
_PARAM_ORDER = ('wq', 'bq', 'wk', 'bk', 'wv', 'bv', 'wo', 'bo',
                'w1', 'b1', 'w2', 'b2',
                'ln0_g', 'ln0_b', 'ln1_g', 'ln1_b', 'lnf_g', 'lnf_b')


# ----------------------------- fused kernel -----------------------------

def _tet_kernel(*refs, num_heads, batch_block):
    """Whole TextEnhancedTransformer forward for `batch_block` batch elements per grid step."""
    xq_ref, xk_ref, xt_ref, pq_ref, pk_ref, pt_ref = refs[:6]
    lower = refs[6:6 + _NUM_ENC_PARAMS]
    upper = refs[6 + _NUM_ENC_PARAMS:6 + 2 * _NUM_ENC_PARAMS]
    o_ref = refs[6 + 2 * _NUM_ENC_PARAMS]

    D = pq_ref.shape[-1]
    H = num_heads
    embed_scale = math.sqrt(D)

    pos_q = pq_ref[...]      # (Sq, D): lower query positions, also upper kv positions (c)
    pos_k = pk_ref[...]      # (Sk, D): upper query positions
    pos_t = pt_ref[...]      # (St, D): lower kv positions

    def layer_norm(z, g, b):                      # f32 LayerNorm over the feature (lane) axis
        mu = jnp.mean(z, axis=-1, keepdims=True)
        zc = z - mu
        var = jnp.mean(zc * zc, axis=-1, keepdims=True)
        return zc * lax.rsqrt(var + 1e-5) * g + b

    def run_encoder(x_q, x_kv, prm):
        (wq, bq, wk, bk, wv, bv, wo, bo, w1, b1, w2, b2,
         g0, e0, g1, e1, gf, ef) = prm
        n_layers = wq.shape[0]
        sq, skv = x_q.shape[0], x_kv.shape[0]

        # Additive future mask, generated in-kernel.  Finite -1e30 (not -inf) so a fully
        # masked row can never produce -inf - (-inf) = NaN or 1/0 in the softmax.
        row = lax.broadcasted_iota(jnp.int32, (1, sq, skv), 1)
        col = lax.broadcasted_iota(jnp.int32, (1, sq, skv), 2)
        neg_mask = jnp.where(col - row >= 1 + abs(skv - sq),
                             jnp.float32(-1e30), jnp.float32(0.0))

        x = x_q
        for l in range(n_layers):                 # static, unrolled; weights VMEM-resident
            # Pre-LN on query and on the (shared) key/value stream; bf16 casts hoisted.
            q_ln = layer_norm(x, g0[l], e0[l]).astype(jnp.bfloat16)
            kv_ln = layer_norm(x_kv, g0[l], e0[l]).astype(jnp.bfloat16)
            q_b = jnp.broadcast_to(q_ln, (H,) + q_ln.shape)      # (H, Sq, D) bf16
            kv_b = jnp.broadcast_to(kv_ln, (H,) + kv_ln.shape)   # (H, Skv, D) bf16

            # Head-batched projections (weights per head: (H, dh, D), contract last dims).
            # 1/sqrt(dh) scaling is folded into wq/bq at init time.
            qh = jnp.einsum('hsd,hfd->hsf', q_b, wq[l],
                            preferred_element_type=jnp.float32) + bq[l]   # (H, Sq, dh)
            kh = jnp.einsum('hsd,hfd->hsf', kv_b, wk[l],
                            preferred_element_type=jnp.float32) + bk[l]   # (H, Skv, dh)
            vh = jnp.einsum('hsd,hfd->hsf', kv_b, wv[l],
                            preferred_element_type=jnp.float32) + bv[l]   # (H, Skv, dh)

            # Scores + one softmax pass over all heads.
            s = jnp.einsum('hqd,hkd->hqk', qh.astype(jnp.bfloat16),
                           kh.astype(jnp.bfloat16),
                           preferred_element_type=jnp.float32)            # (H, Sq, Skv)
            s = s + neg_mask
            s = s - jnp.max(s, axis=-1, keepdims=True)
            p = jnp.exp(s)
            p = p * pl.reciprocal(jnp.sum(p, axis=-1, keepdims=True), approx=True)

            ctx = jnp.einsum('hqk,hkd->hqd', p.astype(jnp.bfloat16),
                             vh.astype(jnp.bfloat16),
                             preferred_element_type=jnp.float32)          # (H, Sq, dh)
            proj = jnp.einsum('hqd,hdf->hqf', ctx.astype(jnp.bfloat16), wo[l],
                              preferred_element_type=jnp.float32)         # (H, Sq, D)

            # Head sum (unrolled, tiny static H) -> output projection result; + residual.
            attn_out = proj[0]
            for h_idx in range(1, H):
                attn_out = attn_out + proj[h_idx]
            x = x + attn_out + bo[l]

            # Pre-LN position-wise FFN + residual.
            h1 = layer_norm(x, g1[l], e1[l])
            h1 = jnp.maximum(jnp.dot(h1.astype(jnp.bfloat16), w1[l],
                                     preferred_element_type=jnp.float32) + b1[l], 0.0)
            x = x + jnp.dot(h1.astype(jnp.bfloat16), w2[l],
                            preferred_element_type=jnp.float32) + b2[l]

        return layer_norm(x, gf[...], ef[...])    # final encoder LayerNorm

    for b in range(batch_block):                  # static loop over batch elements of the step
        cols = slice(b * D, (b + 1) * D)
        xq = xq_ref[:, cols]                      # (Sq, D)
        xk = xk_ref[:, cols]                      # (Sk, D)
        xt = xt_ref[:, cols]                      # (St, D)

        # lower_mha(query_m, text, text): embedding scale + sinusoidal positions, 1 layer.
        c = run_encoder(xq * embed_scale + pos_q, xt * embed_scale + pos_t, lower)
        # upper_mha(key_m, c, c): c is re-scaled and re-positioned (kv length == Sq).
        y = run_encoder(xk * embed_scale + pos_k, c * embed_scale + pos_q, upper)

        o_ref[:, cols] = y


# ----------------------------- host-side wrapper -----------------------------

def _sinusoidal_positions(seq_len, dim):
    # Positions 1..seq_len (padding_idx = 0), fairseq-style sinusoidal table.
    # TODO(synk): fairseq make_positions treats exact-zero rows as padding; we assume
    # no padding tokens (true for the random inputs used here).
    half = dim // 2
    freq = jnp.exp(jnp.arange(half, dtype=jnp.float32) * (-math.log(10000.0) / (half - 1)))
    pos = jnp.arange(1, seq_len + 1, dtype=jnp.float32)[:, None]
    arg = pos * freq[None, :]
    emb = jnp.concatenate([jnp.sin(arg), jnp.cos(arg)], axis=1)
    if dim % 2 == 1:
        emb = jnp.concatenate([emb, jnp.zeros((seq_len, 1), jnp.float32)], axis=1)
    return emb  # (S, D)


def _num_grid_blocks(batch, embed_dim):
    """2-way 'parallel' half-batch split only on dual-TensorCore chips (v7x) AND when the
    half-batch lane width is 128-aligned; otherwise a single grid step so single-TC chips
    (v5e/v6e) pay the per-grid-step overhead exactly once."""
    if batch < 2 or batch % 2 != 0:
        return 1
    if ((batch // 2) * embed_dim) % 128 != 0:
        return 1
    try:
        kind = jax.devices()[0].device_kind.lower()
    except Exception:
        kind = ""
    return 2 if "v7" in kind else 1


def text_enhanced_transformer(query_m, key_m, text, params, num_heads):
    """query_m / key_m / text: (S, B, D) sequence-major, exactly like the PyTorch module."""
    Sq, B, D = query_m.shape
    Sk = key_m.shape[0]
    St = text.shape[0]

    G = _num_grid_blocks(B, D)
    Bb = B // G

    pos_q = _sinusoidal_positions(Sq, D)
    pos_k = _sinusoidal_positions(Sk, D)
    pos_t = _sinusoidal_positions(St, D)

    lower = [params['lower'][name] for name in _PARAM_ORDER]
    upper = [params['upper'][name] for name in _PARAM_ORDER]

    # (S, B, D) -> (S, B*D) is a free, layout-preserving reshape (NOT a transpose); each grid
    # step's BlockSpec then picks its half-batch lane slab directly.
    xq2 = query_m.reshape(Sq, B * D)
    xk2 = key_m.reshape(Sk, B * D)
    xt2 = text.reshape(St, B * D)

    def _resident(a):
        # Full-array block with a constant index map -> fetched once, VMEM-resident.
        nd = a.ndim
        return pl.BlockSpec(a.shape, lambda g: (0,) * nd)

    kernel = functools.partial(_tet_kernel, num_heads=num_heads, batch_block=Bb)

    out2 = pl.pallas_call(
        kernel,
        out_shape=jax.ShapeDtypeStruct((Sk, B * D), jnp.float32),
        grid=(G,),
        in_specs=([pl.BlockSpec((Sq, Bb * D), lambda g: (0, g)),
                   pl.BlockSpec((Sk, Bb * D), lambda g: (0, g)),
                   pl.BlockSpec((St, Bb * D), lambda g: (0, g)),
                   _resident(pos_q), _resident(pos_k), _resident(pos_t)]
                  + [_resident(a) for a in lower]
                  + [_resident(a) for a in upper]),
        out_specs=pl.BlockSpec((Sk, Bb * D), lambda g: (0, g)),
        compiler_params=pltpu.CompilerParams(dimension_semantics=("parallel",)),
        # TODO(synk): at production sizes (large D / many layers) the all-layers-resident
        # weight stacks should be streamed per layer (extra 'arbitrary' grid axis) to stay
        # inside v7x's 64 MiB VMEM; unnecessary at these shapes.
    )(xq2, xk2, xt2, pos_q, pos_k, pos_t, *lower, *upper)

    return out2.reshape(Sk, B, D)


# ----------------------------- pure-JAX reference (for tolerance check) -----------------------------

def _reference_forward(query_m, key_m, text, params, num_heads):
    D = query_m.shape[-1]
    scale = math.sqrt(D)

    def ln(z, g, b):
        mu = jnp.mean(z, axis=-1, keepdims=True)
        var = jnp.mean((z - mu) ** 2, axis=-1, keepdims=True)
        return (z - mu) / jnp.sqrt(var + 1e-5) * g + b

    def encoder(x_q, x_kv, p):
        wq = p['wq'].astype(jnp.float32)
        wk = p['wk'].astype(jnp.float32)
        wv = p['wv'].astype(jnp.float32)
        wo = p['wo'].astype(jnp.float32)
        w1 = p['w1'].astype(jnp.float32)
        w2 = p['w2'].astype(jnp.float32)
        n_layers = wq.shape[0]
        sq, skv = x_q.shape[0], x_kv.shape[0]
        mask = jnp.where(jnp.arange(skv)[None, :] - jnp.arange(sq)[:, None]
                         >= 1 + abs(skv - sq), -1e30, 0.0).astype(jnp.float32)
        x = x_q
        for l in range(n_layers):
            qn = ln(x, p['ln0_g'][l], p['ln0_b'][l])
            kn = ln(x_kv, p['ln0_g'][l], p['ln0_b'][l])
            q = jnp.einsum('sbd,hfd->sbhf', qn, wq[l]) + p['bq'][l][:, 0]
            k = jnp.einsum('sbd,hfd->sbhf', kn, wk[l]) + p['bk'][l][:, 0]
            v = jnp.einsum('sbd,hfd->sbhf', kn, wv[l]) + p['bv'][l][:, 0]
            s = jnp.einsum('qbhd,kbhd->bhqk', q, k) + mask
            a = jax.nn.softmax(s, axis=-1)
            ctx = jnp.einsum('bhqk,kbhd->qbhd', a, v)
            x = x + jnp.einsum('qbhd,hdf->qbf', ctx, wo[l]) + p['bo'][l]
            h1 = ln(x, p['ln1_g'][l], p['ln1_b'][l])
            h1 = jax.nn.relu(jnp.einsum('sbd,df->sbf', h1, w1[l]) + p['b1'][l])
            x = x + jnp.einsum('sbf,fd->sbd', h1, w2[l]) + p['b2'][l]
        return ln(x, p['lnf_g'], p['lnf_b'])

    sq, sk, st = query_m.shape[0], key_m.shape[0], text.shape[0]
    pos_q = _sinusoidal_positions(sq, D)[:, None, :]
    pos_k = _sinusoidal_positions(sk, D)[:, None, :]
    pos_t = _sinusoidal_positions(st, D)[:, None, :]
    c = encoder(query_m * scale + pos_q, text * scale + pos_t, params['lower'])
    return encoder(key_m * scale + pos_k, c * scale + pos_q, params['upper'])


# ----------------------------- deterministic parameter init -----------------------------

def _init_encoder_params(key, embed_dim, num_layers, num_heads):
    D, H, L = embed_dim, num_heads, num_layers
    dh = D // H
    scaling = dh ** -0.5          # folded into the q projection (weights AND bias)
    std = 0.02
    ks = jax.random.split(key, 6)

    def per_head_in(w):           # (L, D_in, D_out) -> (L, H, dh, D_in): lane-major in D_in
        return jnp.transpose(w.reshape(L, D, H, dh), (0, 2, 3, 1))

    def per_head_bias(b):         # (L, D_out) -> (L, H, 1, dh)
        return b.reshape(L, H, dh)[:, :, None, :]

    wq_raw = std * jax.random.normal(ks[0], (L, D, D), jnp.float32)
    wk_raw = std * jax.random.normal(ks[1], (L, D, D), jnp.float32)
    wv_raw = std * jax.random.normal(ks[2], (L, D, D), jnp.float32)
    wo_raw = std * jax.random.normal(ks[3], (L, D, D), jnp.float32)
    bq_raw = jnp.zeros((L, D), jnp.float32)   # real checkpoints: scale the real q bias too
    bk_raw = jnp.zeros((L, D), jnp.float32)
    bv_raw = jnp.zeros((L, D), jnp.float32)

    return {
        'wq': per_head_in(scaling * wq_raw).astype(jnp.bfloat16),
        'bq': per_head_bias(scaling * bq_raw),
        'wk': per_head_in(wk_raw).astype(jnp.bfloat16),
        'bk': per_head_bias(bk_raw),
        'wv': per_head_in(wv_raw).astype(jnp.bfloat16),
        'bv': per_head_bias(bv_raw),
        'wo': wo_raw.reshape(L, H, dh, D).astype(jnp.bfloat16),
        'bo': jnp.zeros((L, 1, D), jnp.float32),
        'w1': (std * jax.random.normal(ks[4], (L, D, 4 * D), jnp.float32)).astype(jnp.bfloat16),
        'b1': jnp.zeros((L, 1, 4 * D), jnp.float32),
        'w2': (std * jax.random.normal(ks[5], (L, 4 * D, D), jnp.float32)).astype(jnp.bfloat16),
        'b2': jnp.zeros((L, 1, D), jnp.float32),
        'ln0_g': jnp.ones((L, 1, D), jnp.float32),
        'ln0_b': jnp.zeros((L, 1, D), jnp.float32),
        'ln1_g': jnp.ones((L, 1, D), jnp.float32),
        'ln1_b': jnp.zeros((L, 1, D), jnp.float32),
        'lnf_g': jnp.ones((1, D), jnp.float32),
        'lnf_b': jnp.zeros((1, D), jnp.float32),
    }


def init_params(key, embed_dim, num_heads, layers):
    k1, k2 = jax.random.split(key)
    return {'lower': _init_encoder_params(k1, embed_dim, 1, num_heads),       # lower_mha: 1 layer
            'upper': _init_encoder_params(k2, embed_dim, layers, num_heads)}  # upper_mha: `layers`


# ----------------------------- main -----------------------------

if __name__ == "__main__":
    embed_dim, num_heads, num_layers = 32, 4, 2
    seq_len, batch = 8, 2

    key = jax.random.PRNGKey(0)
    kq, kk, kt, kp = jax.random.split(key, 4)
    query_m = jax.random.normal(kq, (seq_len, batch, embed_dim), jnp.float32)
    key_m = jax.random.normal(kk, (seq_len, batch, embed_dim), jnp.float32)
    text = jax.random.normal(kt, (seq_len, batch, embed_dim), jnp.float32)
    params = init_params(kp, embed_dim, num_heads, num_layers)

    fn = jax.jit(functools.partial(text_enhanced_transformer, num_heads=num_heads))
    out = fn(query_m, key_m, text, params)
    jax.block_until_ready(out)

    assert out.shape == (seq_len, batch, embed_dim)
    assert bool(jnp.all(jnp.isfinite(out)))

    ref = _reference_forward(query_m, key_m, text, params, num_heads)
    max_err = float(jnp.max(jnp.abs(out - ref)))
    assert max_err < 5e-2, f"max abs error vs reference: {max_err}"

    print("KERNEL_OK")
</pallas_src>

<mosaic_0001>
module attributes {stable_mosaic.version = 11 : i64} {
  func.func @_tet_kernel(%arg0: i32, %arg1: memref<8x64xf32, #tpu.memory_space<vmem>>, %arg2: memref<8x64xf32, #tpu.memory_space<vmem>>, %arg3: memref<8x64xf32, #tpu.memory_space<vmem>>, %arg4: memref<8x32xf32, #tpu.memory_space<vmem>>, %arg5: memref<8x32xf32, #tpu.memory_space<vmem>>, %arg6: memref<8x32xf32, #tpu.memory_space<vmem>>, %arg7: memref<1x4x8x32xbf16, #tpu.memory_space<vmem>>, %arg8: memref<1x4x1x8xf32, #tpu.memory_space<vmem>>, %arg9: memref<1x4x8x32xbf16, #tpu.memory_space<vmem>>, %arg10: memref<1x4x1x8xf32, #tpu.memory_space<vmem>>, %arg11: memref<1x4x8x32xbf16, #tpu.memory_space<vmem>>, %arg12: memref<1x4x1x8xf32, #tpu.memory_space<vmem>>, %arg13: memref<1x4x8x32xbf16, #tpu.memory_space<vmem>>, %arg14: memref<1x1x32xf32, #tpu.memory_space<vmem>>, %arg15: memref<1x32x128xbf16, #tpu.memory_space<vmem>>, %arg16: memref<1x1x128xf32, #tpu.memory_space<vmem>>, %arg17: memref<1x128x32xbf16, #tpu.memory_space<vmem>>, %arg18: memref<1x1x32xf32, #tpu.memory_space<vmem>>, %arg19: memref<1x1x32xf32, #tpu.memory_space<vmem>>, %arg20: memref<1x1x32xf32, #tpu.memory_space<vmem>>, %arg21: memref<1x1x32xf32, #tpu.memory_space<vmem>>, %arg22: memref<1x1x32xf32, #tpu.memory_space<vmem>>, %arg23: memref<1x32xf32, #tpu.memory_space<vmem>>, %arg24: memref<1x32xf32, #tpu.memory_space<vmem>>, %arg25: memref<2x4x8x32xbf16, #tpu.memory_space<vmem>>, %arg26: memref<2x4x1x8xf32, #tpu.memory_space<vmem>>, %arg27: memref<2x4x8x32xbf16, #tpu.memory_space<vmem>>, %arg28: memref<2x4x1x8xf32, #tpu.memory_space<vmem>>, %arg29: memref<2x4x8x32xbf16, #tpu.memory_space<vmem>>, %arg30: memref<2x4x1x8xf32, #tpu.memory_space<vmem>>, %arg31: memref<2x4x8x32xbf16, #tpu.memory_space<vmem>>, %arg32: memref<2x1x32xf32, #tpu.memory_space<vmem>>, %arg33: memref<2x32x128xbf16, #tpu.memory_space<vmem>>, %arg34: memref<2x1x128xf32, #tpu.memory_space<vmem>>, %arg35: memref<2x128x32xbf16, #tpu.memory_space<vmem>>, %arg36: memref<2x1x32xf32, #tpu.memory_space<vmem>>, %arg37: memref<2x1x32xf32, #tpu.memory_space<vmem>>, %arg38: memref<2x1x32xf32, #tpu.memory_space<vmem>>, %arg39: memref<2x1x32xf32, #tpu.memory_space<vmem>>, %arg40: memref<2x1x32xf32, #tpu.memory_space<vmem>>, %arg41: memref<1x32xf32, #tpu.memory_space<vmem>>, %arg42: memref<1x32xf32, #tpu.memory_space<vmem>>, %arg43: memref<8x64xf32, #tpu.memory_space<vmem>>) attributes {dimension_semantics = [#tpu.dimension_semantics<parallel>], iteration_bounds = array<i64: 1>, scalar_prefetch = 0 : i64, scratch_operands = 0 : i64, tpu.core_type = #tpu.core_type<tc>, window_params = [{transform_indices = @transform_0, window_bounds = array<i64: 8, 64>}, {transform_indices = @transform_1, window_bounds = array<i64: 8, 64>}, {transform_indices = @transform_2, window_bounds = array<i64: 8, 64>}, {pipeline_mode = #tpu.pipeline_mode<synchronous>, transform_indices = @transform_3, window_bounds = array<i64: 8, 32>}, {pipeline_mode = #tpu.pipeline_mode<synchronous>, transform_indices = @transform_4, window_bounds = array<i64: 8, 32>}, {pipeline_mode = #tpu.pipeline_mode<synchronous>, transform_indices = @transform_5, window_bounds = array<i64: 8, 32>}, {pipeline_mode = #tpu.pipeline_mode<synchronous>, transform_indices = @transform_6, window_bounds = array<i64: 1, 4, 8, 32>}, {pipeline_mode = #tpu.pipeline_mode<synchronous>, transform_indices = @transform_7, window_bounds = array<i64: 1, 4, 1, 8>}, {pipeline_mode = #tpu.pipeline_mode<synchronous>, transform_indices = @transform_8, window_bounds = array<i64: 1, 4, 8, 32>}, {pipeline_mode = #tpu.pipeline_mode<synchronous>, transform_indices = @transform_9, window_bounds = array<i64: 1, 4, 1, 8>}, {pipeline_mode = #tpu.pipeline_mode<synchronous>, transform_indices = @transform_10, window_bounds = array<i64: 1, 4, 8, 32>}, {pipeline_mode = #tpu.pipeline_mode<synchronous>, transform_indices = @transform_11, window_bounds = array<i64: 1, 4, 1, 8>}, {pipeline_mode = #tpu.pipeline_mode<synchronous>, transform_indices = @transform_12, window_bounds = array<i64: 1, 4, 8, 32>}, {pipeline_mode = #tpu.pipeline_mode<synchronous>, transform_indices = @transform_13, window_bounds = array<i64: 1, 1, 32>}, {pipeline_mode = #tpu.pipeline_mode<synchronous>, transform_indices = @transform_14, window_bounds = array<i64: 1, 32, 128>}, {pipeline_mode = #tpu.pipeline_mode<synchronous>, transform_indices = @transform_15, window_bounds = array<i64: 1, 1, 128>}, {pipeline_mode = #tpu.pipeline_mode<synchronous>, transform_indices = @transform_16, window_bounds = array<i64: 1, 128, 32>}, {pipeline_mode = #tpu.pipeline_mode<synchronous>, transform_indices = @transform_17, window_bounds = array<i64: 1, 1, 32>}, {pipeline_mode = #tpu.pipeline_mode<synchronous>, transform_indices = @transform_18, window_bounds = array<i64: 1, 1, 32>}, {pipeline_mode = #tpu.pipeline_mode<synchronous>, transform_indices = @transform_19, window_bounds = array<i64: 1, 1, 32>}, {pipeline_mode = #tpu.pipeline_mode<synchronous>, transform_indices = @transform_20, window_bounds = array<i64: 1, 1, 32>}, {pipeline_mode = #tpu.pipeline_mode<synchronous>, transform_indices = @transform_21, window_bounds = array<i64: 1, 1, 32>}, {pipeline_mode = #tpu.pipeline_mode<synchronous>, transform_indices = @transform_22, window_bounds = array<i64: 1, 32>}, {pipeline_mode = #tpu.pipeline_mode<synchronous>, transform_indices = @transform_23, window_bounds = array<i64: 1, 32>}, {pipeline_mode = #tpu.pipeline_mode<synchronous>, transform_indices = @transform_24, window_bounds = array<i64: 2, 4, 8, 32>}, {pipeline_mode = #tpu.pipeline_mode<synchronous>, transform_indices = @transform_25, window_bounds = array<i64: 2, 4, 1, 8>}, {pipeline_mode = #tpu.pipeline_mode<synchronous>, transform_indices = @transform_26, window_bounds = array<i64: 2, 4, 8, 32>}, {pipeline_mode = #tpu.pipeline_mode<synchronous>, transform_indices = @transform_27, window_bounds = array<i64: 2, 4, 1, 8>}, {pipeline_mode = #tpu.pipeline_mode<synchronous>, transform_indices = @transform_28, window_bounds = array<i64: 2, 4, 8, 32>}, {pipeline_mode = #tpu.pipeline_mode<synchronous>, transform_indices = @transform_29, window_bounds = array<i64: 2, 4, 1, 8>}, {pipeline_mode = #tpu.pipeline_mode<synchronous>, transform_indices = @transform_30, window_bounds = array<i64: 2, 4, 8, 32>}, {pipeline_mode = #tpu.pipeline_mode<synchronous>, transform_indices = @transform_31, window_bounds = array<i64: 2, 1, 32>}, {pipeline_mode = #tpu.pipeline_mode<synchronous>, transform_indices = @transform_32, window_bounds = array<i64: 2, 32, 128>}, {pipeline_mode = #tpu.pipeline_mode<synchronous>, transform_indices = @transform_33, window_bounds = array<i64: 2, 1, 128>}, {pipeline_mode = #tpu.pipeline_mode<synchronous>, transform_indices = @transform_34, window_bounds = array<i64: 2, 128, 32>}, {pipeline_mode = #tpu.pipeline_mode<synchronous>, transform_indices = @transform_35, window_bounds = array<i64: 2, 1, 32>}, {pipeline_mode = #tpu.pipeline_mode<synchronous>, transform_indices = @transform_36, window_bounds = array<i64: 2, 1, 32>}, {pipeline_mode = #tpu.pipeline_mode<synchronous>, transform_indices = @transform_37, window_bounds = array<i64: 2, 1, 32>}, {pipeline_mode = #tpu.pipeline_mode<synchronous>, transform_indices = @transform_38, window_bounds = array<i64: 2, 1, 32>}, {pipeline_mode = #tpu.pipeline_mode<synchronous>, transform_indices = @transform_39, window_bounds = array<i64: 2, 1, 32>}, {pipeline_mode = #tpu.pipeline_mode<synchronous>, transform_indices = @transform_40, window_bounds = array<i64: 1, 32>}, {pipeline_mode = #tpu.pipeline_mode<synchronous>, transform_indices = @transform_41, window_bounds = array<i64: 1, 32>}, {transform_indices = @transform_42, window_bounds = array<i64: 8, 64>}]} {
    %c0 = arith.constant 0 : index
    %c0_0 = arith.constant 0 : index
    %0 = vector.load %arg4[%c0, %c0_0] : memref<8x32xf32, #tpu.memory_space<vmem>>, vector<8x32xf32>
    %c0_1 = arith.constant 0 : index
    %c0_2 = arith.constant 0 : index
    %1 = vector.load %arg5[%c0_1, %c0_2] : memref<8x32xf32, #tpu.memory_space<vmem>>, vector<8x32xf32>
    %c0_3 = arith.constant 0 : index
    %c0_4 = arith.constant 0 : index
    %2 = vector.load %arg6[%c0_3, %c0_4] : memref<8x32xf32, #tpu.memory_space<vmem>>, vector<8x32xf32>
    %c0_5 = arith.constant 0 : index
    %c0_6 = arith.constant 0 : index
    %3 = vector.load %arg1[%c0_5, %c0_6] : memref<8x64xf32, #tpu.memory_space<vmem>>, vector<8x32xf32>
    %c0_7 = arith.constant 0 : index
    %c0_8 = arith.constant 0 : index
    %4 = vector.load %arg2[%c0_7, %c0_8] : memref<8x64xf32, #tpu.memory_space<vmem>>, vector<8x32xf32>
    %c0_9 = arith.constant 0 : index
    %c0_10 = arith.constant 0 : index
    %5 = vector.load %arg3[%c0_9, %c0_10] : memref<8x64xf32, #tpu.memory_space<vmem>>, vector<8x32xf32>
    %cst = arith.constant 5.65685415 : f32
    %6 = vector.broadcast %cst : f32 to vector<8x32xf32>
    %7 = arith.mulf %3, %6 : vector<8x32xf32>
    %8 = arith.addf %7, %0 : vector<8x32xf32>
    %cst_11 = arith.constant 5.65685415 : f32
    %9 = vector.broadcast %cst_11 : f32 to vector<8x32xf32>
    %10 = arith.mulf %5, %9 : vector<8x32xf32>
    %11 = arith.addf %10, %2 : vector<8x32xf32>
    %12 = tpu.iota {dimensions = array<i32: 1>} : vector<1x8x8xi32>
    %13 = tpu.iota {dimensions = array<i32: 2>} : vector<1x8x8xi32>
    %14 = arith.subi %13, %12 : vector<1x8x8xi32>
    %c1_i32 = arith.constant 1 : i32
    %15 = vector.broadcast %c1_i32 : i32 to vector<1x8x8xi32>
    %16 = arith.cmpi sge, %14, %15 : vector<1x8x8xi32>
    %cst_12 = arith.constant -1.000000e+30 : f32
    %cst_13 = arith.constant 0.000000e+00 : f32
    %17 = vector.broadcast %cst_12 : f32 to vector<1x8x8xf32>
    %18 = vector.broadcast %cst_13 : f32 to vector<1x8x8xf32>
    %19 = arith.select %16, %17, %18 : vector<1x8x8xi1>, vector<1x8x8xf32>
    %c0_14 = arith.constant 0 : index
    %c0_15 = arith.constant 0 : index
    %c0_16 = arith.constant 0 : index
    %20 = vector.load %arg19[%c0_14, %c0_15, %c0_16] : memref<1x1x32xf32, #tpu.memory_space<vmem>>, vector<1x1x32xf32>
    %21 = vector.shape_cast %20 : vector<1x1x32xf32> to vector<1x32xf32>
    %c0_17 = arith.constant 0 : index
    %c0_18 = arith.constant 0 : index
    %c0_19 = arith.constant 0 : index
    %22 = vector.load %arg20[%c0_17, %c0_18, %c0_19] : memref<1x1x32xf32, #tpu.memory_space<vmem>>, vector<1x1x32xf32>
    %23 = vector.shape_cast %22 : vector<1x1x32xf32> to vector<1x32xf32>
    %cst_20 = arith.constant dense<0.000000e+00> : vector<8xf32>
    %24 = vector.multi_reduction <add>, %8, %cst_20 [1] : vector<8x32xf32> to vector<8xf32>
    %25 = vector.shape_cast %24 : vector<8xf32> to vector<8x1xf32>
    %cst_21 = arith.constant 3.200000e+01 : f32
    %26 = vector.broadcast %cst_21 : f32 to vector<8x1xf32>
    %27 = arith.divf %25, %26 : vector<8x1xf32>
    %28 = vector.broadcast %27 : vector<8x1xf32> to vector<8x32xf32>
    %29 = arith.subf %8, %28 : vector<8x32xf32>
    %30 = arith.mulf %29, %29 : vector<8x32xf32>
    %cst_22 = arith.constant dense<0.000000e+00> : vector<8xf32>
    %31 = vector.multi_reduction <add>, %30, %cst_22 [1] : vector<8x32xf32> to vector<8xf32>
    %32 = vector.shape_cast %31 : vector<8xf32> to vector<8x1xf32>
    %cst_23 = arith.constant 3.200000e+01 : f32
    %33 = vector.broadcast %cst_23 : f32 to vector<8x1xf32>
    %34 = arith.divf %32, %33 : vector<8x1xf32>
    %cst_24 = arith.constant 9.99999974E-6 : f32
    %35 = vector.broadcast %cst_24 : f32 to vector<8x1xf32>
    %36 = arith.addf %34, %35 : vector<8x1xf32>
    %37 = math.rsqrt %36 : vector<8x1xf32>
    %38 = vector.broadcast %37 : vector<8x1xf32> to vector<8x32xf32>
    %39 = arith.mulf %29, %38 : vector<8x32xf32>
    %40 = vector.broadcast %21 : vector<1x32xf32> to vector<8x32xf32>
    %41 = arith.mulf %39, %40 : vector<8x32xf32>
    %42 = vector.broadcast %23 : vector<1x32xf32> to vector<8x32xf32>
    %43 = arith.addf %41, %42 : vector<8x32xf32>
    %44 = arith.truncf %43 : vector<8x32xf32> to vector<8x32xbf16>
    %c0_25 = arith.constant 0 : index
    %c0_26 = arith.constant 0 : index
    %c0_27 = arith.constant 0 : index
    %45 = vector.load %arg19[%c0_25, %c0_26, %c0_27] : memref<1x1x32xf32, #tpu.memory_space<vmem>>, vector<1x1x32xf32>
    %46 = vector.shape_cast %45 : vector<1x1x32xf32> to vector<1x32xf32>
    %c0_28 = arith.constant 0 : index
    %c0_29 = arith.constant 0 : index
    %c0_30 = arith.constant 0 : index
    %47 = vector.load %arg20[%c0_28, %c0_29, %c0_30] : memref<1x1x32xf32, #tpu.memory_space<vmem>>, vector<1x1x32xf32>
    %48 = vector.shape_cast %47 : vector<1x1x32xf32> to vector<1x32xf32>
    %cst_31 = arith.constant dense<0.000000e+00> : vector<8xf32>
    %49 = vector.multi_reduction <add>, %11, %cst_31 [1] : vector<8x32xf32> to vector<8xf32>
    %50 = vector.shape_cast %49 : vector<8xf32> to vector<8x1xf32>
    %cst_32 = arith.constant 3.200000e+01 : f32
    %51 = vector.broadcast %cst_32 : f32 to vector<8x1xf32>
    %52 = arith.divf %50, %51 : vector<8x1xf32>
    %53 = vector.broadcast %52 : vector<8x1xf32> to vector<8x32xf32>
    %54 = arith.subf %11, %53 : vector<8x32xf32>
    %55 = arith.mulf %54, %54 : vector<8x32xf32>
    %cst_33 = arith.constant dense<0.000000e+00> : vector<8xf32>
    %56 = vector.multi_reduction <add>, %55, %cst_33 [1] : vector<8x32xf32> to vector<8xf32>
    %57 = vector.shape_cast %56 : vector<8xf32> to vector<8x1xf32>
    %cst_34 = arith.constant 3.200000e+01 : f32
    %58 = vector.broadcast %cst_34 : f32 to vector<8x1xf32>
    %59 = arith.divf %57, %58 : vector<8x1xf32>
    %cst_35 = arith.constant 9.99999974E-6 : f32
    %60 = vector.broadcast %cst_35 : f32 to vector<8x1xf32>
    %61 = arith.addf %59, %60 : vector<8x1xf32>
    %62 = math.rsqrt %61 : vector<8x1xf32>
    %63 = vector.broadcast %62 : vector<8x1xf32> to vector<8x32xf32>
    %64 = arith.mulf %54, %63 : vector<8x32xf32>
    %65 = vector.broadcast %46 : vector<1x32xf32> to vector<8x32xf32>
    %66 = arith.mulf %64, %65 : vector<8x32xf32>
    %67 = vector.broadcast %48 : vector<1x32xf32> to vector<8x32xf32>
    %68 = arith.addf %66, %67 : vector<8x32xf32>
    %69 = arith.truncf %68 : vector<8x32xf32> to vector<8x32xbf16>
    %70 = vector.shape_cast %44 : vector<8x32xbf16> to vector<1x8x32xbf16>
    %71 = vector.broadcast %70 : vector<1x8x32xbf16> to vector<4x8x32xbf16>
    %72 = vector.shape_cast %69 : vector<8x32xbf16> to vector<1x8x32xbf16>
    %73 = vector.broadcast %72 : vector<1x8x32xbf16> to vector<4x8x32xbf16>
    %c0_36 = arith.constant 0 : index
    %c0_37 = arith.constant 0 : index
    %c0_38 = arith.constant 0 : index
    %c0_39 = arith.constant 0 : index
    %74 = vector.load %arg7[%c0_36, %c0_37, %c0_38, %c0_39] : memref<1x4x8x32xbf16, #tpu.memory_space<vmem>>, vector<1x4x8x32xbf16>
    %75 = vector.shape_cast %74 : vector<1x4x8x32xbf16> to vector<4x8x32xbf16>
    "tpu.trace_start"() <{level = 10 : i32, message = "hsd,hfd->hsf"}> : () -> ()
    %cst_40 = arith.constant dense<0.000000e+00> : vector<4x8x8xf32>
    %76 = tpu.matmul %71, %75, %cst_40 {dimension_numbers = #tpu.dot_dimension_numbers<[2], [2], [1], [1], [0, 0, 0, 1, 1, 1], [0], [0]>} : vector<4x8x32xbf16>, vector<4x8x32xbf16>, vector<4x8x8xf32> -> vector<4x8x8xf32>
    "tpu.trace_stop"() : () -> ()
    %c0_41 = arith.constant 0 : index
    %c0_42 = arith.constant 0 : index
    %c0_43 = arith.constant 0 : index
    %c0_44 = arith.constant 0 : index
    %77 = vector.load %arg8[%c0_41, %c0_42, %c0_43, %c0_44] : memref<1x4x1x8xf32, #tpu.memory_space<vmem>>, vector<1x4x1x8xf32>
    %78 = vector.shape_cast %77 : vector<1x4x1x8xf32> to vector<4x1x8xf32>
    %79 = vector.broadcast %78 : vector<4x1x8xf32> to vector<4x8x8xf32>
    %80 = arith.addf %76, %79 : vector<4x8x8xf32>
    %c0_45 = arith.constant 0 : index
    %c0_46 = arith.constant 0 : index
    %c0_47 = arith.constant 0 : index
    %c0_48 = arith.constant 0 : index
    %81 = vector.load %arg9[%c0_45, %c0_46, %c0_47, %c0_48] : memref<1x4x8x32xbf16, #tpu.memory_space<vmem>>, vector<1x4x8x32xbf16>
    %82 = vector.shape_cast %81 : vector<1x4x8x32xbf16> to vector<4x8x32xbf16>
    "tpu.trace_start"() <{level = 10 : i32, message = "hsd,hfd->hsf"}> : () -> ()
    %cst_49 = arith.constant dense<0.000000e+00> : vector<4x8x8xf32>
    %83 = tpu.matmul %73, %82, %cst_49 {dimension_numbers = #tpu.dot_dimension_numbers<[2], [2], [1], [1], [0, 0, 0, 1, 1, 1], [0], [0]>} : vector<4x8x32xbf16>, vector<4x8x32xbf16>, vector<4x8x8xf32> -> vector<4x8x8xf32>
    "tpu.trace_stop"() : () -> ()
    %c0_50 = arith.constant 0 : index
    %c0_51 = arith.constant 0 : index
    %c0_52 = arith.constant 0 : index
    %c0_53 = arith.constant 0 : index
    %84 = vector.load %arg10[%c0_50, %c0_51, %c0_52, %c0_53] : memref<1x4x1x8xf32, #tpu.memory_space<vmem>>, vector<1x4x1x8xf32>
    %85 = vector.shape_cast %84 : vector<1x4x1x8xf32> to vector<4x1x8xf32>
    %86 = vector.broadcast %85 : vector<4x1x8xf32> to vector<4x8x8xf32>
    %87 = arith.addf %83, %86 : vector<4x8x8xf32>
    %c0_54 = arith.constant 0 : index
    %c0_55 = arith.constant 0 : index
    %c0_56 = arith.constant 0 : index
    %c0_57 = arith.constant 0 : index
    %88 = vector.load %arg11[%c0_54, %c0_55, %c0_56, %c0_57] : memref<1x4x8x32xbf16, #tpu.memory_space<vmem>>, vector<1x4x8x32xbf16>
    %89 = vector.shape_cast %88 : vector<1x4x8x32xbf16> to vector<4x8x32xbf16>
    "tpu.trace_start"() <{level = 10 : i32, message = "hsd,hfd->hsf"}> : () -> ()
    %cst_58 = arith.constant dense<0.000000e+00> : vector<4x8x8xf32>
    %90 = tpu.matmul %73, %89, %cst_58 {dimension_numbers = #tpu.dot_dimension_numbers<[2], [2], [1], [1], [0, 0, 0, 1, 1, 1], [0], [0]>} : vector<4x8x32xbf16>, vector<4x8x32xbf16>, vector<4x8x8xf32> -> vector<4x8x8xf32>
    "tpu.trace_stop"() : () -> ()
    %c0_59 = arith.constant 0 : index
    %c0_60 = arith.constant 0 : index
    %c0_61 = arith.constant 0 : index
    %c0_62 = arith.constant 0 : index
    %91 = vector.load %arg12[%c0_59, %c0_60, %c0_61, %c0_62] : memref<1x4x1x8xf32, #tpu.memory_space<vmem>>, vector<1x4x1x8xf32>
    %92 = vector.shape_cast %91 : vector<1x4x1x8xf32> to vector<4x1x8xf32>
    %93 = vector.broadcast %92 : vector<4x1x8xf32> to vector<4x8x8xf32>
    %94 = arith.addf %90, %93 : vector<4x8x8xf32>
    %95 = arith.truncf %80 : vector<4x8x8xf32> to vector<4x8x8xbf16>
    %96 = arith.truncf %87 : vector<4x8x8xf32> to vector<4x8x8xbf16>
    "tpu.trace_start"() <{level = 10 : i32, message = "hqd,hkd->hqk"}> : () -> ()
    %cst_63 = arith.constant dense<0.000000e+00> : vector<4x8x8xf32>
    %97 = tpu.matmul %95, %96, %cst_63 {dimension_numbers = #tpu.dot_dimension_numbers<[2], [2], [1], [1], [0, 0, 0, 1, 1, 1], [0], [0]>} : vector<4x8x8xbf16>, vector<4x8x8xbf16>, vector<4x8x8xf32> -> vector<4x8x8xf32>
    "tpu.trace_stop"() : () -> ()
    %98 = vector.broadcast %19 : vector<1x8x8xf32> to vector<4x8x8xf32>
    %99 = arith.addf %97, %98 : vector<4x8x8xf32>
    %cst_64 = arith.constant dense<0xFF800000> : vector<4x8xf32>
    %100 = vector.multi_reduction <maximumf>, %99, %cst_64 [2] : vector<4x8x8xf32> to vector<4x8xf32>
    %101 = vector.shape_cast %100 : vector<4x8xf32> to vector<4x8x1xf32>
    %102 = vector.broadcast %101 : vector<4x8x1xf32> to vector<4x8x8xf32>
    %103 = arith.subf %99, %102 : vector<4x8x8xf32>
    %104 = math.exp %103 : vector<4x8x8xf32>
    %cst_65 = arith.constant dense<0.000000e+00> : vector<4x8xf32>
    %105 = vector.multi_reduction <add>, %104, %cst_65 [2] : vector<4x8x8xf32> to vector<4x8xf32>
    %106 = vector.shape_cast %105 : vector<4x8xf32> to vector<4x8x1xf32>
    %107 = tpu.reciprocal %106 {approx = true} : vector<4x8x1xf32> -> vector<4x8x1xf32>
    %108 = vector.broadcast %107 : vector<4x8x1xf32> to vector<4x8x8xf32>
    %109 = arith.mulf %104, %108 : vector<4x8x8xf32>
    %110 = arith.truncf %109 : vector<4x8x8xf32> to vector<4x8x8xbf16>
    %111 = arith.truncf %94 : vector<4x8x8xf32> to vector<4x8x8xbf16>
    "tpu.trace_start"() <{level = 10 : i32, message = "hqk,hkd->hqd"}> : () -> ()
    %cst_66 = arith.constant dense<0.000000e+00> : vector<4x8x8xf32>
    %112 = tpu.matmul %110, %111, %cst_66 {dimension_numbers = #tpu.dot_dimension_numbers<[2], [1], [1], [2], [0, 0, 0, 1, 1, 2], [0], [0]>} : vector<4x8x8xbf16>, vector<4x8x8xbf16>, vector<4x8x8xf32> -> vector<4x8x8xf32>
    "tpu.trace_stop"() : () -> ()
    %113 = arith.truncf %112 : vector<4x8x8xf32> to vector<4x8x8xbf16>
    %c0_67 = arith.constant 0 : index
    %c0_68 = arith.constant 0 : index
    %c0_69 = arith.constant 0 : index
    %c0_70 = arith.constant 0 : index
    %114 = vector.load %arg13[%c0_67, %c0_68, %c0_69, %c0_70] : memref<1x4x8x32xbf16, #tpu.memory_space<vmem>>, vector<1x4x8x32xbf16>
    %115 = vector.shape_cast %114 : vector<1x4x8x32xbf16> to vector<4x8x32xbf16>
    "tpu.trace_start"() <{level = 10 : i32, message = "hqd,hdf->hqf"}> : () -> ()
    %cst_71 = arith.constant dense<0.000000e+00> : vector<4x8x32xf32>
    %116 = tpu.matmul %113, %115, %cst_71 {dimension_numbers = #tpu.dot_dimension_numbers<[2], [1], [1], [2], [0, 0, 0, 1, 1, 2], [0], [0]>} : vector<4x8x8xbf16>, vector<4x8x32xbf16>, vector<4x8x32xf32> -> vector<4x8x32xf32>
    "tpu.trace_stop"() : () -> ()
    %117 = vector.extract_strided_slice %116 {offsets = [0, 0, 0], sizes = [1, 8, 32], strides = [1, 1, 1]} : vector<4x8x32xf32> to vector<1x8x32xf32>
    %118 = vector.shape_cast %117 : vector<1x8x32xf32> to vector<8x32xf32>
    %119 = vector.extract_strided_slice %116 {offsets = [1, 0, 0], sizes = [1, 8, 32], strides = [1, 1, 1]} : vector<4x8x32xf32> to vector<1x8x32xf32>
    %120 = vector.shape_cast %119 : vector<1x8x32xf32> to vector<8x32xf32>
    %121 = arith.addf %118, %120 : vector<8x32xf32>
    %122 = vector.extract_strided_slice %116 {offsets = [2, 0, 0], sizes = [1, 8, 32], strides = [1, 1, 1]} : vector<4x8x32xf32> to vector<1x8x32xf32>
    %123 = vector.shape_cast %122 : vector<1x8x32xf32> to vector<8x32xf32>
    %124 = arith.addf %121, %123 : vector<8x32xf32>
    %125 = vector.extract_strided_slice %116 {offsets = [3, 0, 0], sizes = [1, 8, 32], strides = [1, 1, 1]} : vector<4x8x32xf32> to vector<1x8x32xf32>
    %126 = vector.shape_cast %125 : vector<1x8x32xf32> to vector<8x32xf32>
    %127 = arith.addf %124, %126 : vector<8x32xf32>
    %128 = arith.addf %8, %127 : vector<8x32xf32>
    %c0_72 = arith.constant 0 : index
    %c0_73 = arith.constant 0 : index
    %c0_74 = arith.constant 0 : index
    %129 = vector.load %arg14[%c0_72, %c0_73, %c0_74] : memref<1x1x32xf32, #tpu.memory_space<vmem>>, vector<1x1x32xf32>
    %130 = vector.shape_cast %129 : vector<1x1x32xf32> to vector<1x32xf32>
    %131 = vector.broadcast %130 : vector<1x32xf32> to vector<8x32xf32>
    %132 = arith.addf %128, %131 : vector<8x32xf32>
    %c0_75 = arith.constant 0 : index
    %c0_76 = arith.constant 0 : index
    %c0_77 = arith.constant 0 : index
    %133 = vector.load %arg21[%c0_75, %c0_76, %c0_77] : memref<1x1x32xf32, #tpu.memory_space<vmem>>, vector<1x1x32xf32>
    %134 = vector.shape_cast %133 : vector<1x1x32xf32> to vector<1x32xf32>
    %c0_78 = arith.constant 0 : index
    %c0_79 = arith.constant 0 : index
    %c0_80 = arith.constant 0 : index
    %135 = vector.load %arg22[%c0_78, %c0_79, %c0_80] : memref<1x1x32xf32, #tpu.memory_space<vmem>>, vector<1x1x32xf32>
    %136 = vector.shape_cast %135 : vector<1x1x32xf32> to vector<1x32xf32>
    %cst_81 = arith.constant dense<0.000000e+00> : vector<8xf32>
    %137 = vector.multi_reduction <add>, %132, %cst_81 [1] : vector<8x32xf32> to vector<8xf32>
    %138 = vector.shape_cast %137 : vector<8xf32> to vector<8x1xf32>
    %cst_82 = arith.constant 3.200000e+01 : f32
    %139 = vector.broadcast %cst_82 : f32 to vector<8x1xf32>
    %140 = arith.divf %138, %139 : vector<8x1xf32>
    %141 = vector.broadcast %140 : vector<8x1xf32> to vector<8x32xf32>
    %142 = arith.subf %132, %141 : vector<8x32xf32>
    %143 = arith.mulf %142, %142 : vector<8x32xf32>
    %cst_83 = arith.constant dense<0.000000e+00> : vector<8xf32>
    %144 = vector.multi_reduction <add>, %143, %cst_83 [1] : vector<8x32xf32> to vector<8xf32>
    %145 = vector.shape_cast %144 : vector<8xf32> to vector<8x1xf32>
    %cst_84 = arith.constant 3.200000e+01 : f32
    %146 = vector.broadcast %cst_84 : f32 to vector<8x1xf32>
    %147 = arith.divf %145, %146 : vector<8x1xf32>
    %cst_85 = arith.constant 9.99999974E-6 : f32
    %148 = vector.broadcast %cst_85 : f32 to vector<8x1xf32>
    %149 = arith.addf %147, %148 : vector<8x1xf32>
    %150 = math.rsqrt %149 : vector<8x1xf32>
    %151 = vector.broadcast %150 : vector<8x1xf32> to vector<8x32xf32>
    %152 = arith.mulf %142, %151 : vector<8x32xf32>
    %153 = vector.broadcast %134 : vector<1x32xf32> to vector<8x32xf32>
    %154 = arith.mulf %152, %153 : vector<8x32xf32>
    %155 = vector.broadcast %136 : vector<1x32xf32> to vector<8x32xf32>
    %156 = arith.addf %154, %155 : vector<8x32xf32>
    %157 = arith.truncf %156 : vector<8x32xf32> to vector<8x32xbf16>
    %c0_86 = arith.constant 0 : index
    %c0_87 = arith.constant 0 : index
    %c0_88 = arith.constant 0 : index
    %158 = vector.load %arg15[%c0_86, %c0_87, %c0_88] : memref<1x32x128xbf16, #tpu.memory_space<vmem>>, vector<1x32x128xbf16>
    %159 = vector.shape_cast %158 : vector<1x32x128xbf16> to vector<32x128xbf16>
    %cst_89 = arith.constant dense<0.000000e+00> : vector<8x128xf32>
    %160 = tpu.matmul %157, %159, %cst_89 {dimension_numbers = #tpu.dot_dimension_numbers<[1], [0], [0], [1], [0, 0, 1, 1], [], []>} : vector<8x32xbf16>, vector<32x128xbf16>, vector<8x128xf32> -> vector<8x128xf32>
    %c0_90 = arith.constant 0 : index
    %c0_91 = arith.constant 0 : index
    %c0_92 = arith.constant 0 : index
    %161 = vector.load %arg16[%c0_90, %c0_91, %c0_92] : memref<1x1x128xf32, #tpu.memory_space<vmem>>, vector<1x1x128xf32>
    %162 = vector.shape_cast %161 : vector<1x1x128xf32> to vector<1x128xf32>
    %163 = vector.broadcast %162 : vector<1x128xf32> to vector<8x128xf32>
    %164 = arith.addf %160, %163 : vector<8x128xf32>
    %cst_93 = arith.constant 0.000000e+00 : f32
    %165 = vector.broadcast %cst_93 : f32 to vector<8x128xf32>
    %166 = arith.maximumf %164, %165 : vector<8x128xf32>
    %167 = arith.truncf %166 : vector<8x128xf32> to vector<8x128xbf16>
    %c0_94 = arith.constant 0 : index
    %c0_95 = arith.constant 0 : index
    %c0_96 = arith.constant 0 : index
    %168 = vector.load %arg17[%c0_94, %c0_95, %c0_96] : memref<1x128x32xbf16, #tpu.memory_space<vmem>>, vector<1x128x32xbf16>
    %169 = vector.shape_cast %168 : vector<1x128x32xbf16> to vector<128x32xbf16>
    %cst_97 = arith.constant dense<0.000000e+00> : vector<8x32xf32>
    %170 = tpu.matmul %167, %169, %cst_97 {dimension_numbers = #tpu.dot_dimension_numbers<[1], [0], [0], [1], [0, 0, 1, 1], [], []>} : vector<8x128xbf16>, vector<128x32xbf16>, vector<8x32xf32> -> vector<8x32xf32>
    %171 = arith.addf %132, %170 : vector<8x32xf32>
    %c0_98 = arith.constant 0 : index
    %c0_99 = arith.constant 0 : index
    %c0_100 = arith.constant 0 : index
    %172 = vector.load %arg18[%c0_98, %c0_99, %c0_100] : memref<1x1x32xf32, #tpu.memory_space<vmem>>, vector<1x1x32xf32>
    %173 = vector.shape_cast %172 : vector<1x1x32xf32> to vector<1x32xf32>
    %174 = vector.broadcast %173 : vector<1x32xf32> to vector<8x32xf32>
    %175 = arith.addf %171, %174 : vector<8x32xf32>
    %c0_101 = arith.constant 0 : index
    %c0_102 = arith.constant 0 : index
    %176 = vector.load %arg23[%c0_101, %c0_102] : memref<1x32xf32, #tpu.memory_space<vmem>>, vector<1x32xf32>
    %c0_103 = arith.constant 0 : index
    %c0_104 = arith.constant 0 : index
    %177 = vector.load %arg24[%c0_103, %c0_104] : memref<1x32xf32, #tpu.memory_space<vmem>>, vector<1x32xf32>
    %cst_105 = arith.constant dense<0.000000e+00> : vector<8xf32>
    %178 = vector.multi_reduction <add>, %175, %cst_105 [1] : vector<8x32xf32> to vector<8xf32>
    %179 = vector.shape_cast %178 : vector<8xf32> to vector<8x1xf32>
    %cst_106 = arith.constant 3.200000e+01 : f32
    %180 = vector.broadcast %cst_106 : f32 to vector<8x1xf32>
    %181 = arith.divf %179, %180 : vector<8x1xf32>
    %182 = vector.broadcast %181 : vector<8x1xf32> to vector<8x32xf32>
    %183 = arith.subf %175, %182 : vector<8x32xf32>
    %184 = arith.mulf %183, %183 : vector<8x32xf32>
    %cst_107 = arith.constant dense<0.000000e+00> : vector<8xf32>
    %185 = vector.multi_reduction <add>, %184, %cst_107 [1] : vector<8x32xf32> to vector<8xf32>
    %186 = vector.shape_cast %185 : vector<8xf32> to vector<8x1xf32>
    %cst_108 = arith.constant 3.200000e+01 : f32
    %187 = vector.broadcast %cst_108 : f32 to vector<8x1xf32>
    %188 = arith.divf %186, %187 : vector<8x1xf32>
    %cst_109 = arith.constant 9.99999974E-6 : f32
    %189 = vector.broadcast %cst_109 : f32 to vector<8x1xf32>
    %190 = arith.addf %188, %189 : vector<8x1xf32>
    %191 = math.rsqrt %190 : vector<8x1xf32>
    %192 = vector.broadcast %191 : vector<8x1xf32> to vector<8x32xf32>
    %193 = arith.mulf %183, %192 : vector<8x32xf32>
    %194 = vector.broadcast %176 : vector<1x32xf32> to vector<8x32xf32>
    %195 = arith.mulf %193, %194 : vector<8x32xf32>
    %196 = vector.broadcast %177 : vector<1x32xf32> to vector<8x32xf32>
    %197 = arith.addf %195, %196 : vector<8x32xf32>
    %cst_110 = arith.constant 5.65685415 : f32
    %198 = vector.broadcast %cst_110 : f32 to vector<8x32xf32>
    %199 = arith.mulf %4, %198 : vector<8x32xf32>
    %200 = arith.addf %199, %1 : vector<8x32xf32>
    %cst_111 = arith.constant 5.65685415 : f32
    %201 = vector.broadcast %cst_111 : f32 to vector<8x32xf32>
    %202 = arith.mulf %197, %201 : vector<8x32xf32>
    %203 = arith.addf %202, %0 : vector<8x32xf32>
    %204 = tpu.iota {dimensions = array<i32: 1>} : vector<1x8x8xi32>
    %205 = tpu.iota {dimensions = array<i32: 2>} : vector<1x8x8xi32>
    %206 = arith.subi %205, %204 : vector<1x8x8xi32>
    %c1_i32_112 = arith.constant 1 : i32
    %207 = vector.broadcast %c1_i32_112 : i32 to vector<1x8x8xi32>
    %208 = arith.cmpi sge, %206, %207 : vector<1x8x8xi32>
    %cst_113 = arith.constant -1.000000e+30 : f32
    %cst_114 = arith.constant 0.000000e+00 : f32
    %209 = vector.broadcast %cst_113 : f32 to vector<1x8x8xf32>
    %210 = vector.broadcast %cst_114 : f32 to vector<1x8x8xf32>
    %211 = arith.select %208, %209, %210 : vector<1x8x8xi1>, vector<1x8x8xf32>
    %c0_115 = arith.constant 0 : index
    %c0_116 = arith.constant 0 : index
    %c0_117 = arith.constant 0 : index
    %212 = vector.load %arg37[%c0_115, %c0_116, %c0_117] : memref<2x1x32xf32, #tpu.memory_space<vmem>>, vector<1x1x32xf32>
    %213 = vector.shape_cast %212 : vector<1x1x32xf32> to vector<1x32xf32>
    %c0_118 = arith.constant 0 : index
    %c0_119 = arith.constant 0 : index
    %c0_120 = arith.constant 0 : index
    %214 = vector.load %arg38[%c0_118, %c0_119, %c0_120] : memref<2x1x32xf32, #tpu.memory_space<vmem>>, vector<1x1x32xf32>
    %215 = vector.shape_cast %214 : vector<1x1x32xf32> to vector<1x32xf32>
    %cst_121 = arith.constant dense<0.000000e+00> : vector<8xf32>
    %216 = vector.multi_reduction <add>, %200, %cst_121 [1] : vector<8x32xf32> to vector<8xf32>
    %217 = vector.shape_cast %216 : vector<8xf32> to vector<8x1xf32>
    %cst_122 = arith.constant 3.200000e+01 : f32
    %218 = vector.broadcast %cst_122 : f32 to vector<8x1xf32>
    %219 = arith.divf %217, %218 : vector<8x1xf32>
    %220 = vector.broadcast %219 : vector<8x1xf32> to vector<8x32xf32>
    %221 = arith.subf %200, %220 : vector<8x32xf32>
    %222 = arith.mulf %221, %221 : vector<8x32xf32>
    %cst_123 = arith.constant dense<0.000000e+00> : vector<8xf32>
    %223 = vector.multi_reduction <add>, %222, %cst_123 [1] : vector<8x32xf32> to vector<8xf32>
    %224 = vector.shape_cast %223 : vector<8xf32> to vector<8x1xf32>
    %cst_124 = arith.constant 3.200000e+01 : f32
    %225 = vector.broadcast %cst_124 : f32 to vector<8x1xf32>
    %226 = arith.divf %224, %225 : vector<8x1xf32>
    %cst_125 = arith.constant 9.99999974E-6 : f32
    %227 = vector.broadcast %cst_125 : f32 to vector<8x1xf32>
    %228 = arith.addf %226, %227 : vector<8x1xf32>
    %229 = math.rsqrt %228 : vector<8x1xf32>
    %230 = vector.broadcast %229 : vector<8x1xf32> to vector<8x32xf32>
    %231 = arith.mulf %221, %230 : vector<8x32xf32>
    %232 = vector.broadcast %213 : vector<1x32xf32> to vector<8x32xf32>
    %233 = arith.mulf %231, %232 : vector<8x32xf32>
    %234 = vector.broadcast %215 : vector<1x32xf32> to vector<8x32xf32>
    %235 = arith.addf %233, %234 : vector<8x32xf32>
    %236 = arith.truncf %235 : vector<8x32xf32> to vector<8x32xbf16>
    %c0_126 = arith.constant 0 : index
    %c0_127 = arith.constant 0 : index
    %c0_128 = arith.constant 0 : index
    %237 = vector.load %arg37[%c0_126, %c0_127, %c0_128] : memref<2x1x32xf32, #tpu.memory_space<vmem>>, vector<1x1x32xf32>
    %238 = vector.shape_cast %237 : vector<1x1x32xf32> to vector<1x32xf32>
    %c0_129 = arith.constant 0 : index
    %c0_130 = arith.constant 0 : index
    %c0_131 = arith.constant 0 : index
    %239 = vector.load %arg38[%c0_129, %c0_130, %c0_131] : memref<2x1x32xf32, #tpu.memory_space<vmem>>, vector<1x1x32xf32>
    %240 = vector.shape_cast %239 : vector<1x1x32xf32> to vector<1x32xf32>
    %cst_132 = arith.constant dense<0.000000e+00> : vector<8xf32>
    %241 = vector.multi_reduction <add>, %203, %cst_132 [1] : vector<8x32xf32> to vector<8xf32>
    %242 = vector.shape_cast %241 : vector<8xf32> to vector<8x1xf32>
    %cst_133 = arith.constant 3.200000e+01 : f32
    %243 = vector.broadcast %cst_133 : f32 to vector<8x1xf32>
    %244 = arith.divf %242, %243 : vector<8x1xf32>
    %245 = vector.broadcast %244 : vector<8x1xf32> to vector<8x32xf32>
    %246 = arith.subf %203, %245 : vector<8x32xf32>
    %247 = arith.mulf %246, %246 : vector<8x32xf32>
    %cst_134 = arith.constant dense<0.000000e+00> : vector<8xf32>
    %248 = vector.multi_reduction <add>, %247, %cst_134 [1] : vector<8x32xf32> to vector<8xf32>
    %249 = vector.shape_cast %248 : vector<8xf32> to vector<8x1xf32>
    %cst_135 = arith.constant 3.200000e+01 : f32
    %250 = vector.broadcast %cst_135 : f32 to vector<8x1xf32>
    %251 = arith.divf %249, %250 : vector<8x1xf32>
    %cst_136 = arith.constant 9.99999974E-6 : f32
    %252 = vector.broadcast %cst_136 : f32 to vector<8x1xf32>
    %253 = arith.addf %251, %252 : vector<8x1xf32>
    %254 = math.rsqrt %253 : vector<8x1xf32>
    %255 = vector.broadcast %254 : vector<8x1xf32> to vector<8x32xf32>
    %256 = arith.mulf %246, %255 : vector<8x32xf32>
    %257 = vector.broadcast %238 : vector<1x32xf32> to vector<8x32xf32>
    %258 = arith.mulf %256, %257 : vector<8x32xf32>
    %259 = vector.broadcast %240 : vector<1x32xf32> to vector<8x32xf32>
    %260 = arith.addf %258, %259 : vector<8x32xf32>
    %261 = arith.truncf %260 : vector<8x32xf32> to vector<8x32xbf16>
    %262 = vector.shape_cast %236 : vector<8x32xbf16> to vector<1x8x32xbf16>
    %263 = vector.broadcast %262 : vector<1x8x32xbf16> to vector<4x8x32xbf16>
    %264 = vector.shape_cast %261 : vector<8x32xbf16> to vector<1x8x32xbf16>
    %265 = vector.broadcast %264 : vector<1x8x32xbf16> to vector<4x8x32xbf16>
    %c0_137 = arith.constant 0 : index
    %c0_138 = arith.constant 0 : index
    %c0_139 = arith.constant 0 : index
    %c0_140 = arith.constant 0 : index
    %266 = vector.load %arg25[%c0_137, %c0_138, %c0_139, %c0_140] : memref<2x4x8x32xbf16, #tpu.memory_space<vmem>>, vector<1x4x8x32xbf16>
    %267 = vector.shape_cast %266 : vector<1x4x8x32xbf16> to vector<4x8x32xbf16>
    "tpu.trace_start"() <{level = 10 : i32, message = "hsd,hfd->hsf"}> : () -> ()
    %cst_141 = arith.constant dense<0.000000e+00> : vector<4x8x8xf32>
    %268 = tpu.matmul %263, %267, %cst_141 {dimension_numbers = #tpu.dot_dimension_numbers<[2], [2], [1], [1], [0, 0, 0, 1, 1, 1], [0], [0]>} : vector<4x8x32xbf16>, vector<4x8x32xbf16>, vector<4x8x8xf32> -> vector<4x8x8xf32>
    "tpu.trace_stop"() : () -> ()
    %c0_142 = arith.constant 0 : index
    %c0_143 = arith.constant 0 : index
    %c0_144 = arith.constant 0 : index
    %c0_145 = arith.constant 0 : index
    %269 = vector.load %arg26[%c0_142, %c0_143, %c0_144, %c0_145] : memref<2x4x1x8xf32, #tpu.memory_space<vmem>>, vector<1x4x1x8xf32>
    %270 = vector.shape_cast %269 : vector<1x4x1x8xf32> to vector<4x1x8xf32>
    %271 = vector.broadcast %270 : vector<4x1x8xf32> to vector<4x8x8xf32>
    %272 = arith.addf %268, %271 : vector<4x8x8xf32>
    %c0_146 = arith.constant 0 : index
    %c0_147 = arith.constant 0 : index
    %c0_148 = arith.constant 0 : index
    %c0_149 = arith.constant 0 : index
    %273 = vector.load %arg27[%c0_146, %c0_147, %c0_148, %c0_149] : memref<2x4x8x32xbf16, #tpu.memory_space<vmem>>, vector<1x4x8x32xbf16>
    %274 = vector.shape_cast %273 : vector<1x4x8x32xbf16> to vector<4x8x32xbf16>
    "tpu.trace_start"() <{level = 10 : i32, message = "hsd,hfd->hsf"}> : () -> ()
    %cst_150 = arith.constant dense<0.000000e+00> : vector<4x8x8xf32>
    %275 = tpu.matmul %265, %274, %cst_150 {dimension_numbers = #tpu.dot_dimension_numbers<[2], [2], [1], [1], [0, 0, 0, 1, 1, 1], [0], [0]>} : vector<4x8x32xbf16>, vector<4x8x32xbf16>, vector<4x8x8xf32> -> vector<4x8x8xf32>
    "tpu.trace_stop"() : () -> ()
    %c0_151 = arith.constant 0 : index
    %c0_152 = arith.constant 0 : index
    %c0_153 = arith.constant 0 : index
    %c0_154 = arith.constant 0 : index
    %276 = vector.load %arg28[%c0_151, %c0_152, %c0_153, %c0_154] : memref<2x4x1x8xf32, #tpu.memory_space<vmem>>, vector<1x4x1x8xf32>
    %277 = vector.shape_cast %276 : vector<1x4x1x8xf32> to vector<4x1x8xf32>
    %278 = vector.broadcast %277 : vector<4x1x8xf32> to vector<4x8x8xf32>
    %279 = arith.addf %275, %278 : vector<4x8x8xf32>
    %c0_155 = arith.constant 0 : index
    %c0_156 = arith.constant 0 : index
    %c0_157 = arith.constant 0 : index
    %c0_158 = arith.constant 0 : index
    %280 = vector.load %arg29[%c0_155, %c0_156, %c0_157, %c0_158] : memref<2x4x8x32xbf16, #tpu.memory_space<vmem>>, vector<1x4x8x32xbf16>
    %281 = vector.shape_cast %280 : vector<1x4x8x32xbf16> to vector<4x8x32xbf16>
    "tpu.trace_start"() <{level = 10 : i32, message = "hsd,hfd->hsf"}> : () -> ()
    %cst_159 = arith.constant dense<0.000000e+00> : vector<4x8x8xf32>
    %282 = tpu.matmul %265, %281, %cst_159 {dimension_numbers = #tpu.dot_dimension_numbers<[2], [2], [1], [1], [0, 0, 0, 1, 1, 1], [0], [0]>} : vector<4x8x32xbf16>, vector<4x8x32xbf16>, vector<4x8x8xf32> -> vector<4x8x8xf32>
    "tpu.trace_stop"() : () -> ()
    %c0_160 = arith.constant 0 : index
    %c0_161 = arith.constant 0 : index
    %c0_162 = arith.constant 0 : index
    %c0_163 = arith.constant 0 : index
    %283 = vector.load %arg30[%c0_160, %c0_161, %c0_162, %c0_163] : memref<2x4x1x8xf32, #tpu.memory_space<vmem>>, vector<1x4x1x8xf32>
    %284 = vector.shape_cast %283 : vector<1x4x1x8xf32> to vector<4x1x8xf32>
    %285 = vector.broadcast %284 : vector<4x1x8xf32> to vector<4x8x8xf32>
    %286 = arith.addf %282, %285 : vector<4x8x8xf32>
    %287 = arith.truncf %272 : vector<4x8x8xf32> to vector<4x8x8xbf16>
    %288 = arith.truncf %279 : vector<4x8x8xf32> to vector<4x8x8xbf16>
    "tpu.trace_start"() <{level = 10 : i32, message = "hqd,hkd->hqk"}> : () -> ()
    %cst_164 = arith.constant dense<0.000000e+00> : vector<4x8x8xf32>
    %289 = tpu.matmul %287, %288, %cst_164 {dimension_numbers = #tpu.dot_dimension_numbers<[2], [2], [1], [1], [0, 0, 0, 1, 1, 1], [0], [0]>} : vector<4x8x8xbf16>, vector<4x8x8xbf16>, vector<4x8x8xf32> -> vector<4x8x8xf32>
    "tpu.trace_stop"() : () -> ()
    %290 = vector.broadcast %211 : vector<1x8x8xf32> to vector<4x8x8xf32>
    %291 = arith.addf %289, %290 : vector<4x8x8xf32>
    %cst_165 = arith.constant dense<0xFF800000> : vector<4x8xf32>
    %292 = vector.multi_reduction <maximumf>, %291, %cst_165 [2] : vector<4x8x8xf32> to vector<4x8xf32>
    %293 = vector.shape_cast %292 : vector<4x8xf32> to vector<4x8x1xf32>
    %294 = vector.broadcast %293 : vector<4x8x1xf32> to vector<4x8x8xf32>
    %295 = arith.subf %291, %294 : vector<4x8x8xf32>
    %296 = math.exp %295 : vector<4x8x8xf32>
    %cst_166 = arith.constant dense<0.000000e+00> : vector<4x8xf32>
    %297 = vector.multi_reduction <add>, %296, %cst_166 [2] : vector<4x8x8xf32> to vector<4x8xf32>
    %298 = vector.shape_cast %297 : vector<4x8xf32> to vector<4x8x1xf32>
    %299 = tpu.reciprocal %298 {approx = true} : vector<4x8x1xf32> -> vector<4x8x1xf32>
    %300 = vector.broadcast %299 : vector<4x8x1xf32> to vector<4x8x8xf32>
    %301 = arith.mulf %296, %300 : vector<4x8x8xf32>
    %302 = arith.truncf %301 : vector<4x8x8xf32> to vector<4x8x8xbf16>
    %303 = arith.truncf %286 : vector<4x8x8xf32> to vector<4x8x8xbf16>
    "tpu.trace_start"() <{level = 10 : i32, message = "hqk,hkd->hqd"}> : () -> ()
    %cst_167 = arith.constant dense<0.000000e+00> : vector<4x8x8xf32>
    %304 = tpu.matmul %302, %303, %cst_167 {dimension_numbers = #tpu.dot_dimension_numbers<[2], [1], [1], [2], [0, 0, 0, 1, 1, 2], [0], [0]>} : vector<4x8x8xbf16>, vector<4x8x8xbf16>, vector<4x8x8xf32> -> vector<4x8x8xf32>
    "tpu.trace_stop"() : () -> ()
    %305 = arith.truncf %304 : vector<4x8x8xf32> to vector<4x8x8xbf16>
    %c0_168 = arith.constant 0 : index
    %c0_169 = arith.constant 0 : index
    %c0_170 = arith.constant 0 : index
    %c0_171 = arith.constant 0 : index
    %306 = vector.load %arg31[%c0_168, %c0_169, %c0_170, %c0_171] : memref<2x4x8x32xbf16, #tpu.memory_space<vmem>>, vector<1x4x8x32xbf16>
    %307 = vector.shape_cast %306 : vector<1x4x8x32xbf16> to vector<4x8x32xbf16>
    "tpu.trace_start"() <{level = 10 : i32, message = "hqd,hdf->hqf"}> : () -> ()
    %cst_172 = arith.constant dense<0.000000e+00> : vector<4x8x32xf32>
    %308 = tpu.matmul %305, %307, %cst_172 {dimension_numbers = #tpu.dot_dimension_numbers<[2], [1], [1], [2], [0, 0, 0, 1, 1, 2], [0], [0]>} : vector<4x8x8xbf16>, vector<4x8x32xbf16>, vector<4x8x32xf32> -> vector<4x8x32xf32>
    "tpu.trace_stop"() : () -> ()
    %309 = vector.extract_strided_slice %308 {offsets = [0, 0, 0], sizes = [1, 8, 32], strides = [1, 1, 1]} : vector<4x8x32xf32> to vector<1x8x32xf32>
    %310 = vector.shape_cast %309 : vector<1x8x32xf32> to vector<8x32xf32>
    %311 = vector.extract_strided_slice %308 {offsets = [1, 0, 0], sizes = [1, 8, 32], strides = [1, 1, 1]} : vector<4x8x32xf32> to vector<1x8x32xf32>
    %312 = vector.shape_cast %311 : vector<1x8x32xf32> to vector<8x32xf32>
    %313 = arith.addf %310, %312 : vector<8x32xf32>
    %314 = vector.extract_strided_slice %308 {offsets = [2, 0, 0], sizes = [1, 8, 32], strides = [1, 1, 1]} : vector<4x8x32xf32> to vector<1x8x32xf32>
    %315 = vector.shape_cast %314 : vector<1x8x32xf32> to vector<8x32xf32>
    %316 = arith.addf %313, %315 : vector<8x32xf32>
    %317 = vector.extract_strided_slice %308 {offsets = [3, 0, 0], sizes = [1, 8, 32], strides = [1, 1, 1]} : vector<4x8x32xf32> to vector<1x8x32xf32>
    %318 = vector.shape_cast %317 : vector<1x8x32xf32> to vector<8x32xf32>
    %319 = arith.addf %316, %318 : vector<8x32xf32>
    %320 = arith.addf %200, %319 : vector<8x32xf32>
    %c0_173 = arith.constant 0 : index
    %c0_174 = arith.constant 0 : index
    %c0_175 = arith.constant 0 : index
    %321 = vector.load %arg32[%c0_173, %c0_174, %c0_175] : memref<2x1x32xf32, #tpu.memory_space<vmem>>, vector<1x1x32xf32>
    %322 = vector.shape_cast %321 : vector<1x1x32xf32> to vector<1x32xf32>
    %323 = vector.broadcast %322 : vector<1x32xf32> to vector<8x32xf32>
    %324 = arith.addf %320, %323 : vector<8x32xf32>
    %c0_176 = arith.constant 0 : index
    %c0_177 = arith.constant 0 : index
    %c0_178 = arith.constant 0 : index
    %325 = vector.load %arg39[%c0_176, %c0_177, %c0_178] : memref<2x1x32xf32, #tpu.memory_space<vmem>>, vector<1x1x32xf32>
    %326 = vector.shape_cast %325 : vector<1x1x32xf32> to vector<1x32xf32>
    %c0_179 = arith.constant 0 : index
    %c0_180 = arith.constant 0 : index
    %c0_181 = arith.constant 0 : index
    %327 = vector.load %arg40[%c0_179, %c0_180, %c0_181] : memref<2x1x32xf32, #tpu.memory_space<vmem>>, vector<1x1x32xf32>
    %328 = vector.shape_cast %327 : vector<1x1x32xf32> to vector<1x32xf32>
    %cst_182 = arith.constant dense<0.000000e+00> : vector<8xf32>
    %329 = vector.multi_reduction <add>, %324, %cst_182 [1] : vector<8x32xf32> to vector<8xf32>
    %330 = vector.shape_cast %329 : vector<8xf32> to vector<8x1xf32>
    %cst_183 = arith.constant 3.200000e+01 : f32
    %331 = vector.broadcast %cst_183 : f32 to vector<8x1xf32>
    %332 = arith.divf %330, %331 : vector<8x1xf32>
    %333 = vector.broadcast %332 : vector<8x1xf32> to vector<8x32xf32>
    %334 = arith.subf %324, %333 : vector<8x32xf32>
    %335 = arith.mulf %334, %334 : vector<8x32xf32>
    %cst_184 = arith.constant dense<0.000000e+00> : vector<8xf32>
    %336 = vector.multi_reduction <add>, %335, %cst_184 [1] : vector<8x32xf32> to vector<8xf32>
    %337 = vector.shape_cast %336 : vector<8xf32> to vector<8x1xf32>
    %cst_185 = arith.constant 3.200000e+01 : f32
    %338 = vector.broadcast %cst_185 : f32 to vector<8x1xf32>
    %339 = arith.divf %337, %338 : vector<8x1xf32>
    %cst_186 = arith.constant 9.99999974E-6 : f32
    %340 = vector.broadcast %cst_186 : f32 to vector<8x1xf32>
    %341 = arith.addf %339, %340 : vector<8x1xf32>
    %342 = math.rsqrt %341 : vector<8x1xf32>
    %343 = vector.broadcast %342 : vector<8x1xf32> to vector<8x32xf32>
    %344 = arith.mulf %334, %343 : vector<8x32xf32>
    %345 = vector.broadcast %326 : vector<1x32xf32> to vector<8x32xf32>
    %346 = arith.mulf %344, %345 : vector<8x32xf32>
    %347 = vector.broadcast %328 : vector<1x32xf32> to vector<8x32xf32>
    %348 = arith.addf %346, %347 : vector<8x32xf32>
    %349 = arith.truncf %348 : vector<8x32xf32> to vector<8x32xbf16>
    %c0_187 = arith.constant 0 : index
    %c0_188 = arith.constant 0 : index
    %c0_189 = arith.constant 0 : index
    %350 = vector.load %arg33[%c0_187, %c0_188, %c0_189] : memref<2x32x128xbf16, #tpu.memory_space<vmem>>, vector<1x32x128xbf16>
    %351 = vector.shape_cast %350 : vector<1x32x128xbf16> to vector<32x128xbf16>
    %cst_190 = arith.constant dense<0.000000e+00> : vector<8x128xf32>
    %352 = tpu.matmul %349, %351, %cst_190 {dimension_numbers = #tpu.dot_dimension_numbers<[1], [0], [0], [1], [0, 0, 1, 1], [], []>} : vector<8x32xbf16>, vector<32x128xbf16>, vector<8x128xf32> -> vector<8x128xf32>
    %c0_191 = arith.constant 0 : index
    %c0_192 = arith.constant 0 : index
    %c0_193 = arith.constant 0 : index
    %353 = vector.load %arg34[%c0_191, %c0_192, %c0_193] : memref<2x1x128xf32, #tpu.memory_space<vmem>>, vector<1x1x128xf32>
    %354 = vector.shape_cast %353 : vector<1x1x128xf32> to vector<1x128xf32>
    %355 = vector.broadcast %354 : vector<1x128xf32> to vector<8x128xf32>
    %356 = arith.addf %352, %355 : vector<8x128xf32>
    %cst_194 = arith.constant 0.000000e+00 : f32
    %357 = vector.broadcast %cst_194 : f32 to vector<8x128xf32>
    %358 = arith.maximumf %356, %357 : vector<8x128xf32>
    %359 = arith.truncf %358 : vector<8x128xf32> to vector<8x128xbf16>
    %c0_195 = arith.constant 0 : index
    %c0_196 = arith.constant 0 : index
    %c0_197 = arith.constant 0 : index
    %360 = vector.load %arg35[%c0_195, %c0_196, %c0_197] : memref<2x128x32xbf16, #tpu.memory_space<vmem>>, vector<1x128x32xbf16>
    %361 = vector.shape_cast %360 : vector<1x128x32xbf16> to vector<128x32xbf16>
    %cst_198 = arith.constant dense<0.000000e+00> : vector<8x32xf32>
    %362 = tpu.matmul %359, %361, %cst_198 {dimension_numbers = #tpu.dot_dimension_numbers<[1], [0], [0], [1], [0, 0, 1, 1], [], []>} : vector<8x128xbf16>, vector<128x32xbf16>, vector<8x32xf32> -> vector<8x32xf32>
    %363 = arith.addf %324, %362 : vector<8x32xf32>
    %c0_199 = arith.constant 0 : index
    %c0_200 = arith.constant 0 : index
    %c0_201 = arith.constant 0 : index
    %364 = vector.load %arg36[%c0_199, %c0_200, %c0_201] : memref<2x1x32xf32, #tpu.memory_space<vmem>>, vector<1x1x32xf32>
    %365 = vector.shape_cast %364 : vector<1x1x32xf32> to vector<1x32xf32>
    %366 = vector.broadcast %365 : vector<1x32xf32> to vector<8x32xf32>
    %367 = arith.addf %363, %366 : vector<8x32xf32>
    %c1 = arith.constant 1 : index
    %c0_202 = arith.constant 0 : index
    %c0_203 = arith.constant 0 : index
    %368 = vector.load %arg37[%c1, %c0_202, %c0_203] : memref<2x1x32xf32, #tpu.memory_space<vmem>>, vector<1x1x32xf32>
    %369 = vector.shape_cast %368 : vector<1x1x32xf32> to vector<1x32xf32>
    %c1_204 = arith.constant 1 : index
    %c0_205 = arith.constant 0 : index
    %c0_206 = arith.constant 0 : index
    %370 = vector.load %arg38[%c1_204, %c0_205, %c0_206] : memref<2x1x32xf32, #tpu.memory_space<vmem>>, vector<1x1x32xf32>
    %371 = vector.shape_cast %370 : vector<1x1x32xf32> to vector<1x32xf32>
    %cst_207 = arith.constant dense<0.000000e+00> : vector<8xf32>
    %372 = vector.multi_reduction <add>, %367, %cst_207 [1] : vector<8x32xf32> to vector<8xf32>
    %373 = vector.shape_cast %372 : vector<8xf32> to vector<8x1xf32>
    %cst_208 = arith.constant 3.200000e+01 : f32
    %374 = vector.broadcast %cst_208 : f32 to vector<8x1xf32>
    %375 = arith.divf %373, %374 : vector<8x1xf32>
    %376 = vector.broadcast %375 : vector<8x1xf32> to vector<8x32xf32>
    %377 = arith.subf %367, %376 : vector<8x32xf32>
    %378 = arith.mulf %377, %377 : vector<8x32xf32>
    %cst_209 = arith.constant dense<0.000000e+00> : vector<8xf32>
    %379 = vector.multi_reduction <add>, %378, %cst_209 [1] : vector<8x32xf32> to vector<8xf32>
    %380 = vector.shape_cast %379 : vector<8xf32> to vector<8x1xf32>
    %cst_210 = arith.constant 3.200000e+01 : f32
    %381 = vector.broadcast %cst_210 : f32 to vector<8x1xf32>
    %382 = arith.divf %380, %381 : vector<8x1xf32>
    %cst_211 = arith.constant 9.99999974E-6 : f32
    %383 = vector.broadcast %cst_211 : f32 to vector<8x1xf32>
    %384 = arith.addf %382, %383 : vector<8x1xf32>
    %385 = math.rsqrt %384 : vector<8x1xf32>
    %386 = vector.broadcast %385 : vector<8x1xf32> to vector<8x32xf32>
    %387 = arith.mulf %377, %386 : vector<8x32xf32>
    %388 = vector.broadcast %369 : vector<1x32xf32> to vector<8x32xf32>
    %389 = arith.mulf %387, %388 : vector<8x32xf32>
    %390 = vector.broadcast %371 : vector<1x32xf32> to vector<8x32xf32>
    %391 = arith.addf %389, %390 : vector<8x32xf32>
    %392 = arith.truncf %391 : vector<8x32xf32> to vector<8x32xbf16>
    %c1_212 = arith.constant 1 : index
    %c0_213 = arith.constant 0 : index
    %c0_214 = arith.constant 0 : index
    %393 = vector.load %arg37[%c1_212, %c0_213, %c0_214] : memref<2x1x32xf32, #tpu.memory_space<vmem>>, vector<1x1x32xf32>
    %394 = vector.shape_cast %393 : vector<1x1x32xf32> to vector<1x32xf32>
    %c1_215 = arith.constant 1 : index
    %c0_216 = arith.constant 0 : index
    %c0_217 = arith.constant 0 : index
    %395 = vector.load %arg38[%c1_215, %c0_216, %c0_217] : memref<2x1x32xf32, #tpu.memory_space<vmem>>, vector<1x1x32xf32>
    %396 = vector.shape_cast %395 : vector<1x1x32xf32> to vector<1x32xf32>
    %cst_218 = arith.constant dense<0.000000e+00> : vector<8xf32>
    %397 = vector.multi_reduction <add>, %203, %cst_218 [1] : vector<8x32xf32> to vector<8xf32>
    %398 = vector.shape_cast %397 : vector<8xf32> to vector<8x1xf32>
    %cst_219 = arith.constant 3.200000e+01 : f32
    %399 = vector.broadcast %cst_219 : f32 to vector<8x1xf32>
    %400 = arith.divf %398, %399 : vector<8x1xf32>
    %401 = vector.broadcast %400 : vector<8x1xf32> to vector<8x32xf32>
    %402 = arith.subf %203, %401 : vector<8x32xf32>
    %403 = arith.mulf %402, %402 : vector<8x32xf32>
    %cst_220 = arith.constant dense<0.000000e+00> : vector<8xf32>
    %404 = vector.multi_reduction <add>, %403, %cst_220 [1] : vector<8x32xf32> to vector<8xf32>
    %405 = vector.shape_cast %404 : vector<8xf32> to vector<8x1xf32>
    %cst_221 = arith.constant 3.200000e+01 : f32
    %406 = vector.broadcast %cst_221 : f32 to vector<8x1xf32>
    %407 = arith.divf %405, %406 : vector<8x1xf32>
    %cst_222 = arith.constant 9.99999974E-6 : f32
    %408 = vector.broadcast %cst_222 : f32 to vector<8x1xf32>
    %409 = arith.addf %407, %408 : vector<8x1xf32>
    %410 = math.rsqrt %409 : vector<8x1xf32>
    %411 = vector.broadcast %410 : vector<8x1xf32> to vector<8x32xf32>
    %412 = arith.mulf %402, %411 : vector<8x32xf32>
    %413 = vector.broadcast %394 : vector<1x32xf32> to vector<8x32xf32>
    %414 = arith.mulf %412, %413 : vector<8x32xf32>
    %415 = vector.broadcast %396 : vector<1x32xf32> to vector<8x32xf32>
    %416 = arith.addf %414, %415 : vector<8x32xf32>
    %417 = arith.truncf %416 : vector<8x32xf32> to vector<8x32xbf16>
    %418 = vector.shape_cast %392 : vector<8x32xbf16> to vector<1x8x32xbf16>
    %419 = vector.broadcast %418 : vector<1x8x32xbf16> to vector<4x8x32xbf16>
    %420 = vector.shape_cast %417 : vector<8x32xbf16> to vector<1x8x32xbf16>
    %421 = vector.broadcast %420 : vector<1x8x32xbf16> to vector<4x8x32xbf16>
    %c1_223 = arith.constant 1 : index
    %c0_224 = arith.constant 0 : index
    %c0_225 = arith.constant 0 : index
    %c0_226 = arith.constant 0 : index
    %422 = vector.load %arg25[%c1_223, %c0_224, %c0_225, %c0_226] : memref<2x4x8x32xbf16, #tpu.memory_space<vmem>>, vector<1x4x8x32xbf16>
    %423 = vector.shape_cast %422 : vector<1x4x8x32xbf16> to vector<4x8x32xbf16>
    "tpu.trace_start"() <{level = 10 : i32, message = "hsd,hfd->hsf"}> : () -> ()
    %cst_227 = arith.constant dense<0.000000e+00> : vector<4x8x8xf32>
    %424 = tpu.matmul %419, %423, %cst_227 {dimension_numbers = #tpu.dot_dimension_numbers<[2], [2], [1], [1], [0, 0, 0, 1, 1, 1], [0], [0]>} : vector<4x8x32xbf16>, vector<4x8x32xbf16>, vector<4x8x8xf32> -> vector<4x8x8xf32>
    "tpu.trace_stop"() : () -> ()
    %c1_228 = arith.constant 1 : index
    %c0_229 = arith.constant 0 : index
    %c0_230 = arith.constant 0 : index
    %c0_231 = arith.constant 0 : index
    %425 = vector.load %arg26[%c1_228, %c0_229, %c0_230, %c0_231] : memref<2x4x1x8xf32, #tpu.memory_space<vmem>>, vector<1x4x1x8xf32>
    %426 = vector.shape_cast %425 : vector<1x4x1x8xf32> to vector<4x1x8xf32>
    %427 = vector.broadcast %426 : vector<4x1x8xf32> to vector<4x8x8xf32>
    %428 = arith.addf %424, %427 : vector<4x8x8xf32>
    %c1_232 = arith.constant 1 : index
    %c0_233 = arith.constant 0 : index
    %c0_234 = arith.constant 0 : index
    %c0_235 = arith.constant 0 : index
    %429 = vector.load %arg27[%c1_232, %c0_233, %c0_234, %c0_235] : memref<2x4x8x32xbf16, #tpu.memory_space<vmem>>, vector<1x4x8x32xbf16>
    %430 = vector.shape_cast %429 : vector<1x4x8x32xbf16> to vector<4x8x32xbf16>
    "tpu.trace_start"() <{level = 10 : i32, message = "hsd,hfd->hsf"}> : () -> ()
    %cst_236 = arith.constant dense<0.000000e+00> : vector<4x8x8xf32>
    %431 = tpu.matmul %421, %430, %cst_236 {dimension_numbers = #tpu.dot_dimension_numbers<[2], [2], [1], [1], [0, 0, 0, 1, 1, 1], [0], [0]>} : vector<4x8x32xbf16>, vector<4x8x32xbf16>, vector<4x8x8xf32> -> vector<4x8x8xf32>
    "tpu.trace_stop"() : () -> ()
    %c1_237 = arith.constant 1 : index
    %c0_238 = arith.constant 0 : index
    %c0_239 = arith.constant 0 : index
    %c0_240 = arith.constant 0 : index
    %432 = vector.load %arg28[%c1_237, %c0_238, %c0_239, %c0_240] : memref<2x4x1x8xf32, #tpu.memory_space<vmem>>, vector<1x4x1x8xf32>
    %433 = vector.shape_cast %432 : vector<1x4x1x8xf32> to vector<4x1x8xf32>
    %434 = vector.broadcast %433 : vector<4x1x8xf32> to vector<4x8x8xf32>
    %435 = arith.addf %431, %434 : vector<4x8x8xf32>
    %c1_241 = arith.constant 1 : index
    %c0_242 = arith.constant 0 : index
    %c0_243 = arith.constant 0 : index
    %c0_244 = arith.constant 0 : index
    %436 = vector.load %arg29[%c1_241, %c0_242, %c0_243, %c0_244] : memref<2x4x8x32xbf16, #tpu.memory_space<vmem>>, vector<1x4x8x32xbf16>
    %437 = vector.shape_cast %436 : vector<1x4x8x32xbf16> to vector<4x8x32xbf16>
    "tpu.trace_start"() <{level = 10 : i32, message = "hsd,hfd->hsf"}> : () -> ()
    %cst_245 = arith.constant dense<0.000000e+00> : vector<4x8x8xf32>
    %438 = tpu.matmul %421, %437, %cst_245 {dimension_numbers = #tpu.dot_dimension_numbers<[2], [2], [1], [1], [0, 0, 0, 1, 1, 1], [0], [0]>} : vector<4x8x32xbf16>, vector<4x8x32xbf16>, vector<4x8x8xf32> -> vector<4x8x8xf32>
    "tpu.trace_stop"() : () -> ()
    %c1_246 = arith.constant 1 : index
    %c0_247 = arith.constant 0 : index
    %c0_248 = arith.constant 0 : index
    %c0_249 = arith.constant 0 : index
    %439 = vector.load %arg30[%c1_246, %c0_247, %c0_248, %c0_249] : memref<2x4x1x8xf32, #tpu.memory_space<vmem>>, vector<1x4x1x8xf32>
    %440 = vector.shape_cast %439 : vector<1x4x1x8xf32> to vector<4x1x8xf32>
    %441 = vector.broadcast %440 : vector<4x1x8xf32> to vector<4x8x8xf32>
    %442 = arith.addf %438, %441 : vector<4x8x8xf32>
    %443 = arith.truncf %428 : vector<4x8x8xf32> to vector<4x8x8xbf16>
    %444 = arith.truncf %435 : vector<4x8x8xf32> to vector<4x8x8xbf16>
    "tpu.trace_start"() <{level = 10 : i32, message = "hqd,hkd->hqk"}> : () -> ()
    %cst_250 = arith.constant dense<0.000000e+00> : vector<4x8x8xf32>
    %445 = tpu.matmul %443, %444, %cst_250 {dimension_numbers = #tpu.dot_dimension_numbers<[2], [2], [1], [1], [0, 0, 0, 1, 1, 1], [0], [0]>} : vector<4x8x8xbf16>, vector<4x8x8xbf16>, vector<4x8x8xf32> -> vector<4x8x8xf32>
    "tpu.trace_stop"() : () -> ()
    %446 = vector.broadcast %211 : vector<1x8x8xf32> to vector<4x8x8xf32>
    %447 = arith.addf %445, %446 : vector<4x8x8xf32>
    %cst_251 = arith.constant dense<0xFF800000> : vector<4x8xf32>
    %448 = vector.multi_reduction <maximumf>, %447, %cst_251 [2] : vector<4x8x8xf32> to vector<4x8xf32>
    %449 = vector.shape_cast %448 : vector<4x8xf32> to vector<4x8x1xf32>
    %450 = vector.broadcast %449 : vector<4x8x1xf32> to vector<4x8x8xf32>
    %451 = arith.subf %447, %450 : vector<4x8x8xf32>
    %452 = math.exp %451 : vector<4x8x8xf32>
    %cst_252 = arith.constant dense<0.000000e+00> : vector<4x8xf32>
    %453 = vector.multi_reduction <add>, %452, %cst_252 [2] : vector<4x8x8xf32> to vector<4x8xf32>
    %454 = vector.shape_cast %453 : vector<4x8xf32> to vector<4x8x1xf32>
    %455 = tpu.reciprocal %454 {approx = true} : vector<4x8x1xf32> -> vector<4x8x1xf32>
    %456 = vector.broadcast %455 : vector<4x8x1xf32> to vector<4x8x8xf32>
    %457 = arith.mulf %452, %456 : vector<4x8x8xf32>
    %458 = arith.truncf %457 : vector<4x8x8xf32> to vector<4x8x8xbf16>
    %459 = arith.truncf %442 : vector<4x8x8xf32> to vector<4x8x8xbf16>
    "tpu.trace_start"() <{level = 10 : i32, message = "hqk,hkd->hqd"}> : () -> ()
    %cst_253 = arith.constant dense<0.000000e+00> : vector<4x8x8xf32>
    %460 = tpu.matmul %458, %459, %cst_253 {dimension_numbers = #tpu.dot_dimension_numbers<[2], [1], [1], [2], [0, 0, 0, 1, 1, 2], [0], [0]>} : vector<4x8x8xbf16>, vector<4x8x8xbf16>, vector<4x8x8xf32> -> vector<4x8x8xf32>
    "tpu.trace_stop"() : () -> ()
    %461 = arith.truncf %460 : vector<4x8x8xf32> to vector<4x8x8xbf16>
    %c1_254 = arith.constant 1 : index
    %c0_255 = arith.constant 0 : index
    %c0_256 = arith.constant 0 : index
    %c0_257 = arith.constant 0 : index
    %462 = vector.load %arg31[%c1_254, %c0_255, %c0_256, %c0_257] : memref<2x4x8x32xbf16, #tpu.memory_space<vmem>>, vector<1x4x8x32xbf16>
    %463 = vector.shape_cast %462 : vector<1x4x8x32xbf16> to vector<4x8x32xbf16>
    "tpu.trace_start"() <{level = 10 : i32, message = "hqd,hdf->hqf"}> : () -> ()
    %cst_258 = arith.constant dense<0.000000e+00> : vector<4x8x32xf32>
    %464 = tpu.matmul %461, %463, %cst_258 {dimension_numbers = #tpu.dot_dimension_numbers<[2], [1], [1], [2], [0, 0, 0, 1, 1, 2], [0], [0]>} : vector<4x8x8xbf16>, vector<4x8x32xbf16>, vector<4x8x32xf32> -> vector<4x8x32xf32>
    "tpu.trace_stop"() : () -> ()
    %465 = vector.extract_strided_slice %464 {offsets = [0, 0, 0], sizes = [1, 8, 32], strides = [1, 1, 1]} : vector<4x8x32xf32> to vector<1x8x32xf32>
    %466 = vector.shape_cast %465 : vector<1x8x32xf32> to vector<8x32xf32>
    %467 = vector.extract_strided_slice %464 {offsets = [1, 0, 0], sizes = [1, 8, 32], strides = [1, 1, 1]} : vector<4x8x32xf32> to vector<1x8x32xf32>
    %468 = vector.shape_cast %467 : vector<1x8x32xf32> to vector<8x32xf32>
    %469 = arith.addf %466, %468 : vector<8x32xf32>
    %470 = vector.extract_strided_slice %464 {offsets = [2, 0, 0], sizes = [1, 8, 32], strides = [1, 1, 1]} : vector<4x8x32xf32> to vector<1x8x32xf32>
    %471 = vector.shape_cast %470 : vector<1x8x32xf32> to vector<8x32xf32>
    %472 = arith.addf %469, %471 : vector<8x32xf32>
    %473 = vector.extract_strided_slice %464 {offsets = [3, 0, 0], sizes = [1, 8, 32], strides = [1, 1, 1]} : vector<4x8x32xf32> to vector<1x8x32xf32>
    %474 = vector.shape_cast %473 : vector<1x8x32xf32> to vector<8x32xf32>
    %475 = arith.addf %472, %474 : vector<8x32xf32>
    %476 = arith.addf %367, %475 : vector<8x32xf32>
    %c1_259 = arith.constant 1 : index
    %c0_260 = arith.constant 0 : index
    %c0_261 = arith.constant 0 : index
    %477 = vector.load %arg32[%c1_259, %c0_260, %c0_261] : memref<2x1x32xf32, #tpu.memory_space<vmem>>, vector<1x1x32xf32>
    %478 = vector.shape_cast %477 : vector<1x1x32xf32> to vector<1x32xf32>
    %479 = vector.broadcast %478 : vector<1x32xf32> to vector<8x32xf32>
    %480 = arith.addf %476, %479 : vector<8x32xf32>
    %c1_262 = arith.constant 1 : index
    %c0_263 = arith.constant 0 : index
    %c0_264 = arith.constant 0 : index
    %481 = vector.load %arg39[%c1_262, %c0_263, %c0_264] : memref<2x1x32xf32, #tpu.memory_space<vmem>>, vector<1x1x32xf32>
    %482 = vector.shape_cast %481 : vector<1x1x32xf32> to vector<1x32xf32>
    %c1_265 = arith.constant 1 : index
    %c0_266 = arith.constant 0 : index
    %c0_267 = arith.constant 0 : index
    %483 = vector.load %arg40[%c1_265, %c0_266, %c0_267] : memref<2x1x32xf32, #tpu.memory_space<vmem>>, vector<1x1x32xf32>
    %484 = vector.shape_cast %483 : vector<1x1x32xf32> to vector<1x32xf32>
    %cst_268 = arith.constant dense<0.000000e+00> : vector<8xf32>
    %485 = vector.multi_reduction <add>, %480, %cst_268 [1] : vector<8x32xf32> to vector<8xf32>
    %486 = vector.shape_cast %485 : vector<8xf32> to vector<8x1xf32>
    %cst_269 = arith.constant 3.200000e+01 : f32
    %487 = vector.broadcast %cst_269 : f32 to vector<8x1xf32>
    %488 = arith.divf %486, %487 : vector<8x1xf32>
    %489 = vector.broadcast %488 : vector<8x1xf32> to vector<8x32xf32>
    %490 = arith.subf %480, %489 : vector<8x32xf32>
    %491 = arith.mulf %490, %490 : vector<8x32xf32>
    %cst_270 = arith.constant dense<0.000000e+00> : vector<8xf32>
    %492 = vector.multi_reduction <add>, %491, %cst_270 [1] : vector<8x32xf32> to vector<8xf32>
    %493 = vector.shape_cast %492 : vector<8xf32> to vector<8x1xf32>
    %cst_271 = arith.constant 3.200000e+01 : f32
    %494 = vector.broadcast %cst_271 : f32 to vector<8x1xf32>
    %495 = arith.divf %493, %494 : vector<8x1xf32>
    %cst_272 = arith.constant 9.99999974E-6 : f32
    %496 = vector.broadcast %cst_272 : f32 to vector<8x1xf32>
    %497 = arith.addf %495, %496 : vector<8x1xf32>
    %498 = math.rsqrt %497 : vector<8x1xf32>
    %499 = vector.broadcast %498 : vector<8x1xf32> to vector<8x32xf32>
    %500 = arith.mulf %490, %499 : vector<8x32xf32>
    %501 = vector.broadcast %482 : vector<1x32xf32> to vector<8x32xf32>
    %502 = arith.mulf %500, %501 : vector<8x32xf32>
    %503 = vector.broadcast %484 : vector<1x32xf32> to vector<8x32xf32>
    %504 = arith.addf %502, %503 : vector<8x32xf32>
    %505 = arith.truncf %504 : vector<8x32xf32> to vector<8x32xbf16>
    %c1_273 = arith.constant 1 : index
    %c0_274 = arith.constant 0 : index
    %c0_275 = arith.constant 0 : index
    %506 = vector.load %arg33[%c1_273, %c0_274, %c0_275] : memref<2x32x128xbf16, #tpu.memory_space<vmem>>, vector<1x32x128xbf16>
    %507 = vector.shape_cast %506 : vector<1x32x128xbf16> to vector<32x128xbf16>
    %cst_276 = arith.constant dense<0.000000e+00> : vector<8x128xf32>
    %508 = tpu.matmul %505, %507, %cst_276 {dimension_numbers = #tpu.dot_dimension_numbers<[1], [0], [0], [1], [0, 0, 1, 1], [], []>} : vector<8x32xbf16>, vector<32x128xbf16>, vector<8x128xf32> -> vector<8x128xf32>
    %c1_277 = arith.constant 1 : index
    %c0_278 = arith.constant 0 : index
    %c0_279 = arith.constant 0 : index
    %509 = vector.load %arg34[%c1_277, %c0_278, %c0_279] : memref<2x1x128xf32, #tpu.memory_space<vmem>>, vector<1x1x128xf32>
    %510 = vector.shape_cast %509 : vector<1x1x128xf32> to vector<1x128xf32>
    %511 = vector.broadcast %510 : vector<1x128xf32> to vector<8x128xf32>
    %512 = arith.addf %508, %511 : vector<8x128xf32>
    %cst_280 = arith.constant 0.000000e+00 : f32
    %513 = vector.broadcast %cst_280 : f32 to vector<8x128xf32>
    %514 = arith.maximumf %512, %513 : vector<8x128xf32>
    %515 = arith.truncf %514 : vector<8x128xf32> to vector<8x128xbf16>
    %c1_281 = arith.constant 1 : index
    %c0_282 = arith.constant 0 : index
    %c0_283 = arith.constant 0 : index
    %516 = vector.load %arg35[%c1_281, %c0_282, %c0_283] : memref<2x128x32xbf16, #tpu.memory_space<vmem>>, vector<1x128x32xbf16>
    %517 = vector.shape_cast %516 : vector<1x128x32xbf16> to vector<128x32xbf16>
    %cst_284 = arith.constant dense<0.000000e+00> : vector<8x32xf32>
    %518 = tpu.matmul %515, %517, %cst_284 {dimension_numbers = #tpu.dot_dimension_numbers<[1], [0], [0], [1], [0, 0, 1, 1], [], []>} : vector<8x128xbf16>, vector<128x32xbf16>, vector<8x32xf32> -> vector<8x32xf32>
    %519 = arith.addf %480, %518 : vector<8x32xf32>
    %c1_285 = arith.constant 1 : index
    %c0_286 = arith.constant 0 : index
    %c0_287 = arith.constant 0 : index
    %520 = vector.load %arg36[%c1_285, %c0_286, %c0_287] : memref<2x1x32xf32, #tpu.memory_space<vmem>>, vector<1x1x32xf32>
    %521 = vector.shape_cast %520 : vector<1x1x32xf32> to vector<1x32xf32>
    %522 = vector.broadcast %521 : vector<1x32xf32> to vector<8x32xf32>
    %523 = arith.addf %519, %522 : vector<8x32xf32>
    %c0_288 = arith.constant 0 : index
    %c0_289 = arith.constant 0 : index
    %524 = vector.load %arg41[%c0_288, %c0_289] : memref<1x32xf32, #tpu.memory_space<vmem>>, vector<1x32xf32>
    %c0_290 = arith.constant 0 : index
    %c0_291 = arith.constant 0 : index
    %525 = vector.load %arg42[%c0_290, %c0_291] : memref<1x32xf32, #tpu.memory_space<vmem>>, vector<1x32xf32>
    %cst_292 = arith.constant dense<0.000000e+00> : vector<8xf32>
    %526 = vector.multi_reduction <add>, %523, %cst_292 [1] : vector<8x32xf32> to vector<8xf32>
    %527 = vector.shape_cast %526 : vector<8xf32> to vector<8x1xf32>
    %cst_293 = arith.constant 3.200000e+01 : f32
    %528 = vector.broadcast %cst_293 : f32 to vector<8x1xf32>
    %529 = arith.divf %527, %528 : vector<8x1xf32>
    %530 = vector.broadcast %529 : vector<8x1xf32> to vector<8x32xf32>
    %531 = arith.subf %523, %530 : vector<8x32xf32>
    %532 = arith.mulf %531, %531 : vector<8x32xf32>
    %cst_294 = arith.constant dense<0.000000e+00> : vector<8xf32>
    %533 = vector.multi_reduction <add>, %532, %cst_294 [1] : vector<8x32xf32> to vector<8xf32>
    %534 = vector.shape_cast %533 : vector<8xf32> to vector<8x1xf32>
    %cst_295 = arith.constant 3.200000e+01 : f32
    %535 = vector.broadcast %cst_295 : f32 to vector<8x1xf32>
    %536 = arith.divf %534, %535 : vector<8x1xf32>
    %cst_296 = arith.constant 9.99999974E-6 : f32
    %537 = vector.broadcast %cst_296 : f32 to vector<8x1xf32>
    %538 = arith.addf %536, %537 : vector<8x1xf32>
    %539 = math.rsqrt %538 : vector<8x1xf32>
    %540 = vector.broadcast %539 : vector<8x1xf32> to vector<8x32xf32>
    %541 = arith.mulf %531, %540 : vector<8x32xf32>
    %542 = vector.broadcast %524 : vector<1x32xf32> to vector<8x32xf32>
    %543 = arith.mulf %541, %542 : vector<8x32xf32>
    %544 = vector.broadcast %525 : vector<1x32xf32> to vector<8x32xf32>
    %545 = arith.addf %543, %544 : vector<8x32xf32>
    %c0_297 = arith.constant 0 : index
    %c0_298 = arith.constant 0 : index
    %546 = vector.load %arg43[%c0_297, %c0_298] : memref<8x64xf32, #tpu.memory_space<vmem>>, vector<8x32xf32>
    tpu.vector_store %arg43[%c0_297, %c0_298], %545 {strides = array<i32>} : memref<8x64xf32, #tpu.memory_space<vmem>>, vector<8x32xf32>,
    %c0_299 = arith.constant 0 : index
    %c32 = arith.constant 32 : index
    %547 = vector.load %arg1[%c0_299, %c32] : memref<8x64xf32, #tpu.memory_space<vmem>>, vector<8x32xf32>
    %c0_300 = arith.constant 0 : index
    %c32_301 = arith.constant 32 : index
    %548 = vector.load %arg2[%c0_300, %c32_301] : memref<8x64xf32, #tpu.memory_space<vmem>>, vector<8x32xf32>
    %c0_302 = arith.constant 0 : index
    %c32_303 = arith.constant 32 : index
    %549 = vector.load %arg3[%c0_302, %c32_303] : memref<8x64xf32, #tpu.memory_space<vmem>>, vector<8x32xf32>
    %cst_304 = arith.constant 5.65685415 : f32
    %550 = vector.broadcast %cst_304 : f32 to vector<8x32xf32>
    %551 = arith.mulf %547, %550 : vector<8x32xf32>
    %552 = arith.addf %551, %0 : vector<8x32xf32>
    %cst_305 = arith.constant 5.65685415 : f32
    %553 = vector.broadcast %cst_305 : f32 to vector<8x32xf32>
    %554 = arith.mulf %549, %553 : vector<8x32xf32>
    %555 = arith.addf %554, %2 : vector<8x32xf32>
    %556 = tpu.iota {dimensions = array<i32: 1>} : vector<1x8x8xi32>
    %557 = tpu.iota {dimensions = array<i32: 2>} : vector<1x8x8xi32>
    %558 = arith.subi %557, %556 : vector<1x8x8xi32>
    %c1_i32_306 = arith.constant 1 : i32
    %559 = vector.broadcast %c1_i32_306 : i32 to vector<1x8x8xi32>
    %560 = arith.cmpi sge, %558, %559 : vector<1x8x8xi32>
    %cst_307 = arith.constant -1.000000e+30 : f32
    %cst_308 = arith.constant 0.000000e+00 : f32
    %561 = vector.broadcast %cst_307 : f32 to vector<1x8x8xf32>
    %562 = vector.broadcast %cst_308 : f32 to vector<1x8x8xf32>
    %563 = arith.select %560, %561, %562 : vector<1x8x8xi1>, vector<1x8x8xf32>
    %c0_309 = arith.constant 0 : index
    %c0_310 = arith.constant 0 : index
    %c0_311 = arith.constant 0 : index
    %564 = vector.load %arg19[%c0_309, %c0_310, %c0_311] : memref<1x1x32xf32, #tpu.memory_space<vmem>>, vector<1x1x32xf32>
    %565 = vector.shape_cast %564 : vector<1x1x32xf32> to vector<1x32xf32>
    %c0_312 = arith.constant 0 : index
    %c0_313 = arith.constant 0 : index
    %c0_314 = arith.constant 0 : index
    %566 = vector.load %arg20[%c0_312, %c0_313, %c0_314] : memref<1x1x32xf32, #tpu.memory_space<vmem>>, vector<1x1x32xf32>
    %567 = vector.shape_cast %566 : vector<1x1x32xf32> to vector<1x32xf32>
    %cst_315 = arith.constant dense<0.000000e+00> : vector<8xf32>
    %568 = vector.multi_reduction <add>, %552, %cst_315 [1] : vector<8x32xf32> to vector<8xf32>
    %569 = vector.shape_cast %568 : vector<8xf32> to vector<8x1xf32>
    %cst_316 = arith.constant 3.200000e+01 : f32
    %570 = vector.broadcast %cst_316 : f32 to vector<8x1xf32>
    %571 = arith.divf %569, %570 : vector<8x1xf32>
    %572 = vector.broadcast %571 : vector<8x1xf32> to vector<8x32xf32>
    %573 = arith.subf %552, %572 : vector<8x32xf32>
    %574 = arith.mulf %573, %573 : vector<8x32xf32>
    %cst_317 = arith.constant dense<0.000000e+00> : vector<8xf32>
    %575 = vector.multi_reduction <add>, %574, %cst_317 [1] : vector<8x32xf32> to vector<8xf32>
    %576 = vector.shape_cast %575 : vector<8xf32> to vector<8x1xf32>
    %cst_318 = arith.constant 3.200000e+01 : f32
    %577 = vector.broadcast %cst_318 : f32 to vector<8x1xf32>
    %578 = arith.divf %576, %577 : vector<8x1xf32>
    %cst_319 = arith.constant 9.99999974E-6 : f32
    %579 = vector.broadcast %cst_319 : f32 to vector<8x1xf32>
    %580 = arith.addf %578, %579 : vector<8x1xf32>
    %581 = math.rsqrt %580 : vector<8x1xf32>
    %582 = vector.broadcast %581 : vector<8x1xf32> to vector<8x32xf32>
    %583 = arith.mulf %573, %582 : vector<8x32xf32>
    %584 = vector.broadcast %565 : vector<1x32xf32> to vector<8x32xf32>
    %585 = arith.mulf %583, %584 : vector<8x32xf32>
    %586 = vector.broadcast %567 : vector<1x32xf32> to vector<8x32xf32>
    %587 = arith.addf %585, %586 : vector<8x32xf32>
    %588 = arith.truncf %587 : vector<8x32xf32> to vector<8x32xbf16>
    %c0_320 = arith.constant 0 : index
    %c0_321 = arith.constant 0 : index
    %c0_322 = arith.constant 0 : index
    %589 = vector.load %arg19[%c0_320, %c0_321, %c0_322] : memref<1x1x32xf32, #tpu.memory_space<vmem>>, vector<1x1x32xf32>
    %590 = vector.shape_cast %589 : vector<1x1x32xf32> to vector<1x32xf32>
    %c0_323 = arith.constant 0 : index
    %c0_324 = arith.constant 0 : index
    %c0_325 = arith.constant 0 : index
    %591 = vector.load %arg20[%c0_323, %c0_324, %c0_325] : memref<1x1x32xf32, #tpu.memory_space<vmem>>, vector<1x1x32xf32>
    %592 = vector.shape_cast %591 : vector<1x1x32xf32> to vector<1x32xf32>
    %cst_326 = arith.constant dense<0.000000e+00> : vector<8xf32>
    %593 = vector.multi_reduction <add>, %555, %cst_326 [1] : vector<8x32xf32> to vector<8xf32>
    %594 = vector.shape_cast %593 : vector<8xf32> to vector<8x1xf32>
    %cst_327 = arith.constant 3.200000e+01 : f32
    %595 = vector.broadcast %cst_327 : f32 to vector<8x1xf32>
    %596 = arith.divf %594, %595 : vector<8x1xf32>
    %597 = vector.broadcast %596 : vector<8x1xf32> to vector<8x32xf32>
    %598 = arith.subf %555, %597 : vector<8x32xf32>
    %599 = arith.mulf %598, %598 : vector<8x32xf32>
    %cst_328 = arith.constant dense<0.000000e+00> : vector<8xf32>
    %600 = vector.multi_reduction <add>, %599, %cst_328 [1] : vector<8x32xf32> to vector<8xf32>
    %601 = vector.shape_cast %600 : vector<8xf32> to vector<8x1xf32>
    %cst_329 = arith.constant 3.200000e+01 : f32
    %602 = vector.broadcast %cst_329 : f32 to vector<8x1xf32>
    %603 = arith.divf %601, %602 : vector<8x1xf32>
    %cst_330 = arith.constant 9.99999974E-6 : f32
    %604 = vector.broadcast %cst_330 : f32 to vector<8x1xf32>
    %605 = arith.addf %603, %604 : vector<8x1xf32>
    %606 = math.rsqrt %605 : vector<8x1xf32>
    %607 = vector.broadcast %606 : vector<8x1xf32> to vector<8x32xf32>
    %608 = arith.mulf %598, %607 : vector<8x32xf32>
    %609 = vector.broadcast %590 : vector<1x32xf32> to vector<8x32xf32>
    %610 = arith.mulf %608, %609 : vector<8x32xf32>
    %611 = vector.broadcast %592 : vector<1x32xf32> to vector<8x32xf32>
    %612 = arith.addf %610, %611 : vector<8x32xf32>
    %613 = arith.truncf %612 : vector<8x32xf32> to vector<8x32xbf16>
    %614 = vector.shape_cast %588 : vector<8x32xbf16> to vector<1x8x32xbf16>
    %615 = vector.broadcast %614 : vector<1x8x32xbf16> to vector<4x8x32xbf16>
    %616 = vector.shape_cast %613 : vector<8x32xbf16> to vector<1x8x32xbf16>
    %617 = vector.broadcast %616 : vector<1x8x32xbf16> to vector<4x8x32xbf16>
    %c0_331 = arith.constant 0 : index
    %c0_332 = arith.constant 0 : index
    %c0_333 = arith.constant 0 : index
    %c0_334 = arith.constant 0 : index
    %618 = vector.load %arg7[%c0_331, %c0_332, %c0_333, %c0_334] : memref<1x4x8x32xbf16, #tpu.memory_space<vmem>>, vector<1x4x8x32xbf16>
    %619 = vector.shape_cast %618 : vector<1x4x8x32xbf16> to vector<4x8x32xbf16>
    "tpu.trace_start"() <{level = 10 : i32, message = "hsd,hfd->hsf"}> : () -> ()
    %cst_335 = arith.constant dense<0.000000e+00> : vector<4x8x8xf32>
    %620 = tpu.matmul %615, %619, %cst_335 {dimension_numbers = #tpu.dot_dimension_numbers<[2], [2], [1], [1], [0, 0, 0, 1, 1, 1], [0], [0]>} : vector<4x8x32xbf16>, vector<4x8x32xbf16>, vector<4x8x8xf32> -> vector<4x8x8xf32>
    "tpu.trace_stop"() : () -> ()
    %c0_336 = arith.constant 0 : index
    %c0_337 = arith.constant 0 : index
    %c0_338 = arith.constant 0 : index
    %c0_339 = arith.constant 0 : index
    %621 = vector.load %arg8[%c0_336, %c0_337, %c0_338, %c0_339] : memref<1x4x1x8xf32, #tpu.memory_space<vmem>>, vector<1x4x1x8xf32>
    %622 = vector.shape_cast %621 : vector<1x4x1x8xf32> to vector<4x1x8xf32>
    %623 = vector.broadcast %622 : vector<4x1x8xf32> to vector<4x8x8xf32>
    %624 = arith.addf %620, %623 : vector<4x8x8xf32>
    %c0_340 = arith.constant 0 : index
    %c0_341 = arith.constant 0 : index
    %c0_342 = arith.constant 0 : index
    %c0_343 = arith.constant 0 : index
    %625 = vector.load %arg9[%c0_340, %c0_341, %c0_342, %c0_343] : memref<1x4x8x32xbf16, #tpu.memory_space<vmem>>, vector<1x4x8x32xbf16>
    %626 = vector.shape_cast %625 : vector<1x4x8x32xbf16> to vector<4x8x32xbf16>
    "tpu.trace_start"() <{level = 10 : i32, message = "hsd,hfd->hsf"}> : () -> ()
    %cst_344 = arith.constant dense<0.000000e+00> : vector<4x8x8xf32>
    %627 = tpu.matmul %617, %626, %cst_344 {dimension_numbers = #tpu.dot_dimension_numbers<[2], [2], [1], [1], [0, 0, 0, 1, 1, 1], [0], [0]>} : vector<4x8x32xbf16>, vector<4x8x32xbf16>, vector<4x8x8xf32> -> vector<4x8x8xf32>
    "tpu.trace_stop"() : () -> ()
    %c0_345 = arith.constant 0 : index
    %c0_346 = arith.constant 0 : index
    %c0_347 = arith.constant 0 : index
    %c0_348 = arith.constant 0 : index
    %628 = vector.load %arg10[%c0_345, %c0_346, %c0_347, %c0_348] : memref<1x4x1x8xf32, #tpu.memory_space<vmem>>, vector<1x4x1x8xf32>
    %629 = vector.shape_cast %628 : vector<1x4x1x8xf32> to vector<4x1x8xf32>
    %630 = vector.broadcast %629 : vector<4x1x8xf32> to vector<4x8x8xf32>
    %631 = arith.addf %627, %630 : vector<4x8x8xf32>
    %c0_349 = arith.constant 0 : index
    %c0_350 = arith.constant 0 : index
    %c0_351 = arith.constant 0 : index
    %c0_352 = arith.constant 0 : index
    %632 = vector.load %arg11[%c0_349, %c0_350, %c0_351, %c0_352] : memref<1x4x8x32xbf16, #tpu.memory_space<vmem>>, vector<1x4x8x32xbf16>
    %633 = vector.shape_cast %632 : vector<1x4x8x32xbf16> to vector<4x8x32xbf16>
    "tpu.trace_start"() <{level = 10 : i32, message = "hsd,hfd->hsf"}> : () -> ()
    %cst_353 = arith.constant dense<0.000000e+00> : vector<4x8x8xf32>
    %634 = tpu.matmul %617, %633, %cst_353 {dimension_numbers = #tpu.dot_dimension_numbers<[2], [2], [1], [1], [0, 0, 0, 1, 1, 1], [0], [0]>} : vector<4x8x32xbf16>, vector<4x8x32xbf16>, vector<4x8x8xf32> -> vector<4x8x8xf32>
    "tpu.trace_stop"() : () -> ()
    %c0_354 = arith.constant 0 : index
    %c0_355 = arith.constant 0 : index
    %c0_356 = arith.constant 0 : index
    %c0_357 = arith.constant 0 : index
    %635 = vector.load %arg12[%c0_354, %c0_355, %c0_356, %c0_357] : memref<1x4x1x8xf32, #tpu.memory_space<vmem>>, vector<1x4x1x8xf32>
    %636 = vector.shape_cast %635 : vector<1x4x1x8xf32> to vector<4x1x8xf32>
    %637 = vector.broadcast %636 : vector<4x1x8xf32> to vector<4x8x8xf32>
    %638 = arith.addf %634, %637 : vector<4x8x8xf32>
    %639 = arith.truncf %624 : vector<4x8x8xf32> to vector<4x8x8xbf16>
    %640 = arith.truncf %631 : vector<4x8x8xf32> to vector<4x8x8xbf16>
    "tpu.trace_start"() <{level = 10 : i32, message = "hqd,hkd->hqk"}> : () -> ()
    %cst_358 = arith.constant dense<0.000000e+00> : vector<4x8x8xf32>
    %641 = tpu.matmul %639, %640, %cst_358 {dimension_numbers = #tpu.dot_dimension_numbers<[2], [2], [1], [1], [0, 0, 0, 1, 1, 1], [0], [0]>} : vector<4x8x8xbf16>, vector<4x8x8xbf16>, vector<4x8x8xf32> -> vector<4x8x8xf32>
    "tpu.trace_stop"() : () -> ()
    %642 = vector.broadcast %563 : vector<1x8x8xf32> to vector<4x8x8xf32>
    %643 = arith.addf %641, %642 : vector<4x8x8xf32>
    %cst_359 = arith.constant dense<0xFF800000> : vector<4x8xf32>
    %644 = vector.multi_reduction <maximumf>, %643, %cst_359 [2] : vector<4x8x8xf32> to vector<4x8xf32>
    %645 = vector.shape_cast %644 : vector<4x8xf32> to vector<4x8x1xf32>
    %646 = vector.broadcast %645 : vector<4x8x1xf32> to vector<4x8x8xf32>
    %647 = arith.subf %643, %646 : vector<4x8x8xf32>
    %648 = math.exp %647 : vector<4x8x8xf32>
    %cst_360 = arith.constant dense<0.000000e+00> : vector<4x8xf32>
    %649 = vector.multi_reduction <add>, %648, %cst_360 [2] : vector<4x8x8xf32> to vector<4x8xf32>
    %650 = vector.shape_cast %649 : vector<4x8xf32> to vector<4x8x1xf32>
    %651 = tpu.reciprocal %650 {approx = true} : vector<4x8x1xf32> -> vector<4x8x1xf32>
    %652 = vector.broadcast %651 : vector<4x8x1xf32> to vector<4x8x8xf32>
    %653 = arith.mulf %648, %652 : vector<4x8x8xf32>
    %654 = arith.truncf %653 : vector<4x8x8xf32> to vector<4x8x8xbf16>
    %655 = arith.truncf %638 : vector<4x8x8xf32> to vector<4x8x8xbf16>
    "tpu.trace_start"() <{level = 10 : i32, message = "hqk,hkd->hqd"}> : () -> ()
    %cst_361 = arith.constant dense<0.000000e+00> : vector<4x8x8xf32>
    %656 = tpu.matmul %654, %655, %cst_361 {dimension_numbers = #tpu.dot_dimension_numbers<[2], [1], [1], [2], [0, 0, 0, 1, 1, 2], [0], [0]>} : vector<4x8x8xbf16>, vector<4x8x8xbf16>, vector<4x8x8xf32> -> vector<4x8x8xf32>
    "tpu.trace_stop"() : () -> ()
    %657 = arith.truncf %656 : vector<4x8x8xf32> to vector<4x8x8xbf16>
    %c0_362 = arith.constant 0 : index
    %c0_363 = arith.constant 0 : index
    %c0_364 = arith.constant 0 : index
    %c0_365 = arith.constant 0 : index
    %658 = vector.load %arg13[%c0_362, %c0_363, %c0_364, %c0_365] : memref<1x4x8x32xbf16, #tpu.memory_space<vmem>>, vector<1x4x8x32xbf16>
    %659 = vector.shape_cast %658 : vector<1x4x8x32xbf16> to vector<4x8x32xbf16>
    "tpu.trace_start"() <{level = 10 : i32, message = "hqd,hdf->hqf"}> : () -> ()
    %cst_366 = arith.constant dense<0.000000e+00> : vector<4x8x32xf32>
    %660 = tpu.matmul %657, %659, %cst_366 {dimension_numbers = #tpu.dot_dimension_numbers<[2], [1], [1], [2], [0, 0, 0, 1, 1, 2], [0], [0]>} : vector<4x8x8xbf16>, vector<4x8x32xbf16>, vector<4x8x32xf32> -> vector<4x8x32xf32>
    "tpu.trace_stop"() : () -> ()
    %661 = vector.extract_strided_slice %660 {offsets = [0, 0, 0], sizes = [1, 8, 32], strides = [1, 1, 1]} : vector<4x8x32xf32> to vector<1x8x32xf32>
    %662 = vector.shape_cast %661 : vector<1x8x32xf32> to vector<8x32xf32>
    %663 = vector.extract_strided_slice %660 {offsets = [1, 0, 0], sizes = [1, 8, 32], strides = [1, 1, 1]} : vector<4x8x32xf32> to vector<1x8x32xf32>
    %664 = vector.shape_cast %663 : vector<1x8x32xf32> to vector<8x32xf32>
    %665 = arith.addf %662, %664 : vector<8x32xf32>
    %666 = vector.extract_strided_slice %660 {offsets = [2, 0, 0], sizes = [1, 8, 32], strides = [1, 1, 1]} : vector<4x8x32xf32> to vector<1x8x32xf32>
    %667 = vector.shape_cast %666 : vector<1x8x32xf32> to vector<8x32xf32>
    %668 = arith.addf %665, %667 : vector<8x32xf32>
    %669 = vector.extract_strided_slice %660 {offsets = [3, 0, 0], sizes = [1, 8, 32], strides = [1, 1, 1]} : vector<4x8x32xf32> to vector<1x8x32xf32>
    %670 = vector.shape_cast %669 : vector<1x8x32xf32> to vector<8x32xf32>
    %671 = arith.addf %668, %670 : vector<8x32xf32>
    %672 = arith.addf %552, %671 : vector<8x32xf32>
    %c0_367 = arith.constant 0 : index
    %c0_368 = arith.constant 0 : index
    %c0_369 = arith.constant 0 : index
    %673 = vector.load %arg14[%c0_367, %c0_368, %c0_369] : memref<1x1x32xf32, #tpu.memory_space<vmem>>, vector<1x1x32xf32>
    %674 = vector.shape_cast %673 : vector<1x1x32xf32> to vector<1x32xf32>
    %675 = vector.broadcast %674 : vector<1x32xf32> to vector<8x32xf32>
    %676 = arith.addf %672, %675 : vector<8x32xf32>
    %c0_370 = arith.constant 0 : index
    %c0_371 = arith.constant 0 : index
    %c0_372 = arith.constant 0 : index
    %677 = vector.load %arg21[%c0_370, %c0_371, %c0_372] : memref<1x1x32xf32, #tpu.memory_space<vmem>>, vector<1x1x32xf32>
    %678 = vector.shape_cast %677 : vector<1x1x32xf32> to vector<1x32xf32>
    %c0_373 = arith.constant 0 : index
    %c0_374 = arith.constant 0 : index
    %c0_375 = arith.constant 0 : index
    %679 = vector.load %arg22[%c0_373, %c0_374, %c0_375] : memref<1x1x32xf32, #tpu.memory_space<vmem>>, vector<1x1x32xf32>
    %680 = vector.shape_cast %679 : vector<1x1x32xf32> to vector<1x32xf32>
    %cst_376 = arith.constant dense<0.000000e+00> : vector<8xf32>
    %681 = vector.multi_reduction <add>, %676, %cst_376 [1] : vector<8x32xf32> to vector<8xf32>
    %682 = vector.shape_cast %681 : vector<8xf32> to vector<8x1xf32>
    %cst_377 = arith.constant 3.200000e+01 : f32
    %683 = vector.broadcast %cst_377 : f32 to vector<8x1xf32>
    %684 = arith.divf %682, %683 : vector<8x1xf32>
    %685 = vector.broadcast %684 : vector<8x1xf32> to vector<8x32xf32>
    %686 = arith.subf %676, %685 : vector<8x32xf32>
    %687 = arith.mulf %686, %686 : vector<8x32xf32>
    %cst_378 = arith.constant dense<0.000000e+00> : vector<8xf32>
    %688 = vector.multi_reduction <add>, %687, %cst_378 [1] : vector<8x32xf32> to vector<8xf32>
    %689 = vector.shape_cast %688 : vector<8xf32> to vector<8x1xf32>
    %cst_379 = arith.constant 3.200000e+01 : f32
    %690 = vector.broadcast %cst_379 : f32 to vector<8x1xf32>
    %691 = arith.divf %689, %690 : vector<8x1xf32>
    %cst_380 = arith.constant 9.99999974E-6 : f32
    %692 = vector.broadcast %cst_380 : f32 to vector<8x1xf32>
    %693 = arith.addf %691, %692 : vector<8x1xf32>
    %694 = math.rsqrt %693 : vector<8x1xf32>
    %695 = vector.broadcast %694 : vector<8x1xf32> to vector<8x32xf32>
    %696 = arith.mulf %686, %695 : vector<8x32xf32>
    %697 = vector.broadcast %678 : vector<1x32xf32> to vector<8x32xf32>
    %698 = arith.mulf %696, %697 : vector<8x32xf32>
    %699 = vector.broadcast %680 : vector<1x32xf32> to vector<8x32xf32>
    %700 = arith.addf %698, %699 : vector<8x32xf32>
    %701 = arith.truncf %700 : vector<8x32xf32> to vector<8x32xbf16>
    %c0_381 = arith.constant 0 : index
    %c0_382 = arith.constant 0 : index
    %c0_383 = arith.constant 0 : index
    %702 = vector.load %arg15[%c0_381, %c0_382, %c0_383] : memref<1x32x128xbf16, #tpu.memory_space<vmem>>, vector<1x32x128xbf16>
    %703 = vector.shape_cast %702 : vector<1x32x128xbf16> to vector<32x128xbf16>
    %cst_384 = arith.constant dense<0.000000e+00> : vector<8x128xf32>
    %704 = tpu.matmul %701, %703, %cst_384 {dimension_numbers = #tpu.dot_dimension_numbers<[1], [0], [0], [1], [0, 0, 1, 1], [], []>} : vector<8x32xbf16>, vector<32x128xbf16>, vector<8x128xf32> -> vector<8x128xf32>
    %c0_385 = arith.constant 0 : index
    %c0_386 = arith.constant 0 : index
    %c0_387 = arith.constant 0 : index
    %705 = vector.load %arg16[%c0_385, %c0_386, %c0_387] : memref<1x1x128xf32, #tpu.memory_space<vmem>>, vector<1x1x128xf32>
    %706 = vector.shape_cast %705 : vector<1x1x128xf32> to vector<1x128xf32>
    %707 = vector.broadcast %706 : vector<1x128xf32> to vector<8x128xf32>
    %708 = arith.addf %704, %707 : vector<8x128xf32>
    %cst_388 = arith.constant 0.000000e+00 : f32
    %709 = vector.broadcast %cst_388 : f32 to vector<8x128xf32>
    %710 = arith.maximumf %708, %709 : vector<8x128xf32>
    %711 = arith.truncf %710 : vector<8x128xf32> to vector<8x128xbf16>
    %c0_389 = arith.constant 0 : index
    %c0_390 = arith.constant 0 : index
    %c0_391 = arith.constant 0 : index
    %712 = vector.load %arg17[%c0_389, %c0_390, %c0_391] : memref<1x128x32xbf16, #tpu.memory_space<vmem>>, vector<1x128x32xbf16>
    %713 = vector.shape_cast %712 : vector<1x128x32xbf16> to vector<128x32xbf16>
    %cst_392 = arith.constant dense<0.000000e+00> : vector<8x32xf32>
    %714 = tpu.matmul %711, %713, %cst_392 {dimension_numbers = #tpu.dot_dimension_numbers<[1], [0], [0], [1], [0, 0, 1, 1], [], []>} : vector<8x128xbf16>, vector<128x32xbf16>, vector<8x32xf32> -> vector<8x32xf32>
    %715 = arith.addf %676, %714 : vector<8x32xf32>
    %c0_393 = arith.constant 0 : index
    %c0_394 = arith.constant 0 : index
    %c0_395 = arith.constant 0 : index
    %716 = vector.load %arg18[%c0_393, %c0_394, %c0_395] : memref<1x1x32xf32, #tpu.memory_space<vmem>>, vector<1x1x32xf32>
    %717 = vector.shape_cast %716 : vector<1x1x32xf32> to vector<1x32xf32>
    %718 = vector.broadcast %717 : vector<1x32xf32> to vector<8x32xf32>
    %719 = arith.addf %715, %718 : vector<8x32xf32>
    %c0_396 = arith.constant 0 : index
    %c0_397 = arith.constant 0 : index
    %720 = vector.load %arg23[%c0_396, %c0_397] : memref<1x32xf32, #tpu.memory_space<vmem>>, vector<1x32xf32>
    %c0_398 = arith.constant 0 : index
    %c0_399 = arith.constant 0 : index
    %721 = vector.load %arg24[%c0_398, %c0_399] : memref<1x32xf32, #tpu.memory_space<vmem>>, vector<1x32xf32>
    %cst_400 = arith.constant dense<0.000000e+00> : vector<8xf32>
    %722 = vector.multi_reduction <add>, %719, %cst_400 [1] : vector<8x32xf32> to vector<8xf32>
    %723 = vector.shape_cast %722 : vector<8xf32> to vector<8x1xf32>
    %cst_401 = arith.constant 3.200000e+01 : f32
    %724 = vector.broadcast %cst_401 : f32 to vector<8x1xf32>
    %725 = arith.divf %723, %724 : vector<8x1xf32>
    %726 = vector.broadcast %725 : vector<8x1xf32> to vector<8x32xf32>
    %727 = arith.subf %719, %726 : vector<8x32xf32>
    %728 = arith.mulf %727, %727 : vector<8x32xf32>
    %cst_402 = arith.constant dense<0.000000e+00> : vector<8xf32>
    %729 = vector.multi_reduction <add>, %728, %cst_402 [1] : vector<8x32xf32> to vector<8xf32>
    %730 = vector.shape_cast %729 : vector<8xf32> to vector<8x1xf32>
    %cst_403 = arith.constant 3.200000e+01 : f32
    %731 = vector.broadcast %cst_403 : f32 to vector<8x1xf32>
    %732 = arith.divf %730, %731 : vector<8x1xf32>
    %cst_404 = arith.constant 9.99999974E-6 : f32
    %733 = vector.broadcast %cst_404 : f32 to vector<8x1xf32>
    %734 = arith.addf %732, %733 : vector<8x1xf32>
    %735 = math.rsqrt %734 : vector<8x1xf32>
    %736 = vector.broadcast %735 : vector<8x1xf32> to vector<8x32xf32>
    %737 = arith.mulf %727, %736 : vector<8x32xf32>
    %738 = vector.broadcast %720 : vector<1x32xf32> to vector<8x32xf32>
    %739 = arith.mulf %737, %738 : vector<8x32xf32>
    %740 = vector.broadcast %721 : vector<1x32xf32> to vector<8x32xf32>
    %741 = arith.addf %739, %740 : vector<8x32xf32>
    %cst_405 = arith.constant 5.65685415 : f32
    %742 = vector.broadcast %cst_405 : f32 to vector<8x32xf32>
    %743 = arith.mulf %548, %742 : vector<8x32xf32>
    %744 = arith.addf %743, %1 : vector<8x32xf32>
    %cst_406 = arith.constant 5.65685415 : f32
    %745 = vector.broadcast %cst_406 : f32 to vector<8x32xf32>
    %746 = arith.mulf %741, %745 : vector<8x32xf32>
    %747 = arith.addf %746, %0 : vector<8x32xf32>
    %748 = tpu.iota {dimensions = array<i32: 1>} : vector<1x8x8xi32>
    %749 = tpu.iota {dimensions = array<i32: 2>} : vector<1x8x8xi32>
    %750 = arith.subi %749, %748 : vector<1x8x8xi32>
    %c1_i32_407 = arith.constant 1 : i32
    %751 = vector.broadcast %c1_i32_407 : i32 to vector<1x8x8xi32>
    %752 = arith.cmpi sge, %750, %751 : vector<1x8x8xi32>
    %cst_408 = arith.constant -1.000000e+30 : f32
    %cst_409 = arith.constant 0.000000e+00 : f32
    %753 = vector.broadcast %cst_408 : f32 to vector<1x8x8xf32>
    %754 = vector.broadcast %cst_409 : f32 to vector<1x8x8xf32>
    %755 = arith.select %752, %753, %754 : vector<1x8x8xi1>, vector<1x8x8xf32>
    %c0_410 = arith.constant 0 : index
    %c0_411 = arith.constant 0 : index
    %c0_412 = arith.constant 0 : index
    %756 = vector.load %arg37[%c0_410, %c0_411, %c0_412] : memref<2x1x32xf32, #tpu.memory_space<vmem>>, vector<1x1x32xf32>
    %757 = vector.shape_cast %756 : vector<1x1x32xf32> to vector<1x32xf32>
    %c0_413 = arith.constant 0 : index
    %c0_414 = arith.constant 0 : index
    %c0_415 = arith.constant 0 : index
    %758 = vector.load %arg38[%c0_413, %c0_414, %c0_415] : memref<2x1x32xf32, #tpu.memory_space<vmem>>, vector<1x1x32xf32>
    %759 = vector.shape_cast %758 : vector<1x1x32xf32> to vector<1x32xf32>
    %cst_416 = arith.constant dense<0.000000e+00> : vector<8xf32>
    %760 = vector.multi_reduction <add>, %744, %cst_416 [1] : vector<8x32xf32> to vector<8xf32>
    %761 = vector.shape_cast %760 : vector<8xf32> to vector<8x1xf32>
    %cst_417 = arith.constant 3.200000e+01 : f32
    %762 = vector.broadcast %cst_417 : f32 to vector<8x1xf32>
    %763 = arith.divf %761, %762 : vector<8x1xf32>
    %764 = vector.broadcast %763 : vector<8x1xf32> to vector<8x32xf32>
    %765 = arith.subf %744, %764 : vector<8x32xf32>
    %766 = arith.mulf %765, %765 : vector<8x32xf32>
    %cst_418 = arith.constant dense<0.000000e+00> : vector<8xf32>
    %767 = vector.multi_reduction <add>, %766, %cst_418 [1] : vector<8x32xf32> to vector<8xf32>
    %768 = vector.shape_cast %767 : vector<8xf32> to vector<8x1xf32>
    %cst_419 = arith.constant 3.200000e+01 : f32
    %769 = vector.broadcast %cst_419 : f32 to vector<8x1xf32>
    %770 = arith.divf %768, %769 : vector<8x1xf32>
    %cst_420 = arith.constant 9.99999974E-6 : f32
    %771 = vector.broadcast %cst_420 : f32 to vector<8x1xf32>
    %772 = arith.addf %770, %771 : vector<8x1xf32>
    %773 = math.rsqrt %772 : vector<8x1xf32>
    %774 = vector.broadcast %773 : vector<8x1xf32> to vector<8x32xf32>
    %775 = arith.mulf %765, %774 : vector<8x32xf32>
    %776 = vector.broadcast %757 : vector<1x32xf32> to vector<8x32xf32>
    %777 = arith.mulf %775, %776 : vector<8x32xf32>
    %778 = vector.broadcast %759 : vector<1x32xf32> to vector<8x32xf32>
    %779 = arith.addf %777, %778 : vector<8x32xf32>
    %780 = arith.truncf %779 : vector<8x32xf32> to vector<8x32xbf16>
    %c0_421 = arith.constant 0 : index
    %c0_422 = arith.constant 0 : index
    %c0_423 = arith.constant 0 : index
    %781 = vector.load %arg37[%c0_421, %c0_422, %c0_423] : memref<2x1x32xf32, #tpu.memory_space<vmem>>, vector<1x1x32xf32>
    %782 = vector.shape_cast %781 : vector<1x1x32xf32> to vector<1x32xf32>
    %c0_424 = arith.constant 0 : index
    %c0_425 = arith.constant 0 : index
    %c0_426 = arith.constant 0 : index
    %783 = vector.load %arg38[%c0_424, %c0_425, %c0_426] : memref<2x1x32xf32, #tpu.memory_space<vmem>>, vector<1x1x32xf32>
    %784 = vector.shape_cast %783 : vector<1x1x32xf32> to vector<1x32xf32>
    %cst_427 = arith.constant dense<0.000000e+00> : vector<8xf32>
    %785 = vector.multi_reduction <add>, %747, %cst_427 [1] : vector<8x32xf32> to vector<8xf32>
    %786 = vector.shape_cast %785 : vector<8xf32> to vector<8x1xf32>
    %cst_428 = arith.constant 3.200000e+01 : f32
    %787 = vector.broadcast %cst_428 : f32 to vector<8x1xf32>
    %788 = arith.divf %786, %787 : vector<8x1xf32>
    %789 = vector.broadcast %788 : vector<8x1xf32> to vector<8x32xf32>
    %790 = arith.subf %747, %789 : vector<8x32xf32>
    %791 = arith.mulf %790, %790 : vector<8x32xf32>
    %cst_429 = arith.constant dense<0.000000e+00> : vector<8xf32>
    %792 = vector.multi_reduction <add>, %791, %cst_429 [1] : vector<8x32xf32> to vector<8xf32>
    %793 = vector.shape_cast %792 : vector<8xf32> to vector<8x1xf32>
    %cst_430 = arith.constant 3.200000e+01 : f32
    %794 = vector.broadcast %cst_430 : f32 to vector<8x1xf32>
    %795 = arith.divf %793, %794 : vector<8x1xf32>
    %cst_431 = arith.constant 9.99999974E-6 : f32
    %796 = vector.broadcast %cst_431 : f32 to vector<8x1xf32>
    %797 = arith.addf %795, %796 : vector<8x1xf32>
    %798 = math.rsqrt %797 : vector<8x1xf32>
    %799 = vector.broadcast %798 : vector<8x1xf32> to vector<8x32xf32>
    %800 = arith.mulf %790, %799 : vector<8x32xf32>
    %801 = vector.broadcast %782 : vector<1x32xf32> to vector<8x32xf32>
    %802 = arith.mulf %800, %801 : vector<8x32xf32>
    %803 = vector.broadcast %784 : vector<1x32xf32> to vector<8x32xf32>
    %804 = arith.addf %802, %803 : vector<8x32xf32>
    %805 = arith.truncf %804 : vector<8x32xf32> to vector<8x32xbf16>
    %806 = vector.shape_cast %780 : vector<8x32xbf16> to vector<1x8x32xbf16>
    %807 = vector.broadcast %806 : vector<1x8x32xbf16> to vector<4x8x32xbf16>
    %808 = vector.shape_cast %805 : vector<8x32xbf16> to vector<1x8x32xbf16>
    %809 = vector.broadcast %808 : vector<1x8x32xbf16> to vector<4x8x32xbf16>
    %c0_432 = arith.constant 0 : index
    %c0_433 = arith.constant 0 : index
    %c0_434 = arith.constant 0 : index
    %c0_435 = arith.constant 0 : index
    %810 = vector.load %arg25[%c0_432, %c0_433, %c0_434, %c0_435] : memref<2x4x8x32xbf16, #tpu.memory_space<vmem>>, vector<1x4x8x32xbf16>
    %811 = vector.shape_cast %810 : vector<1x4x8x32xbf16> to vector<4x8x32xbf16>
    "tpu.trace_start"() <{level = 10 : i32, message = "hsd,hfd->hsf"}> : () -> ()
    %cst_436 = arith.constant dense<0.000000e+00> : vector<4x8x8xf32>
    %812 = tpu.matmul %807, %811, %cst_436 {dimension_numbers = #tpu.dot_dimension_numbers<[2], [2], [1], [1], [0, 0, 0, 1, 1, 1], [0], [0]>} : vector<4x8x32xbf16>, vector<4x8x32xbf16>, vector<4x8x8xf32> -> vector<4x8x8xf32>
    "tpu.trace_stop"() : () -> ()
    %c0_437 = arith.constant 0 : index
    %c0_438 = arith.constant 0 : index
    %c0_439 = arith.constant 0 : index
    %c0_440 = arith.constant 0 : index
    %813 = vector.load %arg26[%c0_437, %c0_438, %c0_439, %c0_440] : memref<2x4x1x8xf32, #tpu.memory_space<vmem>>, vector<1x4x1x8xf32>
    %814 = vector.shape_cast %813 : vector<1x4x1x8xf32> to vector<4x1x8xf32>
    %815 = vector.broadcast %814 : vector<4x1x8xf32> to vector<4x8x8xf32>
    %816 = arith.addf %812, %815 : vector<4x8x8xf32>
    %c0_441 = arith.constant 0 : index
    %c0_442 = arith.constant 0 : index
    %c0_443 = arith.constant 0 : index
    %c0_444 = arith.constant 0 : index
    %817 = vector.load %arg27[%c0_441, %c0_442, %c0_443, %c0_444] : memref<2x4x8x32xbf16, #tpu.memory_space<vmem>>, vector<1x4x8x32xbf16>
    %818 = vector.shape_cast %817 : vector<1x4x8x32xbf16> to vector<4x8x32xbf16>
    "tpu.trace_start"() <{level = 10 : i32, message = "hsd,hfd->hsf"}> : () -> ()
    %cst_445 = arith.constant dense<0.000000e+00> : vector<4x8x8xf32>
    %819 = tpu.matmul %809, %818, %cst_445 {dimension_numbers = #tpu.dot_dimension_numbers<[2], [2], [1], [1], [0, 0, 0, 1, 1, 1], [0], [0]>} : vector<4x8x32xbf16>, vector<4x8x32xbf16>, vector<4x8x8xf32> -> vector<4x8x8xf32>
    "tpu.trace_stop"() : () -> ()
    %c0_446 = arith.constant 0 : index
    %c0_447 = arith.constant 0 : index
    %c0_448 = arith.constant 0 : index
    %c0_449 = arith.constant 0 : index
    %820 = vector.load %arg28[%c0_446, %c0_447, %c0_448, %c0_449] : memref<2x4x1x8xf32, #tpu.memory_space<vmem>>, vector<1x4x1x8xf32>
    %821 = vector.shape_cast %820 : vector<1x4x1x8xf32> to vector<4x1x8xf32>
    %822 = vector.broadcast %821 : vector<4x1x8xf32> to vector<4x8x8xf32>
    %823 = arith.addf %819, %822 : vector<4x8x8xf32>
    %c0_450 = arith.constant 0 : index
    %c0_451 = arith.constant 0 : index
    %c0_452 = arith.constant 0 : index
    %c0_453 = arith.constant 0 : index
    %824 = vector.load %arg29[%c0_450, %c0_451, %c0_452, %c0_453] : memref<2x4x8x32xbf16, #tpu.memory_space<vmem>>, vector<1x4x8x32xbf16>
    %825 = vector.shape_cast %824 : vector<1x4x8x32xbf16> to vector<4x8x32xbf16>
    "tpu.trace_start"() <{level = 10 : i32, message = "hsd,hfd->hsf"}> : () -> ()
    %cst_454 = arith.constant dense<0.000000e+00> : vector<4x8x8xf32>
    %826 = tpu.matmul %809, %825, %cst_454 {dimension_numbers = #tpu.dot_dimension_numbers<[2], [2], [1], [1], [0, 0, 0, 1, 1, 1], [0], [0]>} : vector<4x8x32xbf16>, vector<4x8x32xbf16>, vector<4x8x8xf32> -> vector<4x8x8xf32>
    "tpu.trace_stop"() : () -> ()
    %c0_455 = arith.constant 0 : index
    %c0_456 = arith.constant 0 : index
    %c0_457 = arith.constant 0 : index
    %c0_458 = arith.constant 0 : index
    %827 = vector.load %arg30[%c0_455, %c0_456, %c0_457, %c0_458] : memref<2x4x1x8xf32, #tpu.memory_space<vmem>>, vector<1x4x1x8xf32>
    %828 = vector.shape_cast %827 : vector<1x4x1x8xf32> to vector<4x1x8xf32>
    %829 = vector.broadcast %828 : vector<4x1x8xf32> to vector<4x8x8xf32>
    %830 = arith.addf %826, %829 : vector<4x8x8xf32>
    %831 = arith.truncf %816 : vector<4x8x8xf32> to vector<4x8x8xbf16>
    %832 = arith.truncf %823 : vector<4x8x8xf32> to vector<4x8x8xbf16>
    "tpu.trace_start"() <{level = 10 : i32, message = "hqd,hkd->hqk"}> : () -> ()
    %cst_459 = arith.constant dense<0.000000e+00> : vector<4x8x8xf32>
    %833 = tpu.matmul %831, %832, %cst_459 {dimension_numbers = #tpu.dot_dimension_numbers<[2], [2], [1], [1], [0, 0, 0, 1, 1, 1], [0], [0]>} : vector<4x8x8xbf16>, vector<4x8x8xbf16>, vector<4x8x8xf32> -> vector<4x8x8xf32>
    "tpu.trace_stop"() : () -> ()
    %834 = vector.broadcast %755 : vector<1x8x8xf32> to vector<4x8x8xf32>
    %835 = arith.addf %833, %834 : vector<4x8x8xf32>
    %cst_460 = arith.constant dense<0xFF800000> : vector<4x8xf32>
    %836 = vector.multi_reduction <maximumf>, %835, %cst_460 [2] : vector<4x8x8xf32> to vector<4x8xf32>
    %837 = vector.shape_cast %836 : vector<4x8xf32> to vector<4x8x1xf32>
    %838 = vector.broadcast %837 : vector<4x8x1xf32> to vector<4x8x8xf32>
    %839 = arith.subf %835, %838 : vector<4x8x8xf32>
    %840 = math.exp %839 : vector<4x8x8xf32>
    %cst_461 = arith.constant dense<0.000000e+00> : vector<4x8xf32>
    %841 = vector.multi_reduction <add>, %840, %cst_461 [2] : vector<4x8x8xf32> to vector<4x8xf32>
    %842 = vector.shape_cast %841 : vector<4x8xf32> to vector<4x8x1xf32>
    %843 = tpu.reciprocal %842 {approx = true} : vector<4x8x1xf32> -> vector<4x8x1xf32>
    %844 = vector.broadcast %843 : vector<4x8x1xf32> to vector<4x8x8xf32>
    %845 = arith.mulf %840, %844 : vector<4x8x8xf32>
    %846 = arith.truncf %845 : vector<4x8x8xf32> to vector<4x8x8xbf16>
    %847 = arith.truncf %830 : vector<4x8x8xf32> to vector<4x8x8xbf16>
    "tpu.trace_start"() <{level = 10 : i32, message = "hqk,hkd->hqd"}> : () -> ()
    %cst_462 = arith.constant dense<0.000000e+00> : vector<4x8x8xf32>
    %848 = tpu.matmul %846, %847, %cst_462 {dimension_numbers = #tpu.dot_dimension_numbers<[2], [1], [1], [2], [0, 0, 0, 1, 1, 2], [0], [0]>} : vector<4x8x8xbf16>, vector<4x8x8xbf16>, vector<4x8x8xf32> -> vector<4x8x8xf32>
    "tpu.trace_stop"() : () -> ()
    %849 = arith.truncf %848 : vector<4x8x8xf32> to vector<4x8x8xbf16>
    %c0_463 = arith.constant 0 : index
    %c0_464 = arith.constant 0 : index
    %c0_465 = arith.constant 0 : index
    %c0_466 = arith.constant 0 : index
    %850 = vector.load %arg31[%c0_463, %c0_464, %c0_465, %c0_466] : memref<2x4x8x32xbf16, #tpu.memory_space<vmem>>, vector<1x4x8x32xbf16>
    %851 = vector.shape_cast %850 : vector<1x4x8x32xbf16> to vector<4x8x32xbf16>
    "tpu.trace_start"() <{level = 10 : i32, message = "hqd,hdf->hqf"}> : () -> ()
    %cst_467 = arith.constant dense<0.000000e+00> : vector<4x8x32xf32>
    %852 = tpu.matmul %849, %851, %cst_467 {dimension_numbers = #tpu.dot_dimension_numbers<[2], [1], [1], [2], [0, 0, 0, 1, 1, 2], [0], [0]>} : vector<4x8x8xbf16>, vector<4x8x32xbf16>, vector<4x8x32xf32> -> vector<4x8x32xf32>
    "tpu.trace_stop"() : () -> ()
    %853 = vector.extract_strided_slice %852 {offsets = [0, 0, 0], sizes = [1, 8, 32], strides = [1, 1, 1]} : vector<4x8x32xf32> to vector<1x8x32xf32>
    %854 = vector.shape_cast %853 : vector<1x8x32xf32> to vector<8x32xf32>
    %855 = vector.extract_strided_slice %852 {offsets = [1, 0, 0], sizes = [1, 8, 32], strides = [1, 1, 1]} : vector<4x8x32xf32> to vector<1x8x32xf32>
    %856 = vector.shape_cast %855 : vector<1x8x32xf32> to vector<8x32xf32>
    %857 = arith.addf %854, %856 : vector<8x32xf32>
    %858 = vector.extract_strided_slice %852 {offsets = [2, 0, 0], sizes = [1, 8, 32], strides = [1, 1, 1]} : vector<4x8x32xf32> to vector<1x8x32xf32>
    %859 = vector.shape_cast %858 : vector<1x8x32xf32> to vector<8x32xf32>
    %860 = arith.addf %857, %859 : vector<8x32xf32>
    %861 = vector.extract_strided_slice %852 {offsets = [3, 0, 0], sizes = [1, 8, 32], strides = [1, 1, 1]} : vector<4x8x32xf32> to vector<1x8x32xf32>
    %862 = vector.shape_cast %861 : vector<1x8x32xf32> to vector<8x32xf32>
    %863 = arith.addf %860, %862 : vector<8x32xf32>
    %864 = arith.addf %744, %863 : vector<8x32xf32>
    %c0_468 = arith.constant 0 : index
    %c0_469 = arith.constant 0 : index
    %c0_470 = arith.constant 0 : index
    %865 = vector.load %arg32[%c0_468, %c0_469, %c0_470] : memref<2x1x32xf32, #tpu.memory_space<vmem>>, vector<1x1x32xf32>
    %866 = vector.shape_cast %865 : vector<1x1x32xf32> to vector<1x32xf32>
    %867 = vector.broadcast %866 : vector<1x32xf32> to vector<8x32xf32>
    %868 = arith.addf %864, %867 : vector<8x32xf32>
    %c0_471 = arith.constant 0 : index
    %c0_472 = arith.constant 0 : index
    %c0_473 = arith.constant 0 : index
    %869 = vector.load %arg39[%c0_471, %c0_472, %c0_473] : memref<2x1x32xf32, #tpu.memory_space<vmem>>, vector<1x1x32xf32>
    %870 = vector.shape_cast %869 : vector<1x1x32xf32> to vector<1x32xf32>
    %c0_474 = arith.constant 0 : index
    %c0_475 = arith.constant 0 : index
    %c0_476 = arith.constant 0 : index
    %871 = vector.load %arg40[%c0_474, %c0_475, %c0_476] : memref<2x1x32xf32, #tpu.memory_space<vmem>>, vector<1x1x32xf32>
    %872 = vector.shape_cast %871 : vector<1x1x32xf32> to vector<1x32xf32>
    %cst_477 = arith.constant dense<0.000000e+00> : vector<8xf32>
    %873 = vector.multi_reduction <add>, %868, %cst_477 [1] : vector<8x32xf32> to vector<8xf32>
    %874 = vector.shape_cast %873 : vector<8xf32> to vector<8x1xf32>
    %cst_478 = arith.constant 3.200000e+01 : f32
    %875 = vector.broadcast %cst_478 : f32 to vector<8x1xf32>
    %876 = arith.divf %874, %875 : vector<8x1xf32>
    %877 = vector.broadcast %876 : vector<8x1xf32> to vector<8x32xf32>
    %878 = arith.subf %868, %877 : vector<8x32xf32>
    %879 = arith.mulf %878, %878 : vector<8x32xf32>
    %cst_479 = arith.constant dense<0.000000e+00> : vector<8xf32>
    %880 = vector.multi_reduction <add>, %879, %cst_479 [1] : vector<8x32xf32> to vector<8xf32>
    %881 = vector.shape_cast %880 : vector<8xf32> to vector<8x1xf32>
    %cst_480 = arith.constant 3.200000e+01 : f32
    %882 = vector.broadcast %cst_480 : f32 to vector<8x1xf32>
    %883 = arith.divf %881, %882 : vector<8x1xf32>
    %cst_481 = arith.constant 9.99999974E-6 : f32
    %884 = vector.broadcast %cst_481 : f32 to vector<8x1xf32>
    %885 = arith.addf %883, %884 : vector<8x1xf32>
    %886 = math.rsqrt %885 : vector<8x1xf32>
    %887 = vector.broadcast %886 : vector<8x1xf32> to vector<8x32xf32>
    %888 = arith.mulf %878, %887 : vector<8x32xf32>
    %889 = vector.broadcast %870 : vector<1x32xf32> to vector<8x32xf32>
    %890 = arith.mulf %888, %889 : vector<8x32xf32>
    %891 = vector.broadcast %872 : vector<1x32xf32> to vector<8x32xf32>
    %892 = arith.addf %890, %891 : vector<8x32xf32>
    %893 = arith.truncf %892 : vector<8x32xf32> to vector<8x32xbf16>
    %c0_482 = arith.constant 0 : index
    %c0_483 = arith.constant 0 : index
    %c0_484 = arith.constant 0 : index
    %894 = vector.load %arg33[%c0_482, %c0_483, %c0_484] : memref<2x32x128xbf16, #tpu.memory_space<vmem>>, vector<1x32x128xbf16>
    %895 = vector.shape_cast %894 : vector<1x32x128xbf16> to vector<32x128xbf16>
    %cst_485 = arith.constant dense<0.000000e+00> : vector<8x128xf32>
    %896 = tpu.matmul %893, %895, %cst_485 {dimension_numbers = #tpu.dot_dimension_numbers<[1], [0], [0], [1], [0, 0, 1, 1], [], []>} : vector<8x32xbf16>, vector<32x128xbf16>, vector<8x128xf32> -> vector<8x128xf32>
    %c0_486 = arith.constant 0 : index
    %c0_487 = arith.constant 0 : index
    %c0_488 = arith.constant 0 : index
    %897 = vector.load %arg34[%c0_486, %c0_487, %c0_488] : memref<2x1x128xf32, #tpu.memory_space<vmem>>, vector<1x1x128xf32>
    %898 = vector.shape_cast %897 : vector<1x1x128xf32> to vector<1x128xf32>
    %899 = vector.broadcast %898 : vector<1x128xf32> to vector<8x128xf32>
    %900 = arith.addf %896, %899 : vector<8x128xf32>
    %cst_489 = arith.constant 0.000000e+00 : f32
    %901 = vector.broadcast %cst_489 : f32 to vector<8x128xf32>
    %902 = arith.maximumf %900, %901 : vector<8x128xf32>
    %903 = arith.truncf %902 : vector<8x128xf32> to vector<8x128xbf16>
    %c0_490 = arith.constant 0 : index
    %c0_491 = arith.constant 0 : index
    %c0_492 = arith.constant 0 : index
    %904 = vector.load %arg35[%c0_490, %c0_491, %c0_492] : memref<2x128x32xbf16, #tpu.memory_space<vmem>>, vector<1x128x32xbf16>
    %905 = vector.shape_cast %904 : vector<1x128x32xbf16> to vector<128x32xbf16>
    %cst_493 = arith.constant dense<0.000000e+00> : vector<8x32xf32>
    %906 = tpu.matmul %903, %905, %cst_493 {dimension_numbers = #tpu.dot_dimension_numbers<[1], [0], [0], [1], [0, 0, 1, 1], [], []>} : vector<8x128xbf16>, vector<128x32xbf16>, vector<8x32xf32> -> vector<8x32xf32>
    %907 = arith.addf %868, %906 : vector<8x32xf32>
    %c0_494 = arith.constant 0 : index
    %c0_495 = arith.constant 0 : index
    %c0_496 = arith.constant 0 : index
    %908 = vector.load %arg36[%c0_494, %c0_495, %c0_496] : memref<2x1x32xf32, #tpu.memory_space<vmem>>, vector<1x1x32xf32>
    %909 = vector.shape_cast %908 : vector<1x1x32xf32> to vector<1x32xf32>
    %910 = vector.broadcast %909 : vector<1x32xf32> to vector<8x32xf32>
    %911 = arith.addf %907, %910 : vector<8x32xf32>
    %c1_497 = arith.constant 1 : index
    %c0_498 = arith.constant 0 : index
    %c0_499 = arith.constant 0 : index
    %912 = vector.load %arg37[%c1_497, %c0_498, %c0_499] : memref<2x1x32xf32, #tpu.memory_space<vmem>>, vector<1x1x32xf32>
    %913 = vector.shape_cast %912 : vector<1x1x32xf32> to vector<1x32xf32>
    %c1_500 = arith.constant 1 : index
    %c0_501 = arith.constant 0 : index
    %c0_502 = arith.constant 0 : index
    %914 = vector.load %arg38[%c1_500, %c0_501, %c0_502] : memref<2x1x32xf32, #tpu.memory_space<vmem>>, vector<1x1x32xf32>
    %915 = vector.shape_cast %914 : vector<1x1x32xf32> to vector<1x32xf32>
    %cst_503 = arith.constant dense<0.000000e+00> : vector<8xf32>
    %916 = vector.multi_reduction <add>, %911, %cst_503 [1] : vector<8x32xf32> to vector<8xf32>
    %917 = vector.shape_cast %916 : vector<8xf32> to vector<8x1xf32>
    %cst_504 = arith.constant 3.200000e+01 : f32
    %918 = vector.broadcast %cst_504 : f32 to vector<8x1xf32>
    %919 = arith.divf %917, %918 : vector<8x1xf32>
    %920 = vector.broadcast %919 : vector<8x1xf32> to vector<8x32xf32>
    %921 = arith.subf %911, %920 : vector<8x32xf32>
    %922 = arith.mulf %921, %921 : vector<8x32xf32>
    %cst_505 = arith.constant dense<0.000000e+00> : vector<8xf32>
    %923 = vector.multi_reduction <add>, %922, %cst_505 [1] : vector<8x32xf32> to vector<8xf32>
    %924 = vector.shape_cast %923 : vector<8xf32> to vector<8x1xf32>
    %cst_506 = arith.constant 3.200000e+01 : f32
    %925 = vector.broadcast %cst_506 : f32 to vector<8x1xf32>
    %926 = arith.divf %924, %925 : vector<8x1xf32>
    %cst_507 = arith.constant 9.99999974E-6 : f32
    %927 = vector.broadcast %cst_507 : f32 to vector<8x1xf32>
    %928 = arith.addf %926, %927 : vector<8x1xf32>
    %929 = math.rsqrt %928 : vector<8x1xf32>
    %930 = vector.broadcast %929 : vector<8x1xf32> to vector<8x32xf32>
    %931 = arith.mulf %921, %930 : vector<8x32xf32>
    %932 = vector.broadcast %913 : vector<1x32xf32> to vector<8x32xf32>
    %933 = arith.mulf %931, %932 : vector<8x32xf32>
    %934 = vector.broadcast %915 : vector<1x32xf32> to vector<8x32xf32>
    %935 = arith.addf %933, %934 : vector<8x32xf32>
    %936 = arith.truncf %935 : vector<8x32xf32> to vector<8x32xbf16>
    %c1_508 = arith.constant 1 : index
    %c0_509 = arith.constant 0 : index
    %c0_510 = arith.constant 0 : index
    %937 = vector.load %arg37[%c1_508, %c0_509, %c0_510] : memref<2x1x32xf32, #tpu.memory_space<vmem>>, vector<1x1x32xf32>
    %938 = vector.shape_cast %937 : vector<1x1x32xf32> to vector<1x32xf32>
    %c1_511 = arith.constant 1 : index
    %c0_512 = arith.constant 0 : index
    %c0_513 = arith.constant 0 : index
    %939 = vector.load %arg38[%c1_511, %c0_512, %c0_513] : memref<2x1x32xf32, #tpu.memory_space<vmem>>, vector<1x1x32xf32>
    %940 = vector.shape_cast %939 : vector<1x1x32xf32> to vector<1x32xf32>
    %cst_514 = arith.constant dense<0.000000e+00> : vector<8xf32>
    %941 = vector.multi_reduction <add>, %747, %cst_514 [1] : vector<8x32xf32> to vector<8xf32>
    %942 = vector.shape_cast %941 : vector<8xf32> to vector<8x1xf32>
    %cst_515 = arith.constant 3.200000e+01 : f32
    %943 = vector.broadcast %cst_515 : f32 to vector<8x1xf32>
    %944 = arith.divf %942, %943 : vector<8x1xf32>
    %945 = vector.broadcast %944 : vector<8x1xf32> to vector<8x32xf32>
    %946 = arith.subf %747, %945 : vector<8x32xf32>
    %947 = arith.mulf %946, %946 : vector<8x32xf32>
    %cst_516 = arith.constant dense<0.000000e+00> : vector<8xf32>
    %948 = vector.multi_reduction <add>, %947, %cst_516 [1] : vector<8x32xf32> to vector<8xf32>
    %949 = vector.shape_cast %948 : vector<8xf32> to vector<8x1xf32>
    %cst_517 = arith.constant 3.200000e+01 : f32
    %950 = vector.broadcast %cst_517 : f32 to vector<8x1xf32>
    %951 = arith.divf %949, %950 : vector<8x1xf32>
    %cst_518 = arith.constant 9.99999974E-6 : f32
    %952 = vector.broadcast %cst_518 : f32 to vector<8x1xf32>
    %953 = arith.addf %951, %952 : vector<8x1xf32>
    %954 = math.rsqrt %953 : vector<8x1xf32>
    %955 = vector.broadcast %954 : vector<8x1xf32> to vector<8x32xf32>
    %956 = arith.mulf %946, %955 : vector<8x32xf32>
    %957 = vector.broadcast %938 : vector<1x32xf32> to vector<8x32xf32>
    %958 = arith.mulf %956, %957 : vector<8x32xf32>
    %959 = vector.broadcast %940 : vector<1x32xf32> to vector<8x32xf32>
    %960 = arith.addf %958, %959 : vector<8x32xf32>
    %961 = arith.truncf %960 : vector<8x32xf32> to vector<8x32xbf16>
    %962 = vector.shape_cast %936 : vector<8x32xbf16> to vector<1x8x32xbf16>
    %963 = vector.broadcast %962 : vector<1x8x32xbf16> to vector<4x8x32xbf16>
    %964 = vector.shape_cast %961 : vector<8x32xbf16> to vector<1x8x32xbf16>
    %965 = vector.broadcast %964 : vector<1x8x32xbf16> to vector<4x8x32xbf16>
    %c1_519 = arith.constant 1 : index
    %c0_520 = arith.constant 0 : index
    %c0_521 = arith.constant 0 : index
    %c0_522 = arith.constant 0 : index
    %966 = vector.load %arg25[%c1_519, %c0_520, %c0_521, %c0_522] : memref<2x4x8x32xbf16, #tpu.memory_space<vmem>>, vector<1x4x8x32xbf16>
    %967 = vector.shape_cast %966 : vector<1x4x8x32xbf16> to vector<4x8x32xbf16>
    "tpu.trace_start"() <{level = 10 : i32, message = "hsd,hfd->hsf"}> : () -> ()
    %cst_523 = arith.constant dense<0.000000e+00> : vector<4x8x8xf32>
    %968 = tpu.matmul %963, %967, %cst_523 {dimension_numbers = #tpu.dot_dimension_numbers<[2], [2], [1], [1], [0, 0, 0, 1, 1, 1], [0], [0]>} : vector<4x8x32xbf16>, vector<4x8x32xbf16>, vector<4x8x8xf32> -> vector<4x8x8xf32>
    "tpu.trace_stop"() : () -> ()
    %c1_524 = arith.constant 1 : index
    %c0_525 = arith.constant 0 : index
    %c0_526 = arith.constant 0 : index
    %c0_527 = arith.constant 0 : index
    %969 = vector.load %arg26[%c1_524, %c0_525, %c0_526, %c0_527] : memref<2x4x1x8xf32, #tpu.memory_space<vmem>>, vector<1x4x1x8xf32>
    %970 = vector.shape_cast %969 : vector<1x4x1x8xf32> to vector<4x1x8xf32>
    %971 = vector.broadcast %970 : vector<4x1x8xf32> to vector<4x8x8xf32>
    %972 = arith.addf %968, %971 : vector<4x8x8xf32>
    %c1_528 = arith.constant 1 : index
    %c0_529 = arith.constant 0 : index
    %c0_530 = arith.constant 0 : index
    %c0_531 = arith.constant 0 : index
    %973 = vector.load %arg27[%c1_528, %c0_529, %c0_530, %c0_531] : memref<2x4x8x32xbf16, #tpu.memory_space<vmem>>, vector<1x4x8x32xbf16>
    %974 = vector.shape_cast %973 : vector<1x4x8x32xbf16> to vector<4x8x32xbf16>
    "tpu.trace_start"() <{level = 10 : i32, message = "hsd,hfd->hsf"}> : () -> ()
    %cst_532 = arith.constant dense<0.000000e+00> : vector<4x8x8xf32>
    %975 = tpu.matmul %965, %974, %cst_532 {dimension_numbers = #tpu.dot_dimension_numbers<[2], [2], [1], [1], [0, 0, 0, 1, 1, 1], [0], [0]>} : vector<4x8x32xbf16>, vector<4x8x32xbf16>, vector<4x8x8xf32> -> vector<4x8x8xf32>
    "tpu.trace_stop"() : () -> ()
    %c1_533 = arith.constant 1 : index
    %c0_534 = arith.constant 0 : index
    %c0_535 = arith.constant 0 : index
    %c0_536 = arith.constant 0 : index
    %976 = vector.load %arg28[%c1_533, %c0_534, %c0_535, %c0_536] : memref<2x4x1x8xf32, #tpu.memory_space<vmem>>, vector<1x4x1x8xf32>
    %977 = vector.shape_cast %976 : vector<1x4x1x8xf32> to vector<4x1x8xf32>
    %978 = vector.broadcast %977 : vector<4x1x8xf32> to vector<4x8x8xf32>
    %979 = arith.addf %975, %978 : vector<4x8x8xf32>
    %c1_537 = arith.constant 1 : index
    %c0_538 = arith.constant 0 : index
    %c0_539 = arith.constant 0 : index
    %c0_540 = arith.constant 0 : index
    %980 = vector.load %arg29[%c1_537, %c0_538, %c0_539, %c0_540] : memref<2x4x8x32xbf16, #tpu.memory_space<vmem>>, vector<1x4x8x32xbf16>
    %981 = vector.shape_cast %980 : vector<1x4x8x32xbf16> to vector<4x8x32xbf16>
    "tpu.trace_start"() <{level = 10 : i32, message = "hsd,hfd->hsf"}> : () -> ()
    %cst_541 = arith.constant dense<0.000000e+00> : vector<4x8x8xf32>
    %982 = tpu.matmul %965, %981, %cst_541 {dimension_numbers = #tpu.dot_dimension_numbers<[2], [2], [1], [1], [0, 0, 0, 1, 1, 1], [0], [0]>} : vector<4x8x32xbf16>, vector<4x8x32xbf16>, vector<4x8x8xf32> -> vector<4x8x8xf32>
    "tpu.trace_stop"() : () -> ()
    %c1_542 = arith.constant 1 : index
    %c0_543 = arith.constant 0 : index
    %c0_544 = arith.constant 0 : index
    %c0_545 = arith.constant 0 : index
    %983 = vector.load %arg30[%c1_542, %c0_543, %c0_544, %c0_545] : memref<2x4x1x8xf32, #tpu.memory_space<vmem>>, vector<1x4x1x8xf32>
    %984 = vector.shape_cast %983 : vector<1x4x1x8xf32> to vector<4x1x8xf32>
    %985 = vector.broadcast %984 : vector<4x1x8xf32> to vector<4x8x8xf32>
    %986 = arith.addf %982, %985 : vector<4x8x8xf32>
    %987 = arith.truncf %972 : vector<4x8x8xf32> to vector<4x8x8xbf16>
    %988 = arith.truncf %979 : vector<4x8x8xf32> to vector<4x8x8xbf16>
    "tpu.trace_start"() <{level = 10 : i32, message = "hqd,hkd->hqk"}> : () -> ()
    %cst_546 = arith.constant dense<0.000000e+00> : vector<4x8x8xf32>
    %989 = tpu.matmul %987, %988, %cst_546 {dimension_numbers = #tpu.dot_dimension_numbers<[2], [2], [1], [1], [0, 0, 0, 1, 1, 1], [0], [0]>} : vector<4x8x8xbf16>, vector<4x8x8xbf16>, vector<4x8x8xf32> -> vector<4x8x8xf32>
    "tpu.trace_stop"() : () -> ()
    %990 = vector.broadcast %755 : vector<1x8x8xf32> to vector<4x8x8xf32>
    %991 = arith.addf %989, %990 : vector<4x8x8xf32>
    %cst_547 = arith.constant dense<0xFF800000> : vector<4x8xf32>
    %992 = vector.multi_reduction <maximumf>, %991, %cst_547 [2] : vector<4x8x8xf32> to vector<4x8xf32>
    %993 = vector.shape_cast %992 : vector<4x8xf32> to vector<4x8x1xf32>
    %994 = vector.broadcast %993 : vector<4x8x1xf32> to vector<4x8x8xf32>
    %995 = arith.subf %991, %994 : vector<4x8x8xf32>
    %996 = math.exp %995 : vector<4x8x8xf32>
    %cst_548 = arith.constant dense<0.000000e+00> : vector<4x8xf32>
    %997 = vector.multi_reduction <add>, %996, %cst_548 [2] : vector<4x8x8xf32> to vector<4x8xf32>
    %998 = vector.shape_cast %997 : vector<4x8xf32> to vector<4x8x1xf32>
    %999 = tpu.reciprocal %998 {approx = true} : vector<4x8x1xf32> -> vector<4x8x1xf32>
    %1000 = vector.broadcast %999 : vector<4x8x1xf32> to vector<4x8x8xf32>
    %1001 = arith.mulf %996, %1000 : vector<4x8x8xf32>
    %1002 = arith.truncf %1001 : vector<4x8x8xf32> to vector<4x8x8xbf16>
    %1003 = arith.truncf %986 : vector<4x8x8xf32> to vector<4x8x8xbf16>
    "tpu.trace_start"() <{level = 10 : i32, message = "hqk,hkd->hqd"}> : () -> ()
    %cst_549 = arith.constant dense<0.000000e+00> : vector<4x8x8xf32>
    %1004 = tpu.matmul %1002, %1003, %cst_549 {dimension_numbers = #tpu.dot_dimension_numbers<[2], [1], [1], [2], [0, 0, 0, 1, 1, 2], [0], [0]>} : vector<4x8x8xbf16>, vector<4x8x8xbf16>, vector<4x8x8xf32> -> vector<4x8x8xf32>
    "tpu.trace_stop"() : () -> ()
    %1005 = arith.truncf %1004 : vector<4x8x8xf32> to vector<4x8x8xbf16>
    %c1_550 = arith.constant 1 : index
    %c0_551 = arith.constant 0 : index
    %c0_552 = arith.constant 0 : index
    %c0_553 = arith.constant 0 : index
    %1006 = vector.load %arg31[%c1_550, %c0_551, %c0_552, %c0_553] : memref<2x4x8x32xbf16, #tpu.memory_space<vmem>>, vector<1x4x8x32xbf16>
    %1007 = vector.shape_cast %1006 : vector<1x4x8x32xbf16> to vector<4x8x32xbf16>
    "tpu.trace_start"() <{level = 10 : i32, message = "hqd,hdf->hqf"}> : () -> ()
    %cst_554 = arith.constant dense<0.000000e+00> : vector<4x8x32xf32>
    %1008 = tpu.matmul %1005, %1007, %cst_554 {dimension_numbers = #tpu.dot_dimension_numbers<[2], [1], [1], [2], [0, 0, 0, 1, 1, 2], [0], [0]>} : vector<4x8x8xbf16>, vector<4x8x32xbf16>, vector<4x8x32xf32> -> vector<4x8x32xf32>
    "tpu.trace_stop"() : () -> ()
    %1009 = vector.extract_strided_slice %1008 {offsets = [0, 0, 0], sizes = [1, 8, 32], strides = [1, 1, 1]} : vector<4x8x32xf32> to vector<1x8x32xf32>
    %1010 = vector.shape_cast %1009 : vector<1x8x32xf32> to vector<8x32xf32>
    %1011 = vector.extract_strided_slice %1008 {offsets = [1, 0, 0], sizes = [1, 8, 32], strides = [1, 1, 1]} : vector<4x8x32xf32> to vector<1x8x32xf32>
    %1012 = vector.shape_cast %1011 : vector<1x8x32xf32> to vector<8x32xf32>
    %1013 = arith.addf %1010, %1012 : vector<8x32xf32>
    %1014 = vector.extract_strided_slice %1008 {offsets = [2, 0, 0], sizes = [1, 8, 32], strides = [1, 1, 1]} : vector<4x8x32xf32> to vector<1x8x32xf32>
    %1015 = vector.shape_cast %1014 : vector<1x8x32xf32> to vector<8x32xf32>
    %1016 = arith.addf %1013, %1015 : vector<8x32xf32>
    %1017 = vector.extract_strided_slice %1008 {offsets = [3, 0, 0], sizes = [1, 8, 32], strides = [1, 1, 1]} : vector<4x8x32xf32> to vector<1x8x32xf32>
    %1018 = vector.shape_cast %1017 : vector<1x8x32xf32> to vector<8x32xf32>
    %1019 = arith.addf %1016, %1018 : vector<8x32xf32>
    %1020 = arith.addf %911, %1019 : vector<8x32xf32>
    %c1_555 = arith.constant 1 : index
    %c0_556 = arith.constant 0 : index
    %c0_557 = arith.constant 0 : index
    %1021 = vector.load %arg32[%c1_555, %c0_556, %c0_557] : memref<2x1x32xf32, #tpu.memory_space<vmem>>, vector<1x1x32xf32>
    %1022 = vector.shape_cast %1021 : vector<1x1x32xf32> to vector<1x32xf32>
    %1023 = vector.broadcast %1022 : vector<1x32xf32> to vector<8x32xf32>
    %1024 = arith.addf %1020, %1023 : vector<8x32xf32>
    %c1_558 = arith.constant 1 : index
    %c0_559 = arith.constant 0 : index
    %c0_560 = arith.constant 0 : index
    %1025 = vector.load %arg39[%c1_558, %c0_559, %c0_560] : memref<2x1x32xf32, #tpu.memory_space<vmem>>, vector<1x1x32xf32>
    %1026 = vector.shape_cast %1025 : vector<1x1x32xf32> to vector<1x32xf32>
    %c1_561 = arith.constant 1 : index
    %c0_562 = arith.constant 0 : index
    %c0_563 = arith.constant 0 : index
    %1027 = vector.load %arg40[%c1_561, %c0_562, %c0_563] : memref<2x1x32xf32, #tpu.memory_space<vmem>>, vector<1x1x32xf32>
    %1028 = vector.shape_cast %1027 : vector<1x1x32xf32> to vector<1x32xf32>
    %cst_564 = arith.constant dense<0.000000e+00> : vector<8xf32>
    %1029 = vector.multi_reduction <add>, %1024, %cst_564 [1] : vector<8x32xf32> to vector<8xf32>
    %1030 = vector.shape_cast %1029 : vector<8xf32> to vector<8x1xf32>
    %cst_565 = arith.constant 3.200000e+01 : f32
    %1031 = vector.broadcast %cst_565 : f32 to vector<8x1xf32>
    %1032 = arith.divf %1030, %1031 : vector<8x1xf32>
    %1033 = vector.broadcast %1032 : vector<8x1xf32> to vector<8x32xf32>
    %1034 = arith.subf %1024, %1033 : vector<8x32xf32>
    %1035 = arith.mulf %1034, %1034 : vector<8x32xf32>
    %cst_566 = arith.constant dense<0.000000e+00> : vector<8xf32>
    %1036 = vector.multi_reduction <add>, %1035, %cst_566 [1] : vector<8x32xf32> to vector<8xf32>
    %1037 = vector.shape_cast %1036 : vector<8xf32> to vector<8x1xf32>
    %cst_567 = arith.constant 3.200000e+01 : f32
    %1038 = vector.broadcast %cst_567 : f32 to vector<8x1xf32>
    %1039 = arith.divf %1037, %1038 : vector<8x1xf32>
    %cst_568 = arith.constant 9.99999974E-6 : f32
    %1040 = vector.broadcast %cst_568 : f32 to vector<8x1xf32>
    %1041 = arith.addf %1039, %1040 : vector<8x1xf32>
    %1042 = math.rsqrt %1041 : vector<8x1xf32>
    %1043 = vector.broadcast %1042 : vector<8x1xf32> to vector<8x32xf32>
    %1044 = arith.mulf %1034, %1043 : vector<8x32xf32>
    %1045 = vector.broadcast %1026 : vector<1x32xf32> to vector<8x32xf32>
    %1046 = arith.mulf %1044, %1045 : vector<8x32xf32>
    %1047 = vector.broadcast %1028 : vector<1x32xf32> to vector<8x32xf32>
    %1048 = arith.addf %1046, %1047 : vector<8x32xf32>
    %1049 = arith.truncf %1048 : vector<8x32xf32> to vector<8x32xbf16>
    %c1_569 = arith.constant 1 : index
    %c0_570 = arith.constant 0 : index
    %c0_571 = arith.constant 0 : index
    %1050 = vector.load %arg33[%c1_569, %c0_570, %c0_571] : memref<2x32x128xbf16, #tpu.memory_space<vmem>>, vector<1x32x128xbf16>
    %1051 = vector.shape_cast %1050 : vector<1x32x128xbf16> to vector<32x128xbf16>
    %cst_572 = arith.constant dense<0.000000e+00> : vector<8x128xf32>
    %1052 = tpu.matmul %1049, %1051, %cst_572 {dimension_numbers = #tpu.dot_dimension_numbers<[1], [0], [0], [1], [0, 0, 1, 1], [], []>} : vector<8x32xbf16>, vector<32x128xbf16>, vector<8x128xf32> -> vector<8x128xf32>
    %c1_573 = arith.constant 1 : index
    %c0_574 = arith.constant 0 : index
    %c0_575 = arith.constant 0 : index
    %1053 = vector.load %arg34[%c1_573, %c0_574, %c0_575] : memref<2x1x128xf32, #tpu.memory_space<vmem>>, vector<1x1x128xf32>
    %1054 = vector.shape_cast %1053 : vector<1x1x128xf32> to vector<1x128xf32>
    %1055 = vector.broadcast %1054 : vector<1x128xf32> to vector<8x128xf32>
    %1056 = arith.addf %1052, %1055 : vector<8x128xf32>
    %cst_576 = arith.constant 0.000000e+00 : f32
    %1057 = vector.broadcast %cst_576 : f32 to vector<8x128xf32>
    %1058 = arith.maximumf %1056, %1057 : vector<8x128xf32>
    %1059 = arith.truncf %1058 : vector<8x128xf32> to vector<8x128xbf16>
    %c1_577 = arith.constant 1 : index
    %c0_578 = arith.constant 0 : index
    %c0_579 = arith.constant 0 : index
    %1060 = vector.load %arg35[%c1_577, %c0_578, %c0_579] : memref<2x128x32xbf16, #tpu.memory_space<vmem>>, vector<1x128x32xbf16>
    %1061 = vector.shape_cast %1060 : vector<1x128x32xbf16> to vector<128x32xbf16>
    %cst_580 = arith.constant dense<0.000000e+00> : vector<8x32xf32>
    %1062 = tpu.matmul %1059, %1061, %cst_580 {dimension_numbers = #tpu.dot_dimension_numbers<[1], [0], [0], [1], [0, 0, 1, 1], [], []>} : vector<8x128xbf16>, vector<128x32xbf16>, vector<8x32xf32> -> vector<8x32xf32>
    %1063 = arith.addf %1024, %1062 : vector<8x32xf32>
    %c1_581 = arith.constant 1 : index
    %c0_582 = arith.constant 0 : index
    %c0_583 = arith.constant 0 : index
    %1064 = vector.load %arg36[%c1_581, %c0_582, %c0_583] : memref<2x1x32xf32, #tpu.memory_space<vmem>>, vector<1x1x32xf32>
    %1065 = vector.shape_cast %1064 : vector<1x1x32xf32> to vector<1x32xf32>
    %1066 = vector.broadcast %1065 : vector<1x32xf32> to vector<8x32xf32>
    %1067 = arith.addf %1063, %1066 : vector<8x32xf32>
    %c0_584 = arith.constant 0 : index
    %c0_585 = arith.constant 0 : index
    %1068 = vector.load %arg41[%c0_584, %c0_585] : memref<1x32xf32, #tpu.memory_space<vmem>>, vector<1x32xf32>
    %c0_586 = arith.constant 0 : index
    %c0_587 = arith.constant 0 : index
    %1069 = vector.load %arg42[%c0_586, %c0_587] : memref<1x32xf32, #tpu.memory_space<vmem>>, vector<1x32xf32>
    %cst_588 = arith.constant dense<0.000000e+00> : vector<8xf32>
    %1070 = vector.multi_reduction <add>, %1067, %cst_588 [1] : vector<8x32xf32> to vector<8xf32>
    %1071 = vector.shape_cast %1070 : vector<8xf32> to vector<8x1xf32>
    %cst_589 = arith.constant 3.200000e+01 : f32
    %1072 = vector.broadcast %cst_589 : f32 to vector<8x1xf32>
    %1073 = arith.divf %1071, %1072 : vector<8x1xf32>
    %1074 = vector.broadcast %1073 : vector<8x1xf32> to vector<8x32xf32>
    %1075 = arith.subf %1067, %1074 : vector<8x32xf32>
    %1076 = arith.mulf %1075, %1075 : vector<8x32xf32>
    %cst_590 = arith.constant dense<0.000000e+00> : vector<8xf32>
    %1077 = vector.multi_reduction <add>, %1076, %cst_590 [1] : vector<8x32xf32> to vector<8xf32>
    %1078 = vector.shape_cast %1077 : vector<8xf32> to vector<8x1xf32>
    %cst_591 = arith.constant 3.200000e+01 : f32
    %1079 = vector.broadcast %cst_591 : f32 to vector<8x1xf32>
    %1080 = arith.divf %1078, %1079 : vector<8x1xf32>
    %cst_592 = arith.constant 9.99999974E-6 : f32
    %1081 = vector.broadcast %cst_592 : f32 to vector<8x1xf32>
    %1082 = arith.addf %1080, %1081 : vector<8x1xf32>
    %1083 = math.rsqrt %1082 : vector<8x1xf32>
    %1084 = vector.broadcast %1083 : vector<8x1xf32> to vector<8x32xf32>
    %1085 = arith.mulf %1075, %1084 : vector<8x32xf32>
    %1086 = vector.broadcast %1068 : vector<1x32xf32> to vector<8x32xf32>
    %1087 = arith.mulf %1085, %1086 : vector<8x32xf32>
    %1088 = vector.broadcast %1069 : vector<1x32xf32> to vector<8x32xf32>
    %1089 = arith.addf %1087, %1088 : vector<8x32xf32>
    %c0_593 = arith.constant 0 : index
    %c32_594 = arith.constant 32 : index
    %1090 = vector.load %arg43[%c0_593, %c32_594] : memref<8x64xf32, #tpu.memory_space<vmem>>, vector<8x32xf32>
    tpu.vector_store %arg43[%c0_593, %c32_594], %1089 {strides = array<i32>} : memref<8x64xf32, #tpu.memory_space<vmem>>, vector<8x32xf32>,
    return
  }
  func.func @transform_0(%arg0: i32) -> (i32, i32) {
    %c0_i32 = arith.constant 0 : i32
    %c0_i32_0 = arith.constant 0 : i32
    return %c0_i32, %arg0 : i32, i32
  }
  func.func @transform_1(%arg0: i32) -> (i32, i32) {
    %c0_i32 = arith.constant 0 : i32
    %c0_i32_0 = arith.constant 0 : i32
    return %c0_i32, %arg0 : i32, i32
  }
  func.func @transform_2(%arg0: i32) -> (i32, i32) {
    %c0_i32 = arith.constant 0 : i32
    %c0_i32_0 = arith.constant 0 : i32
    return %c0_i32, %arg0 : i32, i32
  }
  func.func @transform_3(%arg0: i32) -> (i32, i32) {
    %c0_i32 = arith.constant 0 : i32
    %c0_i32_0 = arith.constant 0 : i32
    %c0_i32_1 = arith.constant 0 : i32
    return %c0_i32, %c0_i32_0 : i32, i32
  }
  func.func @transform_4(%arg0: i32) -> (i32, i32) {
    %c0_i32 = arith.constant 0 : i32
    %c0_i32_0 = arith.constant 0 : i32
    %c0_i32_1 = arith.constant 0 : i32
    return %c0_i32, %c0_i32_0 : i32, i32
  }
  func.func @transform_5(%arg0: i32) -> (i32, i32) {
    %c0_i32 = arith.constant 0 : i32
    %c0_i32_0 = arith.constant 0 : i32
    %c0_i32_1 = arith.constant 0 : i32
    return %c0_i32, %c0_i32_0 : i32, i32
  }
  func.func @transform_6(%arg0: i32) -> (i32, i32, i32, i32) {
    %c0_i32 = arith.constant 0 : i32
    %c0_i32_0 = arith.constant 0 : i32
    %c0_i32_1 = arith.constant 0 : i32
    %c0_i32_2 = arith.constant 0 : i32
    %c0_i32_3 = arith.constant 0 : i32
    return %c0_i32, %c0_i32_0, %c0_i32_1, %c0_i32_2 : i32, i32, i32, i32
  }
  func.func @transform_7(%arg0: i32) -> (i32, i32, i32, i32) {
    %c0_i32 = arith.constant 0 : i32
    %c0_i32_0 = arith.constant 0 : i32
    %c0_i32_1 = arith.constant 0 : i32
    %c0_i32_2 = arith.constant 0 : i32
    %c0_i32_3 = arith.constant 0 : i32
    return %c0_i32, %c0_i32_0, %c0_i32_1, %c0_i32_2 : i32, i32, i32, i32
  }
  func.func @transform_8(%arg0: i32) -> (i32, i32, i32, i32) {
    %c0_i32 = arith.constant 0 : i32
    %c0_i32_0 = arith.constant 0 : i32
    %c0_i32_1 = arith.constant 0 : i32
    %c0_i32_2 = arith.constant 0 : i32
    %c0_i32_3 = arith.constant 0 : i32
    return %c0_i32, %c0_i32_0, %c0_i32_1, %c0_i32_2 : i32, i32, i32, i32
  }
  func.func @transform_9(%arg0: i32) -> (i32, i32, i32, i32) {
    %c0_i32 = arith.constant 0 : i32
    %c0_i32_0 = arith.constant 0 : i32
    %c0_i32_1 = arith.constant 0 : i32
    %c0_i32_2 = arith.constant 0 : i32
    %c0_i32_3 = arith.constant 0 : i32
    return %c0_i32, %c0_i32_0, %c0_i32_1, %c0_i32_2 : i32, i32, i32, i32
  }
  func.func @transform_10(%arg0: i32) -> (i32, i32, i32, i32) {
    %c0_i32 = arith.constant 0 : i32
    %c0_i32_0 = arith.constant 0 : i32
    %c0_i32_1 = arith.constant 0 : i32
    %c0_i32_2 = arith.constant 0 : i32
    %c0_i32_3 = arith.constant 0 : i32
    return %c0_i32, %c0_i32_0, %c0_i32_1, %c0_i32_2 : i32, i32, i32, i32
  }
  func.func @transform_11(%arg0: i32) -> (i32, i32, i32, i32) {
    %c0_i32 = arith.constant 0 : i32
    %c0_i32_0 = arith.constant 0 : i32
    %c0_i32_1 = arith.constant 0 : i32
    %c0_i32_2 = arith.constant 0 : i32
    %c0_i32_3 = arith.constant 0 : i32
    return %c0_i32, %c0_i32_0, %c0_i32_1, %c0_i32_2 : i32, i32, i32, i32
  }
  func.func @transform_12(%arg0: i32) -> (i32, i32, i32, i32) {
    %c0_i32 = arith.constant 0 : i32
    %c0_i32_0 = arith.constant 0 : i32
    %c0_i32_1 = arith.constant 0 : i32
    %c0_i32_2 = arith.constant 0 : i32
    %c0_i32_3 = arith.constant 0 : i32
    return %c0_i32, %c0_i32_0, %c0_i32_1, %c0_i32_2 : i32, i32, i32, i32
  }
  func.func @transform_13(%arg0: i32) -> (i32, i32, i32) {
    %c0_i32 = arith.constant 0 : i32
    %c0_i32_0 = arith.constant 0 : i32
    %c0_i32_1 = arith.constant 0 : i32
    %c0_i32_2 = arith.constant 0 : i32
    return %c0_i32, %c0_i32_0, %c0_i32_1 : i32, i32, i32
  }
  func.func @transform_14(%arg0: i32) -> (i32, i32, i32) {
    %c0_i32 = arith.constant 0 : i32
    %c0_i32_0 = arith.constant 0 : i32
    %c0_i32_1 = arith.constant 0 : i32
    %c0_i32_2 = arith.constant 0 : i32
    return %c0_i32, %c0_i32_0, %c0_i32_1 : i32, i32, i32
  }
  func.func @transform_15(%arg0: i32) -> (i32, i32, i32) {
    %c0_i32 = arith.constant 0 : i32
    %c0_i32_0 = arith.constant 0 : i32
    %c0_i32_1 = arith.constant 0 : i32
    %c0_i32_2 = arith.constant 0 : i32
    return %c0_i32, %c0_i32_0, %c0_i32_1 : i32, i32, i32
  }
  func.func @transform_16(%arg0: i32) -> (i32, i32, i32) {
    %c0_i32 = arith.constant 0 : i32
    %c0_i32_0 = arith.constant 0 : i32
    %c0_i32_1 = arith.constant 0 : i32
    %c0_i32_2 = arith.constant 0 : i32
    return %c0_i32, %c0_i32_0, %c0_i32_1 : i32, i32, i32
  }
  func.func @transform_17(%arg0: i32) -> (i32, i32, i32) {
    %c0_i32 = arith.constant 0 : i32
    %c0_i32_0 = arith.constant 0 : i32
    %c0_i32_1 = arith.constant 0 : i32
    %c0_i32_2 = arith.constant 0 : i32
    return %c0_i32, %c0_i32_0, %c0_i32_1 : i32, i32, i32
  }
  func.func @transform_18(%arg0: i32) -> (i32, i32, i32) {
    %c0_i32 = arith.constant 0 : i32
    %c0_i32_0 = arith.constant 0 : i32
    %c0_i32_1 = arith.constant 0 : i32
    %c0_i32_2 = arith.constant 0 : i32
    return %c0_i32, %c0_i32_0, %c0_i32_1 : i32, i32, i32
  }
  func.func @transform_19(%arg0: i32) -> (i32, i32, i32) {
    %c0_i32 = arith.constant 0 : i32
    %c0_i32_0 = arith.constant 0 : i32
    %c0_i32_1 = arith.constant 0 : i32
    %c0_i32_2 = arith.constant 0 : i32
    return %c0_i32, %c0_i32_0, %c0_i32_1 : i32, i32, i32
  }
  func.func @transform_20(%arg0: i32) -> (i32, i32, i32) {
    %c0_i32 = arith.constant 0 : i32
    %c0_i32_0 = arith.constant 0 : i32
    %c0_i32_1 = arith.constant 0 : i32
    %c0_i32_2 = arith.constant 0 : i32
    return %c0_i32, %c0_i32_0, %c0_i32_1 : i32, i32, i32
  }
  func.func @transform_21(%arg0: i32) -> (i32, i32, i32) {
    %c0_i32 = arith.constant 0 : i32
    %c0_i32_0 = arith.constant 0 : i32
    %c0_i32_1 = arith.constant 0 : i32
    %c0_i32_2 = arith.constant 0 : i32
    return %c0_i32, %c0_i32_0, %c0_i32_1 : i32, i32, i32
  }
  func.func @transform_22(%arg0: i32) -> (i32, i32) {
    %c0_i32 = arith.constant 0 : i32
    %c0_i32_0 = arith.constant 0 : i32
    %c0_i32_1 = arith.constant 0 : i32
    return %c0_i32, %c0_i32_0 : i32, i32
  }
  func.func @transform_23(%arg0: i32) -> (i32, i32) {
    %c0_i32 = arith.constant 0 : i32
    %c0_i32_0 = arith.constant 0 : i32
    %c0_i32_1 = arith.constant 0 : i32
    return %c0_i32, %c0_i32_0 : i32, i32
  }
  func.func @transform_24(%arg0: i32) -> (i32, i32, i32, i32) {
    %c0_i32 = arith.constant 0 : i32
    %c0_i32_0 = arith.constant 0 : i32
    %c0_i32_1 = arith.constant 0 : i32
    %c0_i32_2 = arith.constant 0 : i32
    %c0_i32_3 = arith.constant 0 : i32
    return %c0_i32, %c0_i32_0, %c0_i32_1, %c0_i32_2 : i32, i32, i32, i32
  }
  func.func @transform_25(%arg0: i32) -> (i32, i32, i32, i32) {
    %c0_i32 = arith.constant 0 : i32
    %c0_i32_0 = arith.constant 0 : i32
    %c0_i32_1 = arith.constant 0 : i32
    %c0_i32_2 = arith.constant 0 : i32
    %c0_i32_3 = arith.constant 0 : i32
    return %c0_i32, %c0_i32_0, %c0_i32_1, %c0_i32_2 : i32, i32, i32, i32
  }
  func.func @transform_26(%arg0: i32) -> (i32, i32, i32, i32) {
    %c0_i32 = arith.constant 0 : i32
    %c0_i32_0 = arith.constant 0 : i32
    %c0_i32_1 = arith.constant 0 : i32
    %c0_i32_2 = arith.constant 0 : i32
    %c0_i32_3 = arith.constant 0 : i32
    return %c0_i32, %c0_i32_0, %c0_i32_1, %c0_i32_2 : i32, i32, i32, i32
  }
  func.func @transform_27(%arg0: i32) -> (i32, i32, i32, i32) {
    %c0_i32 = arith.constant 0 : i32
    %c0_i32_0 = arith.constant 0 : i32
    %c0_i32_1 = arith.constant 0 : i32
    %c0_i32_2 = arith.constant 0 : i32
    %c0_i32_3 = arith.constant 0 : i32
    return %c0_i32, %c0_i32_0, %c0_i32_1, %c0_i32_2 : i32, i32, i32, i32
  }
  func.func @transform_28(%arg0: i32) -> (i32, i32, i32, i32) {
    %c0_i32 = arith.constant 0 : i32
    %c0_i32_0 = arith.constant 0 : i32
    %c0_i32_1 = arith.constant 0 : i32
    %c0_i32_2 = arith.constant 0 : i32
    %c0_i32_3 = arith.constant 0 : i32
    return %c0_i32, %c0_i32_0, %c0_i32_1, %c0_i32_2 : i32, i32, i32, i32
  }
  func.func @transform_29(%arg0: i32) -> (i32, i32, i32, i32) {
    %c0_i32 = arith.constant 0 : i32
    %c0_i32_0 = arith.constant 0 : i32
    %c0_i32_1 = arith.constant 0 : i32
    %c0_i32_2 = arith.constant 0 : i32
    %c0_i32_3 = arith.constant 0 : i32
    return %c0_i32, %c0_i32_0, %c0_i32_1, %c0_i32_2 : i32, i32, i32, i32
  }
  func.func @transform_30(%arg0: i32) -> (i32, i32, i32, i32) {
    %c0_i32 = arith.constant 0 : i32
    %c0_i32_0 = arith.constant 0 : i32
    %c0_i32_1 = arith.constant 0 : i32
    %c0_i32_2 = arith.constant 0 : i32
    %c0_i32_3 = arith.constant 0 : i32
    return %c0_i32, %c0_i32_0, %c0_i32_1, %c0_i32_2 : i32, i32, i32, i32
  }
  func.func @transform_31(%arg0: i32) -> (i32, i32, i32) {
    %c0_i32 = arith.constant 0 : i32
    %c0_i32_0 = arith.constant 0 : i32
    %c0_i32_1 = arith.constant 0 : i32
    %c0_i32_2 = arith.constant 0 : i32
    return %c0_i32, %c0_i32_0, %c0_i32_1 : i32, i32, i32
  }
  func.func @transform_32(%arg0: i32) -> (i32, i32, i32) {
    %c0_i32 = arith.constant 0 : i32
    %c0_i32_0 = arith.constant 0 : i32
    %c0_i32_1 = arith.constant 0 : i32
    %c0_i32_2 = arith.constant 0 : i32
    return %c0_i32, %c0_i32_0, %c0_i32_1 : i32, i32, i32
  }
  func.func @transform_33(%arg0: i32) -> (i32, i32, i32) {
    %c0_i32 = arith.constant 0 : i32
    %c0_i32_0 = arith.constant 0 : i32
    %c0_i32_1 = arith.constant 0 : i32
    %c0_i32_2 = arith.constant 0 : i32
    return %c0_i32, %c0_i32_0, %c0_i32_1 : i32, i32, i32
  }
  func.func @transform_34(%arg0: i32) -> (i32, i32, i32) {
    %c0_i32 = arith.constant 0 : i32
    %c0_i32_0 = arith.constant 0 : i32
    %c0_i32_1 = arith.constant 0 : i32
    %c0_i32_2 = arith.constant 0 : i32
    return %c0_i32, %c0_i32_0, %c0_i32_1 : i32, i32, i32
  }
  func.func @transform_35(%arg0: i32) -> (i32, i32, i32) {
    %c0_i32 = arith.constant 0 : i32
    %c0_i32_0 = arith.constant 0 : i32
    %c0_i32_1 = arith.constant 0 : i32
    %c0_i32_2 = arith.constant 0 : i32
    return %c0_i32, %c0_i32_0, %c0_i32_1 : i32, i32, i32
  }
  func.func @transform_36(%arg0: i32) -> (i32, i32, i32) {
    %c0_i32 = arith.constant 0 : i32
    %c0_i32_0 = arith.constant 0 : i32
    %c0_i32_1 = arith.constant 0 : i32
    %c0_i32_2 = arith.constant 0 : i32
    return %c0_i32, %c0_i32_0, %c0_i32_1 : i32, i32, i32
  }
  func.func @transform_37(%arg0: i32) -> (i32, i32, i32) {
    %c0_i32 = arith.constant 0 : i32
    %c0_i32_0 = arith.constant 0 : i32
    %c0_i32_1 = arith.constant 0 : i32
    %c0_i32_2 = arith.constant 0 : i32
    return %c0_i32, %c0_i32_0, %c0_i32_1 : i32, i32, i32
  }
  func.func @transform_38(%arg0: i32) -> (i32, i32, i32) {
    %c0_i32 = arith.constant 0 : i32
    %c0_i32_0 = arith.constant 0 : i32
    %c0_i32_1 = arith.constant 0 : i32
    %c0_i32_2 = arith.constant 0 : i32
    return %c0_i32, %c0_i32_0, %c0_i32_1 : i32, i32, i32
  }
  func.func @transform_39(%arg0: i32) -> (i32, i32, i32) {
    %c0_i32 = arith.constant 0 : i32
    %c0_i32_0 = arith.constant 0 : i32
    %c0_i32_1 = arith.constant 0 : i32
    %c0_i32_2 = arith.constant 0 : i32
    return %c0_i32, %c0_i32_0, %c0_i32_1 : i32, i32, i32
  }
  func.func @transform_40(%arg0: i32) -> (i32, i32) {
    %c0_i32 = arith.constant 0 : i32
    %c0_i32_0 = arith.constant 0 : i32
    %c0_i32_1 = arith.constant 0 : i32
    return %c0_i32, %c0_i32_0 : i32, i32
  }
  func.func @transform_41(%arg0: i32) -> (i32, i32) {
    %c0_i32 = arith.constant 0 : i32
    %c0_i32_0 = arith.constant 0 : i32
    %c0_i32_1 = arith.constant 0 : i32
    return %c0_i32, %c0_i32_0 : i32, i32
  }
  func.func @transform_42(%arg0: i32) -> (i32, i32) {
    %c0_i32 = arith.constant 0 : i32
    %c0_i32_0 = arith.constant 0 : i32
    return %c0_i32, %arg0 : i32, i32
  }
}

</mosaic_0001>

<bundles_post_ra>
// kernel: text_enhanced_transformer.1
= control target key start
LH: loop header
LB: loop body
LE: loop exit
PB: predicated region body
PF: predicated region fallthrough
CT: control target
= control target key end

     0   :  { %s11710_s6 = smov 3   ;;  %s11711_s10 = smov 2   ;;  %vm194_vm0 = vcmask 261120   ;;  %v11714_v22 = vmov 0.0   ;;  %vm11715_vm1 = vmmov 0   ;;  %vm866_vm2 = vcmask 64512   ;;  %s13415_s0 = inlined_call_operand.smem [shape: u32[43], index: -1, kind: input, shape index: {}] }
   0x1   :  { %s11763_s5 = sld [smem:[%s13415_s0]]   ;;  %s11712_s14 = smov 5   ;;  %10397 = vmatprep.subr.bf16.mxu1 %v11714_v22  ;;  %10409 = vmatprep.subr.bf16.mxu0 %v11714_v22  ;;  %vm1106_vm3 = vcmask 1043456   ;;  %vm9547_vm5 = vcmask 523520  }
   0x2   :  { %s11768_s9 = sld [smem:[%s13415_s0 + %s11710_s6]]   ;;  %s11713_s18 = smov 6   ;;  %10399 = vmatprep.mubr.msk.bf16.mxu1 %vm11715_vm1, %v11714_v22  ;;  %10411 = vmatprep.mubr.msk.bf16.mxu0 %vm11715_vm1, %v11714_v22 }
   0x3   :  { %s11773_s13 = sld [smem:[%s13415_s0 + %s11711_s10]]   ;;  %s11716_s22 = smov 18  }
   0x4   :  { %s11778_s17 = sld [smem:[%s13415_s0 + %s11712_s14]]   ;;  %s11717_s26 = smov 19  }
   0x5   :  { %s11795_s21 = sld [smem:[%s13415_s0 + %s11713_s18]]   ;;  %s11718_s30 = smov 8  }
   0x6   :  { %s11812_s25 = sld [smem:[%s13415_s0 + %s11716_s22]]   ;;  %s11719_s4 = smov 10  }
   0x7   :  { %v178_v1 = vld [vmem:[%s11763_s5] sm:$0xff]  ;;  %s11817_s29 = sld [smem:[%s13415_s0 + %s11717_s26]]   ;;  %s11720_s10 = smov 9  }
   0x8   :  { %v175_v0 = vld [vmem:[%s11768_s9] sm:$0xff]  ;;  %v181_v2 = vmul.f32 5.656854, %v178_v1  ;;  %s11822_s3 = sld [smem:[%s13415_s0 + %s11718_s30]]   ;;  %s11721_s15 = smov 7  }
   0x9   :  { %v180_v3 = vld [vmem:[%s11773_s13] sm:$0xff]  ;;  %s11843_s8 = sld [smem:[%s13415_s0 + %s11719_s4]]   ;;  %s11722_s20 = smov 11  }
   0xa   :  { %v177_v4 = vld [vmem:[%s11778_s17] sm:$0xff]  ;;  %v183_v5 = vmul.f32 5.656854, %v180_v3  ;;  %v11784_v6 = vadd.f32 %v181_v2, %v175_v0  ;;  %s11900_s14 = sld [smem:[%s13415_s0 + %s11720_s10]]   ;;  %s11723_s26 = smov 12  }
   0xb   :  { %v240_v20 = vld [vmem:[%s11795_s21] sm:$0xf]  ;;  %v242_v21 = vld [vmem:[%s11795_s21 + $0x8] sm:$0xf]  ;;  %v241_v37 = vld [vmem:[%s11795_s21 + $0x4] sm:$0xf]  ;;  %s11905_s19 = sld [smem:[%s13415_s0 + %s11721_s15]]  }
   0xc   :  { %v184_v7 = vadd.f32 %v183_v5, %v177_v4  ;;  %v195_v8 = vsel %vm194_vm0, %v11784_v6, 0.0  ;;  %v276_v23 = vsel %vm194_vm0, %v240_v20, 0  ;;  %v362_v24 = vsel %vm194_vm0, %v242_v21, 0  ;;  %v9595_v32 = vld [vmem:[%s11812_s25] ss:$0 sm:$0xff]  ;;  %s11914_s24 = sld [smem:[%s13415_s0 + %s11722_s20]]   ;;  %s11724_s1 = smov 13  }
   0xd   :  { %196 = vadd.xlane.f32.xlu0 %v195_v8  ;;  %10398 = vmatpush3.bf16.xpose.msra.mxu1 %v276_v23  ;;  %v9596_v34 = vld [vmem:[%s11817_s29] ss:$0 sm:$0xff]  ;;  %v319_v43 = vsel %vm194_vm0, %v241_v37, 0  ;;  %v243_v46 = vld [vmem:[%s11795_s21 + $0xc] sm:$0xf]  ;;  %s11988_s30 = sld [smem:[%s13415_s0 + %s11723_s26]]   ;;  %s11725_s7 = smov 14  }
   0xe   :  { %v224_v9 = vsel %vm194_vm0, %v184_v7, 0.0  ;;  %10410 = vmatpush3.bf16.xpose.msra.mxu0 %v362_v24  ;;  %10403 = vmatprep.subr.bf16.mxu1 %v11714_v22  ;;  %v447_v38 = vld [vmem:[%s11822_s3] sm:$0xf]  ;;  %v449_v47 = vld [vmem:[%s11822_s3 + $0x8] sm:$0xf]  ;;  %v405_v49 = vsel %vm194_vm0, %v243_v46, 0  ;;  %s12017_s6 = sld [smem:[%s13415_s0 + %s11724_s1]]  }
   0xf   :  { %10421 = vmatprep.subr.bf16.mxu0 %v11714_v22  ;;  %v483_v44 = vsel %vm194_vm0, %v447_v38, 0  ;;  %v569_v50 = vsel %vm194_vm0, %v449_v47, 0  ;;  %v448_v51 = vld [vmem:[%s11822_s3 + $0x4] sm:$0xf]  ;;  %v654_v52 = vld [vmem:[%s11843_s8] sm:$0xf]  ;;  %s12030_s12 = sld [smem:[%s13415_s0 + %s11725_s7]]  }
  0x10   :  { %v526_v53 = vsel %vm194_vm0, %v448_v51, 0  ;;  %v687_v54 = vsel %vm194_vm0, %v654_v52, 0  ;;  %v450_v55 = vld [vmem:[%s11822_s3 + $0xc] sm:$0xf]  ;;  %v656_v56 = vld [vmem:[%s11843_s8 + $0x8] sm:$0xf] }
  0x11   :  { %225 = vadd.xlane.f32.xlu0 %v224_v9  ;;  %v612_v57 = vsel %vm194_vm0, %v450_v55, 0  ;;  %v773_v58 = vsel %vm194_vm0, %v656_v56, 0  ;;  %v655_v59 = vld [vmem:[%s11843_s8 + $0x4] sm:$0xf]  ;;  %v657_v61 = vld [vmem:[%s11843_s8 + $0xc] sm:$0xf] }
  0x12   :  { %v730_v60 = vsel %vm194_vm0, %v655_v59, 0  ;;  %v816_v62 = vsel %vm194_vm0, %v657_v61, 0  ;;  %13437 = sst [smem:[#allocation2_spill]] %s11905_s19  ;;  %v9605_v8 = vld [vmem:[%s11900_s14] ss:$0 sm:$0xff]  ;;  %s11726_s15 = smov 16  }
  0x13   :  { %v9607_v21 = vld [vmem:[%s11900_s14 + $0x2] ss:$0 sm:$0xff]  ;;  %13438 = sst [smem:[#allocation3_spill]] %s11914_s24  ;;  %v9606_v37 = vld [vmem:[%s11900_s14 + $0x1] ss:$0 sm:$0xff]  ;;  %s11727_s22 = smov 20  }
  0x14   :  { %v9613_v38 = vld [vmem:[%s11914_s24] ss:$0 sm:$0xff]  ;;  %v9608_v56 = vld [vmem:[%s11900_s14 + $0x3] ss:$0 sm:$0xff]  ;;  %13439 = sst [smem:[#allocation4_spill]] %s11988_s30  ;;  %s11728_s28 = smov 21  }
  0x15   :  { %13440 = sst [smem:[#allocation5_spill]] %s12017_s6  ;;  %s11729_s7 = smov 15  }
  0x16   :  { %13441 = sst [smem:[#allocation6_spill]] %s12030_s12  ;;  %s11730_s16 = smov 1  }
  0x17   :  { %s12039_s20 = sld [smem:[%s13415_s0 + %s11726_s15]]   ;;  %s11731_s26 = smov 17  }
  0x18   :  { %s12056_s27 = sld [smem:[%s13415_s0 + %s11727_s22]]   ;;  %s11735_s11 = smov 23  }
  0x19   :  { %s12061_s4 = sld [smem:[%s13415_s0 + %s11728_s28]]   ;;  %s11734_s28 = smov 22  }
  0x1a   :  { %s12075_s15 = sld [smem:[%s13415_s0 + %s11729_s7]]   ;;  %s11732_s7 = smov 4  }
  0x1b   :  { %s12083_s23 = sld [smem:[%s13415_s0 + %s11730_s16]]   ;;  %s11733_s16 = smov 24  }
  0x1c   :  { %s12088_s2 = sld [smem:[%s13415_s0 + %s11731_s26]]   ;;  %s11743_s18 = smov 30  }
  0x1d   :  { %13442 = sst [smem:[#allocation7_spill]] %s12039_s20 }
  0x1e   :  { %13443 = sst [smem:[#allocation8_spill]] %s12056_s27 }
  0x1f   :  { %13444 = sst [smem:[#allocation9_spill]] %s12061_s4 }
  0x20   :  { %13445 = sst [smem:[#allocation10_spill]] %s12075_s15 }
  0x21   :  { %13446 = sst [smem:[#allocation11_spill]] %s12083_s23 }
  0x22   :  { %13447 = sst [smem:[#allocation12_spill]] %s12088_s2 }
  0x23   :  { %s12110_s26 = sld [smem:[%s13415_s0 + %s11733_s16]]   ;;  %s11739_s16 = smov 28  }
  0x24   :  { %s12118_s10 = sld [smem:[%s13415_s0 + %s11734_s28]]   ;;  %s11737_s28 = smov 37  }
  0x25   :  { %s12123_s22 = sld [smem:[%s13415_s0 + %s11735_s11]]  }
  0x26   :  { %s12197_s1 = sld [smem:[%s13415_s0 + %s11739_s16]]   ;;  %s11741_s16 = smov 25  }
  0x2a   :  { %13449 = sst [smem:[#allocation14_spill]] %s12118_s10 }
  0x2b   :  { %13450 = sst [smem:[#allocation15_spill]] %s12123_s22 }
  0x9a   :  { %v197_v10 = vpop.xlane.xlu0 %196 }
  0x9b   :  { %v199_v11 = vmul.f32 0.03125, %v197_v10 }
  0x9d   :  { %v200_v12 = vsub.f32 %v11784_v6, %v199_v11 }
  0x9e   :  { %v226_v13 = vpop.xlane.xlu0 %225 }
  0x9f   :  { %v227_v14 = vmul.f32 0.03125, %v226_v13  ;;  %v201_v15 = vmul.f32 %v200_v12, %v200_v12 }
  0xa1   :  { %v228_v16 = vsub.f32 %v184_v7, %v227_v14  ;;  %v202_v17 = vsel %vm194_vm0, %v201_v15, 0.0 }
  0xa2   :  { %203 = vadd.xlane.f32.xlu1 %v202_v17 }
  0xa3   :  { %v229_v18 = vmul.f32 %v228_v16, %v228_v16 }
  0xa5   :  { %v230_v19 = vsel %vm194_vm0, %v229_v18, 0.0 }
  0xa6   :  { %231 = vadd.xlane.f32.xlu1 %v230_v19  ;;  %v9597_v19 = vld [vmem:[%s11905_s19] ss:$0 sm:$0xff] }
 0x12f   :  { %v204_v25 = vpop.xlane.xlu1 %203 }
 0x130   :  { %v205_v26 = vmul.f32 0.03125, %v204_v25 }
 0x132   :  { %v206_v27 = vadd.f32 1e-05, %v205_v26 }
 0x133   :  { %v232_v28 = vpop.xlane.xlu1 %231 }
 0x134   :  { %11570 = vrsqrt.f32 %v206_v27  ;;  %v233_v29 = vmul.f32 0.03125, %v232_v28 }
 0x136   :  { %v234_v30 = vadd.f32 1e-05, %v233_v29 }
 0x138   :  { %11572 = vrsqrt.f32 %v234_v30 }
 0x13e   :  { %v11571_v31 = vpop.eup %11570 }
 0x13f   :  { %v208_v33 = vmul.f32 %v11571_v31, %v200_v12 }
 0x141   :  { %v215_v35 = vmul.f32 %v9595_v32, %v208_v33 }
 0x142   :  { %v11573_v36 = vpop.eup %11572 }
 0x143   :  { %v236_v39 = vmul.f32 %v11573_v36, %v228_v16  ;;  %v222_v40 = vadd.f32 %v9596_v34, %v215_v35  ;;  %v9599_v35 = vld [vmem:[%s11905_s19 + $0x2] ss:$0 sm:$0xff] }
 0x145   :  { %v223_v41 = vpack.c.bf16 %v222_v40, %v222_v40  ;;  %v237_v42 = vmul.f32 %v9595_v32, %v236_v39 }
 0x147   :  { %10400 = vmatmul.mubr.msk.bf16.vlgmr.msra.gmra.mrb[0].mxu1 %vm194_vm0, %v223_v41  ;;  %10412 = vmatmul.mubr.msk.bf16.vlgmr.msra.gmra.mrb[0].mxu0 %vm194_vm0, %v223_v41  ;;  %v238_v45 = vadd.f32 %v9596_v34, %v237_v42 }
 0x148   :  { %10404 = vmatpush3.bf16.xpose.msra.mxu1 %v319_v43  ;;  %10422 = vmatpush3.bf16.xpose.msra.mxu0 %v483_v44 }
 0x149   :  { %10405 = vmatprep.mubr.msk.bf16.mxu1 %vm11715_vm1, %v11714_v22  ;;  %10423 = vmatprep.mubr.msk.bf16.mxu0 %vm11715_vm1, %v11714_v22  ;;  %v239_v48 = vpack.c.bf16 %v238_v45, %v238_v45 }
 0x14a   :  { %10415 = vmatprep.subr.bf16.mxu1 %v11714_v22  ;;  %10433 = vmatprep.subr.bf16.mxu0 %v11714_v22 }
 0x14f   :  { %10406 = vmatmul.mubr.msk.bf16.vlgmr.msra.gmra.mrb[4].mxu1 %vm194_vm0, %v223_v41  ;;  %10424 = vmatmul.mubr.msk.bf16.vlgmr.msra.gmra.mrb[4].mxu0 %vm194_vm0, %v239_v48 }
 0x150   :  { %10416 = vmatpush3.bf16.xpose.msra.mxu1 %v405_v49  ;;  %10434 = vmatpush3.bf16.xpose.msra.mxu0 %v569_v50 }
 0x151   :  { %10417 = vmatprep.mubr.msk.bf16.mxu1 %vm11715_vm1, %v11714_v22  ;;  %10435 = vmatprep.mubr.msk.bf16.mxu0 %vm11715_vm1, %v11714_v22 }
 0x152   :  { %10427 = vmatprep.subr.bf16.mxu1 %v11714_v22  ;;  %10445 = vmatprep.subr.bf16.mxu0 %v11714_v22 }
 0x157   :  { %10418 = vmatmul.mubr.msk.bf16.vlgmr.msra.gmra.mrb[8].mxu1 %vm194_vm0, %v223_v41  ;;  %10436 = vmatmul.mubr.msk.bf16.vlgmr.msra.gmra.mrb[8].mxu0 %vm194_vm0, %v239_v48 }
 0x158   :  { %10428 = vmatpush3.bf16.xpose.msra.mxu1 %v526_v53  ;;  %10446 = vmatpush3.bf16.xpose.msra.mxu0 %v687_v54  ;;  %v9598_v53 = vld [vmem:[%s11905_s19 + $0x1] ss:$0 sm:$0xff] }
 0x159   :  { %10429 = vmatprep.mubr.msk.bf16.mxu1 %vm11715_vm1, %v11714_v22  ;;  %10447 = vmatprep.mubr.msk.bf16.mxu0 %vm11715_vm1, %v11714_v22 }
 0x15a   :  { %10439 = vmatprep.subr.bf16.mxu1 %v11714_v22  ;;  %10457 = vmatprep.subr.bf16.mxu0 %v11714_v22 }
 0x15f   :  { %10430 = vmatmul.mubr.msk.bf16.vlgmr.msra.gmra.mrb[12].mxu1 %vm194_vm0, %v239_v48  ;;  %10448 = vmatmul.mubr.msk.bf16.vlgmr.msra.gmra.mrb[12].mxu0 %vm194_vm0, %v239_v48 }
 0x160   :  { %10440 = vmatpush3.bf16.xpose.msra.mxu1 %v612_v57  ;;  %10458 = vmatpush3.bf16.xpose.msra.mxu0 %v773_v58 }
 0x161   :  { %10441 = vmatprep.mubr.msk.bf16.mxu1 %vm11715_vm1, %v11714_v22  ;;  %10459 = vmatprep.mubr.msk.bf16.mxu0 %vm11715_vm1, %v11714_v22 }
 0x162   :  { %10451 = vmatprep.subr.bf16.mxu1 %v11714_v22  ;;  %10469 = vmatprep.subr.bf16.mxu0 %v11714_v22 }
 0x167   :  { %10442 = vmatmul.mubr.msk.bf16.vlgmr.msra.gmra.mrb[16].mxu1 %vm194_vm0, %v239_v48  ;;  %10460 = vmatmul.mubr.msk.bf16.vlgmr.msra.gmra.mrb[16].mxu0 %vm194_vm0, %v239_v48 }
 0x168   :  { %10452 = vmatpush3.bf16.xpose.msra.mxu1 %v730_v60  ;;  %10453 = vmatprep.mubr.msk.bf16.mxu1 %vm11715_vm1, %v11714_v22 }
 0x169   :  { %10463 = vmatprep.subr.bf16.mxu1 %v11714_v22  ;;  %10471 = vmatprep.mubr.msk.bf16.mxu0 %vm11715_vm1, %v11714_v22 }
 0x16f   :  { %10454 = vmatmul.mubr.msk.bf16.vlgmr.msra.gmra.mrb[20].mxu1 %vm194_vm0, %v239_v48 }
 0x170   :  { %10464 = vmatpush3.bf16.xpose.msra.mxu1 %v816_v62  ;;  %10465 = vmatprep.mubr.msk.bf16.mxu1 %vm11715_vm1, %v11714_v22 }
 0x171   :  { %10475 = vmatprep.subr.bf16.mxu1 %v11714_v22 }
 0x177   :  { %10466 = vmatmul.mubr.msk.bf16.vlgmr.msra.gmra.mrb[24].mxu1 %vm194_vm0, %v239_v48 }
 0x178   :  { %10477 = vmatprep.mubr.msk.bf16.mxu1 %vm11715_vm1, %v11714_v22 }
 0x21a   :  { %v312_v63 = vpop.f32.mrb[0].mxu1  ;;  %v398_v0 = vpop.f32.mrb[0].mxu0 }
 0x21b   :  { %v10401_v1 = vpop.f32.mrb[1].mxu1  ;;  %v10413_v2 = vpop.f32.mrb[1].mxu0  ;;  %v313_v23 = vadd.f32 %v9597_v19, %v312_v63  ;;  %v399_v39 = vadd.f32 %v9599_v35, %v398_v0 }
 0x21c   :  { %v315_v3 = vpop.f32.mrb[2].mxu1  ;;  %v401_v4 = vpop.f32.mrb[2].mxu0 }
 0x21d   :  { %v10402_v5 = vpop.f32.mrb[3].mxu1  ;;  %v10414_v7 = vpop.f32.mrb[3].mxu0  ;;  %v858_v31 = vpack.c.bf16 %v313_v23, %v313_v23  ;;  %v860_v48 = vpack.c.bf16 %v399_v39, %v399_v39  ;;  %v185_v23 = vlaneseq }
 0x21e   :  { %v9600_v5 = vld [vmem:[%s11905_s19 + $0x3] ss:$0 sm:$0xff] }
 0x222   :  { %v355_v9 = vpop.f32.mrb[4].mxu1  ;;  %v519_v10 = vpop.f32.mrb[4].mxu0 }
 0x223   :  { %v520_v11 = vadd.f32 %v9605_v8, %v519_v10  ;;  %v10407_v12 = vpop.f32.mrb[5].mxu1  ;;  %v10425_v13 = vpop.f32.mrb[5].mxu0  ;;  %v356_v57 = vadd.f32 %v9598_v53, %v355_v9  ;;  %v9614_v8 = vld [vmem:[%s11914_s24 + $0x1] ss:$0 sm:$0xff] }
 0x224   :  { %v358_v14 = vpop.f32.mrb[6].mxu1  ;;  %v522_v15 = vpop.f32.mrb[6].mxu0 }
 0x225   :  { %v862_v16 = vpack.c.bf16 %v520_v11, %v520_v11  ;;  %v10408_v17 = vpop.f32.mrb[7].mxu1  ;;  %v10426_v18 = vpop.f32.mrb[7].mxu0  ;;  %v859_v1 = vpack.c.bf16 %v356_v57, %v356_v57 }
 0x227   :  { %v871_v20 = vsel %vm866_vm2, %v862_v16, 0 }
 0x228   :  { %10470 = vmatpush3.bf16.xpose.msra.mxu0 %v871_v20 }
 0x229   :  { %10481 = vmatprep.subr.bf16.mxu0 %v11714_v22 }
 0x22a   :  { %v441_v24 = vpop.f32.mrb[8].mxu1  ;;  %v605_v25 = vpop.f32.mrb[8].mxu0 }
 0x22b   :  { %v606_v26 = vadd.f32 %v9607_v21, %v605_v25  ;;  %v10419_v27 = vpop.f32.mrb[9].mxu1  ;;  %v10437_v28 = vpop.f32.mrb[9].mxu0  ;;  %v442_v9 = vadd.f32 %v9600_v5, %v441_v24  ;;  %v186_v24 = vshrl.u32 %v185_v23, 7  ;;  %v188_v25 = vand.u32 127, %v185_v23  ;;  %v9616_v23 = vld [vmem:[%s11914_s24 + $0x3] ss:$0 sm:$0xff] }
 0x22c   :  { %v444_v29 = vpop.f32.mrb[10].mxu1  ;;  %v608_v30 = vpop.f32.mrb[10].mxu0 }
 0x22d   :  { %v864_v32 = vpack.c.bf16 %v606_v26, %v606_v26  ;;  %v10420_v33 = vpop.f32.mrb[11].mxu1  ;;  %v10438_v34 = vpop.f32.mrb[11].mxu0  ;;  %v861_v14 = vpack.c.bf16 %v442_v9, %v442_v9  ;;  %v189_v26 = vsub.s32 %v188_v25, %v186_v24 }
 0x22f   :  { %10472 = vmatmul.mubr.msk.bf16.vlgmr.msra.gmra.mrb[20].mxu0 %vm866_vm2, %v858_v31  ;;  %v963_v36 = vsel %vm866_vm2, %v864_v32, 0  ;;  %vm190_vm4 = vcmp.ge.s32.totalorder %v189_v26, 1 }
 0x230   :  { %10482 = vmatpush3.bf16.xpose.msra.mxu0 %v963_v36  ;;  %10483 = vmatprep.mubr.msk.bf16.mxu0 %vm11715_vm1, %v11714_v22  ;;  %v11951_v27 = vsel %vm190_vm4, -1e+30, %v11714_v22 }
 0x231   :  { %10493 = vmatprep.subr.bf16.mxu0 %v11714_v22 }
 0x232   :  { %v562_v40 = vpop.f32.mrb[12].mxu1  ;;  %v723_v41 = vpop.f32.mrb[12].mxu0 }
 0x233   :  { %v563_v42 = vadd.f32 %v9606_v37, %v562_v40  ;;  %v724_v43 = vadd.f32 %v9613_v38, %v723_v41  ;;  %v10431_v44 = vpop.f32.mrb[13].mxu1  ;;  %v10449_v45 = vpop.f32.mrb[13].mxu0 }
 0x234   :  { %v565_v46 = vpop.f32.mrb[14].mxu1  ;;  %v726_v47 = vpop.f32.mrb[14].mxu0 }
 0x235   :  { %v863_v49 = vpack.c.bf16 %v563_v42, %v563_v42  ;;  %v1099_v50 = vpack.c.bf16 %v724_v43, %v724_v43  ;;  %v10432_v51 = vpop.f32.mrb[15].mxu1  ;;  %v10450_v52 = vpop.f32.mrb[15].mxu0 }
 0x237   :  { %10484 = vmatmul.mubr.msk.bf16.vlgmr.msra.gmra.mrb[24].mxu0 %vm866_vm2, %v860_v48  ;;  %v917_v54 = vsel %vm866_vm2, %v863_v49, 0  ;;  %v1108_v55 = vsel %vm1106_vm3, %v1099_v50, 0 }
 0x238   :  { %10476 = vmatpush3.bf16.xpose.msra.mxu1 %v917_v54  ;;  %10494 = vmatpush3.bf16.msra.mxu0 %v1108_v55 }
 0x239   :  { %10487 = vmatprep.subr.bf16.mxu1 %v11714_v22  ;;  %10495 = vmatprep.mubr.msk.bf16.mxu0 %vm11715_vm1, %v11714_v22 }
 0x23a   :  { %v648_v58 = vpop.f32.mrb[16].mxu1  ;;  %v11933_v59 = vpop.f32.mrb[16].mxu0  ;;  %10505 = vmatprep.subr.bf16.mxu0 %v11714_v22 }
 0x23b   :  { %v649_v60 = vadd.f32 %v9608_v56, %v648_v58  ;;  %v10443_v61 = vpop.f32.mrb[17].mxu1  ;;  %v10461_v62 = vpop.f32.mrb[17].mxu0 }
 0x23c   :  { %v651_v63 = vpop.f32.mrb[18].mxu1  ;;  %v812_v0 = vpop.f32.mrb[18].mxu0 }
 0x23d   :  { %v865_v2 = vpack.c.bf16 %v649_v60, %v649_v60  ;;  %v10444_v3 = vpop.f32.mrb[19].mxu1  ;;  %v10462_v4 = vpop.f32.mrb[19].mxu0 }
 0x23f   :  { %10478 = vmatmul.mubr.msk.bf16.vlgmr.msra.gmra.mrb[28].mxu1 %vm866_vm2, %v859_v1  ;;  %v1009_v7 = vsel %vm866_vm2, %v865_v2, 0 }
 0x240   :  { %10488 = vmatpush3.bf16.xpose.msra.mxu1 %v1009_v7  ;;  %10489 = vmatprep.mubr.msk.bf16.mxu1 %vm11715_vm1, %v11714_v22 }
 0x241   :  { %10499 = vmatprep.subr.bf16.mxu1 %v11714_v22 }
 0x242   :  { %v766_v10 = vpop.f32.mrb[20].mxu1 }
 0x243   :  { %v767_v11 = vadd.f32 %v9614_v8, %v766_v10  ;;  %v10455_v12 = vpop.f32.mrb[21].mxu1 }
 0x244   :  { %v769_v13 = vpop.f32.mrb[22].mxu1 }
 0x245   :  { %v1100_v15 = vpack.c.bf16 %v767_v11, %v767_v11  ;;  %v10456_v16 = vpop.f32.mrb[23].mxu1  ;;  %v9615_v11 = vld [vmem:[%s11914_s24 + $0x2] ss:$0 sm:$0xff] }
 0x246   :  { %v810_v12 = vadd.f32 %v9615_v11, %v11933_v59 }
 0x247   :  { %10490 = vmatmul.mubr.msk.bf16.vlgmr.msra.gmra.mrb[32].mxu1 %vm866_vm2, %v861_v14  ;;  %v1154_v17 = vsel %vm1106_vm3, %v1100_v15, 0 }
 0x248   :  { %10500 = vmatpush3.bf16.msra.mxu1 %v1154_v17  ;;  %10501 = vmatprep.mubr.msk.bf16.mxu1 %vm11715_vm1, %v11714_v22  ;;  %v1101_v15 = vpack.c.bf16 %v810_v12, %v810_v12 }
 0x249   :  { %10511 = vmatprep.subr.bf16.mxu1 %v11714_v22 }
 0x24a   :  { %v11948_v18 = vpop.f32.mrb[24].mxu1 }
 0x24b   :  { %v10467_v19 = vpop.f32.mrb[25].mxu1  ;;  %v853_v25 = vadd.f32 %v9616_v23, %v11948_v18 }
 0x24c   :  { %v855_v20 = vpop.f32.mrb[26].mxu1 }
 0x24d   :  { %v10468_v21 = vpop.f32.mrb[27].mxu1  ;;  %v1200_v20 = vsel %vm1106_vm3, %v1101_v15, 0 }
 0x302   :  { %v907_v28 = vpop.f32.mrb[20].mxu0 }
 0x303   :  { %v10473_v29 = vpop.f32.mrb[21].mxu0  ;;  %v908_v30 = vadd.f32 %v907_v28, %v11951_v27 }
 0x304   :  { %v910_v31 = vpop.f32.mrb[22].mxu0  ;;  %v1102_v29 = vpack.c.bf16 %v853_v25, %v853_v25 }
 0x305   :  { %v10474_v32 = vpop.f32.mrb[23].mxu0  ;;  %v1051_v33 = vsel %vm866_vm2, %v908_v30, -inf }
 0x306   :  { %1052 = vmax.xlane.f32.xlu0 %v1051_v33  ;;  %v1246_v32 = vsel %vm1106_vm3, %v1102_v29, 0 }
 0x30a   :  { %v999_v34 = vpop.f32.mrb[24].mxu0 }
 0x30b   :  { %v10485_v35 = vpop.f32.mrb[25].mxu0  ;;  %v1000_v36 = vadd.f32 %v999_v34, %v11951_v27 }
 0x30c   :  { %v1002_v37 = vpop.f32.mrb[26].mxu0  ;;  %v1292_v35 = vld [vmem:[%s11988_s30] sm:$0xf] }
 0x30d   :  { %v10486_v38 = vpop.f32.mrb[27].mxu0  ;;  %v1057_v39 = vsel %vm866_vm2, %v1000_v36, -inf  ;;  %v1293_v37 = vld [vmem:[%s11988_s30 + $0x4] sm:$0xf] }
 0x30e   :  { %1058 = vmax.xlane.f32.xlu0 %v1057_v39  ;;  %v1346_v38 = vsel %vm1106_vm3, %v1293_v37, 0  ;;  %v1294_v39 = vld [vmem:[%s11988_s30 + $0x8] sm:$0xf] }
 0x312   :  { %v953_v40 = vpop.f32.mrb[28].mxu1 }
 0x313   :  { %v10479_v41 = vpop.f32.mrb[29].mxu1  ;;  %v954_v42 = vadd.f32 %v953_v40, %v11951_v27 }
 0x314   :  { %v956_v43 = vpop.f32.mrb[30].mxu1 }
 0x315   :  { %v10480_v44 = vpop.f32.mrb[31].mxu1  ;;  %v1054_v45 = vsel %vm866_vm2, %v954_v42, -inf  ;;  %v1392_v43 = vsel %vm1106_vm3, %v1294_v39, 0 }
 0x316   :  { %1055 = vmax.xlane.f32.xlu1 %v1054_v45 }
 0x31a   :  { %v1045_v46 = vpop.f32.mrb[32].mxu1 }
 0x31b   :  { %v1046_v47 = vadd.f32 %v1045_v46, %v11951_v27  ;;  %v10491_v48 = vpop.f32.mrb[33].mxu1 }
 0x31c   :  { %v1048_v49 = vpop.f32.mrb[34].mxu1 }
 0x31d   :  { %v10492_v50 = vpop.f32.mrb[35].mxu1  ;;  %v1060_v51 = vsel %vm866_vm2, %v1046_v47, -inf }
 0x31e   :  { %1061 = vmax.xlane.f32.xlu1 %v1060_v51  ;;  %v1295_v51 = vld [vmem:[%s11988_s30 + $0xc] sm:$0xf] }
 0x393   :  { %v1053_v52 = vpop.xlane.xlu0 %1052 }
 0x394   :  { %v1063_v53 = vsub.f32 %v908_v30, %v1053_v52 }
 0x396   :  { %v1067_v54 = vmul.f32 1.442695, %v1063_v53 }
 0x398   :  { %11574 = vpow2.f32 %v1067_v54 }
 0x39b   :  { %v1059_v55 = vpop.xlane.xlu0 %1058 }
 0x39c   :  { %v1065_v56 = vsub.f32 %v1000_v36, %v1059_v55  ;;  %v1300_v36 = vsel %vm1106_vm3, %v1292_v35, 0  ;;  %v1438_v55 = vsel %vm1106_vm3, %v1295_v51, 0  ;;  %v11516_v35 = vld [vmem:[%s12039_s20 + $0x20] sm:$0xff]  }
 0x39e   :  { %v1071_v57 = vmul.f32 1.442695, %v1065_v56 }
 0x3a0   :  { %11576 = vpow2.f32 %v1071_v57 }
 0x3a2   :  { %v11575_v58 = vpop.eup %11574 }
 0x3a3   :  { %v1056_v60 = vpop.xlane.xlu1 %1055  ;;  %v1075_v61 = vsel %vm866_vm2, %v11575_v58, 0.0 }
 0x3a4   :  { %v1064_v62 = vsub.f32 %v954_v42, %v1056_v60  ;;  %1076 = vadd.xlane.f32.xlu0 %v1075_v61 }
 0x3a6   :  { %v1069_v63 = vmul.f32 1.442695, %v1064_v62 }
 0x3a8   :  { %11578 = vpow2.f32 %v1069_v63 }
 0x3aa   :  { %v11577_v0 = vpop.eup %11576 }
 0x3ab   :  { %v1062_v1 = vpop.xlane.xlu1 %1061  ;;  %v1081_v2 = vsel %vm866_vm2, %v11577_v0, 0.0 }
 0x3ac   :  { %v1066_v3 = vsub.f32 %v1046_v47, %v1062_v1  ;;  %1082 = vadd.xlane.f32.xlu0 %v1081_v2 }
 0x3ae   :  { %v1073_v4 = vmul.f32 1.442695, %v1066_v3 }
 0x3b0   :  { %11580 = vpow2.f32 %v1073_v4 }
 0x3b2   :  { %v11579_v5 = vpop.eup %11578 }
 0x3b3   :  { %v1078_v7 = vsel %vm866_vm2, %v11579_v5, 0.0 }
 0x3b4   :  { %1079 = vadd.xlane.f32.xlu1 %v1078_v7 }
 0x3ba   :  { %v11581_v8 = vpop.eup %11580 }
 0x3bb   :  { %v1084_v9 = vsel %vm866_vm2, %v11581_v8, 0.0 }
 0x3bc   :  { %1085 = vadd.xlane.f32.xlu1 %v1084_v9 }
 0x431   :  { %v1077_v10 = vpop.xlane.xlu0 %1076 }
 0x432   :  { %11582 = vrcp.f32 %v1077_v10 }
 0x439   :  { %v1083_v13 = vpop.xlane.xlu0 %1082 }
 0x43a   :  { %11584 = vrcp.f32 %v1083_v13 }
 0x43c   :  { %v11583_v14 = vpop.eup %11582 }
 0x43d   :  { %v1091_v16 = vmul.f32 %v11583_v14, %v11575_v58 }
 0x43f   :  { %v1095_v17 = vpack.c.bf16 %v1091_v16, %v1091_v16 }
 0x441   :  { %v1080_v19 = vpop.xlane.xlu1 %1079  ;;  %10496 = vmatmul.mubr.msk.bf16.vlgmr.msra.gmra.mrb[28].mxu0 %vm866_vm2, %v1095_v17 }
 0x442   :  { %11586 = vrcp.f32 %v1080_v19  ;;  %10506 = vmatpush3.bf16.msra.mxu0 %v1200_v20  ;;  %10507 = vmatprep.mubr.msk.bf16.mxu0 %vm11715_vm1, %v11714_v22  ;;  %v9633_v19 = vld [vmem:[%s12017_s6] ss:$0 sm:$0xff]  ;;  %s11747_s6 = smov 38  }
 0x443   :  { %10517 = vmatprep.subr.bf16.mxu0 %v11714_v22 }
 0x444   :  { %v11585_v59 = vpop.eup %11584 }
 0x445   :  { %v1093_v21 = vmul.f32 %v11585_v59, %v11577_v0 }
 0x447   :  { %v1097_v24 = vpack.c.bf16 %v1093_v21, %v1093_v21 }
 0x449   :  { %v1086_v26 = vpop.xlane.xlu1 %1085  ;;  %10508 = vmatmul.mubr.msk.bf16.vlgmr.msra.gmra.mrb[32].mxu0 %vm866_vm2, %v1097_v24 }
 0x44a   :  { %11588 = vrcp.f32 %v1086_v26  ;;  %10519 = vmatprep.mubr.msk.bf16.mxu0 %vm11715_vm1, %v11714_v22  ;;  %10518 = vmatpush3.bf16.msra.mxu0 %v1300_v36  ;;  %v11517_v36 = vld [vmem:[%s12039_s20 + $0x28] sm:$0xff]  }
 0x44b   :  { %10529 = vmatprep.subr.bf16.mxu0 %v11714_v22 }
 0x44c   :  { %v11587_v28 = vpop.eup %11586 }
 0x44d   :  { %v1092_v30 = vmul.f32 %v11587_v28, %v11579_v5 }
 0x44f   :  { %v1096_v31 = vpack.c.bf16 %v1092_v30, %v1092_v30 }
 0x451   :  { %10502 = vmatmul.mubr.msk.bf16.vlgmr.msra.gmra.mrb[36].mxu1 %vm866_vm2, %v1096_v31  ;;  %v11511_v31 = vld [vmem:[%s12030_s12 + $0x8] sm:$0xff]  }
 0x452   :  { %10512 = vmatpush3.bf16.msra.mxu1 %v1246_v32  ;;  %10513 = vmatprep.mubr.msk.bf16.mxu1 %vm11715_vm1, %v11714_v22  ;;  %v11512_v32 = vld [vmem:[%s12039_s20] sm:$0xff]  }
 0x453   :  { %10523 = vmatprep.subr.bf16.mxu1 %v11714_v22 }
 0x454   :  { %v11589_v18 = vpop.eup %11588 }
 0x455   :  { %v1094_v33 = vmul.f32 %v11589_v18, %v11581_v8  ;;  %v11513_v18 = vld [vmem:[%s12039_s20 + $0x8] sm:$0xff]  }
 0x457   :  { %v1098_v34 = vpack.c.bf16 %v1094_v33, %v1094_v33  ;;  %v11514_v33 = vld [vmem:[%s12039_s20 + $0x10] sm:$0xff]  }
 0x459   :  { %10514 = vmatmul.mubr.msk.bf16.vlgmr.msra.gmra.mrb[40].mxu1 %vm866_vm2, %v1098_v34  ;;  %v11515_v34 = vld [vmem:[%s12039_s20 + $0x18] sm:$0xff]  }
 0x45a   :  { %10525 = vmatprep.mubr.msk.bf16.mxu1 %vm11715_vm1, %v11714_v22  ;;  %10524 = vmatpush3.bf16.msra.mxu1 %v1346_v38 }
 0x45b   :  { %10535 = vmatprep.subr.bf16.mxu1 %v11714_v22 }
 0x514   :  { %v1144_v40 = vpop.f32.mrb[28].mxu0 }
 0x515   :  { %v1288_v41 = vpack.c.bf16 %v1144_v40, %v1144_v40  ;;  %v10497_v42 = vpop.f32.mrb[29].mxu0 }
 0x516   :  { %v1147_v44 = vpop.f32.mrb[30].mxu0 }
 0x517   :  { %v10498_v45 = vpop.f32.mrb[31].mxu0  ;;  %10520 = vmatmul.mubr.msk.bf16.vlgmr.msra.gmra.mrb[36].mxu0 %vm866_vm2, %v1288_v41  ;;  %v9634_v41 = vld [vmem:[%s12056_s27] ss:$0 sm:$0xff]  ;;  %s11746_s27 = smov 34  }
 0x518   :  { %10530 = vmatpush3.bf16.msra.mxu0 %v1392_v43  ;;  %10531 = vmatprep.mubr.msk.bf16.mxu0 %vm11715_vm1, %v11714_v22  ;;  %v9635_v43 = vld [vmem:[%s12061_s4] ss:$0 sm:$0xff]  ;;  %s12384_s30 = sld [smem:[%s13415_s0 + %s11746_s27]]   ;;  %s11750_s4 = smov 35  }
 0x519   :  { %10541 = vmatprep.subr.bf16.mxu0 %v11714_v22  ;;  %s12467_s24 = sld [smem:[%s13415_s0 + %s11750_s4]]  }
 0x51a   :  { %s13461_s4 = sld [smem:[#allocation12_spill]] }
 0x51c   :  { %v1236_v46 = vpop.f32.mrb[32].mxu0 }
 0x51d   :  { %v1290_v47 = vpack.c.bf16 %v1236_v46, %v1236_v46  ;;  %v10509_v48 = vpop.f32.mrb[33].mxu0 }
 0x51e   :  { %v1239_v49 = vpop.f32.mrb[34].mxu0  ;;  %v11519_v48 = vld [vmem:[%s12039_s20 + $0x38] sm:$0xff]  }
 0x51f   :  { %v10510_v50 = vpop.f32.mrb[35].mxu0  ;;  %10532 = vmatmul.mubr.msk.bf16.vlgmr.msra.gmra.mrb[40].mxu0 %vm866_vm2, %v1290_v47  ;;  %v11518_v47 = vld [vmem:[%s12039_s20 + $0x30] sm:$0xff]   ;;  %v9636_v49 = vld [vmem:[%s12075_s15] ss:$0 sm:$0xff]  ;;  %s12093_s15 = sld [smem:[%s13415_s0 + %s11732_s7]]   ;;  %s11740_s7 = smov 27  }
 0x520   :  { %10545 = vmatprep.mubr.msk.bf16.mxu0 %vm11715_vm1, %v11714_v22 }
 0x524   :  { %v1190_v52 = vpop.f32.mrb[36].mxu1 }
 0x525   :  { %v1289_v53 = vpack.c.bf16 %v1190_v52, %v1190_v52  ;;  %v10503_v54 = vpop.f32.mrb[37].mxu1  ;;  %13448 = sst [smem:[#allocation13_spill]] %s12093_s15 }
 0x526   :  { %v1193_v56 = vpop.f32.mrb[38].mxu1 }
 0x527   :  { %v10504_v57 = vpop.f32.mrb[39].mxu1  ;;  %10526 = vmatmul.mubr.msk.bf16.vlgmr.msra.gmra.mrb[44].mxu1 %vm866_vm2, %v1289_v53 }
 0x528   :  { %10536 = vmatpush3.bf16.msra.mxu1 %v1438_v55  ;;  %10537 = vmatprep.mubr.msk.bf16.mxu1 %vm11715_vm1, %v11714_v22  ;;  %v179_v57 = vld [vmem:[%s12083_s23] sm:$0xff]  ;;  %s11736_s23 = smov 36  }
 0x529   :  { %10549 = vmatprep.subr.bf16.mxu1 %v11714_v22  ;;  %s12128_s20 = sld [smem:[%s13415_s0 + %s11736_s23]]   ;;  %s11744_s23 = smov 31  }
 0x52c   :  { %v1282_v58 = vpop.f32.mrb[40].mxu1 }
 0x52d   :  { %v1291_v60 = vpack.c.bf16 %v1282_v58, %v1282_v58  ;;  %v10515_v61 = vpop.f32.mrb[41].mxu1  ;;  %v1732_v58 = vmul.f32 5.656854, %v179_v57 }
 0x52e   :  { %v1285_v62 = vpop.f32.mrb[42].mxu1  ;;  %v9648_v61 = vld [vmem:[%s12088_s2] ss:$0 sm:$0xff]  ;;  %s12243_s2 = sld [smem:[%s13415_s0 + %s11740_s7]]   ;;  %s11742_s7 = smov 29  }
 0x52f   :  { %v10516_v63 = vpop.f32.mrb[43].mxu1  ;;  %10538 = vmatmul.mubr.msk.bf16.vlgmr.msra.gmra.mrb[48].mxu1 %vm866_vm2, %v1291_v60  ;;  %v176_v62 = vld [vmem:[%s12093_s15] sm:$0xff]  ;;  %s11738_s15 = smov 26  }
 0x530   :  { %10565 = vmatprep.mubr.msk.bf16.mxu1 %vm11715_vm1, %v11714_v22  ;;  %10550 = vmatpush3.bf16.msra.mxu1 %v11512_v32  ;;  %s12172_s11 = sld [smem:[%s13415_s0 + %s11738_s15]]  }
 0x531   :  { %10551 = vmatprep.subr.bf16.mxu1 %v11714_v22  ;;  %s12316_s15 = sld [smem:[%s13415_s0 + %s11743_s18]]  }
 0x532   :  { %s12405_s18 = sld [smem:[%s13415_s0 + %s11747_s6]]   ;;  %s11749_s6 = smov 33  }
 0x533   :  { %s12420_s27 = sld [smem:[%s13415_s0 + %s11749_s6]]  }
 0x534   :  { %10552 = vmatpush3.bf16.msra.mxu1 %v11513_v18  ;;  %v12138_v18 = vld [vmem:[%s12128_s20] ss:$0 sm:$0xff]  ;;  %s13463_s6 = sld [smem:[#allocation15_spill]] }
 0x535   :  { %10553 = vmatprep.subr.bf16.mxu1 %v11714_v22 }
 0x538   :  { %10554 = vmatpush3.bf16.msra.mxu1 %v11514_v33 }
 0x539   :  { %10555 = vmatprep.subr.bf16.mxu1 %v11714_v22 }
 0x53c   :  { %10556 = vmatpush3.bf16.msra.mxu1 %v11515_v34 }
 0x53d   :  { %10557 = vmatprep.subr.bf16.mxu1 %v11714_v22 }
 0x540   :  { %10558 = vmatpush3.bf16.msra.mxu1 %v11516_v35 }
 0x541   :  { %10559 = vmatprep.subr.bf16.mxu1 %v11714_v22 }
 0x544   :  { %10560 = vmatpush3.bf16.msra.mxu1 %v11517_v36 }
 0x545   :  { %10561 = vmatprep.subr.bf16.mxu1 %v11714_v22 }
 0x548   :  { %10562 = vmatpush3.bf16.msra.mxu1 %v11518_v47  ;;  %v1785_v47 = vld [vmem:[%s12110_s26 + $0xc] sm:$0xf] }
 0x549   :  { %10563 = vmatprep.subr.bf16.mxu1 %v11714_v22 }
 0x54c   :  { %10564 = vmatpush3.bf16.msra.mxu1 %v11519_v48  ;;  %v1947_v48 = vsel %vm194_vm0, %v1785_v47, 0 }
 0x54d   :  { %10593 = vmatprep.subr.bf16.mxu1 %v11714_v22 }
 0x5ea   :  { %v1336_v0 = vpop.f32.mrb[36].mxu0 }
 0x5eb   :  { %v10521_v1 = vpop.f32.mrb[37].mxu0 }
 0x5ec   :  { %v1339_v2 = vpop.f32.mrb[38].mxu0 }
 0x5ed   :  { %v10522_v3 = vpop.f32.mrb[39].mxu0 }
 0x5f2   :  { %v1428_v4 = vpop.f32.mrb[40].mxu0 }
 0x5f3   :  { %v10533_v5 = vpop.f32.mrb[41].mxu0 }
 0x5f4   :  { %v1431_v7 = vpop.f32.mrb[42].mxu0 }
 0x5f5   :  { %v10534_v8 = vpop.f32.mrb[43].mxu0 }
 0x5fa   :  { %v1382_v9 = vpop.f32.mrb[44].mxu1 }
 0x5fb   :  { %v1480_v10 = vadd.f32 %v1382_v9, %v1336_v0  ;;  %v10527_v11 = vpop.f32.mrb[45].mxu1 }
 0x5fc   :  { %v1385_v12 = vpop.f32.mrb[46].mxu1 }
 0x5fd   :  { %v10528_v13 = vpop.f32.mrb[47].mxu1  ;;  %v1481_v14 = vadd.f32 %v1480_v10, %v1428_v4  ;;  %v12099_v4 = vadd.f32 %v1732_v58, %v176_v62 }
 0x5ff   :  { %v1738_v7 = vsel %vm194_vm0, %v12099_v4, 0.0 }
 0x602   :  { %v1474_v15 = vpop.f32.mrb[48].mxu1 }
 0x603   :  { %v1482_v16 = vadd.f32 %v1481_v14, %v1474_v15  ;;  %v10539_v17 = vpop.f32.mrb[49].mxu1 }
 0x604   :  { %v1477_v20 = vpop.f32.mrb[50].mxu1 }
 0x605   :  { %v1483_v59 = vadd.f32 %v1482_v16, %v11784_v6  ;;  %v10540_v21 = vpop.f32.mrb[51].mxu1  ;;  %v11510_v6 = vld [vmem:[%s12030_s12] sm:$0xff]   ;;  %s12133_s12 = sld [smem:[%s13415_s0 + %s11737_s28]]   ;;  %s11748_s28 = smov 39  }
 0x606   :  { %10542 = vmatpush3.bf16.msra.mxu0 %v11510_v6  ;;  %v9650_v6 = vld [vmem:[%s12123_s22] ss:$0 sm:$0xff]  ;;  %s12410_s19 = sld [smem:[%s13415_s0 + %s11748_s28]]  }
 0x607   :  { %v12021_v23 = vadd.f32 %v9633_v19, %v1483_v59  ;;  %10543 = vmatprep.subr.bf16.mxu0 %v11714_v22  ;;  %v1782_v19 = vld [vmem:[%s12110_s26] sm:$0xf]  ;;  %s13462_s28 = sld [smem:[#allocation13_spill]] }
 0x608   :  { %v1818_v20 = vsel %vm194_vm0, %v1782_v19, 0 }
 0x609   :  { %v1494_v24 = vsel %vm194_vm0, %v12021_v23, 0.0 }
 0x60a   :  { %1495 = vadd.xlane.f32.xlu0 %v1494_v24  ;;  %10544 = vmatpush3.bf16.msra.mxu0 %v11511_v31 }
 0x60b   :  { %10569 = vmatprep.subr.bf16.mxu0 %v11714_v22  ;;  %v12141_v35 = vld [vmem:[%s12133_s12] ss:$0 sm:$0xff] }
 0x697   :  { %v1496_v25 = vpop.xlane.xlu0 %1495 }
 0x698   :  { %v1497_v26 = vmul.f32 0.03125, %v1496_v25 }
 0x69a   :  { %v1498_v28 = vsub.f32 %v12021_v23, %v1497_v26 }
 0x69c   :  { %v1499_v29 = vmul.f32 %v1498_v28, %v1498_v28 }
 0x69e   :  { %v1500_v30 = vsel %vm194_vm0, %v1499_v29, 0.0  ;;  %v9649_v29 = vld [vmem:[%s12118_s10] ss:$0 sm:$0xff]  ;;  %s12248_s10 = sld [smem:[%s13415_s0 + %s11741_s16]]  }
 0x69f   :  { %1501 = vadd.xlane.f32.xlu1 %v1500_v30  ;;  %s12261_s16 = sld [smem:[%s13415_s0 + %s11742_s7]]  }
 0x6a0   :  { %s12361_s7 = sld [smem:[%s13415_s0 + %s11744_s23]]   ;;  %s13431_s23 = smov 32  }
 0x6a1   :  { %s12375_s22 = sld [smem:[%s13415_s0 + %s13431_s23]]   ;;  %s13451_s23 = smov 32  }
 0x6a4   :  { %v9653_v47 = vld [vmem:[%s12248_s10] ss:$0 sm:$0xff] }
 0x72c   :  { %v1502_v37 = vpop.xlane.xlu1 %1501 }
 0x72d   :  { %v1503_v38 = vmul.f32 0.03125, %v1502_v37 }
 0x72f   :  { %v1504_v39 = vadd.f32 1e-05, %v1503_v38  ;;  %v1783_v38 = vld [vmem:[%s12110_s26 + $0x4] sm:$0xf] }
 0x731   :  { %11590 = vrsqrt.f32 %v1504_v39  ;;  %v11706_v39 = vld [vmem:[%s11768_s9] sm:$0xff] }
 0x73b   :  { %v11591_v40 = vpop.eup %11590 }
 0x73c   :  { %v1506_v42 = vmul.f32 %v11591_v40, %v1498_v28 }
 0x73e   :  { %v1513_v44 = vmul.f32 %v9634_v41, %v1506_v42 }
 0x740   :  { %v1520_v45 = vadd.f32 %v9635_v43, %v1513_v44  ;;  %v1861_v44 = vsel %vm194_vm0, %v1783_v38, 0 }
 0x742   :  { %v1521_v46 = vpack.c.bf16 %v1520_v45, %v1520_v45  ;;  %v1784_v45 = vld [vmem:[%s12110_s26 + $0x8] sm:$0xf] }
 0x744   :  { %10546 = vmatmul.mubr.msk.bf16.vlgmr.msra.gmra.mrb[44].mxu0 %vm194_vm0, %v1521_v46  ;;  %v1904_v46 = vsel %vm194_vm0, %v1784_v45, 0 }
 0x745   :  { %10571 = vmatprep.mubr.msk.bf16.mxu0 %vm11715_vm1, %v11714_v22  ;;  %10570 = vmatpush3.bf16.xpose.msra.mxu0 %v1818_v20  ;;  %v1991_v20 = vld [vmem:[%s12172_s11 + $0x8] sm:$0xf] }
 0x746   :  { %10575 = vmatprep.subr.bf16.mxu0 %v11714_v22 }
 0x817   :  { %v1582_v50 = vpop.f32.mrb[44].mxu0 }
 0x818   :  { %v1583_v51 = vadd.f32 %v9636_v49, %v1582_v50  ;;  %v10547_v52 = vpop.f32.mrb[45].mxu0 }
 0x819   :  { %v1585_v53 = vpop.f32.mrb[46].mxu0 }
 0x81a   :  { %v1588_v54 = vmax.f32 %v1583_v51, 0.0  ;;  %v10548_v55 = vpop.f32.mrb[47].mxu0 }
 0x81b   :  { %v1990_v55 = vld [vmem:[%s12172_s11 + $0x4] sm:$0xf] }
 0x81c   :  { %v1589_v56 = vpack.c.bf16 %v1588_v54, %v1588_v54  ;;  %v1989_v54 = vld [vmem:[%s12172_s11] sm:$0xf]  ;;  %v2068_v57 = vsel %vm194_vm0, %v1990_v55, 0 }
 0x81e   :  { %10566 = vmatmul.mubr.bf16.vlgmr.msra.gmra.mrb[52].mxu1 %v1589_v56  ;;  %v2025_v56 = vsel %vm194_vm0, %v1989_v54, 0 }
 0x81f   :  { %10595 = vmatprep.mubr.msk.bf16.mxu1 %vm11715_vm1, %v11714_v22  ;;  %10594 = vmatpush3.bf16.xpose.msra.mxu1 %v2025_v56 }
 0x820   :  { %10605 = vmatprep.subr.bf16.mxu1 %v11714_v22 }
 0x8f1   :  { %v1688_v60 = vpop.f32.mrb[52].mxu1 }
 0x8f2   :  { %v1694_v63 = vadd.f32 %v1688_v60, %v12021_v23  ;;  %v10567_v0 = vpop.f32.mrb[53].mxu1 }
 0x8f3   :  { %v1691_v1 = vpop.f32.mrb[54].mxu1 }
 0x8f4   :  { %v10568_v2 = vpop.f32.mrb[55].mxu1  ;;  %v1702_v3 = vadd.f32 %v9648_v61, %v1694_v63 }
 0x8f6   :  { %v1705_v5 = vsel %vm194_vm0, %v1702_v3, 0.0 }
 0x8f7   :  { %1706 = vadd.xlane.f32.xlu0 %v1705_v5 }
 0x8fb   :  { %1739 = vadd.xlane.f32.xlu0 %v1738_v7 }
 0x984   :  { %v1707_v8 = vpop.xlane.xlu0 %1706 }
 0x985   :  { %v1708_v9 = vmul.f32 0.03125, %v1707_v8 }
 0x987   :  { %v1709_v10 = vsub.f32 %v1702_v3, %v1708_v9 }
 0x988   :  { %v1740_v11 = vpop.xlane.xlu0 %1739 }
 0x989   :  { %v1710_v12 = vmul.f32 %v1709_v10, %v1709_v10  ;;  %v1741_v13 = vmul.f32 0.03125, %v1740_v11 }
 0x98b   :  { %v1711_v14 = vsel %vm194_vm0, %v1710_v12, 0.0  ;;  %v1742_v15 = vsub.f32 %v12099_v4, %v1741_v13 }
 0x98c   :  { %1712 = vadd.xlane.f32.xlu1 %v1711_v14 }
 0x98d   :  { %v1743_v16 = vmul.f32 %v1742_v15, %v1742_v15 }
 0x98f   :  { %v1744_v17 = vsel %vm194_vm0, %v1743_v16, 0.0 }
 0x990   :  { %1745 = vadd.xlane.f32.xlu0 %v1744_v17 }
 0xa19   :  { %v1713_v59 = vpop.xlane.xlu1 %1712 }
 0xa1a   :  { %v1714_v21 = vmul.f32 0.03125, %v1713_v59  ;;  %v1992_v59 = vld [vmem:[%s12172_s11 + $0xc] sm:$0xf] }
 0xa1c   :  { %v1715_v23 = vadd.f32 1e-05, %v1714_v21 }
 0xa1d   :  { %v1746_v24 = vpop.xlane.xlu0 %1745 }
 0xa1e   :  { %11592 = vrsqrt.f32 %v1715_v23  ;;  %v1747_v25 = vmul.f32 0.03125, %v1746_v24  ;;  %v2111_v24 = vsel %vm194_vm0, %v1991_v20, 0 }
 0xa20   :  { %v1748_v26 = vadd.f32 1e-05, %v1747_v25  ;;  %v2154_v25 = vsel %vm194_vm0, %v1992_v59, 0 }
 0xa22   :  { %11594 = vrsqrt.f32 %v1748_v26  ;;  %v2196_v26 = vld [vmem:[%s12197_s1] sm:$0xf] }
 0xa28   :  { %v11593_v28 = vpop.eup %11592 }
 0xa29   :  { %v1717_v30 = vmul.f32 %v11593_v28, %v1709_v10  ;;  %v2197_v28 = vld [vmem:[%s12197_s1 + $0x4] sm:$0xf] }
 0xa2b   :  { %v1724_v31 = vmul.f32 %v9649_v29, %v1717_v30  ;;  %v2229_v29 = vsel %vm194_vm0, %v2196_v26, 0  ;;  %v2272_v30 = vsel %vm194_vm0, %v2197_v28, 0 }
 0xa2c   :  { %v11595_v32 = vpop.eup %11594 }
 0xa2d   :  { %v1731_v33 = vadd.f32 %v9650_v6, %v1724_v31  ;;  %v1750_v34 = vmul.f32 %v11595_v32, %v1742_v15  ;;  %v2198_v6 = vld [vmem:[%s12197_s1 + $0x8] sm:$0xf]  ;;  %v2199_v31 = vld [vmem:[%s12197_s1 + $0xc] sm:$0xf] }
 0xa2e   :  { %v2315_v32 = vsel %vm194_vm0, %v2198_v6, 0 }
 0xa2f   :  { %v1734_v36 = vmul.f32 5.656854, %v1731_v33  ;;  %v1757_v37 = vmul.f32 %v12138_v18, %v1750_v34  ;;  %v9661_v33 = vld [vmem:[%s12243_s2] ss:$0 sm:$0xff]  ;;  %v9662_v34 = vld [vmem:[%s12243_s2 + $0x1] ss:$0 sm:$0xff] }
 0xa31   :  { %v1735_v40 = vadd.f32 %v11706_v39, %v1734_v36  ;;  %v1764_v41 = vadd.f32 %v12141_v35, %v1757_v37 }
 0xa33   :  { %v1766_v42 = vsel %vm194_vm0, %v1735_v40, 0.0  ;;  %v1765_v43 = vpack.c.bf16 %v1764_v41, %v1764_v41 }
 0xa34   :  { %1767 = vadd.xlane.f32.xlu1 %v1766_v42 }
 0xa35   :  { %10572 = vmatmul.mubr.msk.bf16.vlgmr.msra.gmra.mrb[48].mxu0 %vm194_vm0, %v1765_v43 }
 0xa36   :  { %10576 = vmatpush3.bf16.xpose.msra.mxu0 %v1861_v44  ;;  %10577 = vmatprep.mubr.msk.bf16.mxu0 %vm11715_vm1, %v11714_v22 }
 0xa37   :  { %10581 = vmatprep.subr.bf16.mxu0 %v11714_v22 }
 0xa3d   :  { %10578 = vmatmul.mubr.msk.bf16.vlgmr.msra.gmra.mrb[52].mxu0 %vm194_vm0, %v1765_v43 }
 0xa3e   :  { %10582 = vmatpush3.bf16.xpose.msra.mxu0 %v1904_v46  ;;  %10583 = vmatprep.mubr.msk.bf16.mxu0 %vm11715_vm1, %v11714_v22 }
 0xa3f   :  { %10587 = vmatprep.subr.bf16.mxu0 %v11714_v22 }
 0xa45   :  { %10584 = vmatmul.mubr.msk.bf16.vlgmr.msra.gmra.mrb[56].mxu0 %vm194_vm0, %v1765_v43 }
 0xa46   :  { %10588 = vmatpush3.bf16.xpose.msra.mxu0 %v1947_v48  ;;  %10589 = vmatprep.mubr.msk.bf16.mxu0 %vm11715_vm1, %v11714_v22  ;;  %v9654_v48 = vld [vmem:[%s12248_s10 + $0x1] ss:$0 sm:$0xff] }
 0xa47   :  { %10599 = vmatprep.subr.bf16.mxu0 %v11714_v22 }
 0xa4d   :  { %10590 = vmatmul.mubr.msk.bf16.vlgmr.msra.gmra.mrb[60].mxu0 %vm194_vm0, %v1765_v43 }
 0xa4e   :  { %10601 = vmatprep.mubr.msk.bf16.mxu0 %vm11715_vm1, %v11714_v22  ;;  %10600 = vmatpush3.bf16.xpose.msra.mxu0 %v2068_v57 }
 0xa4f   :  { %10611 = vmatprep.subr.bf16.mxu0 %v11714_v22 }
 0xac1   :  { %v1768_v49 = vpop.xlane.xlu1 %1767 }
 0xac2   :  { %v1769_v50 = vmul.f32 0.03125, %v1768_v49 }
 0xac4   :  { %v1770_v51 = vsub.f32 %v1735_v40, %v1769_v50 }
 0xac6   :  { %v1771_v52 = vmul.f32 %v1770_v51, %v1770_v51 }
 0xac8   :  { %v1772_v53 = vsel %vm194_vm0, %v1771_v52, 0.0  ;;  %v9664_v52 = vld [vmem:[%s12243_s2 + $0x3] ss:$0 sm:$0xff] }
 0xac9   :  { %1773 = vadd.xlane.f32.xlu1 %v1772_v53 }
 0xb08   :  { %v12180_v58 = vpop.f32.mrb[48].mxu0 }
 0xb09   :  { %v10573_v60 = vpop.f32.mrb[49].mxu0  ;;  %v1855_v53 = vadd.f32 %v9653_v47, %v12180_v58 }
 0xb0a   :  { %v1857_v61 = vpop.f32.mrb[50].mxu0 }
 0xb0b   :  { %v10574_v62 = vpop.f32.mrb[51].mxu0 }
 0xb10   :  { %v12182_v63 = vpop.f32.mrb[52].mxu0 }
 0xb11   :  { %v10579_v0 = vpop.f32.mrb[53].mxu0  ;;  %v1898_v54 = vadd.f32 %v9654_v48, %v12182_v63 }
 0xb12   :  { %v1900_v1 = vpop.f32.mrb[54].mxu0 }
 0xb13   :  { %v10580_v2 = vpop.f32.mrb[55].mxu0  ;;  %v2401_v58 = vpack.c.bf16 %v1898_v54, %v1898_v54 }
 0xb14   :  { %v2400_v2 = vpack.c.bf16 %v1855_v53, %v1855_v53 }
 0xb18   :  { %v12184_v3 = vpop.f32.mrb[56].mxu0 }
 0xb19   :  { %v10585_v5 = vpop.f32.mrb[57].mxu0 }
 0xb1a   :  { %v1943_v7 = vpop.f32.mrb[58].mxu0 }
 0xb1b   :  { %v10586_v8 = vpop.f32.mrb[59].mxu0 }
 0xb20   :  { %v12186_v9 = vpop.f32.mrb[60].mxu0 }
 0xb21   :  { %v10591_v10 = vpop.f32.mrb[61].mxu0 }
 0xb22   :  { %v1986_v11 = vpop.f32.mrb[62].mxu0  ;;  %v9655_v10 = vld [vmem:[%s12248_s10 + $0x2] ss:$0 sm:$0xff] }
 0xb23   :  { %v10592_v12 = vpop.f32.mrb[63].mxu0  ;;  %v9656_v11 = vld [vmem:[%s12248_s10 + $0x3] ss:$0 sm:$0xff] }
 0xb56   :  { %v1774_v13 = vpop.xlane.xlu1 %1773 }
 0xb57   :  { %v1775_v14 = vmul.f32 0.03125, %v1774_v13 }
 0xb59   :  { %v1776_v15 = vadd.f32 1e-05, %v1775_v14  ;;  %v9669_v14 = vld [vmem:[%s12261_s16] ss:$0 sm:$0xff] }
 0xb5b   :  { %11596 = vrsqrt.f32 %v1776_v15  ;;  %v9670_v15 = vld [vmem:[%s12261_s16 + $0x1] ss:$0 sm:$0xff] }
 0xb65   :  { %v11597_v16 = vpop.eup %11596 }
 0xb66   :  { %v12188_v17 = vmul.f32 %v11597_v16, %v1770_v51  ;;  %v9663_v51 = vld [vmem:[%s12243_s2 + $0x2] ss:$0 sm:$0xff]  ;;  %v1941_v16 = vadd.f32 %v9655_v10, %v12184_v3 }
 0xb68   :  { %v1779_v19 = vmul.f32 %v12138_v18, %v12188_v17  ;;  %v2358_v18 = vsel %vm194_vm0, %v2199_v31, 0  ;;  %v2402_v28 = vpack.c.bf16 %v1941_v16, %v1941_v16 }
 0xb6a   :  { %v1780_v21 = vadd.f32 %v12141_v35, %v1779_v19  ;;  %v1984_v19 = vadd.f32 %v9656_v11, %v12186_v9 }
 0xb6c   :  { %v1781_v23 = vpack.c.bf16 %v1780_v21, %v1780_v21  ;;  %v2403_v9 = vpack.c.bf16 %v1984_v19, %v1984_v19 }
 0xb6e   :  { %10596 = vmatmul.mubr.msk.bf16.vlgmr.msra.gmra.mrb[56].mxu1 %vm194_vm0, %v1781_v23  ;;  %10602 = vmatmul.mubr.msk.bf16.vlgmr.msra.gmra.mrb[64].mxu0 %vm194_vm0, %v1781_v23 }
 0xb6f   :  { %10606 = vmatpush3.bf16.xpose.msra.mxu1 %v2111_v24  ;;  %10612 = vmatpush3.bf16.xpose.msra.mxu0 %v2154_v25 }
 0xb70   :  { %10607 = vmatprep.mubr.msk.bf16.mxu1 %vm11715_vm1, %v11714_v22  ;;  %10613 = vmatprep.mubr.msk.bf16.mxu0 %vm11715_vm1, %v11714_v22 }
 0xb71   :  { %10617 = vmatprep.subr.bf16.mxu1 %v11714_v22  ;;  %10623 = vmatprep.subr.bf16.mxu0 %v11714_v22 }
 0xb76   :  { %10608 = vmatmul.mubr.msk.bf16.vlgmr.msra.gmra.mrb[60].mxu1 %vm194_vm0, %v1781_v23  ;;  %10614 = vmatmul.mubr.msk.bf16.vlgmr.msra.gmra.mrb[68].mxu0 %vm194_vm0, %v1781_v23 }
 0xb77   :  { %10618 = vmatpush3.bf16.xpose.msra.mxu1 %v2229_v29  ;;  %10624 = vmatpush3.bf16.xpose.msra.mxu0 %v2272_v30 }
 0xb78   :  { %10619 = vmatprep.mubr.msk.bf16.mxu1 %vm11715_vm1, %v11714_v22  ;;  %10625 = vmatprep.mubr.msk.bf16.mxu0 %vm11715_vm1, %v11714_v22 }
 0xb79   :  { %10629 = vmatprep.subr.bf16.mxu1 %v11714_v22  ;;  %10635 = vmatprep.subr.bf16.mxu0 %v11714_v22 }
 0xb7e   :  { %10620 = vmatmul.mubr.msk.bf16.vlgmr.msra.gmra.mrb[64].mxu1 %vm194_vm0, %v1781_v23  ;;  %10626 = vmatmul.mubr.msk.bf16.vlgmr.msra.gmra.mrb[72].mxu0 %vm194_vm0, %v1781_v23 }
 0xb7f   :  { %10630 = vmatpush3.bf16.xpose.msra.mxu1 %v2315_v32  ;;  %10636 = vmatpush3.bf16.xpose.msra.mxu0 %v2358_v18 }
 0xb80   :  { %10631 = vmatprep.mubr.msk.bf16.mxu1 %vm11715_vm1, %v11714_v22  ;;  %10637 = vmatprep.mubr.msk.bf16.mxu0 %vm11715_vm1, %v11714_v22 }
 0xb81   :  { %10641 = vmatprep.subr.bf16.mxu1 %v11714_v22  ;;  %10647 = vmatprep.subr.bf16.mxu0 %v11714_v22 }
 0xb86   :  { %10632 = vmatmul.mubr.msk.bf16.vlgmr.msra.gmra.mrb[68].mxu1 %vm194_vm0, %v1781_v23  ;;  %10638 = vmatmul.mubr.msk.bf16.vlgmr.msra.gmra.mrb[76].mxu0 %vm194_vm0, %v1781_v23 }
 0xb87   :  { %10643 = vmatprep.mubr.msk.bf16.mxu1 %vm11715_vm1, %v11714_v22  ;;  %10649 = vmatprep.mubr.msk.bf16.mxu0 %vm11715_vm1, %v11714_v22 }
 0xc41   :  { %v2061_v35 = vpop.f32.mrb[56].mxu1  ;;  %v2104_v36 = vpop.f32.mrb[64].mxu0 }
 0xc42   :  { %v2062_v37 = vadd.f32 %v9661_v33, %v2061_v35  ;;  %v2105_v38 = vadd.f32 %v9662_v34, %v2104_v36  ;;  %v10597_v39 = vpop.f32.mrb[57].mxu1  ;;  %v10603_v40 = vpop.f32.mrb[65].mxu0 }
 0xc43   :  { %v2064_v41 = vpop.f32.mrb[58].mxu1  ;;  %v2107_v42 = vpop.f32.mrb[66].mxu0 }
 0xc44   :  { %v2404_v43 = vpack.c.bf16 %v2062_v37, %v2062_v37  ;;  %v2405_v44 = vpack.c.bf16 %v2105_v38, %v2105_v38  ;;  %v10598_v45 = vpop.f32.mrb[59].mxu1  ;;  %v10604_v46 = vpop.f32.mrb[67].mxu0 }
 0xc46   :  { %v2412_v49 = vsel %vm866_vm2, %v2404_v43, 0  ;;  %v2458_v50 = vsel %vm866_vm2, %v2405_v44, 0 }
 0xc47   :  { %10642 = vmatpush3.bf16.xpose.msra.mxu1 %v2412_v49  ;;  %10648 = vmatpush3.bf16.xpose.msra.mxu0 %v2458_v50 }
 0xc48   :  { %10653 = vmatprep.subr.bf16.mxu1 %v11714_v22  ;;  %10659 = vmatprep.subr.bf16.mxu0 %v11714_v22 }
 0xc49   :  { %v2147_v55 = vpop.f32.mrb[60].mxu1  ;;  %v2190_v56 = vpop.f32.mrb[68].mxu0 }
 0xc4a   :  { %v2148_v57 = vadd.f32 %v9663_v51, %v2147_v55  ;;  %v2191_v60 = vadd.f32 %v9664_v52, %v2190_v56  ;;  %v10609_v61 = vpop.f32.mrb[61].mxu1  ;;  %v10615_v62 = vpop.f32.mrb[69].mxu0 }
 0xc4b   :  { %v2150_v0 = vpop.f32.mrb[62].mxu1  ;;  %v2193_v1 = vpop.f32.mrb[70].mxu0 }
 0xc4c   :  { %v2406_v5 = vpack.c.bf16 %v2148_v57, %v2148_v57  ;;  %v2407_v63 = vpack.c.bf16 %v2191_v60, %v2191_v60  ;;  %v10610_v7 = vpop.f32.mrb[63].mxu1  ;;  %v10616_v8 = vpop.f32.mrb[71].mxu0 }
 0xc4e   :  { %v2504_v12 = vsel %vm866_vm2, %v2406_v5, 0  ;;  %v2550_v13 = vsel %vm866_vm2, %v2407_v63, 0  ;;  %10644 = vmatmul.mubr.msk.bf16.vlgmr.msra.gmra.mrb[72].mxu1 %vm866_vm2, %v2400_v2  ;;  %10650 = vmatmul.mubr.msk.bf16.vlgmr.msra.gmra.mrb[80].mxu0 %vm866_vm2, %v2401_v58 }
 0xc4f   :  { %10654 = vmatpush3.bf16.xpose.msra.mxu1 %v2504_v12  ;;  %10660 = vmatpush3.bf16.xpose.msra.mxu0 %v2550_v13 }
 0xc50   :  { %10655 = vmatprep.mubr.msk.bf16.mxu1 %vm11715_vm1, %v11714_v22  ;;  %10661 = vmatprep.mubr.msk.bf16.mxu0 %vm11715_vm1, %v11714_v22 }
 0xc51   :  { %v2265_v20 = vpop.f32.mrb[64].mxu1  ;;  %v2308_v59 = vpop.f32.mrb[72].mxu0  ;;  %10665 = vmatprep.subr.bf16.mxu1 %v11714_v22  ;;  %10671 = vmatprep.subr.bf16.mxu0 %v11714_v22 }
 0xc52   :  { %v2266_v21 = vadd.f32 %v9669_v14, %v2265_v20  ;;  %v2309_v23 = vadd.f32 %v9670_v15, %v2308_v59  ;;  %v10621_v24 = vpop.f32.mrb[65].mxu1  ;;  %v10627_v25 = vpop.f32.mrb[73].mxu0 }
 0xc53   :  { %v2268_v26 = vpop.f32.mrb[66].mxu1  ;;  %v2311_v3 = vpop.f32.mrb[74].mxu0 }
 0xc54   :  { %v2640_v29 = vpack.c.bf16 %v2266_v21, %v2266_v21  ;;  %v2641_v30 = vpack.c.bf16 %v2309_v23, %v2309_v23  ;;  %v10622_v6 = vpop.f32.mrb[67].mxu1  ;;  %v10628_v31 = vpop.f32.mrb[75].mxu0 }
 0xc56   :  { %v2648_v32 = vsel %vm1106_vm3, %v2640_v29, 0  ;;  %v2694_v18 = vsel %vm1106_vm3, %v2641_v30, 0  ;;  %10656 = vmatmul.mubr.msk.bf16.vlgmr.msra.gmra.mrb[76].mxu1 %vm866_vm2, %v2402_v28  ;;  %10662 = vmatmul.mubr.msk.bf16.vlgmr.msra.gmra.mrb[84].mxu0 %vm866_vm2, %v2403_v9  ;;  %v9671_v29 = vld [vmem:[%s12261_s16 + $0x2] ss:$0 sm:$0xff]  ;;  %v9672_v30 = vld [vmem:[%s12261_s16 + $0x3] ss:$0 sm:$0xff] }
 0xc57   :  { %10666 = vmatpush3.bf16.msra.mxu1 %v2648_v32  ;;  %10672 = vmatpush3.bf16.msra.mxu0 %v2694_v18 }
 0xc58   :  { %10667 = vmatprep.mubr.msk.bf16.mxu1 %vm11715_vm1, %v11714_v22  ;;  %10673 = vmatprep.mubr.msk.bf16.mxu0 %vm11715_vm1, %v11714_v22 }
 0xc59   :  { %v12291_v33 = vpop.f32.mrb[68].mxu1  ;;  %v12293_v34 = vpop.f32.mrb[76].mxu0  ;;  %10677 = vmatprep.subr.bf16.mxu1 %v11714_v22  ;;  %10683 = vmatprep.subr.bf16.mxu0 %v11714_v22 }
 0xc5a   :  { %v10633_v35 = vpop.f32.mrb[69].mxu1  ;;  %v10639_v36 = vpop.f32.mrb[77].mxu0  ;;  %v2352_v6 = vadd.f32 %v9671_v29, %v12291_v33  ;;  %v2395_v32 = vadd.f32 %v9672_v30, %v12293_v34 }
 0xc5b   :  { %v2354_v37 = vpop.f32.mrb[70].mxu1  ;;  %v2397_v38 = vpop.f32.mrb[78].mxu0 }
 0xc5c   :  { %v10634_v39 = vpop.f32.mrb[71].mxu1  ;;  %v10640_v40 = vpop.f32.mrb[79].mxu0  ;;  %v2642_v37 = vpack.c.bf16 %v2352_v6, %v2352_v6 }
 0xc5d   :  { %v2643_v39 = vpack.c.bf16 %v2395_v32, %v2395_v32 }
 0xc5e   :  { %v2740_v34 = vsel %vm1106_vm3, %v2642_v37, 0  ;;  %v9689_v37 = vld [vmem:[%s12361_s7] ss:$0 sm:$0xff] }
 0xd21   :  { %v2448_v41 = vpop.f32.mrb[72].mxu1  ;;  %v2494_v42 = vpop.f32.mrb[80].mxu0 }
 0xd22   :  { %v2449_v43 = vadd.f32 %v2448_v41, %v11951_v27  ;;  %v2495_v44 = vadd.f32 %v2494_v42, %v11951_v27  ;;  %v10645_v45 = vpop.f32.mrb[73].mxu1  ;;  %v10651_v46 = vpop.f32.mrb[81].mxu0  ;;  %v2786_v42 = vsel %vm1106_vm3, %v2643_v39, 0 }
 0xd23   :  { %v2451_v47 = vpop.f32.mrb[74].mxu1  ;;  %v2497_v48 = vpop.f32.mrb[82].mxu0 }
 0xd24   :  { %v10646_v49 = vpop.f32.mrb[75].mxu1  ;;  %v10652_v50 = vpop.f32.mrb[83].mxu0  ;;  %v2592_v51 = vsel %vm866_vm2, %v2449_v43, -inf  ;;  %v2595_v52 = vsel %vm866_vm2, %v2495_v44, -inf  ;;  %v2833_v47 = vld [vmem:[%s12316_s15 + $0x4] sm:$0xf] }
 0xd25   :  { %2593 = vmax.xlane.f32.xlu0 %v2592_v51  ;;  %2596 = vmax.xlane.f32.xlu1 %v2595_v52  ;;  %v2886_v52 = vsel %vm1106_vm3, %v2833_v47, 0  ;;  %v11523_v47 = vld [vmem:[%s12384_s30 + $0x8] sm:$0xff]  }
 0xd29   :  { %v2540_v53 = vpop.f32.mrb[76].mxu1  ;;  %v2586_v54 = vpop.f32.mrb[84].mxu0 }
 0xd2a   :  { %v2541_v55 = vadd.f32 %v2540_v53, %v11951_v27  ;;  %v2587_v56 = vadd.f32 %v2586_v54, %v11951_v27  ;;  %v10657_v57 = vpop.f32.mrb[77].mxu1  ;;  %v10663_v60 = vpop.f32.mrb[85].mxu0  ;;  %v2834_v53 = vld [vmem:[%s12316_s15 + $0x8] sm:$0xf]  ;;  %v2835_v54 = vld [vmem:[%s12316_s15 + $0xc] sm:$0xf] }
 0xd2b   :  { %v2543_v61 = vpop.f32.mrb[78].mxu1  ;;  %v2589_v62 = vpop.f32.mrb[86].mxu0 }
 0xd2c   :  { %v10658_v0 = vpop.f32.mrb[79].mxu1  ;;  %v10664_v1 = vpop.f32.mrb[87].mxu0  ;;  %v2598_v2 = vsel %vm866_vm2, %v2541_v55, -inf  ;;  %v2601_v58 = vsel %vm866_vm2, %v2587_v56, -inf  ;;  %v2932_v61 = vsel %vm1106_vm3, %v2834_v53, 0  ;;  %v11529_v53 = vld [vmem:[%s12384_s30 + $0x38] sm:$0xff]  }
 0xd2d   :  { %2599 = vmax.xlane.f32.xlu0 %v2598_v2  ;;  %2602 = vmax.xlane.f32.xlu1 %v2601_v58  ;;  %v2978_v2 = vsel %vm1106_vm3, %v2835_v54, 0 }
 0xdb2   :  { %v2594_v5 = vpop.xlane.xlu0 %2593  ;;  %v2597_v63 = vpop.xlane.xlu1 %2596 }
 0xdb3   :  { %v2604_v7 = vsub.f32 %v2449_v43, %v2594_v5  ;;  %v2605_v8 = vsub.f32 %v2495_v44, %v2597_v63  ;;  %v2832_v44 = vld [vmem:[%s12316_s15] sm:$0xf] }
 0xdb4   :  { %v2840_v50 = vsel %vm1106_vm3, %v2832_v44, 0 }
 0xdb5   :  { %v2608_v10 = vmul.f32 1.442695, %v2604_v7  ;;  %v2610_v11 = vmul.f32 1.442695, %v2605_v8 }
 0xdb7   :  { %11598 = vpow2.f32 %v2608_v10 }
 0xdb8   :  { %11600 = vpow2.f32 %v2610_v11 }
 0xdba   :  { %v2600_v12 = vpop.xlane.xlu0 %2599  ;;  %v2603_v13 = vpop.xlane.xlu1 %2602 }
 0xdbb   :  { %v2606_v14 = vsub.f32 %v2541_v55, %v2600_v12  ;;  %v2607_v15 = vsub.f32 %v2587_v56, %v2603_v13 }
 0xdbd   :  { %v2612_v16 = vmul.f32 1.442695, %v2606_v14  ;;  %v2614_v19 = vmul.f32 1.442695, %v2607_v15 }
 0xdbf   :  { %11602 = vpow2.f32 %v2612_v16 }
 0xdc0   :  { %11604 = vpow2.f32 %v2614_v19 }
 0xdc1   :  { %v11599_v20 = vpop.eup %11598 }
 0xdc2   :  { %v11601_v59 = vpop.eup %11600  ;;  %v2616_v21 = vsel %vm866_vm2, %v11599_v20, 0.0 }
 0xdc3   :  { %2617 = vadd.xlane.f32.xlu0 %v2616_v21  ;;  %v2619_v23 = vsel %vm866_vm2, %v11601_v59, 0.0 }
 0xdc4   :  { %2620 = vadd.xlane.f32.xlu1 %v2619_v23 }
 0xdc9   :  { %v11603_v24 = vpop.eup %11602 }
 0xdca   :  { %v11605_v25 = vpop.eup %11604  ;;  %v2622_v26 = vsel %vm866_vm2, %v11603_v24, 0.0 }
 0xdcb   :  { %2623 = vadd.xlane.f32.xlu0 %v2622_v26  ;;  %v2625_v3 = vsel %vm866_vm2, %v11605_v25, 0.0 }
 0xdcc   :  { %2626 = vadd.xlane.f32.xlu1 %v2625_v3 }
 0xe50   :  { %v2618_v28 = vpop.xlane.xlu0 %2617 }
 0xe51   :  { %11606 = vrcp.f32 %v2618_v28  ;;  %v2621_v9 = vpop.xlane.xlu1 %2620 }
 0xe52   :  { %11608 = vrcp.f32 %v2621_v9 }
 0xe58   :  { %v2624_v31 = vpop.xlane.xlu0 %2623 }
 0xe59   :  { %11610 = vrcp.f32 %v2624_v31  ;;  %v2627_v18 = vpop.xlane.xlu1 %2626 }
 0xe5a   :  { %11612 = vrcp.f32 %v2627_v18 }
 0xe5b   :  { %v11607_v35 = vpop.eup %11606 }
 0xe5c   :  { %v11609_v36 = vpop.eup %11608  ;;  %v2632_v38 = vmul.f32 %v11607_v35, %v11599_v20 }
 0xe5d   :  { %v2633_v40 = vmul.f32 %v11609_v36, %v11601_v59 }
 0xe5e   :  { %v2636_v33 = vpack.c.bf16 %v2632_v38, %v2632_v38 }
 0xe5f   :  { %v2637_v41 = vpack.c.bf16 %v2633_v40, %v2633_v40 }
 0xe60   :  { %10668 = vmatmul.mubr.msk.bf16.vlgmr.msra.gmra.mrb[80].mxu1 %vm866_vm2, %v2636_v33 }
 0xe61   :  { %10674 = vmatmul.mubr.msk.bf16.vlgmr.msra.gmra.mrb[88].mxu0 %vm866_vm2, %v2637_v41  ;;  %10678 = vmatpush3.bf16.msra.mxu1 %v2740_v34 }
 0xe62   :  { %10684 = vmatpush3.bf16.msra.mxu0 %v2786_v42  ;;  %10679 = vmatprep.mubr.msk.bf16.mxu1 %vm11715_vm1, %v11714_v22 }
 0xe63   :  { %v11611_v43 = vpop.eup %11610  ;;  %10685 = vmatprep.mubr.msk.bf16.mxu0 %vm11715_vm1, %v11714_v22  ;;  %10689 = vmatprep.subr.bf16.mxu1 %v11714_v22 }
 0xe64   :  { %v11613_v45 = vpop.eup %11612  ;;  %v2634_v46 = vmul.f32 %v11611_v43, %v11603_v24  ;;  %10695 = vmatprep.subr.bf16.mxu0 %v11714_v22 }
 0xe65   :  { %v2635_v48 = vmul.f32 %v11613_v45, %v11605_v25  ;;  %v11521_v45 = vld [vmem:[%s12375_s22 + $0x8] sm:$0xff]  }
 0xe66   :  { %v2638_v49 = vpack.c.bf16 %v2634_v46, %v2634_v46  ;;  %v11522_v46 = vld [vmem:[%s12384_s30] sm:$0xff]  }
 0xe67   :  { %v2639_v51 = vpack.c.bf16 %v2635_v48, %v2635_v48  ;;  %v11524_v48 = vld [vmem:[%s12384_s30 + $0x10] sm:$0xff]  }
 0xe68   :  { %10680 = vmatmul.mubr.msk.bf16.vlgmr.msra.gmra.mrb[84].mxu1 %vm866_vm2, %v2638_v49  ;;  %v11525_v49 = vld [vmem:[%s12384_s30 + $0x18] sm:$0xff]  }
 0xe69   :  { %10686 = vmatmul.mubr.msk.bf16.vlgmr.msra.gmra.mrb[92].mxu0 %vm866_vm2, %v2639_v51  ;;  %10690 = vmatpush3.bf16.msra.mxu1 %v2840_v50  ;;  %v11526_v50 = vld [vmem:[%s12384_s30 + $0x20] sm:$0xff]   ;;  %v11527_v51 = vld [vmem:[%s12384_s30 + $0x28] sm:$0xff]  }
 0xe6a   :  { %10696 = vmatpush3.bf16.msra.mxu0 %v2886_v52  ;;  %10691 = vmatprep.mubr.msk.bf16.mxu1 %vm11715_vm1, %v11714_v22  ;;  %v11528_v52 = vld [vmem:[%s12384_s30 + $0x30] sm:$0xff]  }
 0xe6b   :  { %10697 = vmatprep.mubr.msk.bf16.mxu0 %vm11715_vm1, %v11714_v22  ;;  %10701 = vmatprep.subr.bf16.mxu1 %v11714_v22 }
 0xe6c   :  { %10707 = vmatprep.subr.bf16.mxu0 %v11714_v22 }
 0xf33   :  { %v2684_v55 = vpop.f32.mrb[80].mxu1 }
 0xf34   :  { %v2828_v56 = vpack.c.bf16 %v2684_v55, %v2684_v55  ;;  %v2730_v57 = vpop.f32.mrb[88].mxu0  ;;  %v10669_v60 = vpop.f32.mrb[81].mxu1 }
 0xf35   :  { %v2829_v62 = vpack.c.bf16 %v2730_v57, %v2730_v57  ;;  %v10675_v0 = vpop.f32.mrb[89].mxu0  ;;  %v2687_v1 = vpop.f32.mrb[82].mxu1  ;;  %v9690_v60 = vld [vmem:[%s12405_s18] ss:$0 sm:$0xff] }
 0xf36   :  { %v2733_v58 = vpop.f32.mrb[90].mxu0  ;;  %v10670_v5 = vpop.f32.mrb[83].mxu1  ;;  %10692 = vmatmul.mubr.msk.bf16.vlgmr.msra.gmra.mrb[88].mxu1 %vm866_vm2, %v2828_v56 }
 0xf37   :  { %v10676_v63 = vpop.f32.mrb[91].mxu0  ;;  %10698 = vmatmul.mubr.msk.bf16.vlgmr.msra.gmra.mrb[96].mxu0 %vm866_vm2, %v2829_v62  ;;  %10702 = vmatpush3.bf16.msra.mxu1 %v2932_v61  ;;  %v9691_v62 = vld [vmem:[%s12410_s19] ss:$0 sm:$0xff] }
 0xf38   :  { %10708 = vmatpush3.bf16.msra.mxu0 %v2978_v2  ;;  %10703 = vmatprep.mubr.msk.bf16.mxu1 %vm11715_vm1, %v11714_v22  ;;  %v9692_v58 = vld [vmem:[%s12420_s27] ss:$0 sm:$0xff] }
 0xf39   :  { %10709 = vmatprep.mubr.msk.bf16.mxu0 %vm11715_vm1, %v11714_v22  ;;  %10713 = vmatprep.subr.bf16.mxu1 %v11714_v22 }
 0xf3a   :  { %10721 = vmatprep.subr.bf16.mxu0 %v11714_v22 }
 0xf3b   :  { %v2776_v7 = vpop.f32.mrb[84].mxu1 }
 0xf3c   :  { %v2830_v8 = vpack.c.bf16 %v2776_v7, %v2776_v7  ;;  %v2822_v10 = vpop.f32.mrb[92].mxu0  ;;  %v10681_v11 = vpop.f32.mrb[85].mxu1 }
 0xf3d   :  { %v2831_v12 = vpack.c.bf16 %v2822_v10, %v2822_v10  ;;  %v10687_v13 = vpop.f32.mrb[93].mxu0  ;;  %v2779_v14 = vpop.f32.mrb[86].mxu1  ;;  %v9725_v11 = vld [vmem:[%s12172_s11 + $0x10] sm:$0xf] }
 0xf3e   :  { %v2825_v15 = vpop.f32.mrb[94].mxu0  ;;  %v10682_v16 = vpop.f32.mrb[87].mxu1  ;;  %10704 = vmatmul.mubr.msk.bf16.vlgmr.msra.gmra.mrb[92].mxu1 %vm866_vm2, %v2830_v8  ;;  %v12424_v8 = vld [vmem:[%s12128_s20 + $0x1] ss:$0 sm:$0xff] }
 0xf3f   :  { %v10688_v19 = vpop.f32.mrb[95].mxu0  ;;  %10710 = vmatmul.mubr.msk.bf16.vlgmr.msra.gmra.mrb[100].mxu0 %vm866_vm2, %v2831_v12  ;;  %10717 = vmatprep.mubr.msk.bf16.mxu1 %vm11715_vm1, %v11714_v22  ;;  %v3275_v14 = vmul.f32 %v12424_v8, %v12188_v17  ;;  %v3525_v16 = vsel %vm194_vm0, %v9725_v11, 0 }
 0xf40   :  { %10737 = vmatprep.mubr.msk.bf16.mxu0 %vm11715_vm1, %v11714_v22  ;;  %10722 = vmatpush3.bf16.msra.mxu0 %v11522_v46  ;;  %v12431_v19 = vld [vmem:[%s12133_s12 + $0x1] ss:$0 sm:$0xff] }
 0xf41   :  { %10723 = vmatprep.subr.bf16.mxu0 %v11714_v22 }
 0xf44   :  { %10724 = vmatpush3.bf16.msra.mxu0 %v11523_v47 }
 0xf45   :  { %10725 = vmatprep.subr.bf16.mxu0 %v11714_v22 }
 0xf48   :  { %10726 = vmatpush3.bf16.msra.mxu0 %v11524_v48 }
 0xf49   :  { %10727 = vmatprep.subr.bf16.mxu0 %v11714_v22 }
 0xf4c   :  { %10728 = vmatpush3.bf16.msra.mxu0 %v11525_v49 }
 0xf4d   :  { %10729 = vmatprep.subr.bf16.mxu0 %v11714_v22 }
 0xf50   :  { %10730 = vmatpush3.bf16.msra.mxu0 %v11526_v50 }
 0xf51   :  { %10731 = vmatprep.subr.bf16.mxu0 %v11714_v22 }
 0xf54   :  { %10732 = vmatpush3.bf16.msra.mxu0 %v11527_v51 }
 0xf55   :  { %10733 = vmatprep.subr.bf16.mxu0 %v11714_v22 }
 0xf58   :  { %10734 = vmatpush3.bf16.msra.mxu0 %v11528_v52 }
 0xf59   :  { %10735 = vmatprep.subr.bf16.mxu0 %v11714_v22 }
 0xf5c   :  { %10736 = vmatpush3.bf16.msra.mxu0 %v11529_v53 }
 0xf5d   :  { %10765 = vmatprep.subr.bf16.mxu0 %v11714_v22 }
0x1009   :  { %v2876_v20 = vpop.f32.mrb[88].mxu1 }
0x100a   :  { %v2922_v59 = vpop.f32.mrb[96].mxu0  ;;  %v10693_v21 = vpop.f32.mrb[89].mxu1 }
0x100b   :  { %v3020_v23 = vadd.f32 %v2922_v59, %v2876_v20  ;;  %v10699_v24 = vpop.f32.mrb[97].mxu0  ;;  %v2879_v25 = vpop.f32.mrb[90].mxu1  ;;  %v3276_v20 = vadd.f32 %v12431_v19, %v3275_v14  ;;  %v9727_v59 = vld [vmem:[%s12172_s11 + $0x18] sm:$0xf] }
0x100c   :  { %v2925_v26 = vpop.f32.mrb[98].mxu0  ;;  %v10694_v3 = vpop.f32.mrb[91].mxu1  ;;  %v3611_v17 = vsel %vm194_vm0, %v9727_v59, 0  ;;  %v9743_v25 = vld [vmem:[%s12197_s1 + $0x18] sm:$0xf] }
0x100d   :  { %v10700_v28 = vpop.f32.mrb[99].mxu0  ;;  %v12438_v21 = vpack.c.bf16 %v3276_v20, %v3276_v20  ;;  %v3817_v26 = vsel %vm194_vm0, %v9743_v25, 0  ;;  %v9744_v59 = vld [vmem:[%s12197_s1 + $0x1c] sm:$0xf]  ;;  %v9717_v25 = vld [vmem:[%s12248_s10 + $0x4] ss:$0 sm:$0xff] }
0x100e   :  { %v9704_v28 = vld [vmem:[%s12467_s24] ss:$0 sm:$0xff] }
0x1011   :  { %v2968_v9 = vpop.f32.mrb[92].mxu1 }
0x1012   :  { %v3021_v29 = vadd.f32 %v3020_v23, %v2968_v9  ;;  %v3014_v30 = vpop.f32.mrb[100].mxu0  ;;  %v10705_v6 = vpop.f32.mrb[93].mxu1  ;;  %v9741_v23 = vld [vmem:[%s12197_s1 + $0x10] sm:$0xf] }
0x1013   :  { %v10711_v31 = vpop.f32.mrb[101].mxu0  ;;  %v2971_v32 = vpop.f32.mrb[94].mxu1  ;;  %v3731_v24 = vsel %vm194_vm0, %v9741_v23, 0  ;;  %v9735_v23 = vld [vmem:[%s12243_s2 + $0x6] ss:$0 sm:$0xff] }
0x1014   :  { %v3022_v18 = vadd.f32 %v3021_v29, %v3014_v30  ;;  %v3017_v35 = vpop.f32.mrb[102].mxu0  ;;  %v10706_v36 = vpop.f32.mrb[95].mxu1 }
0x1015   :  { %v10712_v38 = vpop.f32.mrb[103].mxu0 }
0x1016   :  { %v3023_v39 = vadd.f32 %v3022_v18, %v12099_v4  ;;  %v11520_v4 = vld [vmem:[%s12375_s22] sm:$0xff]  }
0x1017   :  { %10714 = vmatpush3.bf16.msra.mxu1 %v11520_v4  ;;  %v9733_v18 = vld [vmem:[%s12243_s2 + $0x4] ss:$0 sm:$0xff] }
0x1018   :  { %v12365_v40 = vadd.f32 %v9689_v37, %v3023_v39  ;;  %10715 = vmatprep.subr.bf16.mxu1 %v11714_v22 }
0x101a   :  { %v3034_v33 = vsel %vm194_vm0, %v12365_v40, 0.0 }
0x101b   :  { %3035 = vadd.xlane.f32.xlu0 %v3034_v33  ;;  %10716 = vmatpush3.bf16.msra.mxu1 %v11521_v45 }
0x101c   :  { %10741 = vmatprep.subr.bf16.mxu1 %v11714_v22 }
0x10a8   :  { %v3036_v41 = vpop.xlane.xlu0 %3035 }
0x10a9   :  { %v3037_v34 = vmul.f32 0.03125, %v3036_v41 }
0x10ab   :  { %v3038_v42 = vsub.f32 %v12365_v40, %v3037_v34 }
0x10ad   :  { %v3039_v43 = vmul.f32 %v3038_v42, %v3038_v42 }
0x10af   :  { %v3040_v44 = vsel %vm194_vm0, %v3039_v43, 0.0 }
0x10b0   :  { %3041 = vadd.xlane.f32.xlu1 %v3040_v44 }
0x113d   :  { %v3042_v54 = vpop.xlane.xlu1 %3041 }
0x113e   :  { %v3043_v55 = vmul.f32 0.03125, %v3042_v54 }
0x1140   :  { %v3044_v56 = vadd.f32 1e-05, %v3043_v55 }
0x1142   :  { %11614 = vrsqrt.f32 %v3044_v56  ;;  %v9709_v56 = vld [vmem:[%s12110_s26 + $0x10] sm:$0xf] }
0x114c   :  { %v11615_v57 = vpop.eup %11614 }
0x114d   :  { %v3046_v61 = vmul.f32 %v11615_v57, %v3038_v42  ;;  %v3316_v57 = vsel %vm194_vm0, %v9709_v56, 0 }
0x114f   :  { %v3053_v0 = vmul.f32 %v9690_v60, %v3046_v61 }
0x1151   :  { %v3060_v1 = vadd.f32 %v9691_v62, %v3053_v0 }
0x1153   :  { %v3061_v2 = vpack.c.bf16 %v3060_v1, %v3060_v1 }
0x1155   :  { %10718 = vmatmul.mubr.msk.bf16.vlgmr.msra.gmra.mrb[96].mxu1 %vm194_vm0, %v3061_v2 }
0x1156   :  { %10743 = vmatprep.mubr.msk.bf16.mxu1 %vm11715_vm1, %v11714_v22  ;;  %10742 = vmatpush3.bf16.xpose.msra.mxu1 %v3316_v57  ;;  %v9718_v57 = vld [vmem:[%s12248_s10 + $0x5] ss:$0 sm:$0xff] }
0x1157   :  { %10747 = vmatprep.subr.bf16.mxu1 %v11714_v22 }
0x1228   :  { %v3122_v5 = vpop.f32.mrb[96].mxu1 }
0x1229   :  { %v3123_v63 = vadd.f32 %v9692_v58, %v3122_v5  ;;  %v10719_v7 = vpop.f32.mrb[97].mxu1  ;;  %v9710_v58 = vld [vmem:[%s12110_s26 + $0x14] sm:$0xf] }
0x122a   :  { %v3125_v10 = vpop.f32.mrb[98].mxu1  ;;  %v3359_v7 = vsel %vm194_vm0, %v9710_v58, 0 }
0x122b   :  { %v3128_v12 = vmax.f32 %v3123_v63, 0.0  ;;  %v10720_v13 = vpop.f32.mrb[99].mxu1  ;;  %v9711_v10 = vld [vmem:[%s12110_s26 + $0x18] sm:$0xf] }
0x122c   :  { %v3402_v11 = vsel %vm194_vm0, %v9711_v10, 0  ;;  %v9726_v13 = vld [vmem:[%s12172_s11 + $0x14] sm:$0xf]  ;;  %v9720_v10 = vld [vmem:[%s12248_s10 + $0x7] ss:$0 sm:$0xff] }
0x122d   :  { %v3129_v15 = vpack.c.bf16 %v3128_v12, %v3128_v12  ;;  %v3568_v14 = vsel %vm194_vm0, %v9726_v13, 0 }
0x122f   :  { %10738 = vmatmul.mubr.bf16.vlgmr.msra.gmra.mrb[104].mxu0 %v3129_v15  ;;  %v9728_v15 = vld [vmem:[%s12172_s11 + $0x1c] sm:$0xf] }
0x1230   :  { %10766 = vmatpush3.bf16.xpose.msra.mxu0 %v3525_v16  ;;  %10767 = vmatprep.mubr.msk.bf16.mxu0 %vm11715_vm1, %v11714_v22  ;;  %v3654_v16 = vsel %vm194_vm0, %v9728_v15, 0 }
0x1231   :  { %10777 = vmatprep.subr.bf16.mxu0 %v11714_v22 }
0x1237   :  { %10768 = vmatmul.mubr.msk.bf16.vlgmr.msra.gmra.mrb[108].mxu0 %vm194_vm0, %v12438_v21 }
0x1238   :  { %10778 = vmatpush3.bf16.xpose.msra.mxu0 %v3611_v17  ;;  %10779 = vmatprep.mubr.msk.bf16.mxu0 %vm11715_vm1, %v11714_v22  ;;  %v3860_v17 = vsel %vm194_vm0, %v9744_v59, 0 }
0x1239   :  { %10789 = vmatprep.subr.bf16.mxu0 %v11714_v22 }
0x123f   :  { %10780 = vmatmul.mubr.msk.bf16.vlgmr.msra.gmra.mrb[112].mxu0 %vm194_vm0, %v12438_v21 }
0x1240   :  { %10790 = vmatpush3.bf16.xpose.msra.mxu0 %v3731_v24  ;;  %10791 = vmatprep.mubr.msk.bf16.mxu0 %vm11715_vm1, %v11714_v22 }
0x1241   :  { %10801 = vmatprep.subr.bf16.mxu0 %v11714_v22 }
0x1247   :  { %10792 = vmatmul.mubr.msk.bf16.vlgmr.msra.gmra.mrb[116].mxu0 %vm194_vm0, %v12438_v21 }
0x1248   :  { %10802 = vmatpush3.bf16.xpose.msra.mxu0 %v3817_v26  ;;  %10803 = vmatprep.mubr.msk.bf16.mxu0 %vm11715_vm1, %v11714_v22 }
0x1249   :  { %10813 = vmatprep.subr.bf16.mxu0 %v11714_v22 }
0x124f   :  { %10804 = vmatmul.mubr.msk.bf16.vlgmr.msra.gmra.mrb[120].mxu0 %vm194_vm0, %v12438_v21 }
0x1250   :  { %10815 = vmatprep.mubr.msk.bf16.mxu0 %vm11715_vm1, %v11714_v22 }
0x1302   :  { %v3228_v3 = vpop.f32.mrb[104].mxu0 }
0x1303   :  { %v3234_v9 = vadd.f32 %v3228_v3, %v12365_v40  ;;  %v10739_v29 = vpop.f32.mrb[105].mxu0 }
0x1304   :  { %v3231_v30 = vpop.f32.mrb[106].mxu0 }
0x1305   :  { %v12471_v6 = vadd.f32 %v9704_v28, %v3234_v9  ;;  %v10740_v31 = vpop.f32.mrb[107].mxu0 }
0x1307   :  { %v3247_v32 = vsel %vm194_vm0, %v12471_v6, 0.0 }
0x1308   :  { %3248 = vadd.xlane.f32.xlu0 %v3247_v32 }
0x130a   :  { %v3561_v35 = vpop.f32.mrb[108].mxu0 }
0x130b   :  { %v3562_v36 = vadd.f32 %v9733_v18, %v3561_v35  ;;  %v10769_v37 = vpop.f32.mrb[109].mxu0  ;;  %v9749_v35 = vld [vmem:[%s12261_s16 + $0x4] ss:$0 sm:$0xff] }
0x130c   :  { %v3564_v38 = vpop.f32.mrb[110].mxu0 }
0x130d   :  { %v3906_v39 = vpack.c.bf16 %v3562_v36, %v3562_v36  ;;  %v10770_v33 = vpop.f32.mrb[111].mxu0 }
0x130f   :  { %v3914_v41 = vsel %vm866_vm2, %v3906_v39, 0  ;;  %v9719_v39 = vld [vmem:[%s12248_s10 + $0x6] ss:$0 sm:$0xff] }
0x1310   :  { %10814 = vmatpush3.bf16.xpose.msra.mxu0 %v3914_v41 }
0x1311   :  { %10825 = vmatprep.subr.bf16.mxu0 %v11714_v22 }
0x1312   :  { %v12478_v40 = vpop.f32.mrb[112].mxu0 }
0x1313   :  { %v10781_v34 = vpop.f32.mrb[113].mxu0  ;;  %v3648_v24 = vadd.f32 %v9735_v23, %v12478_v40 }
0x1314   :  { %v3650_v42 = vpop.f32.mrb[114].mxu0 }
0x1315   :  { %v10782_v43 = vpop.f32.mrb[115].mxu0  ;;  %v3908_v3 = vpack.c.bf16 %v3648_v24, %v3648_v24 }
0x1317   :  { %v4006_v32 = vsel %vm866_vm2, %v3908_v3, 0 }
0x131a   :  { %v12480_v44 = vpop.f32.mrb[116].mxu0 }
0x131b   :  { %v10793_v4 = vpop.f32.mrb[117].mxu0  ;;  %v3768_v38 = vadd.f32 %v9749_v35, %v12480_v44 }
0x131c   :  { %v3770_v45 = vpop.f32.mrb[118].mxu0 }
0x131d   :  { %v10794_v46 = vpop.f32.mrb[119].mxu0  ;;  %v4142_v41 = vpack.c.bf16 %v3768_v38, %v3768_v38 }
0x131f   :  { %v4150_v45 = vsel %vm1106_vm3, %v4142_v41, 0 }
0x1322   :  { %v12482_v47 = vpop.f32.mrb[120].mxu0 }
0x1323   :  { %v10805_v48 = vpop.f32.mrb[121].mxu0 }
0x1324   :  { %v3856_v49 = vpop.f32.mrb[122].mxu0 }
0x1325   :  { %v10806_v50 = vpop.f32.mrb[123].mxu0 }
0x1326   :  { %v9734_v50 = vld [vmem:[%s12243_s2 + $0x5] ss:$0 sm:$0xff] }
0x1395   :  { %v3249_v51 = vpop.xlane.xlu0 %3248 }
0x1396   :  { %v3250_v52 = vmul.f32 0.03125, %v3249_v51 }
0x1398   :  { %v3251_v53 = vsub.f32 %v12471_v6, %v3250_v52 }
0x139a   :  { %v3252_v54 = vmul.f32 %v3251_v53, %v3251_v53 }
0x139c   :  { %v3253_v55 = vsel %vm194_vm0, %v3252_v54, 0.0 }
0x139d   :  { %3254 = vadd.xlane.f32.xlu1 %v3253_v55 }
0x142a   :  { %v3255_v60 = vpop.xlane.xlu1 %3254 }
0x142b   :  { %v3256_v61 = vmul.f32 0.03125, %v3255_v60 }
0x142d   :  { %v3257_v62 = vadd.f32 1e-05, %v3256_v61  ;;  %v9736_v61 = vld [vmem:[%s12243_s2 + $0x7] ss:$0 sm:$0xff] }
0x142f   :  { %11616 = vrsqrt.f32 %v3257_v62 }
0x1439   :  { %v11617_v0 = vpop.eup %11616 }
0x143a   :  { %v3259_v1 = vmul.f32 %v11617_v0, %v3251_v53 }
0x143c   :  { %v3266_v2 = vmul.f32 %v12424_v8, %v3259_v1  ;;  %v9712_v8 = vld [vmem:[%s12110_s26 + $0x1c] sm:$0xf] }
0x143d   :  { %v3445_v12 = vsel %vm194_vm0, %v9712_v8, 0  ;;  %v9750_v8 = vld [vmem:[%s12261_s16 + $0x5] ss:$0 sm:$0xff] }
0x143e   :  { %v3273_v5 = vadd.f32 %v12431_v19, %v3266_v2  ;;  %v9742_v19 = vld [vmem:[%s12197_s1 + $0x14] sm:$0xf] }
0x143f   :  { %v3774_v20 = vsel %vm194_vm0, %v9742_v19, 0 }
0x1440   :  { %v3274_v63 = vpack.c.bf16 %v3273_v5, %v3273_v5 }
0x1442   :  { %10744 = vmatmul.mubr.msk.bf16.vlgmr.msra.gmra.mrb[100].mxu1 %vm194_vm0, %v3274_v63 }
0x1443   :  { %10748 = vmatpush3.bf16.xpose.msra.mxu1 %v3359_v7  ;;  %10749 = vmatprep.mubr.msk.bf16.mxu1 %vm11715_vm1, %v11714_v22 }
0x1444   :  { %10753 = vmatprep.subr.bf16.mxu1 %v11714_v22 }
0x144a   :  { %10750 = vmatmul.mubr.msk.bf16.vlgmr.msra.gmra.mrb[104].mxu1 %vm194_vm0, %v3274_v63 }
0x144b   :  { %10754 = vmatpush3.bf16.xpose.msra.mxu1 %v3402_v11  ;;  %10755 = vmatprep.mubr.msk.bf16.mxu1 %vm11715_vm1, %v11714_v22 }
0x144c   :  { %10759 = vmatprep.subr.bf16.mxu1 %v11714_v22 }
0x1452   :  { %10756 = vmatmul.mubr.msk.bf16.vlgmr.msra.gmra.mrb[108].mxu1 %vm194_vm0, %v3274_v63 }
0x1453   :  { %10760 = vmatpush3.bf16.xpose.msra.mxu1 %v3445_v12  ;;  %10761 = vmatprep.mubr.msk.bf16.mxu1 %vm11715_vm1, %v11714_v22 }
0x1454   :  { %10771 = vmatprep.subr.bf16.mxu1 %v11714_v22 }
0x145a   :  { %10762 = vmatmul.mubr.msk.bf16.vlgmr.msra.gmra.mrb[112].mxu1 %vm194_vm0, %v3274_v63 }
0x145b   :  { %10772 = vmatpush3.bf16.xpose.msra.mxu1 %v3568_v14  ;;  %10773 = vmatprep.mubr.msk.bf16.mxu1 %vm11715_vm1, %v11714_v22 }
0x145c   :  { %10783 = vmatprep.subr.bf16.mxu1 %v11714_v22 }
0x1462   :  { %10774 = vmatmul.mubr.msk.bf16.vlgmr.msra.gmra.mrb[116].mxu1 %vm194_vm0, %v12438_v21 }
0x1463   :  { %10784 = vmatpush3.bf16.xpose.msra.mxu1 %v3654_v16  ;;  %10785 = vmatprep.mubr.msk.bf16.mxu1 %vm11715_vm1, %v11714_v22 }
0x1464   :  { %10795 = vmatprep.subr.bf16.mxu1 %v11714_v22 }
0x146a   :  { %10786 = vmatmul.mubr.msk.bf16.vlgmr.msra.gmra.mrb[120].mxu1 %vm194_vm0, %v12438_v21 }
0x146b   :  { %10796 = vmatpush3.bf16.xpose.msra.mxu1 %v3774_v20  ;;  %10797 = vmatprep.mubr.msk.bf16.mxu1 %vm11715_vm1, %v11714_v22 }
0x146c   :  { %10807 = vmatprep.subr.bf16.mxu1 %v11714_v22 }
0x1472   :  { %10798 = vmatmul.mubr.msk.bf16.vlgmr.msra.gmra.mrb[124].mxu1 %vm194_vm0, %v12438_v21 }
0x1473   :  { %10808 = vmatpush3.bf16.xpose.msra.mxu1 %v3860_v17  ;;  %10809 = vmatprep.mubr.msk.bf16.mxu1 %vm11715_vm1, %v11714_v22 }
0x1474   :  { %10819 = vmatprep.subr.bf16.mxu1 %v11714_v22 }
0x147a   :  { %10810 = vmatmul.mubr.msk.bf16.vlgmr.msra.gmra.mrb[128].mxu1 %vm194_vm0, %v12438_v21 }
0x147b   :  { %10821 = vmatprep.mubr.msk.bf16.mxu1 %vm11715_vm1, %v11714_v22 }
0x1515   :  { %v3352_v26 = vpop.f32.mrb[100].mxu1 }
0x1516   :  { %v3353_v28 = vadd.f32 %v9717_v25, %v3352_v26  ;;  %v10745_v9 = vpop.f32.mrb[101].mxu1 }
0x1517   :  { %v3355_v29 = vpop.f32.mrb[102].mxu1 }
0x1518   :  { %v3902_v30 = vpack.c.bf16 %v3353_v28, %v3353_v28  ;;  %v10746_v31 = vpop.f32.mrb[103].mxu1 }
0x151a   :  { %10816 = vmatmul.mubr.msk.bf16.vlgmr.msra.gmra.mrb[124].mxu0 %vm866_vm2, %v3902_v30 }
0x151b   :  { %10826 = vmatpush3.bf16.xpose.msra.mxu0 %v4006_v32  ;;  %10827 = vmatprep.mubr.msk.bf16.mxu0 %vm11715_vm1, %v11714_v22 }
0x151c   :  { %10837 = vmatprep.subr.bf16.mxu0 %v11714_v22 }
0x151d   :  { %v3395_v21 = vpop.f32.mrb[104].mxu1 }
0x151e   :  { %v10751_v18 = vpop.f32.mrb[105].mxu1  ;;  %v3396_v62 = vadd.f32 %v9718_v57, %v3395_v21 }
0x151f   :  { %v3398_v36 = vpop.f32.mrb[106].mxu1 }
0x1520   :  { %v10752_v37 = vpop.f32.mrb[107].mxu1  ;;  %v3903_v5 = vpack.c.bf16 %v3396_v62, %v3396_v62 }
0x1525   :  { %v3438_v33 = vpop.f32.mrb[108].mxu1 }
0x1526   :  { %v3439_v40 = vadd.f32 %v9719_v39, %v3438_v33  ;;  %v10757_v34 = vpop.f32.mrb[109].mxu1 }
0x1527   :  { %v3441_v42 = vpop.f32.mrb[110].mxu1 }
0x1528   :  { %v3904_v43 = vpack.c.bf16 %v3439_v40, %v3439_v40  ;;  %v10758_v4 = vpop.f32.mrb[111].mxu1 }
0x152a   :  { %10828 = vmatmul.mubr.msk.bf16.vlgmr.msra.gmra.mrb[128].mxu0 %vm866_vm2, %v3904_v43 }
0x152b   :  { %10838 = vmatpush3.bf16.msra.mxu0 %v4150_v45  ;;  %10839 = vmatprep.mubr.msk.bf16.mxu0 %vm11715_vm1, %v11714_v22 }
0x152c   :  { %10849 = vmatprep.subr.bf16.mxu0 %v11714_v22 }
0x152d   :  { %v3481_v44 = vpop.f32.mrb[112].mxu1 }
0x152e   :  { %v10763_v46 = vpop.f32.mrb[113].mxu1  ;;  %v3482_v12 = vadd.f32 %v9720_v10, %v3481_v44 }
0x152f   :  { %v3484_v48 = vpop.f32.mrb[114].mxu1 }
0x1530   :  { %v10764_v49 = vpop.f32.mrb[115].mxu1  ;;  %v3905_v19 = vpack.c.bf16 %v3482_v12, %v3482_v12  ;;  %v9751_v12 = vld [vmem:[%s12261_s16 + $0x6] ss:$0 sm:$0xff] }
0x1535   :  { %v3604_v51 = vpop.f32.mrb[116].mxu1 }
0x1536   :  { %v3605_v52 = vadd.f32 %v9734_v50, %v3604_v51  ;;  %v10775_v53 = vpop.f32.mrb[117].mxu1 }
0x1537   :  { %v3607_v54 = vpop.f32.mrb[118].mxu1 }
0x1538   :  { %v3907_v55 = vpack.c.bf16 %v3605_v52, %v3605_v52  ;;  %v10776_v56 = vpop.f32.mrb[119].mxu1 }
0x153a   :  { %v3960_v60 = vsel %vm866_vm2, %v3907_v55, 0 }
0x153b   :  { %10820 = vmatpush3.bf16.xpose.msra.mxu1 %v3960_v60 }
0x153c   :  { %10831 = vmatprep.subr.bf16.mxu1 %v11714_v22 }
0x153d   :  { %v3690_v0 = vpop.f32.mrb[120].mxu1 }
0x153e   :  { %v3691_v1 = vadd.f32 %v9736_v61, %v3690_v0  ;;  %v10787_v2 = vpop.f32.mrb[121].mxu1 }
0x153f   :  { %v3693_v58 = vpop.f32.mrb[122].mxu1 }
0x1540   :  { %v3909_v63 = vpack.c.bf16 %v3691_v1, %v3691_v1  ;;  %v10788_v7 = vpop.f32.mrb[123].mxu1 }
0x1542   :  { %v4052_v11 = vsel %vm866_vm2, %v3909_v63, 0  ;;  %10822 = vmatmul.mubr.msk.bf16.vlgmr.msra.gmra.mrb[132].mxu1 %vm866_vm2, %v3903_v5  ;;  %v11707_v5 = vld [vmem:[%s11768_s9] sm:$0xff]  ;;  %s11751_s9 = smov 96  }
0x1543   :  { %10832 = vmatpush3.bf16.xpose.msra.mxu1 %v4052_v11  ;;  %10833 = vmatprep.mubr.msk.bf16.mxu1 %vm11715_vm1, %v11714_v22  ;;  %v11708_v11 = vld [vmem:[%s11778_s17] sm:$0xff]  ;;  %s13454_s17 = sld [smem:[#allocation4_spill]] }
0x1544   :  { %10843 = vmatprep.subr.bf16.mxu1 %v11714_v22 }
0x1545   :  { %v3810_v13 = vpop.f32.mrb[124].mxu1 }
0x1546   :  { %v3811_v14 = vadd.f32 %v9750_v8, %v3810_v13  ;;  %v10799_v15 = vpop.f32.mrb[125].mxu1  ;;  %v3854_v13 = vadd.f32 %v9751_v12, %v12482_v47 }
0x1547   :  { %v3813_v16 = vpop.f32.mrb[126].mxu1 }
0x1548   :  { %v4143_v20 = vpack.c.bf16 %v3811_v14, %v3811_v14  ;;  %v10800_v59 = vpop.f32.mrb[127].mxu1  ;;  %v4144_v15 = vpack.c.bf16 %v3854_v13, %v3854_v13 }
0x154a   :  { %v4196_v17 = vsel %vm1106_vm3, %v4143_v20, 0  ;;  %10834 = vmatmul.mubr.msk.bf16.vlgmr.msra.gmra.mrb[136].mxu1 %vm866_vm2, %v3905_v19  ;;  %v4242_v20 = vsel %vm1106_vm3, %v4144_v15, 0 }
0x154b   :  { %10844 = vmatpush3.bf16.msra.mxu1 %v4196_v17  ;;  %10845 = vmatprep.mubr.msk.bf16.mxu1 %vm11715_vm1, %v11714_v22 }
0x154c   :  { %10855 = vmatprep.subr.bf16.mxu1 %v11714_v22 }
0x154d   :  { %v12573_v23 = vpop.f32.mrb[128].mxu1 }
0x154e   :  { %v10811_v24 = vpop.f32.mrb[129].mxu1 }
0x154f   :  { %v3899_v25 = vpop.f32.mrb[130].mxu1 }
0x1550   :  { %v10812_v26 = vpop.f32.mrb[131].mxu1 }
0x1551   :  { %v9752_v26 = vld [vmem:[%s12261_s16 + $0x7] ss:$0 sm:$0xff] }
0x15ed   :  { %v3950_v3 = vpop.f32.mrb[124].mxu0 }
0x15ee   :  { %v3951_v28 = vadd.f32 %v3950_v3, %v11951_v27  ;;  %v10817_v9 = vpop.f32.mrb[125].mxu0  ;;  %v3897_v3 = vadd.f32 %v9752_v26, %v12573_v23 }
0x15ef   :  { %v3953_v29 = vpop.f32.mrb[126].mxu0 }
0x15f0   :  { %v10818_v30 = vpop.f32.mrb[127].mxu0  ;;  %v4094_v31 = vsel %vm866_vm2, %v3951_v28, -inf  ;;  %v4145_v29 = vpack.c.bf16 %v3897_v3, %v3897_v3 }
0x15f1   :  { %4095 = vmax.xlane.f32.xlu0 %v4094_v31 }
0x15fd   :  { %v4042_v32 = vpop.f32.mrb[128].mxu0 }
0x15fe   :  { %v4043_v21 = vadd.f32 %v4042_v32, %v11951_v27  ;;  %v10829_v18 = vpop.f32.mrb[129].mxu0  ;;  %v4288_v32 = vsel %vm1106_vm3, %v4145_v29, 0 }
0x15ff   :  { %v4045_v35 = vpop.f32.mrb[130].mxu0 }
0x1600   :  { %v10830_v36 = vpop.f32.mrb[131].mxu0  ;;  %v4100_v37 = vsel %vm866_vm2, %v4043_v21, -inf  ;;  %v9765_v35 = vld [vmem:[%s12316_s15 + $0x10] sm:$0xf] }
0x1601   :  { %4101 = vmax.xlane.f32.xlu0 %v4100_v37  ;;  %v4343_v36 = vsel %vm1106_vm3, %v9765_v35, 0  ;;  %v9766_v37 = vld [vmem:[%s12316_s15 + $0x14] sm:$0xf] }
0x1615   :  { %v3996_v38 = vpop.f32.mrb[132].mxu1 }
0x1616   :  { %v3997_v39 = vadd.f32 %v3996_v38, %v11951_v27  ;;  %v10823_v33 = vpop.f32.mrb[133].mxu1  ;;  %v4389_v38 = vsel %vm1106_vm3, %v9766_v37, 0 }
0x1617   :  { %v3999_v41 = vpop.f32.mrb[134].mxu1 }
0x1618   :  { %v10824_v40 = vpop.f32.mrb[135].mxu1  ;;  %v4097_v34 = vsel %vm866_vm2, %v3997_v39, -inf  ;;  %v4785_v41 = vld [vmem:[%s11773_s13] sm:$0xff]  ;;  %s13453_s13 = sld [smem:[#allocation3_spill]] }
0x1619   :  { %4098 = vmax.xlane.f32.xlu1 %v4097_v34  ;;  %v4792_v34 = vmul.f32 5.656854, %v4785_v41 }
0x161d   :  { %v4088_v42 = vpop.f32.mrb[136].mxu1 }
0x161e   :  { %v4089_v43 = vadd.f32 %v4088_v42, %v11951_v27  ;;  %v10835_v4 = vpop.f32.mrb[137].mxu1 }
0x161f   :  { %v4091_v45 = vpop.f32.mrb[138].mxu1 }
0x1620   :  { %v10836_v44 = vpop.f32.mrb[139].mxu1  ;;  %v4103_v46 = vsel %vm866_vm2, %v4089_v43, -inf  ;;  %v9767_v45 = vld [vmem:[%s12316_s15 + $0x18] sm:$0xf] }
0x1621   :  { %4104 = vmax.xlane.f32.xlu1 %v4103_v46 }
0x167e   :  { %v4096_v48 = vpop.xlane.xlu0 %4095 }
0x167f   :  { %v4106_v49 = vsub.f32 %v3951_v28, %v4096_v48 }
0x1681   :  { %v4110_v50 = vmul.f32 1.442695, %v4106_v49  ;;  %v4435_v49 = vsel %vm1106_vm3, %v9767_v45, 0 }
0x1683   :  { %11618 = vpow2.f32 %v4110_v50 }
0x168d   :  { %v11619_v51 = vpop.eup %11618 }
0x168e   :  { %v4102_v52 = vpop.xlane.xlu0 %4101  ;;  %v4118_v53 = vsel %vm866_vm2, %v11619_v51, 0.0 }
0x168f   :  { %v4108_v54 = vsub.f32 %v4043_v21, %v4102_v52  ;;  %4119 = vadd.xlane.f32.xlu0 %v4118_v53 }
0x1691   :  { %v4114_v55 = vmul.f32 1.442695, %v4108_v54 }
0x1693   :  { %11620 = vpow2.f32 %v4114_v55 }
0x169d   :  { %v11621_v56 = vpop.eup %11620 }
0x169e   :  { %v4124_v57 = vsel %vm866_vm2, %v11621_v56, 0.0 }
0x169f   :  { %4125 = vadd.xlane.f32.xlu0 %v4124_v57  ;;  %v9768_v57 = vld [vmem:[%s12316_s15 + $0x1c] sm:$0xf] }
0x16a6   :  { %v4099_v60 = vpop.xlane.xlu1 %4098 }
0x16a7   :  { %v4107_v61 = vsub.f32 %v3997_v39, %v4099_v60  ;;  %v4783_v39 = vld [vmem:[%s11763_s5] sm:$0xff]  ;;  %s13452_s5 = sld [smem:[#allocation2_spill]] }
0x16a8   :  { %v4786_v40 = vmul.f32 5.656854, %v4783_v39 }
0x16a9   :  { %v4112_v62 = vmul.f32 1.442695, %v4107_v61 }
0x16ab   :  { %11622 = vpow2.f32 %v4112_v62 }
0x16ae   :  { %v4105_v0 = vpop.xlane.xlu1 %4104 }
0x16af   :  { %v4109_v1 = vsub.f32 %v4089_v43, %v4105_v0  ;;  %v4481_v0 = vsel %vm1106_vm3, %v9768_v57, 0 }
0x16b1   :  { %v4116_v2 = vmul.f32 1.442695, %v4109_v1 }
0x16b3   :  { %11624 = vpow2.f32 %v4116_v2 }
0x16b5   :  { %v11623_v58 = vpop.eup %11622  ;;  %4788 = vrot.lane.b32.xlu0 %v11707_v5, %s13451_s23 }
0x16b6   :  { %v4121_v63 = vsel %vm866_vm2, %v11623_v58, 0.0 }
0x16b7   :  { %4122 = vadd.xlane.f32.xlu1 %v4121_v63 }
0x16bd   :  { %v11625_v7 = vpop.eup %11624 }
0x16be   :  { %v4127_v10 = vsel %vm866_vm2, %v11625_v7, 0.0 }
0x16bf   :  { %4128 = vadd.xlane.f32.xlu1 %v4127_v10 }
0x16d0   :  { %4794 = vrot.lane.b32.xlu1 %v11708_v11, %s13451_s23 }
0x171c   :  { %v4120_v8 = vpop.xlane.xlu0 %4119 }
0x171d   :  { %11626 = vrcp.f32 %v4120_v8 }
0x1727   :  { %v11627_v14 = vpop.eup %11626 }
0x1728   :  { %v4134_v16 = vmul.f32 %v11627_v14, %v11619_v51 }
0x172a   :  { %v4138_v19 = vpack.c.bf16 %v4134_v16, %v4134_v16 }
0x172c   :  { %10840 = vmatmul.mubr.msk.bf16.vlgmr.msra.gmra.mrb[132].mxu0 %vm866_vm2, %v4138_v19  ;;  %v4126_v59 = vpop.xlane.xlu0 %4125 }
0x172d   :  { %10850 = vmatpush3.bf16.msra.mxu0 %v4242_v20  ;;  %11628 = vrcp.f32 %v4126_v59  ;;  %10851 = vmatprep.mubr.msk.bf16.mxu0 %vm11715_vm1, %v11714_v22 }
0x172e   :  { %10861 = vmatprep.subr.bf16.mxu0 %v11714_v22 }
0x1730   :  { %v12618_v33 = vpop.permute.xlu0 %4788 }
0x1731   :  { %v12622_v43 = vadd.f32 %v12618_v33, %v4786_v40 }
0x1733   :  { %4801 = vrot.lane.b32.xlu0 %v12622_v43, %s11751_s9 }
0x1737   :  { %v11629_v17 = vpop.eup %11628 }
0x1738   :  { %v4136_v24 = vmul.f32 %v11629_v17, %v11621_v56 }
0x173a   :  { %v4140_v47 = vpack.c.bf16 %v4136_v24, %v4136_v24 }
0x173c   :  { %10852 = vmatmul.mubr.msk.bf16.vlgmr.msra.gmra.mrb[136].mxu0 %vm866_vm2, %v4140_v47 }
0x173d   :  { %10863 = vmatprep.mubr.msk.bf16.mxu0 %vm11715_vm1, %v11714_v22  ;;  %10862 = vmatpush3.bf16.msra.mxu0 %v4343_v36 }
0x173e   :  { %10873 = vmatprep.subr.bf16.mxu0 %v11714_v22 }
0x1744   :  { %v4123_v25 = vpop.xlane.xlu1 %4122 }
0x1745   :  { %11630 = vrcp.f32 %v4123_v25 }
0x174c   :  { %v4129_v28 = vpop.xlane.xlu1 %4128 }
0x174d   :  { %11632 = vrcp.f32 %v4129_v28 }
0x174f   :  { %v11631_v9 = vpop.eup %11630 }
0x1750   :  { %v4135_v30 = vmul.f32 %v11631_v9, %v11623_v58  ;;  %v4795_v42 = vpop.permute.xlu1 %4794  ;;  %v9774_v9 = vld [vmem:[%s12361_s7 + $0x1] ss:$0 sm:$0xff] }
0x1751   :  { %v12626_v4 = vadd.f32 %v4795_v42, %v4792_v34 }
0x1752   :  { %v4139_v31 = vpack.c.bf16 %v4135_v30, %v4135_v30 }
0x1753   :  { %4841 = vrot.lane.b32.xlu0 %v12626_v4, %s11751_s9 }
0x1754   :  { %10846 = vmatmul.mubr.msk.bf16.vlgmr.msra.gmra.mrb[140].mxu1 %vm866_vm2, %v4139_v31 }
0x1755   :  { %10856 = vmatpush3.bf16.msra.mxu1 %v4288_v32  ;;  %10857 = vmatprep.mubr.msk.bf16.mxu1 %vm11715_vm1, %v11714_v22 }
0x1756   :  { %10867 = vmatprep.subr.bf16.mxu1 %v11714_v22 }
0x1757   :  { %v11633_v23 = vpop.eup %11632 }
0x1758   :  { %v4137_v21 = vmul.f32 %v11633_v23, %v11625_v7 }
0x175a   :  { %v4141_v18 = vpack.c.bf16 %v4137_v21, %v4137_v21 }
0x175c   :  { %10858 = vmatmul.mubr.msk.bf16.vlgmr.msra.gmra.mrb[144].mxu1 %vm866_vm2, %v4141_v18 }
0x175d   :  { %10869 = vmatprep.mubr.msk.bf16.mxu1 %vm11715_vm1, %v11714_v22  ;;  %10868 = vmatpush3.bf16.msra.mxu1 %v4389_v38 }
0x175e   :  { %10879 = vmatprep.subr.bf16.mxu1 %v11714_v22 }
0x17a5   :  { %v4802_v32 = vpop.permute.xlu0 %4801 }
0x17a6   :  { %v4804_v18 = vsel %vm194_vm0, %v4802_v32, 0.0 }
0x17c5   :  { %v4842_v35 = vpop.permute.xlu0 %4841 }
0x17c6   :  { %v4844_v36 = vsel %vm194_vm0, %v4842_v35, 0.0 }
0x17ff   :  { %v4186_v44 = vpop.f32.mrb[132].mxu0 }
0x1800   :  { %v4330_v46 = vpack.c.bf16 %v4186_v44, %v4186_v44  ;;  %v10841_v48 = vpop.f32.mrb[133].mxu0 }
0x1801   :  { %v4189_v50 = vpop.f32.mrb[134].mxu0 }
0x1802   :  { %v10842_v51 = vpop.f32.mrb[135].mxu0  ;;  %10864 = vmatmul.mubr.msk.bf16.vlgmr.msra.gmra.mrb[140].mxu0 %vm866_vm2, %v4330_v46  ;;  %v11530_v50 = vld [vmem:[%s12375_s22 + $0x10] sm:$0xff]  }
0x1803   :  { %10874 = vmatpush3.bf16.msra.mxu0 %v4435_v49  ;;  %10875 = vmatprep.mubr.msk.bf16.mxu0 %vm11715_vm1, %v11714_v22  ;;  %v11531_v51 = vld [vmem:[%s12375_s22 + $0x18] sm:$0xff]  }
0x1804   :  { %10885 = vmatprep.subr.bf16.mxu0 %v11714_v22 }
0x180f   :  { %v4278_v52 = vpop.f32.mrb[136].mxu0 }
0x1810   :  { %v4332_v53 = vpack.c.bf16 %v4278_v52, %v4278_v52  ;;  %v10853_v54 = vpop.f32.mrb[137].mxu0 }
0x1811   :  { %v4281_v55 = vpop.f32.mrb[138].mxu0 }
0x1812   :  { %v10854_v56 = vpop.f32.mrb[139].mxu0  ;;  %10876 = vmatmul.mubr.msk.bf16.vlgmr.msra.gmra.mrb[144].mxu0 %vm866_vm2, %v4332_v53  ;;  %v9816_v55 = vld [vmem:[%s11812_s25] ss:$0 sm:$0xff]  ;;  %s13456_s25 = sld [smem:[#allocation9_spill]] }
0x1813   :  { %10889 = vmatprep.mubr.msk.bf16.mxu0 %vm11715_vm1, %v11714_v22  ;;  %10886 = vmatpush3.bf16.msra.mxu0 %v11530_v50  ;;  %v5076_v50 = vld [vmem:[%s11822_s3 + $0x8] sm:$0xf] }
0x1814   :  { %10887 = vmatprep.subr.bf16.mxu0 %v11714_v22 }
0x1817   :  { %10888 = vmatpush3.bf16.msra.mxu0 %v11531_v51  ;;  %v5199_v51 = vsel %vm194_vm0, %v5076_v50, 0 }
0x1818   :  { %10913 = vmatprep.subr.bf16.mxu0 %v11714_v22 }
0x1827   :  { %v4232_v60 = vpop.f32.mrb[140].mxu1 }
0x1828   :  { %v4331_v61 = vpack.c.bf16 %v4232_v60, %v4232_v60  ;;  %v10847_v62 = vpop.f32.mrb[141].mxu1 }
0x1829   :  { %v4235_v1 = vpop.f32.mrb[142].mxu1  ;;  %v9777_v62 = vld [vmem:[%s12405_s18 + $0x1] ss:$0 sm:$0xff] }
0x182a   :  { %v10848_v2 = vpop.f32.mrb[143].mxu1  ;;  %10870 = vmatmul.mubr.msk.bf16.vlgmr.msra.gmra.mrb[148].mxu1 %vm866_vm2, %v4331_v61  ;;  %v9778_v1 = vld [vmem:[%s12410_s19 + $0x1] ss:$0 sm:$0xff] }
0x182b   :  { %10880 = vmatpush3.bf16.msra.mxu1 %v4481_v0  ;;  %10881 = vmatprep.mubr.msk.bf16.mxu1 %vm11715_vm1, %v11714_v22 }
0x182c   :  { %10893 = vmatprep.subr.bf16.mxu1 %v11714_v22 }
0x182f   :  { %v4324_v58 = vpop.f32.mrb[144].mxu1 }
0x1830   :  { %v4333_v5 = vpack.c.bf16 %v4324_v58, %v4324_v58  ;;  %v10859_v63 = vpop.f32.mrb[145].mxu1 }
0x1831   :  { %v4327_v7 = vpop.f32.mrb[146].mxu1 }
0x1832   :  { %v10860_v10 = vpop.f32.mrb[147].mxu1  ;;  %10882 = vmatmul.mubr.msk.bf16.vlgmr.msra.gmra.mrb[152].mxu1 %vm866_vm2, %v4333_v5  ;;  %v9817_v5 = vld [vmem:[%s11817_s29] ss:$0 sm:$0xff]  ;;  %s13457_s29 = sld [smem:[#allocation8_spill]] }
0x1833   :  { %10909 = vmatprep.mubr.msk.bf16.mxu1 %vm11715_vm1, %v11714_v22  ;;  %v11532_v7 = vld [vmem:[%s12384_s30 + $0x40] sm:$0xff]   ;;  %v11533_v10 = vld [vmem:[%s12384_s30 + $0x48] sm:$0xff]  }
0x1834   :  { %10894 = vmatpush3.bf16.msra.mxu1 %v11532_v7 }
0x1835   :  { %10895 = vmatprep.subr.bf16.mxu1 %v11714_v22 }
0x1838   :  { %10896 = vmatpush3.bf16.msra.mxu1 %v11533_v10 }
0x1839   :  { %10897 = vmatprep.subr.bf16.mxu1 %v11714_v22 }
0x18d5   :  { %v4379_v11 = vpop.f32.mrb[140].mxu0 }
0x18d6   :  { %v10865_v8 = vpop.f32.mrb[141].mxu0 }
0x18d7   :  { %v4382_v12 = vpop.f32.mrb[142].mxu0  ;;  %v11535_v8 = vld [vmem:[%s12384_s30 + $0x58] sm:$0xff]  }
0x18d8   :  { %v10866_v13 = vpop.f32.mrb[143].mxu0  ;;  %v11536_v12 = vld [vmem:[%s12384_s30 + $0x60] sm:$0xff]  }
0x18d9   :  { %v11537_v13 = vld [vmem:[%s12384_s30 + $0x68] sm:$0xff]  }
0x18e5   :  { %v4471_v14 = vpop.f32.mrb[144].mxu0 }
0x18e6   :  { %v10877_v15 = vpop.f32.mrb[145].mxu0 }
0x18e7   :  { %v4474_v16 = vpop.f32.mrb[146].mxu0  ;;  %v11539_v15 = vld [vmem:[%s12384_s30 + $0x78] sm:$0xff]  }
0x18e8   :  { %v10878_v19 = vpop.f32.mrb[147].mxu0  ;;  %v4864_v16 = vld [vmem:[%s11795_s21] sm:$0xf] }
0x18e9   :  { %v4903_v19 = vsel %vm194_vm0, %v4864_v16, 0  ;;  %v9826_v16 = vld [vmem:[%s11900_s14] ss:$0 sm:$0xff] }
0x18fd   :  { %v4425_v20 = vpop.f32.mrb[148].mxu1 }
0x18fe   :  { %v4523_v59 = vadd.f32 %v4425_v20, %v4379_v11  ;;  %v10871_v17 = vpop.f32.mrb[149].mxu1  ;;  %v11534_v11 = vld [vmem:[%s12384_s30 + $0x50] sm:$0xff]  }
0x18ff   :  { %v4428_v24 = vpop.f32.mrb[150].mxu1  ;;  %10898 = vmatpush3.bf16.msra.mxu1 %v11534_v11 }
0x1900   :  { %v10872_v47 = vpop.f32.mrb[151].mxu1  ;;  %v4524_v25 = vadd.f32 %v4523_v59, %v4471_v14  ;;  %10899 = vmatprep.subr.bf16.mxu1 %v11714_v22  ;;  %v11538_v14 = vld [vmem:[%s12384_s30 + $0x70] sm:$0xff]  }
0x1903   :  { %10900 = vmatpush3.bf16.msra.mxu1 %v11535_v8 }
0x1904   :  { %10901 = vmatprep.subr.bf16.mxu1 %v11714_v22 }
0x1905   :  { %v4517_v26 = vpop.f32.mrb[152].mxu1 }
0x1906   :  { %v4525_v3 = vadd.f32 %v4524_v25, %v4517_v26  ;;  %v10883_v28 = vpop.f32.mrb[153].mxu1 }
0x1907   :  { %v4520_v29 = vpop.f32.mrb[154].mxu1  ;;  %10902 = vmatpush3.bf16.msra.mxu1 %v11536_v12 }
0x1908   :  { %v4526_v30 = vadd.f32 %v4525_v3, %v12471_v6  ;;  %v10884_v31 = vpop.f32.mrb[155].mxu1  ;;  %10903 = vmatprep.subr.bf16.mxu1 %v11714_v22 }
0x190a   :  { %v12650_v23 = vadd.f32 %v9774_v9, %v4526_v30 }
0x190b   :  { %10904 = vmatpush3.bf16.msra.mxu1 %v11537_v13 }
0x190c   :  { %v4540_v21 = vsel %vm194_vm0, %v12650_v23, 0.0  ;;  %10905 = vmatprep.subr.bf16.mxu1 %v11714_v22 }
0x190d   :  { %4541 = vadd.xlane.f32.xlu1 %v4540_v21 }
0x190f   :  { %10906 = vmatpush3.bf16.msra.mxu1 %v11538_v14 }
0x1910   :  { %10907 = vmatprep.subr.bf16.mxu1 %v11714_v22 }
0x1911   :  { %4805 = vadd.xlane.f32.xlu1 %v4804_v18 }
0x1913   :  { %10908 = vmatpush3.bf16.msra.mxu1 %v11539_v15 }
0x1914   :  { %10937 = vmatprep.subr.bf16.mxu1 %v11714_v22 }
0x1915   :  { %4845 = vadd.xlane.f32.xlu1 %v4844_v36 }
0x199a   :  { %v4542_v37 = vpop.xlane.xlu1 %4541 }
0x199b   :  { %v4543_v38 = vmul.f32 0.03125, %v4542_v37  ;;  %v9784_v37 = vld [vmem:[%s12420_s27 + $0x1] ss:$0 sm:$0xff] }
0x199d   :  { %v4544_v6 = vsub.f32 %v12650_v23, %v4543_v38 }
0x199e   :  { %v4806_v39 = vpop.xlane.xlu1 %4805 }
0x199f   :  { %v4545_v41 = vmul.f32 %v4544_v6, %v4544_v6  ;;  %v4807_v46 = vmul.f32 0.03125, %v4806_v39 }
0x19a1   :  { %v4546_v40 = vsel %vm194_vm0, %v4545_v41, 0.0  ;;  %v12665_v48 = vsub.f32 %v12622_v43, %v4807_v46  ;;  %v4865_v46 = vld [vmem:[%s11795_s21 + $0x4] sm:$0xf] }
0x19a2   :  { %4547 = vadd.xlane.f32.xlu0 %v4546_v40  ;;  %v4846_v34 = vpop.xlane.xlu1 %4845  ;;  %v5074_v40 = vld [vmem:[%s11822_s3] sm:$0xf] }
0x19a3   :  { %v4847_v42 = vmul.f32 0.03125, %v4846_v34  ;;  %v4809_v49 = vmul.f32 %v12665_v48, %v12665_v48 }
0x19a5   :  { %v12659_v45 = vsub.f32 %v12626_v4, %v4847_v42 }
0x19a7   :  { %v4849_v44 = vmul.f32 %v12659_v45, %v12659_v45 }
0x19a9   :  { %4851 = vrot.lane.b32.xlu1 %v4849_v44, %s11751_s9  ;;  %v5113_v44 = vsel %vm194_vm0, %v5074_v40, 0 }
0x19b8   :  { %4811 = vrot.lane.b32.xlu0 %v4809_v49, %s11751_s9 }
0x1a1b   :  { %v4852_v4 = vpop.permute.xlu1 %4851 }
0x1a1c   :  { %v4854_v52 = vsel %vm194_vm0, %v4852_v4, 0.0 }
0x1a1d   :  { %4855 = vadd.xlane.f32.xlu0 %v4854_v52  ;;  %v4866_v52 = vld [vmem:[%s11795_s21 + $0x8] sm:$0xf] }
0x1a2f   :  { %v4548_v53 = vpop.xlane.xlu0 %4547 }
0x1a30   :  { %v4549_v54 = vmul.f32 0.03125, %v4548_v53  ;;  %v4989_v53 = vsel %vm194_vm0, %v4866_v52, 0 }
0x1a32   :  { %v4550_v56 = vadd.f32 1e-05, %v4549_v54  ;;  %v5284_v54 = vld [vmem:[%s11843_s8] sm:$0xf] }
0x1a33   :  { %v4812_v57 = vpop.permute.xlu0 %4811  ;;  %4826 = vrot.lane.b32.xlu0 %v9816_v55, %s13451_s23  ;;  %v5317_v55 = vsel %vm194_vm0, %v5284_v54, 0 }
0x1a34   :  { %11634 = vrsqrt.f32 %v4550_v56  ;;  %v4814_v60 = vsel %vm194_vm0, %v4812_v57, 0.0  ;;  %v4867_v56 = vld [vmem:[%s11795_s21 + $0xc] sm:$0xf]  ;;  %s13455_s21 = sld [smem:[#allocation5_spill]] }
0x1a35   :  { %4815 = vadd.xlane.f32.xlu1 %v4814_v60  ;;  %v5032_v57 = vsel %vm194_vm0, %v4867_v56, 0  ;;  %v5286_v60 = vld [vmem:[%s11843_s8 + $0x8] sm:$0xf] }
0x1a3e   :  { %v11635_v61 = vpop.eup %11634 }
0x1a3f   :  { %v4552_v0 = vmul.f32 %v11635_v61, %v4544_v6  ;;  %v5403_v61 = vsel %vm194_vm0, %v5286_v60, 0 }
0x1a41   :  { %v4559_v2 = vmul.f32 %v9777_v62, %v4552_v0  ;;  %v5075_v62 = vld [vmem:[%s11822_s3 + $0x4] sm:$0xf] }
0x1a42   :  { %v5156_v0 = vsel %vm194_vm0, %v5075_v62, 0 }
0x1a43   :  { %v4566_v58 = vadd.f32 %v9778_v1, %v4559_v2  ;;  %v5077_v1 = vld [vmem:[%s11822_s3 + $0xc] sm:$0xf]  ;;  %s13458_s3 = sld [smem:[#allocation6_spill]] }
0x1a44   :  { %v5242_v2 = vsel %vm194_vm0, %v5077_v1, 0  ;;  %v9827_v1 = vld [vmem:[%s11900_s14 + $0x1] ss:$0 sm:$0xff] }
0x1a45   :  { %v4567_v63 = vpack.c.bf16 %v4566_v58, %v4566_v58  ;;  %v5285_v58 = vld [vmem:[%s11843_s8 + $0x4] sm:$0xf] }
0x1a46   :  { %4835 = vrot.lane.b32.xlu1 %v9817_v5, %s13451_s23  ;;  %v5360_v5 = vsel %vm194_vm0, %v5285_v58, 0 }
0x1a47   :  { %10890 = vmatmul.mubr.msk.bf16.vlgmr.msra.gmra.mrb[148].mxu0 %vm194_vm0, %v4567_v63  ;;  %v5287_v63 = vld [vmem:[%s11843_s8 + $0xc] sm:$0xf]  ;;  %s13459_s8 = sld [smem:[#allocation7_spill]] }
0x1a48   :  { %10915 = vmatprep.mubr.msk.bf16.mxu0 %vm11715_vm1, %v11714_v22  ;;  %10914 = vmatpush3.bf16.xpose.msra.mxu0 %v4903_v19  ;;  %v5446_v7 = vsel %vm194_vm0, %v5287_v63, 0 }
0x1a49   :  { %10919 = vmatprep.subr.bf16.mxu0 %v11714_v22 }
0x1aaa   :  { %v4856_v20 = vpop.xlane.xlu0 %4855 }
0x1aab   :  { %v4857_v59 = vmul.f32 0.03125, %v4856_v20 }
0x1aad   :  { %v4858_v17 = vadd.f32 1e-05, %v4857_v59 }
0x1aae   :  { %v4827_v29 = vpop.permute.xlu0 %4826 }
0x1aaf   :  { %11636 = vrsqrt.f32 %v4858_v17 }
0x1ab9   :  { %v11637_v26 = vpop.eup %11636 }
0x1aba   :  { %v4860_v28 = vmul.f32 %v11637_v26, %v12659_v45  ;;  %v9818_v26 = vld [vmem:[%s13452_s5] ss:$0 sm:$0xff] }
0x1abc   :  { %v4861_v32 = vmul.f32 %v4860_v28, %v4827_v29 }
0x1ac2   :  { %v4816_v24 = vpop.xlane.xlu1 %4815 }
0x1ac3   :  { %v4817_v47 = vmul.f32 0.03125, %v4816_v24 }
0x1ac5   :  { %v4818_v25 = vadd.f32 1e-05, %v4817_v47 }
0x1ac6   :  { %v4836_v31 = vpop.permute.xlu1 %4835 }
0x1ac7   :  { %11638 = vrsqrt.f32 %v4818_v25  ;;  %v4862_v35 = vadd.f32 %v4861_v32, %v4836_v31 }
0x1ac9   :  { %v4863_v36 = vpack.c.bf16 %v4862_v35, %v4862_v35 }
0x1ad1   :  { %v11639_v3 = vpop.eup %11638 }
0x1ad2   :  { %v4820_v9 = vmul.f32 %v11639_v3, %v12665_v48  ;;  %v4946_v48 = vsel %vm194_vm0, %v4865_v46, 0 }
0x1ad4   :  { %v4829_v30 = vmul.f32 %v4827_v29, %v4820_v9 }
0x1ad6   :  { %v4838_v21 = vadd.f32 %v4836_v31, %v4829_v30  ;;  %v9828_v30 = vld [vmem:[%s11900_s14 + $0x2] ss:$0 sm:$0xff] }
0x1ad8   :  { %v4839_v18 = vpack.c.bf16 %v4838_v21, %v4838_v21 }
0x1ada   :  { %4897 = vrot.lane.b32.xlu1 %v4839_v18, %s11751_s9 }
0x1ade   :  { %5107 = vrot.lane.b32.xlu1 %v4863_v36, %s11751_s9 }
0x1b1a   :  { %v4630_v38 = vpop.f32.mrb[148].mxu0 }
0x1b1b   :  { %v4631_v6 = vadd.f32 %v9784_v37, %v4630_v38  ;;  %v10891_v39 = vpop.f32.mrb[149].mxu0 }
0x1b1c   :  { %v4633_v41 = vpop.f32.mrb[150].mxu0  ;;  %v9820_v39 = vld [vmem:[%s13452_s5 + $0x2] ss:$0 sm:$0xff] }
0x1b1d   :  { %v4636_v34 = vmax.f32 %v4631_v6, 0.0  ;;  %v10892_v42 = vpop.f32.mrb[151].mxu0 }
0x1b1f   :  { %v4637_v45 = vpack.c.bf16 %v4636_v34, %v4636_v34 }
0x1b21   :  { %10910 = vmatmul.mubr.bf16.vlgmr.msra.gmra.mrb[156].mxu1 %v4637_v45  ;;  %v9834_v45 = vld [vmem:[%s13453_s13] ss:$0 sm:$0xff] }
0x1b22   :  { %10938 = vmatpush3.bf16.xpose.msra.mxu1 %v5113_v44  ;;  %10939 = vmatprep.mubr.msk.bf16.mxu1 %vm11715_vm1, %v11714_v22 }
0x1b23   :  { %10949 = vmatprep.subr.bf16.mxu1 %v11714_v22 }
0x1b4c   :  { %v4898_v49 = vpop.permute.xlu1 %4897 }
0x1b4d   :  { %10916 = vmatmul.mubr.msk.bf16.vlgmr.msra.gmra.mrb[152].mxu0 %vm194_vm0, %v4898_v49 }
0x1b4e   :  { %10920 = vmatpush3.bf16.xpose.msra.mxu0 %v4946_v48  ;;  %10921 = vmatprep.mubr.msk.bf16.mxu0 %vm11715_vm1, %v11714_v22 }
0x1b4f   :  { %10925 = vmatprep.subr.bf16.mxu0 %v11714_v22 }
0x1b50   :  { %v5108_v4 = vpop.permute.xlu1 %5107 }
0x1b51   :  { %10940 = vmatmul.mubr.msk.bf16.vlgmr.msra.gmra.mrb[160].mxu1 %vm194_vm0, %v5108_v4 }
0x1b52   :  { %10950 = vmatpush3.bf16.xpose.msra.mxu1 %v5199_v51  ;;  %10951 = vmatprep.mubr.msk.bf16.mxu1 %vm11715_vm1, %v11714_v22 }
0x1b53   :  { %10961 = vmatprep.subr.bf16.mxu1 %v11714_v22 }
0x1b55   :  { %10922 = vmatmul.mubr.msk.bf16.vlgmr.msra.gmra.mrb[156].mxu0 %vm194_vm0, %v4898_v49 }
0x1b56   :  { %10926 = vmatpush3.bf16.xpose.msra.mxu0 %v4989_v53  ;;  %10927 = vmatprep.mubr.msk.bf16.mxu0 %vm11715_vm1, %v11714_v22 }
0x1b57   :  { %10931 = vmatprep.subr.bf16.mxu0 %v11714_v22 }
0x1b59   :  { %10952 = vmatmul.mubr.msk.bf16.vlgmr.msra.gmra.mrb[164].mxu1 %vm194_vm0, %v5108_v4 }
0x1b5a   :  { %10962 = vmatpush3.bf16.xpose.msra.mxu1 %v5317_v55  ;;  %10963 = vmatprep.mubr.msk.bf16.mxu1 %vm11715_vm1, %v11714_v22 }
0x1b5b   :  { %10973 = vmatprep.subr.bf16.mxu1 %v11714_v22 }
0x1b5d   :  { %10928 = vmatmul.mubr.msk.bf16.vlgmr.msra.gmra.mrb[160].mxu0 %vm194_vm0, %v4898_v49 }
0x1b5e   :  { %10932 = vmatpush3.bf16.xpose.msra.mxu0 %v5032_v57  ;;  %10933 = vmatprep.mubr.msk.bf16.mxu0 %vm11715_vm1, %v11714_v22 }
0x1b5f   :  { %10943 = vmatprep.subr.bf16.mxu0 %v11714_v22 }
0x1b61   :  { %10964 = vmatmul.mubr.msk.bf16.vlgmr.msra.gmra.mrb[168].mxu1 %vm194_vm0, %v5108_v4 }
0x1b62   :  { %10974 = vmatpush3.bf16.xpose.msra.mxu1 %v5403_v61  ;;  %10975 = vmatprep.mubr.msk.bf16.mxu1 %vm11715_vm1, %v11714_v22 }
0x1b63   :  { %10985 = vmatprep.subr.bf16.mxu1 %v11714_v22 }
0x1b65   :  { %10934 = vmatmul.mubr.msk.bf16.vlgmr.msra.gmra.mrb[164].mxu0 %vm194_vm0, %v4898_v49 }
0x1b66   :  { %10944 = vmatpush3.bf16.xpose.msra.mxu0 %v5156_v0  ;;  %10945 = vmatprep.mubr.msk.bf16.mxu0 %vm11715_vm1, %v11714_v22 }
0x1b67   :  { %10955 = vmatprep.subr.bf16.mxu0 %v11714_v22 }
0x1b69   :  { %10976 = vmatmul.mubr.msk.bf16.vlgmr.msra.gmra.mrb[172].mxu1 %vm194_vm0, %v5108_v4 }
0x1b6a   :  { %10987 = vmatprep.mubr.msk.bf16.mxu1 %vm11715_vm1, %v11714_v22 }
0x1b6d   :  { %10946 = vmatmul.mubr.msk.bf16.vlgmr.msra.gmra.mrb[168].mxu0 %vm194_vm0, %v5108_v4 }
0x1b6e   :  { %10956 = vmatpush3.bf16.xpose.msra.mxu0 %v5242_v2  ;;  %10957 = vmatprep.mubr.msk.bf16.mxu0 %vm11715_vm1, %v11714_v22 }
0x1b6f   :  { %10967 = vmatprep.subr.bf16.mxu0 %v11714_v22 }
0x1b75   :  { %10958 = vmatmul.mubr.msk.bf16.vlgmr.msra.gmra.mrb[172].mxu0 %vm194_vm0, %v5108_v4 }
0x1b76   :  { %10968 = vmatpush3.bf16.xpose.msra.mxu0 %v5360_v5  ;;  %10969 = vmatprep.mubr.msk.bf16.mxu0 %vm11715_vm1, %v11714_v22 }
0x1b77   :  { %10979 = vmatprep.subr.bf16.mxu0 %v11714_v22 }
0x1b7d   :  { %10970 = vmatmul.mubr.msk.bf16.vlgmr.msra.gmra.mrb[176].mxu0 %vm194_vm0, %v5108_v4 }
0x1b7e   :  { %10980 = vmatpush3.bf16.xpose.msra.mxu0 %v5446_v7  ;;  %10981 = vmatprep.mubr.msk.bf16.mxu0 %vm11715_vm1, %v11714_v22 }
0x1b7f   :  { %10991 = vmatprep.subr.bf16.mxu0 %v11714_v22 }
0x1b85   :  { %10982 = vmatmul.mubr.msk.bf16.vlgmr.msra.gmra.mrb[180].mxu0 %vm194_vm0, %v5108_v4 }
0x1b86   :  { %10993 = vmatprep.mubr.msk.bf16.mxu0 %vm11715_vm1, %v11714_v22 }
0x1bf4   :  { %v12780_v10 = vpop.f32.mrb[156].mxu1 }
0x1bf5   :  { %v10911_v11 = vpop.f32.mrb[157].mxu1 }
0x1bf6   :  { %v4740_v8 = vpop.f32.mrb[158].mxu1 }
0x1bf7   :  { %v10912_v12 = vpop.f32.mrb[159].mxu1 }
0x1bf8   :  { %v9819_v12 = vld [vmem:[%s13452_s5 + $0x1] ss:$0 sm:$0xff] }
0x1c20   :  { %v4939_v13 = vpop.f32.mrb[152].mxu0 }
0x1c21   :  { %v10917_v14 = vpop.f32.mrb[153].mxu0  ;;  %v4940_v31 = vadd.f32 %v9818_v26, %v4939_v13 }
0x1c22   :  { %v4942_v15 = vpop.f32.mrb[154].mxu0  ;;  %v9829_v14 = vld [vmem:[%s11900_s14 + $0x3] ss:$0 sm:$0xff]  ;;  %s13460_s14 = sld [smem:[#allocation10_spill]] }
0x1c23   :  { %v10918_v19 = vpop.f32.mrb[155].mxu0  ;;  %v5488_v37 = vpack.c.bf16 %v4940_v31, %v4940_v31 }
0x1c24   :  { %v5149_v20 = vpop.f32.mrb[160].mxu1 }
0x1c25   :  { %v5150_v59 = vadd.f32 %v9826_v16, %v5149_v20  ;;  %v10941_v17 = vpop.f32.mrb[161].mxu1 }
0x1c26   :  { %v5152_v24 = vpop.f32.mrb[162].mxu1 }
0x1c27   :  { %v5492_v47 = vpack.c.bf16 %v5150_v59, %v5150_v59  ;;  %v10942_v25 = vpop.f32.mrb[163].mxu1 }
0x1c28   :  { %v4982_v3 = vpop.f32.mrb[156].mxu0  ;;  %v9821_v25 = vld [vmem:[%s13452_s5 + $0x3] ss:$0 sm:$0xff]  ;;  %s13464_s5 = sld [smem:[#allocation11_spill]] }
0x1c29   :  { %v5500_v28 = vsel %vm866_vm2, %v5492_v47, 0  ;;  %v10923_v9 = vpop.f32.mrb[157].mxu0  ;;  %v4983_v15 = vadd.f32 %v9819_v12, %v4982_v3 }
0x1c2a   :  { %v4985_v29 = vpop.f32.mrb[158].mxu0  ;;  %10986 = vmatpush3.bf16.xpose.msra.mxu1 %v5500_v28  ;;  %v9835_v28 = vld [vmem:[%s13453_s13 + $0x1] ss:$0 sm:$0xff] }
0x1c2b   :  { %v10924_v32 = vpop.f32.mrb[159].mxu0  ;;  %10997 = vmatprep.subr.bf16.mxu1 %v11714_v22  ;;  %v5489_v17 = vpack.c.bf16 %v4983_v15, %v4983_v15 }
0x1c2c   :  { %v5235_v21 = vpop.f32.mrb[164].mxu1 }
0x1c2d   :  { %v5236_v18 = vadd.f32 %v9828_v30, %v5235_v21  ;;  %v10953_v35 = vpop.f32.mrb[165].mxu1 }
0x1c2e   :  { %v5238_v36 = vpop.f32.mrb[166].mxu1 }
0x1c2f   :  { %v5494_v38 = vpack.c.bf16 %v5236_v18, %v5236_v18  ;;  %v10954_v6 = vpop.f32.mrb[167].mxu1 }
0x1c30   :  { %v5025_v41 = vpop.f32.mrb[160].mxu0 }
0x1c31   :  { %v5592_v40 = vsel %vm866_vm2, %v5494_v38, 0  ;;  %v10929_v34 = vpop.f32.mrb[161].mxu0  ;;  %10988 = vmatmul.mubr.msk.bf16.vlgmr.msra.gmra.mrb[176].mxu1 %vm866_vm2, %v5488_v37  ;;  %v5026_v44 = vadd.f32 %v9820_v39, %v5025_v41 }
0x1c32   :  { %v5028_v42 = vpop.f32.mrb[162].mxu0  ;;  %10998 = vmatpush3.bf16.xpose.msra.mxu1 %v5592_v40  ;;  %10999 = vmatprep.mubr.msk.bf16.mxu1 %vm11715_vm1, %v11714_v22 }
0x1c33   :  { %v10930_v46 = vpop.f32.mrb[163].mxu0  ;;  %11009 = vmatprep.subr.bf16.mxu1 %v11714_v22  ;;  %v5490_v4 = vpack.c.bf16 %v5026_v44, %v5026_v44 }
0x1c34   :  { %v5353_v48 = vpop.f32.mrb[168].mxu1 }
0x1c35   :  { %v5354_v49 = vadd.f32 %v9834_v45, %v5353_v48  ;;  %v10965_v50 = vpop.f32.mrb[169].mxu1 }
0x1c36   :  { %v5356_v51 = vpop.f32.mrb[170].mxu1 }
0x1c37   :  { %v5728_v52 = vpack.c.bf16 %v5354_v49, %v5354_v49  ;;  %v10966_v53 = vpop.f32.mrb[171].mxu1 }
0x1c38   :  { %v5068_v54 = vpop.f32.mrb[164].mxu0 }
0x1c39   :  { %v5736_v55 = vsel %vm1106_vm3, %v5728_v52, 0  ;;  %v10935_v56 = vpop.f32.mrb[165].mxu0  ;;  %11000 = vmatmul.mubr.msk.bf16.vlgmr.msra.gmra.mrb[180].mxu1 %vm866_vm2, %v5490_v4  ;;  %v5069_v3 = vadd.f32 %v9821_v25, %v5068_v54 }
0x1c3a   :  { %v5071_v57 = vpop.f32.mrb[166].mxu0  ;;  %11010 = vmatpush3.bf16.msra.mxu1 %v5736_v55  ;;  %11011 = vmatprep.mubr.msk.bf16.mxu1 %vm11715_vm1, %v11714_v22 }
0x1c3b   :  { %v10936_v60 = vpop.f32.mrb[167].mxu0  ;;  %11021 = vmatprep.subr.bf16.mxu1 %v11714_v22  ;;  %v5491_v32 = vpack.c.bf16 %v5069_v3, %v5069_v3 }
0x1c3c   :  { %v12799_v61 = vpop.f32.mrb[172].mxu1 }
0x1c3d   :  { %v10977_v62 = vpop.f32.mrb[173].mxu1 }
0x1c3e   :  { %v5442_v0 = vpop.f32.mrb[174].mxu1 }
0x1c3f   :  { %v10978_v2 = vpop.f32.mrb[175].mxu1 }
0x1c40   :  { %v5192_v58 = vpop.f32.mrb[168].mxu0 }
0x1c41   :  { %v5193_v5 = vadd.f32 %v9827_v1, %v5192_v58  ;;  %v10947_v63 = vpop.f32.mrb[169].mxu0 }
0x1c42   :  { %v5195_v7 = vpop.f32.mrb[170].mxu0 }
0x1c43   :  { %v5493_v11 = vpack.c.bf16 %v5193_v5, %v5193_v5  ;;  %v10948_v8 = vpop.f32.mrb[171].mxu0 }
0x1c45   :  { %v5546_v13 = vsel %vm866_vm2, %v5493_v11, 0 }
0x1c46   :  { %10992 = vmatpush3.bf16.xpose.msra.mxu0 %v5546_v13 }
0x1c47   :  { %11003 = vmatprep.subr.bf16.mxu0 %v11714_v22 }
0x1c48   :  { %v5278_v16 = vpop.f32.mrb[172].mxu0 }
0x1c49   :  { %v5279_v19 = vadd.f32 %v9829_v14, %v5278_v16  ;;  %v10959_v20 = vpop.f32.mrb[173].mxu0 }
0x1c4a   :  { %v5281_v59 = vpop.f32.mrb[174].mxu0 }
0x1c4b   :  { %v5495_v24 = vpack.c.bf16 %v5279_v19, %v5279_v19  ;;  %v10960_v47 = vpop.f32.mrb[175].mxu0 }
0x1c4d   :  { %v5638_v26 = vsel %vm866_vm2, %v5495_v24, 0  ;;  %10994 = vmatmul.mubr.msk.bf16.vlgmr.msra.gmra.mrb[184].mxu0 %vm866_vm2, %v5489_v17 }
0x1c4e   :  { %11004 = vmatpush3.bf16.xpose.msra.mxu0 %v5638_v26  ;;  %11005 = vmatprep.mubr.msk.bf16.mxu0 %vm11715_vm1, %v11714_v22 }
0x1c4f   :  { %11015 = vmatprep.subr.bf16.mxu0 %v11714_v22 }
0x1c50   :  { %v5396_v9 = vpop.f32.mrb[176].mxu0 }
0x1c51   :  { %v5397_v29 = vadd.f32 %v9835_v28, %v5396_v9  ;;  %v10971_v30 = vpop.f32.mrb[177].mxu0  ;;  %v9836_v9 = vld [vmem:[%s13453_s13 + $0x2] ss:$0 sm:$0xff] }
0x1c52   :  { %v5399_v31 = vpop.f32.mrb[178].mxu0 }
0x1c53   :  { %v5729_v21 = vpack.c.bf16 %v5397_v29, %v5397_v29  ;;  %v10972_v18 = vpop.f32.mrb[179].mxu0  ;;  %v5440_v29 = vadd.f32 %v9836_v9, %v12799_v61 }
0x1c55   :  { %v5782_v35 = vsel %vm1106_vm3, %v5729_v21, 0  ;;  %11006 = vmatmul.mubr.msk.bf16.vlgmr.msra.gmra.mrb[188].mxu0 %vm866_vm2, %v5491_v32  ;;  %v5730_v32 = vpack.c.bf16 %v5440_v29, %v5440_v29 }
0x1c56   :  { %11016 = vmatpush3.bf16.msra.mxu0 %v5782_v35  ;;  %11017 = vmatprep.mubr.msk.bf16.mxu0 %vm11715_vm1, %v11714_v22 }
0x1c57   :  { %11027 = vmatprep.subr.bf16.mxu0 %v11714_v22  ;;  %v5828_v35 = vsel %vm1106_vm3, %v5730_v32, 0 }
0x1c58   :  { %v12818_v36 = vpop.f32.mrb[180].mxu0 }
0x1c59   :  { %v10983_v37 = vpop.f32.mrb[181].mxu0 }
0x1c5a   :  { %v5485_v38 = vpop.f32.mrb[182].mxu0 }
0x1c5b   :  { %v10984_v6 = vpop.f32.mrb[183].mxu0 }
0x1d04   :  { %v5536_v39 = vpop.f32.mrb[176].mxu1 }
0x1d05   :  { %v5537_v41 = vadd.f32 %v5536_v39, %v11951_v27  ;;  %v10989_v40 = vpop.f32.mrb[177].mxu1  ;;  %v9837_v39 = vld [vmem:[%s13453_s13 + $0x3] ss:$0 sm:$0xff]  ;;  %s13465_s13 = sld [smem:[#allocation14_spill]] }
0x1d06   :  { %v5539_v34 = vpop.f32.mrb[178].mxu1 }
0x1d07   :  { %v10990_v42 = vpop.f32.mrb[179].mxu1  ;;  %v5680_v45 = vsel %vm866_vm2, %v5537_v41, -inf }
0x1d08   :  { %5681 = vmax.xlane.f32.xlu0 %v5680_v45 }
0x1d0c   :  { %v5628_v44 = vpop.f32.mrb[180].mxu1 }
0x1d0d   :  { %v5629_v46 = vadd.f32 %v5628_v44, %v11951_v27  ;;  %v11001_v48 = vpop.f32.mrb[181].mxu1 }
0x1d0e   :  { %v5631_v49 = vpop.f32.mrb[182].mxu1 }
0x1d0f   :  { %v11002_v50 = vpop.f32.mrb[183].mxu1  ;;  %v5686_v51 = vsel %vm866_vm2, %v5629_v46, -inf }
0x1d10   :  { %5687 = vmax.xlane.f32.xlu0 %v5686_v51  ;;  %v5920_v50 = vld [vmem:[%s13454_s17] sm:$0xf] }
0x1d11   :  { %v5928_v51 = vsel %vm1106_vm3, %v5920_v50, 0  ;;  %v11542_v50 = vld [vmem:[%s13459_s8] sm:$0xff]  }
0x1d20   :  { %v5582_v4 = vpop.f32.mrb[184].mxu0 }
0x1d21   :  { %v5583_v52 = vadd.f32 %v5582_v4, %v11951_v27  ;;  %v10995_v53 = vpop.f32.mrb[185].mxu0  ;;  %v5921_v4 = vld [vmem:[%s13454_s17 + $0x4] sm:$0xf] }
0x1d22   :  { %v5585_v54 = vpop.f32.mrb[186].mxu0 }
0x1d23   :  { %v10996_v55 = vpop.f32.mrb[187].mxu0  ;;  %v5683_v56 = vsel %vm866_vm2, %v5583_v52, -inf }
0x1d24   :  { %5684 = vmax.xlane.f32.xlu1 %v5683_v56  ;;  %v5974_v55 = vsel %vm1106_vm3, %v5921_v4, 0  ;;  %v11543_v4 = vld [vmem:[%s13459_s8 + $0x8] sm:$0xff]  }
0x1d28   :  { %v5674_v57 = vpop.f32.mrb[188].mxu0 }
0x1d29   :  { %v5675_v60 = vadd.f32 %v5674_v57, %v11951_v27  ;;  %v11007_v62 = vpop.f32.mrb[189].mxu0 }
0x1d2a   :  { %v5677_v0 = vpop.f32.mrb[190].mxu0 }
0x1d2b   :  { %v11008_v1 = vpop.f32.mrb[191].mxu0  ;;  %v5689_v2 = vsel %vm866_vm2, %v5675_v60, -inf }
0x1d2c   :  { %5690 = vmax.xlane.f32.xlu0 %v5689_v2  ;;  %v5922_v2 = vld [vmem:[%s13454_s17 + $0x8] sm:$0xf] }
0x1d95   :  { %v5682_v58 = vpop.xlane.xlu0 %5681 }
0x1d96   :  { %v5692_v5 = vsub.f32 %v5537_v41, %v5682_v58  ;;  %v5483_v41 = vadd.f32 %v9837_v39, %v12818_v36  ;;  %v11541_v39 = vld [vmem:[%s13458_s3 + $0x8] sm:$0xff]  }
0x1d98   :  { %v5696_v63 = vmul.f32 1.442695, %v5692_v5  ;;  %v5731_v42 = vpack.c.bf16 %v5483_v41, %v5483_v41 }
0x1d9a   :  { %11640 = vpow2.f32 %v5696_v63 }
0x1d9d   :  { %v5688_v7 = vpop.xlane.xlu0 %5687 }
0x1d9e   :  { %v5694_v11 = vsub.f32 %v5629_v46, %v5688_v7  ;;  %v5874_v46 = vsel %vm1106_vm3, %v5731_v42, 0  ;;  %v6020_v7 = vsel %vm1106_vm3, %v5922_v2, 0 }
0x1da0   :  { %v5700_v8 = vmul.f32 1.442695, %v5694_v11 }
0x1da2   :  { %11642 = vpow2.f32 %v5700_v8 }
0x1da4   :  { %v11641_v12 = vpop.eup %11640 }
0x1da5   :  { %v5704_v13 = vsel %vm866_vm2, %v11641_v12, 0.0 }
0x1da6   :  { %5705 = vadd.xlane.f32.xlu0 %v5704_v13 }
0x1dac   :  { %v11643_v14 = vpop.eup %11642 }
0x1dad   :  { %v5710_v15 = vsel %vm866_vm2, %v11643_v14, 0.0 }
0x1dae   :  { %5711 = vadd.xlane.f32.xlu0 %v5710_v15  ;;  %v5923_v15 = vld [vmem:[%s13454_s17 + $0xc] sm:$0xf] }
0x1db1   :  { %v5685_v16 = vpop.xlane.xlu1 %5684 }
0x1db2   :  { %v5693_v19 = vsub.f32 %v5583_v52, %v5685_v16 }
0x1db4   :  { %v5698_v20 = vmul.f32 1.442695, %v5693_v19 }
0x1db6   :  { %11644 = vpow2.f32 %v5698_v20  ;;  %v6066_v20 = vsel %vm1106_vm3, %v5923_v15, 0 }
0x1db9   :  { %v5691_v59 = vpop.xlane.xlu0 %5690 }
0x1dba   :  { %v5695_v17 = vsub.f32 %v5675_v60, %v5691_v59 }
0x1dbc   :  { %v5702_v24 = vmul.f32 1.442695, %v5695_v17  ;;  %v9854_v17 = vld [vmem:[%s13455_s21] ss:$0 sm:$0xff] }
0x1dbe   :  { %11646 = vpow2.f32 %v5702_v24 }
0x1dc0   :  { %v11645_v47 = vpop.eup %11644 }
0x1dc1   :  { %v5707_v25 = vsel %vm866_vm2, %v11645_v47, 0.0 }
0x1dc2   :  { %5708 = vadd.xlane.f32.xlu1 %v5707_v25 }
0x1dc8   :  { %v11647_v26 = vpop.eup %11646 }
0x1dc9   :  { %v5713_v28 = vsel %vm866_vm2, %v11647_v26, 0.0 }
0x1dca   :  { %5714 = vadd.xlane.f32.xlu1 %v5713_v28 }
0x1ddb   :  { %6122 = vrot.lane.b32.xlu1 %v9854_v17, %s13451_s23  ;;  %v11709_v17 = vld [vmem:[%s13462_s28] sm:$0xff] }
0x1e33   :  { %v5706_v3 = vpop.xlane.xlu0 %5705 }
0x1e34   :  { %11648 = vrcp.f32 %v5706_v3 }
0x1e3b   :  { %v5712_v30 = vpop.xlane.xlu0 %5711 }
0x1e3c   :  { %11650 = vrcp.f32 %v5712_v30 }
0x1e3e   :  { %v11649_v31 = vpop.eup %11648 }
0x1e3f   :  { %v5720_v21 = vmul.f32 %v11649_v31, %v11641_v12 }
0x1e41   :  { %v5724_v18 = vpack.c.bf16 %v5720_v21, %v5720_v21 }
0x1e43   :  { %11012 = vmatmul.mubr.msk.bf16.vlgmr.msra.gmra.mrb[184].mxu1 %vm866_vm2, %v5724_v18 }
0x1e44   :  { %11022 = vmatpush3.bf16.msra.mxu1 %v5828_v35  ;;  %11023 = vmatprep.mubr.msk.bf16.mxu1 %vm11715_vm1, %v11714_v22 }
0x1e45   :  { %11033 = vmatprep.subr.bf16.mxu1 %v11714_v22 }
0x1e46   :  { %v11651_v37 = vpop.eup %11650 }
0x1e47   :  { %v5722_v38 = vmul.f32 %v11651_v37, %v11643_v14 }
0x1e49   :  { %v5726_v61 = vpack.c.bf16 %v5722_v38, %v5722_v38 }
0x1e4b   :  { %11024 = vmatmul.mubr.msk.bf16.vlgmr.msra.gmra.mrb[188].mxu1 %vm866_vm2, %v5726_v61  ;;  %v9855_v61 = vld [vmem:[%s13457_s29] ss:$0 sm:$0xff] }
0x1e4c   :  { %11035 = vmatprep.mubr.msk.bf16.mxu1 %vm11715_vm1, %v11714_v22  ;;  %11034 = vmatpush3.bf16.msra.mxu1 %v5928_v51 }
0x1e4d   :  { %11039 = vmatprep.subr.bf16.mxu1 %v11714_v22 }
0x1e4f   :  { %v5709_v6 = vpop.xlane.xlu1 %5708 }
0x1e50   :  { %11652 = vrcp.f32 %v5709_v6  ;;  %v11540_v6 = vld [vmem:[%s13458_s3] sm:$0xff]  }
0x1e57   :  { %v5715_v40 = vpop.xlane.xlu1 %5714 }
0x1e58   :  { %11654 = vrcp.f32 %v5715_v40 }
0x1e5a   :  { %v11653_v34 = vpop.eup %11652 }
0x1e5b   :  { %v5721_v45 = vmul.f32 %v11653_v34, %v11645_v47  ;;  %v6123_v3 = vpop.permute.xlu1 %6122 }
0x1e5d   :  { %v5725_v44 = vpack.c.bf16 %v5721_v45, %v5721_v45 }
0x1e5f   :  { %11018 = vmatmul.mubr.msk.bf16.vlgmr.msra.gmra.mrb[192].mxu0 %vm866_vm2, %v5725_v44 }
0x1e60   :  { %11028 = vmatpush3.bf16.msra.mxu0 %v5874_v46  ;;  %11029 = vmatprep.mubr.msk.bf16.mxu0 %vm11715_vm1, %v11714_v22 }
0x1e61   :  { %11057 = vmatprep.subr.bf16.mxu0 %v11714_v22 }
0x1e62   :  { %v11655_v48 = vpop.eup %11654 }
0x1e63   :  { %v5723_v36 = vmul.f32 %v11655_v48, %v11647_v26 }
0x1e65   :  { %v5727_v49 = vpack.c.bf16 %v5723_v36, %v5723_v36 }
0x1e67   :  { %11030 = vmatmul.mubr.msk.bf16.vlgmr.msra.gmra.mrb[196].mxu0 %vm866_vm2, %v5727_v49 }
0x1e68   :  { %11061 = vmatprep.mubr.msk.bf16.mxu0 %vm11715_vm1, %v11714_v22  ;;  %11058 = vmatpush3.bf16.msra.mxu0 %v11540_v6 }
0x1e69   :  { %11059 = vmatprep.subr.bf16.mxu0 %v11714_v22 }
0x1e6c   :  { %11060 = vmatpush3.bf16.msra.mxu0 %v11541_v39 }
0x1e6d   :  { %11065 = vmatprep.subr.bf16.mxu0 %v11714_v22 }
0x1f16   :  { %v5772_v52 = vpop.f32.mrb[184].mxu1 }
0x1f17   :  { %v5916_v53 = vpack.c.bf16 %v5772_v52, %v5772_v52  ;;  %v11013_v54 = vpop.f32.mrb[185].mxu1  ;;  %v11544_v52 = vld [vmem:[%s13459_s8 + $0x10] sm:$0xff]  }
0x1f18   :  { %v5775_v56 = vpop.f32.mrb[186].mxu1  ;;  %v11546_v54 = vld [vmem:[%s13459_s8 + $0x20] sm:$0xff]  }
0x1f19   :  { %v11014_v57 = vpop.f32.mrb[187].mxu1  ;;  %11036 = vmatmul.mubr.msk.bf16.vlgmr.msra.gmra.mrb[192].mxu1 %vm866_vm2, %v5916_v53  ;;  %v11545_v53 = vld [vmem:[%s13459_s8 + $0x18] sm:$0xff]   ;;  %v11548_v56 = vld [vmem:[%s13459_s8 + $0x30] sm:$0xff]  }
0x1f1a   :  { %11040 = vmatpush3.bf16.msra.mxu1 %v5974_v55  ;;  %11041 = vmatprep.mubr.msk.bf16.mxu1 %vm11715_vm1, %v11714_v22  ;;  %v11547_v55 = vld [vmem:[%s13459_s8 + $0x28] sm:$0xff]   ;;  %v11549_v57 = vld [vmem:[%s13459_s8 + $0x38] sm:$0xff]  }
0x1f1b   :  { %11045 = vmatprep.subr.bf16.mxu1 %v11714_v22 }
0x1f1e   :  { %v5864_v60 = vpop.f32.mrb[188].mxu1 }
0x1f1f   :  { %v11025_v62 = vpop.f32.mrb[189].mxu1  ;;  %v5918_v19 = vpack.c.bf16 %v5864_v60, %v5864_v60  ;;  %v9857_v60 = vld [vmem:[%s13460_s14] ss:$0 sm:$0xff] }
0x1f20   :  { %v5867_v0 = vpop.f32.mrb[190].mxu1 }
0x1f21   :  { %v11026_v1 = vpop.f32.mrb[191].mxu1 }
0x1f32   :  { %v5818_v58 = vpop.f32.mrb[192].mxu0 }
0x1f33   :  { %v5917_v5 = vpack.c.bf16 %v5818_v58, %v5818_v58  ;;  %v11019_v63 = vpop.f32.mrb[193].mxu0 }
0x1f34   :  { %v5821_v11 = vpop.f32.mrb[194].mxu0 }
0x1f35   :  { %v11020_v8 = vpop.f32.mrb[195].mxu0  ;;  %11042 = vmatmul.mubr.msk.bf16.vlgmr.msra.gmra.mrb[192].mxu1 %vm866_vm2, %v5917_v5 }
0x1f36   :  { %11046 = vmatpush3.bf16.msra.mxu1 %v6020_v7  ;;  %11047 = vmatprep.mubr.msk.bf16.mxu1 %vm11715_vm1, %v11714_v22  ;;  %v9869_v7 = vld [vmem:[%s13461_s4] ss:$0 sm:$0xff] }
0x1f37   :  { %11051 = vmatprep.subr.bf16.mxu1 %v11714_v22 }
0x1f3a   :  { %v5910_v12 = vpop.f32.mrb[196].mxu0 }
0x1f3b   :  { %v11031_v13 = vpop.f32.mrb[197].mxu0  ;;  %v5919_v59 = vpack.c.bf16 %v5910_v12, %v5910_v12 }
0x1f3c   :  { %v5913_v14 = vpop.f32.mrb[198].mxu0 }
0x1f3d   :  { %v11032_v16 = vpop.f32.mrb[199].mxu0 }
0x1f41   :  { %11048 = vmatmul.mubr.msk.bf16.vlgmr.msra.gmra.mrb[192].mxu1 %vm866_vm2, %v5918_v19 }
0x1f42   :  { %11052 = vmatpush3.bf16.msra.mxu1 %v6066_v20  ;;  %11053 = vmatprep.mubr.msk.bf16.mxu1 %vm11715_vm1, %v11714_v22 }
0x1f43   :  { %11085 = vmatprep.subr.bf16.mxu1 %v11714_v22 }
0x1f4d   :  { %11054 = vmatmul.mubr.msk.bf16.vlgmr.msra.gmra.mrb[192].mxu1 %vm866_vm2, %v5919_v59 }
0x1f4e   :  { %11087 = vmatprep.mubr.msk.bf16.mxu1 %vm11715_vm1, %v11714_v22 }
0x2020   :  { %v6102_v24 = vpop.f32.mrb[192].mxu1 }
0x2021   :  { %6112 = vrot.lane.b32.xlu0 %v6102_v24, %s13451_s23  ;;  %v11055_v47 = vpop.f32.mrb[193].mxu1  ;;  %v9871_v24 = vld [vmem:[%s13463_s6] ss:$0 sm:$0xff] }
0x2022   :  { %v6105_v25 = vpop.f32.mrb[194].mxu1  ;;  %v4784_v47 = vld [vmem:[%s13464_s5] sm:$0xff] }
0x2023   :  { %v11056_v26 = vpop.f32.mrb[195].mxu1 }
0x2093   :  { %v6113_v28 = vpop.permute.xlu0 %6112 }
0x2094   :  { %v6115_v9 = vadd.f32 %v6113_v28, %v12622_v43  ;;  %v9856_v43 = vld [vmem:[%s13456_s25] ss:$0 sm:$0xff]  ;;  %v6399_v28 = vmul.f32 5.656854, %v4784_v47 }
0x2096   :  { %v12880_v29 = vadd.f32 %v6123_v3, %v6115_v9 }
0x2098   :  { %6129 = vrot.lane.b32.xlu1 %v12880_v29, %s11751_s9 }
0x210a   :  { %v6130_v30 = vpop.permute.xlu1 %6129 }
0x210b   :  { %v6132_v31 = vsel %vm194_vm0, %v6130_v30, 0.0 }
0x210c   :  { %6133 = vadd.xlane.f32.xlu1 %v6132_v31 }
0x211d   :  { %6163 = vrot.lane.b32.xlu1 %v9856_v43, %s13451_s23  ;;  %v9870_v43 = vld [vmem:[%s13465_s13] ss:$0 sm:$0xff] }
0x2199   :  { %v6134_v32 = vpop.xlane.xlu1 %6133 }
0x219a   :  { %v6135_v21 = vmul.f32 0.03125, %v6134_v32 }
0x219c   :  { %v6136_v18 = vsub.f32 %v12880_v29, %v6135_v21 }
0x219d   :  { %v6164_v46 = vpop.permute.xlu1 %6163 }
0x219e   :  { %v6137_v35 = vmul.f32 %v6136_v18, %v6136_v18 }
0x21a0   :  { %6139 = vrot.lane.b32.xlu0 %v6137_v35, %s11751_s9 }
0x2212   :  { %v6140_v37 = vpop.permute.xlu0 %6139 }
0x2213   :  { %v6142_v38 = vsel %vm194_vm0, %v6140_v37, 0.0 }
0x2214   :  { %6143 = vadd.xlane.f32.xlu0 %v6142_v38 }
0x222a   :  { %6154 = vrot.lane.b32.xlu0 %v9855_v61, %s13451_s23 }
0x222e   :  { %6354 = vrot.lane.b32.xlu0 %v9869_v7, %s13451_s23 }
0x22a1   :  { %v6144_v41 = vpop.xlane.xlu0 %6143 }
0x22a2   :  { %v6145_v40 = vmul.f32 0.03125, %v6144_v41 }
0x22a4   :  { %v6146_v34 = vadd.f32 1e-05, %v6145_v40 }
0x22a5   :  { %v6155_v45 = vpop.permute.xlu0 %6154 }
0x22a6   :  { %11656 = vrsqrt.f32 %v6146_v34 }
0x22a9   :  { %v6355_v15 = vpop.permute.xlu0 %6354 }
0x22b0   :  { %v11657_v42 = vpop.eup %11656 }
0x22b1   :  { %v6148_v44 = vmul.f32 %v11657_v42, %v6136_v18 }
0x22b3   :  { %v6157_v48 = vmul.f32 %v6155_v45, %v6148_v44 }
0x22b5   :  { %v6166_v36 = vadd.f32 %v6164_v46, %v6157_v48 }
0x22b7   :  { %v6167_v49 = vpack.c.bf16 %v6166_v36, %v6166_v36 }
0x22b9   :  { %6180 = vrot.lane.b32.xlu1 %v6167_v49, %s11751_s9 }
0x232b   :  { %v6181_v51 = vpop.permute.xlu1 %6180 }
0x232c   :  { %11062 = vmatmul.mubr.msk.bf16.vlgmr.msra.gmra.mrb[200].mxu0 %vm194_vm0, %v6181_v51 }
0x232d   :  { %11066 = vmatpush3.bf16.msra.mxu0 %v11542_v50  ;;  %11081 = vmatprep.mubr.msk.bf16.mxu0 %vm11715_vm1, %v11714_v22 }
0x232e   :  { %11067 = vmatprep.subr.bf16.mxu0 %v11714_v22 }
0x2331   :  { %11068 = vmatpush3.bf16.msra.mxu0 %v11543_v4 }
0x2332   :  { %11069 = vmatprep.subr.bf16.mxu0 %v11714_v22 }
0x2335   :  { %11070 = vmatpush3.bf16.msra.mxu0 %v11544_v52  ;;  %v9872_v52 = vld [vmem:[%s12128_s20] ss:$0 sm:$0xff] }
0x2336   :  { %11071 = vmatprep.subr.bf16.mxu0 %v11714_v22 }
0x2339   :  { %11072 = vmatpush3.bf16.msra.mxu0 %v11545_v53 }
0x233a   :  { %11073 = vmatprep.subr.bf16.mxu0 %v11714_v22 }
0x233d   :  { %11074 = vmatpush3.bf16.msra.mxu0 %v11546_v54 }
0x233e   :  { %11075 = vmatprep.subr.bf16.mxu0 %v11714_v22 }
0x2341   :  { %11076 = vmatpush3.bf16.msra.mxu0 %v11547_v55 }
0x2342   :  { %11077 = vmatprep.subr.bf16.mxu0 %v11714_v22 }
0x2345   :  { %11078 = vmatpush3.bf16.msra.mxu0 %v11548_v56 }
0x2346   :  { %11079 = vmatprep.subr.bf16.mxu0 %v11714_v22 }
0x2349   :  { %11080 = vmatpush3.bf16.msra.mxu0 %v11549_v57 }
0x234a   :  { %11097 = vmatprep.subr.bf16.mxu0 %v11714_v22 }
0x23ff   :  { %v6231_v62 = vpop.f32.mrb[200].mxu0 }
0x2400   :  { %v6232_v0 = vadd.f32 %v9857_v60, %v6231_v62  ;;  %v11063_v1 = vpop.f32.mrb[201].mxu0  ;;  %v9873_v60 = vld [vmem:[%s12133_s12] ss:$0 sm:$0xff] }
0x2401   :  { %v6234_v2 = vpop.f32.mrb[202].mxu0  ;;  %v6473_v62 = vld [vmem:[%s12110_s26] sm:$0xf] }
0x2402   :  { %v6237_v58 = vmax.f32 %v6232_v0, 0.0  ;;  %v11064_v5 = vpop.f32.mrb[203].mxu0  ;;  %v6475_v0 = vld [vmem:[%s12110_s26 + $0x8] sm:$0xf]  ;;  %v6512_v1 = vsel %vm194_vm0, %v6473_v62, 0 }
0x2403   :  { %v6598_v2 = vsel %vm194_vm0, %v6475_v0, 0  ;;  %11086 = vmatpush3.bf16.xpose.msra.mxu1 %v6512_v1 }
0x2404   :  { %v6238_v63 = vpack.c.bf16 %v6237_v58, %v6237_v58  ;;  %11091 = vmatprep.subr.bf16.mxu1 %v11714_v22 }
0x2406   :  { %11082 = vmatmul.mubr.bf16.vlgmr.msra.gmra.mrb[204].mxu0 %v6238_v63 }
0x2407   :  { %11099 = vmatprep.mubr.msk.bf16.mxu0 %vm11715_vm1, %v11714_v22  ;;  %11098 = vmatpush3.bf16.xpose.msra.mxu0 %v6598_v2 }
0x2408   :  { %11109 = vmatprep.subr.bf16.mxu0 %v11714_v22 }
0x24d9   :  { %v6337_v11 = vpop.f32.mrb[204].mxu0 }
0x24da   :  { %6344 = vrot.lane.b32.xlu1 %v6337_v11, %s13451_s23  ;;  %v11083_v8 = vpop.f32.mrb[205].mxu0 }
0x24db   :  { %v6340_v12 = vpop.f32.mrb[206].mxu0 }
0x24dc   :  { %v11084_v13 = vpop.f32.mrb[207].mxu0 }
0x254c   :  { %v6345_v14 = vpop.permute.xlu1 %6344 }
0x254d   :  { %v6347_v16 = vadd.f32 %v6345_v14, %v12880_v29 }
0x254f   :  { %v6357_v19 = vadd.f32 %v6355_v15, %v6347_v16 }
0x2551   :  { %6361 = vrot.lane.b32.xlu1 %v6357_v19, %s11751_s9 }
0x25c3   :  { %v6362_v20 = vpop.permute.xlu1 %6361 }
0x25c4   :  { %v6364_v59 = vsel %vm194_vm0, %v6362_v20, 0.0 }
0x25c5   :  { %6365 = vadd.xlane.f32.xlu0 %v6364_v59 }
0x25db   :  { %6401 = vrot.lane.b32.xlu0 %v11709_v17, %s13451_s23 }
0x25df   :  { %6395 = vrot.lane.b32.xlu0 %v9871_v24, %s13451_s23 }
0x2652   :  { %v6366_v25 = vpop.xlane.xlu0 %6365 }
0x2653   :  { %v6367_v26 = vmul.f32 0.03125, %v6366_v25 }
0x2655   :  { %v6368_v3 = vsub.f32 %v6357_v19, %v6367_v26  ;;  %v6474_v26 = vld [vmem:[%s12110_s26 + $0x4] sm:$0xf] }
0x2656   :  { %v6402_v9 = vpop.permute.xlu0 %6401 }
0x2657   :  { %v12930_v29 = vadd.f32 %v6402_v9, %v6399_v28  ;;  %v6369_v30 = vmul.f32 %v6368_v3, %v6368_v3  ;;  %v6683_v28 = vld [vmem:[%s12172_s11] sm:$0xf] }
0x2659   :  { %6371 = vrot.lane.b32.xlu1 %v6369_v30, %s11751_s9  ;;  %6410 = vrot.lane.b32.xlu0 %v12930_v29, %s11751_s9  ;;  %v6722_v30 = vsel %vm194_vm0, %v6683_v28, 0 }
0x265a   :  { %v6396_v31 = vpop.permute.xlu0 %6395 }
0x26cb   :  { %v6372_v32 = vpop.permute.xlu1 %6371  ;;  %v6411_v21 = vpop.permute.xlu0 %6410 }
0x26cc   :  { %v6374_v18 = vsel %vm194_vm0, %v6372_v32, 0.0  ;;  %v6413_v35 = vsel %vm194_vm0, %v6411_v21, 0.0  ;;  %v6685_v21 = vld [vmem:[%s12172_s11 + $0x8] sm:$0xf] }
0x26cd   :  { %6375 = vadd.xlane.f32.xlu1 %v6374_v18  ;;  %6414 = vadd.xlane.f32.xlu0 %v6413_v35  ;;  %v6684_v18 = vld [vmem:[%s12172_s11 + $0x4] sm:$0xf]  ;;  %v6808_v35 = vsel %vm194_vm0, %v6685_v21, 0 }
0x26de   :  { %6386 = vrot.lane.b32.xlu1 %v9870_v43, %s13451_s23 }
0x275a   :  { %v6376_v37 = vpop.xlane.xlu1 %6375  ;;  %v6415_v38 = vpop.xlane.xlu0 %6414 }
0x275b   :  { %v6377_v61 = vmul.f32 0.03125, %v6376_v37  ;;  %v6416_v6 = vmul.f32 0.03125, %v6415_v38  ;;  %v6765_v37 = vsel %vm194_vm0, %v6684_v18, 0  ;;  %v6893_v38 = vld [vmem:[%s12197_s1] sm:$0xf] }
0x275d   :  { %v6378_v39 = vadd.f32 1e-05, %v6377_v61  ;;  %v6417_v41 = vsub.f32 %v12930_v29, %v6416_v6  ;;  %v6686_v61 = vld [vmem:[%s12172_s11 + $0xc] sm:$0xf]  ;;  %v6926_v6 = vsel %vm194_vm0, %v6893_v38, 0 }
0x275e   :  { %v6387_v42 = vpop.permute.xlu1 %6386 }
0x275f   :  { %11658 = vrsqrt.f32 %v6378_v39  ;;  %v6418_v40 = vmul.f32 %v6417_v41, %v6417_v41  ;;  %v6851_v39 = vsel %vm194_vm0, %v6686_v61, 0 }
0x2761   :  { %6420 = vrot.lane.b32.xlu0 %v6418_v40, %s11751_s9  ;;  %v6894_v40 = vld [vmem:[%s12197_s1 + $0x4] sm:$0xf] }
0x2769   :  { %v11659_v34 = vpop.eup %11658 }
0x276a   :  { %v6380_v45 = vmul.f32 %v11659_v34, %v6368_v3  ;;  %v6555_v3 = vsel %vm194_vm0, %v6474_v26, 0 }
0x276c   :  { %v6389_v44 = vmul.f32 %v6387_v42, %v6380_v45  ;;  %v6969_v42 = vsel %vm194_vm0, %v6894_v40, 0  ;;  %v6896_v45 = vld [vmem:[%s12197_s1 + $0xc] sm:$0xf] }
0x276e   :  { %v6398_v46 = vadd.f32 %v6396_v31, %v6389_v44  ;;  %v6476_v31 = vld [vmem:[%s12110_s26 + $0xc] sm:$0xf]  ;;  %v7055_v44 = vsel %vm194_vm0, %v6896_v45, 0 }
0x276f   :  { %v6641_v32 = vsel %vm194_vm0, %v6476_v31, 0 }
0x2770   :  { %v6405_v48 = vmul.f32 5.656854, %v6398_v46 }
0x2772   :  { %v6406_v36 = vadd.f32 %v6405_v48, %v12618_v33 }
0x2774   :  { %6450 = vrot.lane.b32.xlu1 %v6406_v36, %s11751_s9 }
0x27d3   :  { %v6421_v49 = vpop.permute.xlu0 %6420 }
0x27d4   :  { %v6423_v50 = vsel %vm194_vm0, %v6421_v49, 0.0 }
0x27d5   :  { %6424 = vadd.xlane.f32.xlu0 %v6423_v50 }
0x27e6   :  { %v6451_v51 = vpop.permute.xlu1 %6450 }
0x27e7   :  { %v6453_v4 = vsel %vm194_vm0, %v6451_v51, 0.0 }
0x27e8   :  { %6454 = vadd.xlane.f32.xlu1 %v6453_v4 }
0x27eb   :  { %6435 = vrot.lane.b32.xlu0 %v9872_v52, %s13451_s23 }
0x2862   :  { %v6425_v58 = vpop.xlane.xlu0 %6424 }
0x2863   :  { %v6426_v5 = vmul.f32 0.03125, %v6425_v58 }
0x2865   :  { %v6427_v63 = vadd.f32 1e-05, %v6426_v5 }
0x2866   :  { %v6436_v8 = vpop.permute.xlu0 %6435 }
0x2867   :  { %11660 = vrsqrt.f32 %v6427_v63 }
0x2871   :  { %v11661_v7 = vpop.eup %11660 }
0x2872   :  { %v6429_v11 = vmul.f32 %v11661_v7, %v6417_v41  ;;  %v6895_v41 = vld [vmem:[%s12197_s1 + $0x8] sm:$0xf]  ;;  %v9874_v7 = vld [vmem:[%s12248_s10] ss:$0 sm:$0xff] }
0x2873   :  { %v7012_v34 = vsel %vm194_vm0, %v6895_v41, 0 }
0x2874   :  { %v6438_v14 = vmul.f32 %v6436_v8, %v6429_v11 }
0x2875   :  { %v6455_v53 = vpop.xlane.xlu1 %6454 }
0x2876   :  { %v6456_v54 = vmul.f32 0.03125, %v6455_v53 }
0x2878   :  { %v6457_v55 = vsub.f32 %v6406_v36, %v6456_v54 }
0x287a   :  { %v6458_v33 = vmul.f32 %v6457_v55, %v6457_v55 }
0x287c   :  { %6460 = vrot.lane.b32.xlu1 %v6458_v33, %s11751_s9 }
0x28ee   :  { %v6461_v56 = vpop.permute.xlu1 %6460 }
0x28ef   :  { %v6463_v57 = vsel %vm194_vm0, %v6461_v56, 0.0  ;;  %v9882_v56 = vld [vmem:[%s12243_s2] ss:$0 sm:$0xff] }
0x28f0   :  { %6464 = vadd.xlane.f32.xlu1 %v6463_v57 }
0x2901   :  { %6444 = vrot.lane.b32.xlu1 %v9873_v60, %s13451_s23 }
0x297d   :  { %v6465_v12 = vpop.xlane.xlu1 %6464 }
0x297e   :  { %v6466_v13 = vmul.f32 0.03125, %v6465_v12  ;;  %v9884_v12 = vld [vmem:[%s12243_s2 + $0x2] ss:$0 sm:$0xff] }
0x2980   :  { %v6467_v15 = vadd.f32 1e-05, %v6466_v13 }
0x2981   :  { %v6445_v16 = vpop.permute.xlu1 %6444 }
0x2982   :  { %11662 = vrsqrt.f32 %v6467_v15  ;;  %v6447_v19 = vadd.f32 %v6445_v16, %v6438_v14  ;;  %v9883_v14 = vld [vmem:[%s12243_s2 + $0x1] ss:$0 sm:$0xff] }
0x2984   :  { %v6448_v20 = vpack.c.bf16 %v6447_v19, %v6447_v19 }
0x2986   :  { %6506 = vrot.lane.b32.xlu0 %v6448_v20, %s11751_s9 }
0x298c   :  { %v11663_v59 = vpop.eup %11662 }
0x298d   :  { %v12958_v17 = vmul.f32 %v11663_v59, %v6457_v55 }
0x298f   :  { %v6470_v24 = vmul.f32 %v12958_v17, %v6436_v8 }
0x2991   :  { %v6471_v47 = vadd.f32 %v6470_v24, %v6445_v16 }
0x2993   :  { %v6472_v25 = vpack.c.bf16 %v6471_v47, %v6471_v47 }
0x2995   :  { %6716 = vrot.lane.b32.xlu1 %v6472_v25, %s11751_s9 }
0x29f8   :  { %v6507_v9 = vpop.permute.xlu0 %6506 }
0x29f9   :  { %11088 = vmatmul.mubr.msk.bf16.vlgmr.msra.gmra.mrb[196].mxu1 %vm194_vm0, %v6507_v9  ;;  %11100 = vmatmul.mubr.msk.bf16.vlgmr.msra.gmra.mrb[208].mxu0 %vm194_vm0, %v6507_v9 }
0x29fa   :  { %11092 = vmatpush3.bf16.xpose.msra.mxu1 %v6555_v3  ;;  %11093 = vmatprep.mubr.msk.bf16.mxu1 %vm11715_vm1, %v11714_v22 }
0x29fb   :  { %11103 = vmatprep.subr.bf16.mxu1 %v11714_v22  ;;  %11110 = vmatpush3.bf16.xpose.msra.mxu0 %v6722_v30 }
0x29fc   :  { %11111 = vmatprep.mubr.msk.bf16.mxu0 %vm11715_vm1, %v11714_v22  ;;  %11121 = vmatprep.subr.bf16.mxu0 %v11714_v22 }
0x2a01   :  { %11094 = vmatmul.mubr.msk.bf16.vlgmr.msra.gmra.mrb[200].mxu1 %vm194_vm0, %v6507_v9 }
0x2a02   :  { %11104 = vmatpush3.bf16.xpose.msra.mxu1 %v6641_v32  ;;  %11105 = vmatprep.mubr.msk.bf16.mxu1 %vm11715_vm1, %v11714_v22  ;;  %v9875_v32 = vld [vmem:[%s12248_s10 + $0x1] ss:$0 sm:$0xff] }
0x2a03   :  { %11115 = vmatprep.subr.bf16.mxu1 %v11714_v22 }
0x2a07   :  { %v6717_v43 = vpop.permute.xlu1 %6716 }
0x2a08   :  { %11112 = vmatmul.mubr.msk.bf16.vlgmr.msra.gmra.mrb[212].mxu0 %vm194_vm0, %v6717_v43 }
0x2a09   :  { %11106 = vmatmul.mubr.msk.bf16.vlgmr.msra.gmra.mrb[204].mxu1 %vm194_vm0, %v6507_v9  ;;  %11122 = vmatpush3.bf16.xpose.msra.mxu0 %v6808_v35  ;;  %v9876_v9 = vld [vmem:[%s12248_s10 + $0x2] ss:$0 sm:$0xff]  ;;  %v9890_v35 = vld [vmem:[%s12261_s16] ss:$0 sm:$0xff] }
0x2a0a   :  { %11116 = vmatpush3.bf16.xpose.msra.mxu1 %v6765_v37  ;;  %11123 = vmatprep.mubr.msk.bf16.mxu0 %vm11715_vm1, %v11714_v22  ;;  %v9885_v37 = vld [vmem:[%s12243_s2 + $0x3] ss:$0 sm:$0xff] }
0x2a0b   :  { %11117 = vmatprep.mubr.msk.bf16.mxu1 %vm11715_vm1, %v11714_v22  ;;  %11133 = vmatprep.subr.bf16.mxu0 %v11714_v22 }
0x2a0c   :  { %11127 = vmatprep.subr.bf16.mxu1 %v11714_v22 }
0x2a10   :  { %11124 = vmatmul.mubr.msk.bf16.vlgmr.msra.gmra.mrb[216].mxu0 %vm194_vm0, %v6717_v43 }
0x2a11   :  { %11118 = vmatmul.mubr.msk.bf16.vlgmr.msra.gmra.mrb[208].mxu1 %vm194_vm0, %v6717_v43  ;;  %11134 = vmatpush3.bf16.xpose.msra.mxu0 %v6926_v6 }
0x2a12   :  { %11128 = vmatpush3.bf16.xpose.msra.mxu1 %v6851_v39  ;;  %11135 = vmatprep.mubr.msk.bf16.mxu0 %vm11715_vm1, %v11714_v22 }
0x2a13   :  { %11129 = vmatprep.mubr.msk.bf16.mxu1 %vm11715_vm1, %v11714_v22  ;;  %11145 = vmatprep.subr.bf16.mxu0 %v11714_v22 }
0x2a14   :  { %11139 = vmatprep.subr.bf16.mxu1 %v11714_v22 }
0x2a18   :  { %11136 = vmatmul.mubr.msk.bf16.vlgmr.msra.gmra.mrb[220].mxu0 %vm194_vm0, %v6717_v43 }
0x2a19   :  { %11130 = vmatmul.mubr.msk.bf16.vlgmr.msra.gmra.mrb[212].mxu1 %vm194_vm0, %v6717_v43  ;;  %11146 = vmatpush3.bf16.xpose.msra.mxu0 %v7012_v34 }
0x2a1a   :  { %11140 = vmatpush3.bf16.xpose.msra.mxu1 %v6969_v42  ;;  %11147 = vmatprep.mubr.msk.bf16.mxu0 %vm11715_vm1, %v11714_v22 }
0x2a1b   :  { %11141 = vmatprep.mubr.msk.bf16.mxu1 %vm11715_vm1, %v11714_v22  ;;  %11151 = vmatprep.subr.bf16.mxu1 %v11714_v22 }
0x2a1c   :  { %11157 = vmatprep.subr.bf16.mxu0 %v11714_v22 }
0x2a20   :  { %11148 = vmatmul.mubr.msk.bf16.vlgmr.msra.gmra.mrb[224].mxu0 %vm194_vm0, %v6717_v43 }
0x2a21   :  { %11142 = vmatmul.mubr.msk.bf16.vlgmr.msra.gmra.mrb[216].mxu1 %vm194_vm0, %v6717_v43  ;;  %11159 = vmatprep.mubr.msk.bf16.mxu0 %vm11715_vm1, %v11714_v22 }
0x2a22   :  { %11152 = vmatpush3.bf16.xpose.msra.mxu1 %v7055_v44  ;;  %11153 = vmatprep.mubr.msk.bf16.mxu1 %vm11715_vm1, %v11714_v22 }
0x2a23   :  { %11163 = vmatprep.subr.bf16.mxu1 %v11714_v22 }
0x2a29   :  { %11154 = vmatmul.mubr.msk.bf16.vlgmr.msra.gmra.mrb[220].mxu1 %vm194_vm0, %v6717_v43 }
0x2a2a   :  { %11165 = vmatprep.mubr.msk.bf16.mxu1 %vm11715_vm1, %v11714_v22 }
0x2acc   :  { %v6548_v46 = vpop.f32.mrb[196].mxu1  ;;  %v6634_v48 = vpop.f32.mrb[208].mxu0 }
0x2acd   :  { %v11089_v36 = vpop.f32.mrb[197].mxu1  ;;  %v11101_v49 = vpop.f32.mrb[209].mxu0  ;;  %v6549_v13 = vadd.f32 %v9874_v7, %v6548_v46  ;;  %v6635_v43 = vadd.f32 %v9876_v9, %v6634_v48 }
0x2ace   :  { %v6551_v50 = vpop.f32.mrb[198].mxu1  ;;  %v6637_v51 = vpop.f32.mrb[210].mxu0 }
0x2acf   :  { %v11090_v4 = vpop.f32.mrb[199].mxu1  ;;  %v11102_v52 = vpop.f32.mrb[211].mxu0  ;;  %v7097_v25 = vpack.c.bf16 %v6549_v13, %v6549_v13  ;;  %v7099_v45 = vpack.c.bf16 %v6635_v43, %v6635_v43  ;;  %v9877_v51 = vld [vmem:[%s12248_s10 + $0x3] ss:$0 sm:$0xff] }
0x2ad4   :  { %v6591_v53 = vpop.f32.mrb[200].mxu1 }
0x2ad5   :  { %v11095_v54 = vpop.f32.mrb[201].mxu1  ;;  %v6592_v38 = vadd.f32 %v9875_v32, %v6591_v53  ;;  %v9891_v53 = vld [vmem:[%s12261_s16 + $0x1] ss:$0 sm:$0xff] }
0x2ad6   :  { %v6594_v55 = vpop.f32.mrb[202].mxu1 }
0x2ad7   :  { %v11096_v33 = vpop.f32.mrb[203].mxu1  ;;  %v7098_v36 = vpack.c.bf16 %v6592_v38, %v6592_v38 }
0x2adb   :  { %v6758_v57 = vpop.f32.mrb[212].mxu0 }
0x2adc   :  { %v6759_v60 = vadd.f32 %v9882_v56, %v6758_v57  ;;  %v13029_v62 = vpop.f32.mrb[204].mxu1  ;;  %v11113_v0 = vpop.f32.mrb[213].mxu0 }
0x2add   :  { %v11107_v1 = vpop.f32.mrb[205].mxu1  ;;  %v6761_v2 = vpop.f32.mrb[214].mxu0  ;;  %v6678_v54 = vadd.f32 %v9877_v51, %v13029_v62 }
0x2ade   :  { %v7101_v58 = vpack.c.bf16 %v6759_v60, %v6759_v60  ;;  %v6680_v5 = vpop.f32.mrb[206].mxu1  ;;  %v11114_v63 = vpop.f32.mrb[215].mxu0 }
0x2adf   :  { %v11108_v11 = vpop.f32.mrb[207].mxu1 }
0x2ae0   :  { %v7109_v8 = vsel %vm866_vm2, %v7101_v58, 0  ;;  %v7100_v58 = vpack.c.bf16 %v6678_v54, %v6678_v54 }
0x2ae1   :  { %11158 = vmatpush3.bf16.xpose.msra.mxu0 %v7109_v8 }
0x2ae2   :  { %11169 = vmatprep.subr.bf16.mxu0 %v11714_v22 }
0x2ae3   :  { %v6844_v15 = vpop.f32.mrb[216].mxu0 }
0x2ae4   :  { %v6845_v16 = vadd.f32 %v9884_v12, %v6844_v15  ;;  %v6801_v19 = vpop.f32.mrb[208].mxu1  ;;  %v11125_v20 = vpop.f32.mrb[217].mxu0 }
0x2ae5   :  { %v6802_v59 = vadd.f32 %v9883_v14, %v6801_v19  ;;  %v11119_v24 = vpop.f32.mrb[209].mxu1  ;;  %v6847_v47 = vpop.f32.mrb[218].mxu0 }
0x2ae6   :  { %v7103_v26 = vpack.c.bf16 %v6845_v16, %v6845_v16  ;;  %v6804_v28 = vpop.f32.mrb[210].mxu1  ;;  %v11126_v3 = vpop.f32.mrb[219].mxu0 }
0x2ae7   :  { %v7102_v30 = vpack.c.bf16 %v6802_v59, %v6802_v59  ;;  %v11120_v31 = vpop.f32.mrb[211].mxu1 }
0x2ae8   :  { %v7201_v21 = vsel %vm866_vm2, %v7103_v26, 0  ;;  %11160 = vmatmul.mubr.msk.bf16.vlgmr.msra.gmra.mrb[228].mxu0 %vm866_vm2, %v7097_v25 }
0x2ae9   :  { %v7155_v18 = vsel %vm866_vm2, %v7102_v30, 0  ;;  %11170 = vmatpush3.bf16.xpose.msra.mxu0 %v7201_v21  ;;  %11171 = vmatprep.mubr.msk.bf16.mxu0 %vm11715_vm1, %v11714_v22 }
0x2aea   :  { %11164 = vmatpush3.bf16.xpose.msra.mxu1 %v7155_v18  ;;  %11181 = vmatprep.subr.bf16.mxu0 %v11714_v22 }
0x2aeb   :  { %v6962_v61 = vpop.f32.mrb[220].mxu0  ;;  %11175 = vmatprep.subr.bf16.mxu1 %v11714_v22 }
0x2aec   :  { %v6963_v6 = vadd.f32 %v9890_v35, %v6962_v61  ;;  %v6887_v39 = vpop.f32.mrb[212].mxu1  ;;  %v11137_v41 = vpop.f32.mrb[221].mxu0 }
0x2aed   :  { %v6888_v40 = vadd.f32 %v9885_v37, %v6887_v39  ;;  %v11131_v34 = vpop.f32.mrb[213].mxu1  ;;  %v6965_v42 = vpop.f32.mrb[222].mxu0 }
0x2aee   :  { %v7337_v44 = vpack.c.bf16 %v6963_v6, %v6963_v6  ;;  %v6890_v46 = vpop.f32.mrb[214].mxu1  ;;  %v11138_v48 = vpop.f32.mrb[223].mxu0 }
0x2aef   :  { %v7104_v49 = vpack.c.bf16 %v6888_v40, %v6888_v40  ;;  %v11132_v50 = vpop.f32.mrb[215].mxu1 }
0x2af0   :  { %v7345_v4 = vsel %vm1106_vm3, %v7337_v44, 0  ;;  %11172 = vmatmul.mubr.msk.bf16.vlgmr.msra.gmra.mrb[232].mxu0 %vm866_vm2, %v7099_v45 }
0x2af1   :  { %v7247_v52 = vsel %vm866_vm2, %v7104_v49, 0  ;;  %11166 = vmatmul.mubr.msk.bf16.vlgmr.msra.gmra.mrb[224].mxu1 %vm866_vm2, %v7098_v36  ;;  %11182 = vmatpush3.bf16.msra.mxu0 %v7345_v4 }
0x2af2   :  { %11176 = vmatpush3.bf16.xpose.msra.mxu1 %v7247_v52  ;;  %11177 = vmatprep.mubr.msk.bf16.mxu1 %vm11715_vm1, %v11714_v22 }
0x2af3   :  { %v13056_v55 = vpop.f32.mrb[224].mxu0  ;;  %11187 = vmatprep.subr.bf16.mxu1 %v11714_v22  ;;  %11183 = vmatprep.mubr.msk.bf16.mxu0 %vm11715_vm1, %v11714_v22 }
0x2af4   :  { %v7005_v33 = vpop.f32.mrb[216].mxu1  ;;  %v11149_v56 = vpop.f32.mrb[225].mxu0  ;;  %11193 = vmatprep.subr.bf16.mxu0 %v11714_v22 }
0x2af5   :  { %v7006_v57 = vadd.f32 %v9891_v53, %v7005_v33  ;;  %v11143_v60 = vpop.f32.mrb[217].mxu1  ;;  %v7051_v0 = vpop.f32.mrb[226].mxu0 }
0x2af6   :  { %v7008_v1 = vpop.f32.mrb[218].mxu1  ;;  %v11150_v2 = vpop.f32.mrb[227].mxu0  ;;  %v9892_v60 = vld [vmem:[%s12261_s16 + $0x2] ss:$0 sm:$0xff] }
0x2af7   :  { %v7338_v5 = vpack.c.bf16 %v7006_v57, %v7006_v57  ;;  %v11144_v63 = vpop.f32.mrb[219].mxu1  ;;  %v7049_v0 = vadd.f32 %v9892_v60, %v13056_v55 }
0x2af9   :  { %v7391_v62 = vsel %vm1106_vm3, %v7338_v5, 0  ;;  %11178 = vmatmul.mubr.msk.bf16.vlgmr.msra.gmra.mrb[228].mxu1 %vm866_vm2, %v7100_v58  ;;  %v7339_v5 = vpack.c.bf16 %v7049_v0, %v7049_v0 }
0x2afa   :  { %11188 = vmatpush3.bf16.msra.mxu1 %v7391_v62  ;;  %11189 = vmatprep.mubr.msk.bf16.mxu1 %vm11715_vm1, %v11714_v22  ;;  %v9893_v62 = vld [vmem:[%s12261_s16 + $0x3] ss:$0 sm:$0xff] }
0x2afb   :  { %11199 = vmatprep.subr.bf16.mxu1 %v11714_v22 }
0x2afc   :  { %v13067_v7 = vpop.f32.mrb[220].mxu1 }
0x2afd   :  { %v11155_v11 = vpop.f32.mrb[221].mxu1 }
0x2afe   :  { %v7094_v8 = vpop.f32.mrb[222].mxu1 }
0x2aff   :  { %v11156_v12 = vpop.f32.mrb[223].mxu1  ;;  %v7437_v8 = vsel %vm1106_vm3, %v7339_v5, 0 }
0x2b00   :  { %v7092_v12 = vadd.f32 %v9893_v62, %v13067_v7 }
0x2bbb   :  { %v7145_v13 = vpop.f32.mrb[228].mxu0 }
0x2bbc   :  { %v7146_v14 = vadd.f32 %v7145_v13, %v11951_v27  ;;  %v11161_v15 = vpop.f32.mrb[229].mxu0 }
0x2bbd   :  { %v7148_v16 = vpop.f32.mrb[230].mxu0 }
0x2bbe   :  { %v11162_v19 = vpop.f32.mrb[231].mxu0  ;;  %v7289_v20 = vsel %vm866_vm2, %v7146_v14, -inf }
0x2bbf   :  { %7290 = vmax.xlane.f32.xlu0 %v7289_v20  ;;  %v7340_v19 = vpack.c.bf16 %v7092_v12, %v7092_v12  ;;  %v9911_v12 = vld [vmem:[%s12405_s18] ss:$0 sm:$0xff] }
0x2bc1   :  { %v7483_v7 = vsel %vm1106_vm3, %v7340_v19, 0 }
0x2bc3   :  { %v7237_v59 = vpop.f32.mrb[232].mxu0 }
0x2bc4   :  { %v7238_v24 = vadd.f32 %v7237_v59, %v11951_v27  ;;  %v7191_v47 = vpop.f32.mrb[224].mxu1  ;;  %v11173_v25 = vpop.f32.mrb[233].mxu0 }
0x2bc5   :  { %v7192_v26 = vadd.f32 %v7191_v47, %v11951_v27  ;;  %v11167_v28 = vpop.f32.mrb[225].mxu1  ;;  %v7240_v3 = vpop.f32.mrb[234].mxu0 }
0x2bc6   :  { %v7194_v9 = vpop.f32.mrb[226].mxu1  ;;  %v11174_v30 = vpop.f32.mrb[235].mxu0  ;;  %v7295_v31 = vsel %vm866_vm2, %v7238_v24, -inf  ;;  %v7530_v3 = vld [vmem:[%s12316_s15 + $0x4] sm:$0xf] }
0x2bc7   :  { %v11168_v32 = vpop.f32.mrb[227].mxu1  ;;  %7296 = vmax.xlane.f32.xlu0 %v7295_v31  ;;  %v7292_v21 = vsel %vm866_vm2, %v7192_v26, -inf }
0x2bc8   :  { %7293 = vmax.xlane.f32.xlu1 %v7292_v21  ;;  %v7583_v32 = vsel %vm1106_vm3, %v7530_v3, 0  ;;  %v11553_v3 = vld [vmem:[%s12384_s30 + $0x8] sm:$0xff]  }
0x2bcc   :  { %v7283_v18 = vpop.f32.mrb[228].mxu1 }
0x2bcd   :  { %v7284_v35 = vadd.f32 %v7283_v18, %v11951_v27  ;;  %v11179_v43 = vpop.f32.mrb[229].mxu1 }
0x2bce   :  { %v7286_v37 = vpop.f32.mrb[230].mxu1 }
0x2bcf   :  { %v11180_v38 = vpop.f32.mrb[231].mxu1  ;;  %v7298_v61 = vsel %vm866_vm2, %v7284_v35, -inf }
0x2bd0   :  { %7299 = vmax.xlane.f32.xlu0 %v7298_v61 }
0x2c4c   :  { %v7291_v6 = vpop.xlane.xlu0 %7290 }
0x2c4d   :  { %v7301_v39 = vsub.f32 %v7146_v14, %v7291_v6  ;;  %v7529_v14 = vld [vmem:[%s12316_s15] sm:$0xf]  ;;  %v7531_v6 = vld [vmem:[%s12316_s15 + $0x8] sm:$0xf] }
0x2c4f   :  { %v7305_v41 = vmul.f32 1.442695, %v7301_v39 }
0x2c51   :  { %11664 = vpow2.f32 %v7305_v41 }
0x2c54   :  { %v7297_v40 = vpop.xlane.xlu0 %7296 }
0x2c55   :  { %v7303_v34 = vsub.f32 %v7238_v24, %v7297_v40  ;;  %v7294_v42 = vpop.xlane.xlu1 %7293  ;;  %v7537_v24 = vsel %vm1106_vm3, %v7529_v14, 0 }
0x2c56   :  { %v7302_v45 = vsub.f32 %v7192_v26, %v7294_v42  ;;  %v7629_v42 = vsel %vm1106_vm3, %v7531_v6, 0 }
0x2c57   :  { %v7309_v44 = vmul.f32 1.442695, %v7303_v34 }
0x2c58   :  { %v7307_v46 = vmul.f32 1.442695, %v7302_v45 }
0x2c59   :  { %11666 = vpow2.f32 %v7309_v44 }
0x2c5a   :  { %11668 = vpow2.f32 %v7307_v46 }
0x2c5b   :  { %v11665_v48 = vpop.eup %11664 }
0x2c5c   :  { %v7313_v36 = vsel %vm866_vm2, %v11665_v48, 0.0 }
0x2c5d   :  { %7314 = vadd.xlane.f32.xlu0 %v7313_v36  ;;  %v7300_v49 = vpop.xlane.xlu0 %7299  ;;  %v7532_v36 = vld [vmem:[%s12316_s15 + $0xc] sm:$0xf] }
0x2c5e   :  { %v7304_v50 = vsub.f32 %v7284_v35, %v7300_v49 }
0x2c60   :  { %v7311_v51 = vmul.f32 1.442695, %v7304_v50  ;;  %v7675_v50 = vsel %vm1106_vm3, %v7532_v36, 0 }
0x2c62   :  { %11670 = vpow2.f32 %v7311_v51 }
0x2c63   :  { %v11667_v4 = vpop.eup %11666 }
0x2c64   :  { %v11669_v52 = vpop.eup %11668  ;;  %v7319_v53 = vsel %vm866_vm2, %v11667_v4, 0.0 }
0x2c65   :  { %7320 = vadd.xlane.f32.xlu0 %v7319_v53  ;;  %v7316_v54 = vsel %vm866_vm2, %v11669_v52, 0.0 }
0x2c66   :  { %7317 = vadd.xlane.f32.xlu1 %v7316_v54 }
0x2c6c   :  { %v11671_v33 = vpop.eup %11670 }
0x2c6d   :  { %v7322_v56 = vsel %vm866_vm2, %v11671_v33, 0.0 }
0x2c6e   :  { %7323 = vadd.xlane.f32.xlu1 %v7322_v56 }
0x2cea   :  { %v7315_v57 = vpop.xlane.xlu0 %7314 }
0x2ceb   :  { %11672 = vrcp.f32 %v7315_v57 }
0x2cf2   :  { %v7321_v1 = vpop.xlane.xlu0 %7320 }
0x2cf3   :  { %11674 = vrcp.f32 %v7321_v1  ;;  %v7318_v2 = vpop.xlane.xlu1 %7317 }
0x2cf4   :  { %11676 = vrcp.f32 %v7318_v2 }
0x2cf5   :  { %v11673_v58 = vpop.eup %11672 }
0x2cf6   :  { %v7329_v63 = vmul.f32 %v11673_v58, %v11665_v48 }
0x2cf8   :  { %v7333_v11 = vpack.c.bf16 %v7329_v63, %v7329_v63 }
0x2cfa   :  { %11184 = vmatmul.mubr.msk.bf16.vlgmr.msra.gmra.mrb[236].mxu0 %vm866_vm2, %v7333_v11 }
0x2cfb   :  { %11194 = vmatpush3.bf16.msra.mxu0 %v7437_v8  ;;  %v7324_v13 = vpop.xlane.xlu1 %7323  ;;  %11195 = vmatprep.mubr.msk.bf16.mxu0 %vm11715_vm1, %v11714_v22 }
0x2cfc   :  { %11678 = vrcp.f32 %v7324_v13  ;;  %11205 = vmatprep.subr.bf16.mxu0 %v11714_v22  ;;  %v11550_v13 = vld [vmem:[%s12375_s22] sm:$0xff]  }
0x2cfd   :  { %v11675_v55 = vpop.eup %11674 }
0x2cfe   :  { %v11677_v15 = vpop.eup %11676  ;;  %v7331_v16 = vmul.f32 %v11675_v55, %v11667_v4  ;;  %v9910_v4 = vld [vmem:[%s12361_s7] ss:$0 sm:$0xff]  ;;  %v11551_v55 = vld [vmem:[%s12375_s22 + $0x8] sm:$0xff]  }
0x2cff   :  { %v7330_v20 = vmul.f32 %v11677_v15, %v11669_v52  ;;  %7731 = vrot.lane.b32.xlu1 %v9910_v4, %s13451_s23  ;;  %v9928_v4 = vld [vmem:[%s12128_s20 + $0x1] ss:$0 sm:$0xff] }
0x2d00   :  { %v7335_v59 = vpack.c.bf16 %v7331_v16, %v7331_v16 }
0x2d01   :  { %v7334_v47 = vpack.c.bf16 %v7330_v20, %v7330_v20 }
0x2d02   :  { %11196 = vmatmul.mubr.msk.bf16.vlgmr.msra.gmra.mrb[240].mxu0 %vm866_vm2, %v7335_v59 }
0x2d03   :  { %11190 = vmatmul.mubr.msk.bf16.vlgmr.msra.gmra.mrb[232].mxu1 %vm866_vm2, %v7334_v47  ;;  %11206 = vmatpush3.bf16.msra.mxu0 %v7537_v24 }
0x2d04   :  { %11200 = vmatpush3.bf16.msra.mxu1 %v7483_v7  ;;  %11201 = vmatprep.mubr.msk.bf16.mxu1 %vm11715_vm1, %v11714_v22 }
0x2d05   :  { %11207 = vmatprep.mubr.msk.bf16.mxu0 %vm11715_vm1, %v11714_v22  ;;  %11211 = vmatprep.subr.bf16.mxu0 %v11714_v22 }
0x2d06   :  { %v11679_v25 = vpop.eup %11678  ;;  %11229 = vmatprep.subr.bf16.mxu1 %v11714_v22 }
0x2d07   :  { %v7332_v26 = vmul.f32 %v11679_v25, %v11671_v33 }
0x2d09   :  { %v7336_v28 = vpack.c.bf16 %v7332_v26, %v7332_v26  ;;  %v11552_v26 = vld [vmem:[%s12384_s30] sm:$0xff]  }
0x2d0b   :  { %11202 = vmatmul.mubr.msk.bf16.vlgmr.msra.gmra.mrb[236].mxu1 %vm866_vm2, %v7336_v28 }
0x2d0c   :  { %11233 = vmatprep.mubr.msk.bf16.mxu1 %vm11715_vm1, %v11714_v22  ;;  %11230 = vmatpush3.bf16.msra.mxu1 %v11550_v13 }
0x2d0d   :  { %11231 = vmatprep.subr.bf16.mxu1 %v11714_v22 }
0x2d10   :  { %11232 = vmatpush3.bf16.msra.mxu1 %v11551_v55 }
0x2d11   :  { %11237 = vmatprep.subr.bf16.mxu1 %v11714_v22 }
0x2d71   :  { %v7732_v57 = vpop.permute.xlu1 %7731 }
0x2dcd   :  { %v7381_v9 = vpop.f32.mrb[236].mxu0 }
0x2dce   :  { %v7525_v30 = vpack.c.bf16 %v7381_v9, %v7381_v9  ;;  %v11185_v31 = vpop.f32.mrb[237].mxu0  ;;  %v11554_v9 = vld [vmem:[%s12384_s30 + $0x10] sm:$0xff]  }
0x2dcf   :  { %v7384_v21 = vpop.f32.mrb[238].mxu0  ;;  %v11556_v31 = vld [vmem:[%s12384_s30 + $0x20] sm:$0xff]  }
0x2dd0   :  { %v11186_v18 = vpop.f32.mrb[239].mxu0  ;;  %11208 = vmatmul.mubr.msk.bf16.vlgmr.msra.gmra.mrb[244].mxu0 %vm866_vm2, %v7525_v30  ;;  %v11555_v30 = vld [vmem:[%s12384_s30 + $0x18] sm:$0xff]   ;;  %v11558_v21 = vld [vmem:[%s12384_s30 + $0x30] sm:$0xff]  }
0x2dd1   :  { %11212 = vmatpush3.bf16.msra.mxu0 %v7583_v32  ;;  %11213 = vmatprep.mubr.msk.bf16.mxu0 %vm11715_vm1, %v11714_v22  ;;  %v11557_v32 = vld [vmem:[%s12384_s30 + $0x28] sm:$0xff]   ;;  %v11559_v18 = vld [vmem:[%s12384_s30 + $0x38] sm:$0xff]  }
0x2dd2   :  { %11217 = vmatprep.subr.bf16.mxu0 %v11714_v22 }
0x2dd5   :  { %v7473_v35 = vpop.f32.mrb[240].mxu0 }
0x2dd6   :  { %v7427_v43 = vpop.f32.mrb[232].mxu1  ;;  %v11197_v37 = vpop.f32.mrb[241].mxu0  ;;  %v7527_v49 = vpack.c.bf16 %v7473_v35, %v7473_v35  ;;  %v9913_v35 = vld [vmem:[%s12420_s27] ss:$0 sm:$0xff] }
0x2dd7   :  { %v11191_v38 = vpop.f32.mrb[233].mxu1  ;;  %v7476_v61 = vpop.f32.mrb[242].mxu0  ;;  %v7526_v34 = vpack.c.bf16 %v7427_v43, %v7427_v43 }
0x2dd8   :  { %v7430_v39 = vpop.f32.mrb[234].mxu1  ;;  %v11198_v41 = vpop.f32.mrb[243].mxu0 }
0x2dd9   :  { %v11192_v40 = vpop.f32.mrb[235].mxu1 }
0x2dda   :  { %v9925_v40 = vld [vmem:[%s12467_s24] ss:$0 sm:$0xff] }
0x2ddc   :  { %11214 = vmatmul.mubr.msk.bf16.vlgmr.msra.gmra.mrb[244].mxu0 %vm866_vm2, %v7526_v34 }
0x2ddd   :  { %11218 = vmatpush3.bf16.msra.mxu0 %v7629_v42  ;;  %11219 = vmatprep.mubr.msk.bf16.mxu0 %vm11715_vm1, %v11714_v22 }
0x2dde   :  { %v7519_v45 = vpop.f32.mrb[236].mxu1  ;;  %11223 = vmatprep.subr.bf16.mxu0 %v11714_v22 }
0x2ddf   :  { %v11203_v44 = vpop.f32.mrb[237].mxu1  ;;  %v7528_v51 = vpack.c.bf16 %v7519_v45, %v7519_v45 }
0x2de0   :  { %v7522_v46 = vpop.f32.mrb[238].mxu1 }
0x2de1   :  { %v11204_v48 = vpop.f32.mrb[239].mxu1 }
0x2de8   :  { %11220 = vmatmul.mubr.msk.bf16.vlgmr.msra.gmra.mrb[244].mxu0 %vm866_vm2, %v7527_v49 }
0x2de9   :  { %11224 = vmatpush3.bf16.msra.mxu0 %v7675_v50  ;;  %11225 = vmatprep.mubr.msk.bf16.mxu0 %vm11715_vm1, %v11714_v22 }
0x2dea   :  { %11257 = vmatprep.subr.bf16.mxu0 %v11714_v22 }
0x2df4   :  { %11226 = vmatmul.mubr.msk.bf16.vlgmr.msra.gmra.mrb[244].mxu0 %vm866_vm2, %v7528_v51 }
0x2df5   :  { %11259 = vmatprep.mubr.msk.bf16.mxu0 %vm11715_vm1, %v11714_v22 }
0x2ec7   :  { %v7711_v52 = vpop.f32.mrb[244].mxu0 }
0x2ec8   :  { %7721 = vrot.lane.b32.xlu0 %v7711_v52, %s13451_s23  ;;  %v11227_v53 = vpop.f32.mrb[245].mxu0 }
0x2ec9   :  { %v7714_v54 = vpop.f32.mrb[246].mxu0 }
0x2eca   :  { %v11228_v33 = vpop.f32.mrb[247].mxu0 }
0x2f3a   :  { %v7722_v56 = vpop.permute.xlu0 %7721 }
0x2f3b   :  { %v7724_v60 = vadd.f32 %v7722_v56, %v12930_v29  ;;  %v9912_v29 = vld [vmem:[%s12410_s19] ss:$0 sm:$0xff] }
0x2f3d   :  { %v13129_v0 = vadd.f32 %v7732_v57, %v7724_v60  ;;  %v9929_v60 = vld [vmem:[%s12133_s12 + $0x1] ss:$0 sm:$0xff] }
0x2f3f   :  { %7738 = vrot.lane.b32.xlu1 %v13129_v0, %s11751_s9 }
0x2fb1   :  { %v7739_v1 = vpop.permute.xlu1 %7738 }
0x2fb2   :  { %v7741_v2 = vsel %vm194_vm0, %v7739_v1, 0.0  ;;  %v9932_v1 = vld [vmem:[%s12110_s26 + $0x18] sm:$0xf] }
0x2fb3   :  { %7742 = vadd.xlane.f32.xlu1 %v7741_v2 }
0x2fc4   :  { %7772 = vrot.lane.b32.xlu1 %v9912_v29, %s13451_s23 }
0x3040   :  { %v7743_v58 = vpop.xlane.xlu1 %7742 }
0x3041   :  { %v7744_v5 = vmul.f32 0.03125, %v7743_v58  ;;  %v8137_v58 = vsel %vm194_vm0, %v9932_v1, 0  ;;  %v9956_v1 = vld [vmem:[%s12243_s2 + $0x6] ss:$0 sm:$0xff] }
0x3043   :  { %v7745_v63 = vsub.f32 %v13129_v0, %v7744_v5 }
0x3044   :  { %v7773_v24 = vpop.permute.xlu1 %7772 }
0x3045   :  { %v7746_v62 = vmul.f32 %v7745_v63, %v7745_v63 }
0x3047   :  { %7748 = vrot.lane.b32.xlu0 %v7746_v62, %s11751_s9 }
0x30b9   :  { %v7749_v11 = vpop.permute.xlu0 %7748 }
0x30ba   :  { %v7751_v8 = vsel %vm194_vm0, %v7749_v11, 0.0 }
0x30bb   :  { %7752 = vadd.xlane.f32.xlu0 %v7751_v8 }
0x30d1   :  { %7763 = vrot.lane.b32.xlu0 %v9911_v12, %s13451_s23 }
0x30d5   :  { %7963 = vrot.lane.b32.xlu0 %v9925_v40, %s13451_s23 }
0x3148   :  { %v7753_v14 = vpop.xlane.xlu0 %7752 }
0x3149   :  { %v7754_v15 = vmul.f32 0.03125, %v7753_v14 }
0x314b   :  { %v7755_v16 = vadd.f32 1e-05, %v7754_v15 }
0x314c   :  { %v7764_v20 = vpop.permute.xlu0 %7763 }
0x314d   :  { %11680 = vrsqrt.f32 %v7755_v16 }
0x3150   :  { %v7964_v48 = vpop.permute.xlu0 %7963 }
0x3157   :  { %v11681_v19 = vpop.eup %11680 }
0x3158   :  { %v7757_v59 = vmul.f32 %v11681_v19, %v7745_v63 }
0x315a   :  { %v7766_v47 = vmul.f32 %v7764_v20, %v7757_v59  ;;  %v9931_v20 = vld [vmem:[%s12110_s26 + $0x14] sm:$0xf]  ;;  %v9946_v59 = vld [vmem:[%s12172_s11 + $0x10] sm:$0xf] }
0x315c   :  { %v7775_v7 = vadd.f32 %v7773_v24, %v7766_v47  ;;  %v8094_v24 = vsel %vm194_vm0, %v9931_v20, 0  ;;  %v8261_v47 = vsel %vm194_vm0, %v9946_v59, 0  ;;  %v9970_v20 = vld [vmem:[%s12261_s16 + $0x4] ss:$0 sm:$0xff] }
0x315e   :  { %v7776_v25 = vpack.c.bf16 %v7775_v7, %v7775_v7 }
0x3160   :  { %7789 = vrot.lane.b32.xlu1 %v7776_v25, %s11751_s9  ;;  %v9948_v25 = vld [vmem:[%s12172_s11 + $0x18] sm:$0xf] }
0x31d2   :  { %v7790_v28 = vpop.permute.xlu1 %7789 }
0x31d3   :  { %11234 = vmatmul.mubr.msk.bf16.vlgmr.msra.gmra.mrb[240].mxu1 %vm194_vm0, %v7790_v28  ;;  %v8347_v28 = vsel %vm194_vm0, %v9948_v25, 0 }
0x31d4   :  { %11238 = vmatpush3.bf16.msra.mxu1 %v11552_v26  ;;  %11253 = vmatprep.mubr.msk.bf16.mxu1 %vm11715_vm1, %v11714_v22 }
0x31d5   :  { %11239 = vmatprep.subr.bf16.mxu1 %v11714_v22 }
0x31d8   :  { %11240 = vmatpush3.bf16.msra.mxu1 %v11553_v3 }
0x31d9   :  { %11241 = vmatprep.subr.bf16.mxu1 %v11714_v22 }
0x31dc   :  { %11242 = vmatpush3.bf16.msra.mxu1 %v11554_v9  ;;  %v9947_v9 = vld [vmem:[%s12172_s11 + $0x14] sm:$0xf] }
0x31dd   :  { %11243 = vmatprep.subr.bf16.mxu1 %v11714_v22 }
0x31e0   :  { %11244 = vmatpush3.bf16.msra.mxu1 %v11555_v30  ;;  %v9962_v30 = vld [vmem:[%s12197_s1 + $0x10] sm:$0xf] }
0x31e1   :  { %11245 = vmatprep.subr.bf16.mxu1 %v11714_v22 }
0x31e4   :  { %11246 = vmatpush3.bf16.msra.mxu1 %v11556_v31  ;;  %v8304_v31 = vsel %vm194_vm0, %v9947_v9, 0 }
0x31e5   :  { %11247 = vmatprep.subr.bf16.mxu1 %v11714_v22 }
0x31e8   :  { %11248 = vmatpush3.bf16.msra.mxu1 %v11557_v32  ;;  %v8465_v32 = vsel %vm194_vm0, %v9962_v30, 0 }
0x31e9   :  { %11249 = vmatprep.subr.bf16.mxu1 %v11714_v22 }
0x31ec   :  { %11250 = vmatpush3.bf16.msra.mxu1 %v11558_v21  ;;  %v9949_v21 = vld [vmem:[%s12172_s11 + $0x1c] sm:$0xf] }
0x31ed   :  { %11251 = vmatprep.subr.bf16.mxu1 %v11714_v22 }
0x31f0   :  { %11252 = vmatpush3.bf16.msra.mxu1 %v11559_v18  ;;  %v9964_v18 = vld [vmem:[%s12197_s1 + $0x18] sm:$0xf] }
0x31f1   :  { %11269 = vmatprep.subr.bf16.mxu1 %v11714_v22 }
0x32a6   :  { %v7840_v43 = vpop.f32.mrb[240].mxu1 }
0x32a7   :  { %v7841_v37 = vadd.f32 %v9913_v35, %v7840_v43  ;;  %v11235_v38 = vpop.f32.mrb[241].mxu1  ;;  %v8390_v35 = vsel %vm194_vm0, %v9949_v21, 0  ;;  %v8551_v43 = vsel %vm194_vm0, %v9964_v18, 0  ;;  %v9939_v18 = vld [vmem:[%s12248_s10 + $0x5] ss:$0 sm:$0xff] }
0x32a8   :  { %v7843_v61 = vpop.f32.mrb[242].mxu1 }
0x32a9   :  { %v7846_v6 = vmax.f32 %v7841_v37, 0.0  ;;  %v11236_v39 = vpop.f32.mrb[243].mxu1  ;;  %v9963_v37 = vld [vmem:[%s12197_s1 + $0x14] sm:$0xf]  ;;  %v9965_v61 = vld [vmem:[%s12197_s1 + $0x1c] sm:$0xf] }
0x32aa   :  { %v8508_v38 = vsel %vm194_vm0, %v9963_v37, 0  ;;  %v9957_v37 = vld [vmem:[%s12243_s2 + $0x7] ss:$0 sm:$0xff]  ;;  %s11754_s1 = smov 42  }
0x32ab   :  { %v7847_v41 = vpack.c.bf16 %v7846_v6, %v7846_v6  ;;  %v8594_v6 = vsel %vm194_vm0, %v9965_v61, 0 }
0x32ad   :  { %11254 = vmatmul.mubr.bf16.vlgmr.msra.gmra.mrb[244].mxu1 %v7847_v41 }
0x32ae   :  { %11271 = vmatprep.mubr.msk.bf16.mxu1 %vm11715_vm1, %v11714_v22  ;;  %11270 = vmatpush3.bf16.xpose.msra.mxu1 %v8137_v58 }
0x32af   :  { %11281 = vmatprep.subr.bf16.mxu1 %v11714_v22 }
0x3380   :  { %v7946_v34 = vpop.f32.mrb[244].mxu1 }
0x3381   :  { %7953 = vrot.lane.b32.xlu1 %v7946_v34, %s13451_s23  ;;  %v11255_v42 = vpop.f32.mrb[245].mxu1 }
0x3382   :  { %v7949_v45 = vpop.f32.mrb[246].mxu1 }
0x3383   :  { %v11256_v44 = vpop.f32.mrb[247].mxu1 }
0x33f3   :  { %v7954_v46 = vpop.permute.xlu1 %7953 }
0x33f4   :  { %v7956_v36 = vadd.f32 %v7954_v46, %v13129_v0  ;;  %v9930_v0 = vld [vmem:[%s12110_s26 + $0x10] sm:$0xf] }
0x33f5   :  { %v8051_v2 = vsel %vm194_vm0, %v9930_v0, 0 }
0x33f6   :  { %v13172_v49 = vadd.f32 %v7964_v48, %v7956_v36  ;;  %11258 = vmatpush3.bf16.xpose.msra.mxu0 %v8051_v2  ;;  %v9954_v48 = vld [vmem:[%s12243_s2 + $0x4] ss:$0 sm:$0xff] }
0x33f7   :  { %11263 = vmatprep.subr.bf16.mxu0 %v11714_v22 }
0x33f8   :  { %7970 = vrot.lane.b32.xlu1 %v13172_v49, %s11751_s9 }
0x346a   :  { %v7971_v50 = vpop.permute.xlu1 %7970 }
0x346b   :  { %v7973_v51 = vsel %vm194_vm0, %v7971_v50, 0.0 }
0x346c   :  { %7974 = vadd.xlane.f32.xlu0 %v7973_v51 }
0x3482   :  { %7995 = vrot.lane.b32.xlu0 %v9928_v4, %s13451_s23 }
0x34f9   :  { %v7975_v52 = vpop.xlane.xlu0 %7974 }
0x34fa   :  { %v7976_v53 = vmul.f32 0.03125, %v7975_v52 }
0x34fc   :  { %v7977_v54 = vsub.f32 %v13172_v49, %v7976_v53 }
0x34fd   :  { %v7996_v8 = vpop.permute.xlu0 %7995 }
0x34fe   :  { %v7978_v33 = vmul.f32 %v7977_v54, %v7977_v54  ;;  %v8009_v55 = vmul.f32 %v7996_v8, %v12958_v17  ;;  %v9933_v17 = vld [vmem:[%s12110_s26 + $0x1c] sm:$0xf]  ;;  %s11753_s26 = smov 40  }
0x34ff   :  { %v8180_v26 = vsel %vm194_vm0, %v9933_v17, 0  ;;  %s9592_s11 = sld [smem:[%s13415_s0 + %s11753_s26]]  }
0x3500   :  { %7980 = vrot.lane.b32.xlu1 %v7978_v33, %s11751_s9 }
0x3572   :  { %v7981_v56 = vpop.permute.xlu1 %7980 }
0x3573   :  { %v7983_v57 = vsel %vm194_vm0, %v7981_v56, 0.0 }
0x3574   :  { %7984 = vadd.xlane.f32.xlu1 %v7983_v57 }
0x3585   :  { %8004 = vrot.lane.b32.xlu1 %v9929_v60, %s13451_s23  ;;  %v9938_v60 = vld [vmem:[%s12248_s10 + $0x4] ss:$0 sm:$0xff] }
0x3601   :  { %v7985_v5 = vpop.xlane.xlu1 %7984 }
0x3602   :  { %v7986_v63 = vmul.f32 0.03125, %v7985_v5 }
0x3604   :  { %v7987_v62 = vadd.f32 1e-05, %v7986_v63 }
0x3605   :  { %v8005_v13 = vpop.permute.xlu1 %8004 }
0x3606   :  { %11682 = vrsqrt.f32 %v7987_v62  ;;  %v8010_v16 = vadd.f32 %v8009_v55, %v8005_v13 }
0x3608   :  { %v8011_v19 = vpack.c.bf16 %v8010_v16, %v8010_v16 }
0x3610   :  { %v11683_v29 = vpop.eup %11682 }
0x3611   :  { %v7989_v11 = vmul.f32 %v11683_v29, %v7977_v54 }
0x3613   :  { %v7998_v12 = vmul.f32 %v7996_v8, %v7989_v11 }
0x3615   :  { %v8007_v14 = vadd.f32 %v8005_v13, %v7998_v12 }
0x3617   :  { %v8008_v15 = vpack.c.bf16 %v8007_v14, %v8007_v14 }
0x3619   :  { %8045 = vrot.lane.b32.xlu0 %v8008_v15, %s11751_s9  ;;  %v9940_v15 = vld [vmem:[%s12248_s10 + $0x6] ss:$0 sm:$0xff] }
0x361d   :  { %8255 = vrot.lane.b32.xlu0 %v8011_v19, %s11751_s9  ;;  %v9955_v19 = vld [vmem:[%s12243_s2 + $0x5] ss:$0 sm:$0xff] }
0x368b   :  { %v8046_v7 = vpop.permute.xlu0 %8045 }
0x368c   :  { %11260 = vmatmul.mubr.msk.bf16.vlgmr.msra.gmra.mrb[248].mxu0 %vm194_vm0, %v8046_v7  ;;  %11272 = vmatmul.mubr.msk.bf16.vlgmr.msra.gmra.mrb[248].mxu1 %vm194_vm0, %v8046_v7 }
0x368d   :  { %11264 = vmatpush3.bf16.xpose.msra.mxu0 %v8094_v24  ;;  %11282 = vmatpush3.bf16.xpose.msra.mxu1 %v8261_v47 }
0x368e   :  { %11265 = vmatprep.mubr.msk.bf16.mxu0 %vm11715_vm1, %v11714_v22  ;;  %11283 = vmatprep.mubr.msk.bf16.mxu1 %vm11715_vm1, %v11714_v22 }
0x368f   :  { %11275 = vmatprep.subr.bf16.mxu0 %v11714_v22  ;;  %11293 = vmatprep.subr.bf16.mxu1 %v11714_v22  ;;  %v8256_v3 = vpop.permute.xlu0 %8255 }
0x3694   :  { %11266 = vmatmul.mubr.msk.bf16.vlgmr.msra.gmra.mrb[252].mxu0 %vm194_vm0, %v8046_v7  ;;  %11284 = vmatmul.mubr.msk.bf16.vlgmr.msra.gmra.mrb[252].mxu1 %vm194_vm0, %v8256_v3 }
0x3695   :  { %11276 = vmatpush3.bf16.xpose.msra.mxu0 %v8180_v26  ;;  %11294 = vmatpush3.bf16.xpose.msra.mxu1 %v8347_v28 }
0x3696   :  { %11277 = vmatprep.mubr.msk.bf16.mxu0 %vm11715_vm1, %v11714_v22  ;;  %11295 = vmatprep.mubr.msk.bf16.mxu1 %vm11715_vm1, %v11714_v22 }
0x3697   :  { %11287 = vmatprep.subr.bf16.mxu0 %v11714_v22  ;;  %11305 = vmatprep.subr.bf16.mxu1 %v11714_v22 }
0x369c   :  { %11278 = vmatmul.mubr.msk.bf16.vlgmr.msra.gmra.mrb[0].mxu0 %vm194_vm0, %v8046_v7  ;;  %11296 = vmatmul.mubr.msk.bf16.vlgmr.msra.gmra.mrb[0].mxu1 %vm194_vm0, %v8256_v3 }
0x369d   :  { %11288 = vmatpush3.bf16.xpose.msra.mxu0 %v8304_v31  ;;  %11306 = vmatpush3.bf16.xpose.msra.mxu1 %v8465_v32 }
0x369e   :  { %11289 = vmatprep.mubr.msk.bf16.mxu0 %vm11715_vm1, %v11714_v22  ;;  %11307 = vmatprep.mubr.msk.bf16.mxu1 %vm11715_vm1, %v11714_v22 }
0x369f   :  { %11299 = vmatprep.subr.bf16.mxu0 %v11714_v22  ;;  %11317 = vmatprep.subr.bf16.mxu1 %v11714_v22 }
0x36a4   :  { %11290 = vmatmul.mubr.msk.bf16.vlgmr.msra.gmra.mrb[4].mxu0 %vm194_vm0, %v8256_v3  ;;  %11308 = vmatmul.mubr.msk.bf16.vlgmr.msra.gmra.mrb[4].mxu1 %vm194_vm0, %v8256_v3 }
0x36a5   :  { %11300 = vmatpush3.bf16.xpose.msra.mxu0 %v8390_v35  ;;  %11318 = vmatpush3.bf16.xpose.msra.mxu1 %v8551_v43 }
0x36a6   :  { %11301 = vmatprep.mubr.msk.bf16.mxu0 %vm11715_vm1, %v11714_v22  ;;  %11319 = vmatprep.mubr.msk.bf16.mxu1 %vm11715_vm1, %v11714_v22 }
0x36a7   :  { %11311 = vmatprep.subr.bf16.mxu0 %v11714_v22  ;;  %11329 = vmatprep.subr.bf16.mxu1 %v11714_v22 }
0x36ac   :  { %11302 = vmatmul.mubr.msk.bf16.vlgmr.msra.gmra.mrb[8].mxu0 %vm194_vm0, %v8256_v3  ;;  %11320 = vmatmul.mubr.msk.bf16.vlgmr.msra.gmra.mrb[8].mxu1 %vm194_vm0, %v8256_v3 }
0x36ad   :  { %11312 = vmatpush3.bf16.xpose.msra.mxu0 %v8508_v38  ;;  %11313 = vmatprep.mubr.msk.bf16.mxu0 %vm11715_vm1, %v11714_v22 }
0x36ae   :  { %11323 = vmatprep.subr.bf16.mxu0 %v11714_v22  ;;  %11331 = vmatprep.mubr.msk.bf16.mxu1 %vm11715_vm1, %v11714_v22 }
0x36b4   :  { %11314 = vmatmul.mubr.msk.bf16.vlgmr.msra.gmra.mrb[12].mxu0 %vm194_vm0, %v8256_v3 }
0x36b5   :  { %11324 = vmatpush3.bf16.xpose.msra.mxu0 %v8594_v6  ;;  %11325 = vmatprep.mubr.msk.bf16.mxu0 %vm11715_vm1, %v11714_v22 }
0x36b6   :  { %11335 = vmatprep.subr.bf16.mxu0 %v11714_v22 }
0x36bc   :  { %11326 = vmatmul.mubr.msk.bf16.vlgmr.msra.gmra.mrb[16].mxu0 %vm194_vm0, %v8256_v3 }
0x36bd   :  { %11337 = vmatprep.mubr.msk.bf16.mxu0 %vm11715_vm1, %v11714_v22 }
0x375f   :  { %v8087_v39 = vpop.f32.mrb[248].mxu0  ;;  %v8173_v41 = vpop.f32.mrb[248].mxu1 }
0x3760   :  { %v11261_v40 = vpop.f32.mrb[249].mxu0  ;;  %v11273_v34 = vpop.f32.mrb[249].mxu1  ;;  %v8088_v2 = vadd.f32 %v9938_v60, %v8087_v39  ;;  %v8174_v59 = vadd.f32 %v9940_v15, %v8173_v41 }
0x3761   :  { %v8090_v42 = vpop.f32.mrb[250].mxu0  ;;  %v8176_v45 = vpop.f32.mrb[250].mxu1 }
0x3762   :  { %v11262_v44 = vpop.f32.mrb[251].mxu0  ;;  %v11274_v46 = vpop.f32.mrb[251].mxu1  ;;  %v8636_v12 = vpack.c.bf16 %v8088_v2, %v8088_v2  ;;  %v8638_v9 = vpack.c.bf16 %v8174_v59, %v8174_v59 }
0x3767   :  { %v8130_v36 = vpop.f32.mrb[252].mxu0  ;;  %v8297_v50 = vpop.f32.mrb[252].mxu1 }
0x3768   :  { %v8298_v51 = vadd.f32 %v9954_v48, %v8297_v50  ;;  %v11267_v4 = vpop.f32.mrb[253].mxu0  ;;  %v11285_v52 = vpop.f32.mrb[253].mxu1  ;;  %v8131_v38 = vadd.f32 %v9939_v18, %v8130_v36  ;;  %v9941_v36 = vld [vmem:[%s12248_s10 + $0x7] ss:$0 sm:$0xff] }
0x3769   :  { %v8133_v53 = vpop.f32.mrb[254].mxu0  ;;  %v8300_v54 = vpop.f32.mrb[254].mxu1 }
0x376a   :  { %v8640_v33 = vpack.c.bf16 %v8298_v51, %v8298_v51  ;;  %v11268_v56 = vpop.f32.mrb[255].mxu0  ;;  %v11286_v57 = vpop.f32.mrb[255].mxu1  ;;  %v8637_v45 = vpack.c.bf16 %v8131_v38, %v8131_v38  ;;  %v9971_v51 = vld [vmem:[%s12261_s16 + $0x5] ss:$0 sm:$0xff] }
0x376c   :  { %v8648_v0 = vsel %vm866_vm2, %v8640_v33, 0 }
0x376d   :  { %11330 = vmatpush3.bf16.xpose.msra.mxu1 %v8648_v0 }
0x376e   :  { %11341 = vmatprep.subr.bf16.mxu1 %v11714_v22 }
0x376f   :  { %v8216_v58 = vpop.f32.mrb[0].mxu0  ;;  %v8383_v5 = vpop.f32.mrb[0].mxu1 }
0x3770   :  { %v8384_v63 = vadd.f32 %v9956_v1, %v8383_v5  ;;  %v11279_v62 = vpop.f32.mrb[1].mxu0  ;;  %v11297_v29 = vpop.f32.mrb[1].mxu1  ;;  %v8217_v4 = vadd.f32 %v9941_v36, %v8216_v58 }
0x3771   :  { %v8219_v11 = vpop.f32.mrb[2].mxu0  ;;  %v8386_v8 = vpop.f32.mrb[2].mxu1 }
0x3772   :  { %v8642_v13 = vpack.c.bf16 %v8384_v63, %v8384_v63  ;;  %v11280_v55 = vpop.f32.mrb[3].mxu0  ;;  %v11298_v14 = vpop.f32.mrb[3].mxu1  ;;  %v8639_v56 = vpack.c.bf16 %v8217_v4, %v8217_v4 }
0x3774   :  { %v8740_v16 = vsel %vm866_vm2, %v8642_v13, 0  ;;  %11332 = vmatmul.mubr.msk.bf16.vlgmr.msra.gmra.mrb[12].mxu1 %vm866_vm2, %v8636_v12 }
0x3775   :  { %11342 = vmatpush3.bf16.xpose.msra.mxu1 %v8740_v16  ;;  %11343 = vmatprep.mubr.msk.bf16.mxu1 %vm11715_vm1, %v11714_v22 }
0x3776   :  { %11353 = vmatprep.subr.bf16.mxu1 %v11714_v22 }
0x3777   :  { %v8340_v24 = vpop.f32.mrb[4].mxu0  ;;  %v8501_v47 = vpop.f32.mrb[4].mxu1 }
0x3778   :  { %v8341_v7 = vadd.f32 %v9955_v19, %v8340_v24  ;;  %v8502_v17 = vadd.f32 %v9970_v20, %v8501_v47  ;;  %v11291_v25 = vpop.f32.mrb[5].mxu0  ;;  %v11309_v26 = vpop.f32.mrb[5].mxu1 }
0x3779   :  { %v8343_v28 = vpop.f32.mrb[6].mxu0  ;;  %v8504_v3 = vpop.f32.mrb[6].mxu1 }
0x377a   :  { %v8641_v30 = vpack.c.bf16 %v8341_v7, %v8341_v7  ;;  %v8876_v31 = vpack.c.bf16 %v8502_v17, %v8502_v17  ;;  %v11292_v32 = vpop.f32.mrb[7].mxu0  ;;  %v11310_v21 = vpop.f32.mrb[7].mxu1 }
0x377c   :  { %v8694_v35 = vsel %vm866_vm2, %v8641_v30, 0  ;;  %v8884_v43 = vsel %vm1106_vm3, %v8876_v31, 0  ;;  %11344 = vmatmul.mubr.msk.bf16.vlgmr.msra.gmra.mrb[16].mxu1 %vm866_vm2, %v8638_v9 }
0x377d   :  { %11336 = vmatpush3.bf16.xpose.msra.mxu0 %v8694_v35  ;;  %11354 = vmatpush3.bf16.msra.mxu1 %v8884_v43 }
0x377e   :  { %11347 = vmatprep.subr.bf16.mxu0 %v11714_v22  ;;  %11355 = vmatprep.mubr.msk.bf16.mxu1 %vm11715_vm1, %v11714_v22 }
0x377f   :  { %v8426_v61 = vpop.f32.mrb[8].mxu0  ;;  %v13280_v6 = vpop.f32.mrb[8].mxu1  ;;  %11365 = vmatprep.subr.bf16.mxu1 %v11714_v22 }
0x3780   :  { %v8427_v39 = vadd.f32 %v9957_v37, %v8426_v61  ;;  %v11303_v41 = vpop.f32.mrb[9].mxu0  ;;  %v11321_v40 = vpop.f32.mrb[9].mxu1 }
0x3781   :  { %v8429_v34 = vpop.f32.mrb[10].mxu0  ;;  %v8590_v42 = vpop.f32.mrb[10].mxu1 }
0x3782   :  { %v8643_v44 = vpack.c.bf16 %v8427_v39, %v8427_v39  ;;  %v11304_v46 = vpop.f32.mrb[11].mxu0  ;;  %v11322_v48 = vpop.f32.mrb[11].mxu1 }
0x3784   :  { %v8786_v50 = vsel %vm866_vm2, %v8643_v44, 0  ;;  %11338 = vmatmul.mubr.msk.bf16.vlgmr.msra.gmra.mrb[20].mxu0 %vm866_vm2, %v8637_v45 }
0x3785   :  { %11348 = vmatpush3.bf16.xpose.msra.mxu0 %v8786_v50  ;;  %11349 = vmatprep.mubr.msk.bf16.mxu0 %vm11715_vm1, %v11714_v22 }
0x3786   :  { %11359 = vmatprep.subr.bf16.mxu0 %v11714_v22 }
0x3787   :  { %v8544_v52 = vpop.f32.mrb[12].mxu0 }
0x3788   :  { %v8545_v53 = vadd.f32 %v9971_v51, %v8544_v52  ;;  %v11315_v54 = vpop.f32.mrb[13].mxu0  ;;  %v9972_v51 = vld [vmem:[%s12261_s16 + $0x6] ss:$0 sm:$0xff] }
0x3789   :  { %v8547_v33 = vpop.f32.mrb[14].mxu0  ;;  %v8588_v4 = vadd.f32 %v9972_v51, %v13280_v6 }
0x378a   :  { %v8877_v57 = vpack.c.bf16 %v8545_v53, %v8545_v53  ;;  %v11316_v60 = vpop.f32.mrb[15].mxu0 }
0x378b   :  { %v8878_v53 = vpack.c.bf16 %v8588_v4, %v8588_v4 }
0x378c   :  { %v8930_v0 = vsel %vm1106_vm3, %v8877_v57, 0  ;;  %11350 = vmatmul.mubr.msk.bf16.vlgmr.msra.gmra.mrb[24].mxu0 %vm866_vm2, %v8639_v56 }
0x378d   :  { %11360 = vmatpush3.bf16.msra.mxu0 %v8930_v0  ;;  %11361 = vmatprep.mubr.msk.bf16.mxu0 %vm11715_vm1, %v11714_v22  ;;  %v8976_v56 = vsel %vm1106_vm3, %v8878_v53, 0  ;;  %v9973_v0 = vld [vmem:[%s12261_s16 + $0x7] ss:$0 sm:$0xff] }
0x378e   :  { %11371 = vmatprep.subr.bf16.mxu0 %v11714_v22 }
0x378f   :  { %v13295_v1 = vpop.f32.mrb[16].mxu0 }
0x3790   :  { %v11327_v2 = vpop.f32.mrb[17].mxu0  ;;  %v8631_v6 = vadd.f32 %v9973_v0, %v13295_v1  ;;  %v11560_v0 = vld [vmem:[%s12375_s22 + $0x10] sm:$0xff]  }
0x3791   :  { %v8633_v58 = vpop.f32.mrb[18].mxu0 }
0x3792   :  { %v11328_v5 = vpop.f32.mrb[19].mxu0 }
0x3793   :  { %v8879_v5 = vpack.c.bf16 %v8631_v6, %v8631_v6  ;;  %v11561_v6 = vld [vmem:[%s12375_s22 + $0x18] sm:$0xff]  }
0x3847   :  { %v8684_v63 = vpop.f32.mrb[12].mxu1 }
0x3848   :  { %v8685_v62 = vadd.f32 %v8684_v63, %v11951_v27  ;;  %v11333_v29 = vpop.f32.mrb[13].mxu1 }
0x3849   :  { %v8687_v11 = vpop.f32.mrb[14].mxu1 }
0x384a   :  { %v11334_v8 = vpop.f32.mrb[15].mxu1  ;;  %v8828_v12 = vsel %vm866_vm2, %v8685_v62, -inf  ;;  %v9022_v11 = vsel %vm1106_vm3, %v8879_v5, 0 }
0x384b   :  { %8829 = vmax.xlane.f32.xlu1 %v8828_v12 }
0x384f   :  { %v8776_v13 = vpop.f32.mrb[16].mxu1 }
0x3850   :  { %v11345_v55 = vpop.f32.mrb[17].mxu1  ;;  %v8777_v24 = vadd.f32 %v8776_v13, %v11951_v27 }
0x3851   :  { %v8779_v14 = vpop.f32.mrb[18].mxu1 }
0x3852   :  { %v11346_v15 = vpop.f32.mrb[19].mxu1  ;;  %v8834_v17 = vsel %vm866_vm2, %v8777_v24, -inf  ;;  %v9986_v14 = vld [vmem:[%s12316_s15 + $0x10] sm:$0xf] }
0x3853   :  { %v9076_v15 = vsel %vm1106_vm3, %v9986_v14, 0  ;;  %v11563_v14 = vld [vmem:[%s12384_s30 + $0x48] sm:$0xff]  }
0x3857   :  { %v8730_v16 = vpop.f32.mrb[20].mxu0 }
0x3858   :  { %v8731_v19 = vadd.f32 %v8730_v16, %v11951_v27  ;;  %v11339_v20 = vpop.f32.mrb[21].mxu0  ;;  %v9987_v16 = vld [vmem:[%s12316_s15 + $0x14] sm:$0xf] }
0x3859   :  { %v8733_v59 = vpop.f32.mrb[22].mxu0 }
0x385a   :  { %v11340_v47 = vpop.f32.mrb[23].mxu0  ;;  %v8831_v7 = vsel %vm866_vm2, %v8731_v19, -inf }
0x385b   :  { %8832 = vmax.xlane.f32.xlu0 %v8831_v7 }
0x385f   :  { %8835 = vmax.xlane.f32.xlu0 %v8834_v17  ;;  %v8822_v25 = vpop.f32.mrb[24].mxu0  ;;  %v9988_v17 = vld [vmem:[%s12316_s15 + $0x18] sm:$0xf] }
0x3860   :  { %v8823_v26 = vadd.f32 %v8822_v25, %v11951_v27  ;;  %v11351_v28 = vpop.f32.mrb[25].mxu0 }
0x3861   :  { %v8825_v3 = vpop.f32.mrb[26].mxu0 }
0x3862   :  { %v11352_v9 = vpop.f32.mrb[27].mxu0  ;;  %v8837_v30 = vsel %vm866_vm2, %v8823_v26, -inf  ;;  %v9168_v3 = vsel %vm1106_vm3, %v9988_v17, 0 }
0x3863   :  { %8838 = vmax.xlane.f32.xlu0 %v8837_v30 }
0x38d8   :  { %v8830_v31 = vpop.xlane.xlu1 %8829 }
0x38d9   :  { %v8840_v32 = vsub.f32 %v8685_v62, %v8830_v31 }
0x38db   :  { %v8844_v21 = vmul.f32 1.442695, %v8840_v32 }
0x38dd   :  { %11684 = vpow2.f32 %v8844_v21 }
0x38e7   :  { %v11685_v18 = vpop.eup %11684 }
0x38e8   :  { %v8833_v35 = vpop.xlane.xlu0 %8832  ;;  %v8852_v43 = vsel %vm866_vm2, %v11685_v18, 0.0 }
0x38e9   :  { %v8841_v37 = vsub.f32 %v8731_v19, %v8833_v35  ;;  %8853 = vadd.xlane.f32.xlu1 %v8852_v43 }
0x38eb   :  { %v8846_v38 = vmul.f32 1.442695, %v8841_v37 }
0x38ec   :  { %v8836_v61 = vpop.xlane.xlu0 %8835 }
0x38ed   :  { %11686 = vpow2.f32 %v8846_v38  ;;  %v8842_v27 = vsub.f32 %v8777_v24, %v8836_v61  ;;  %v9122_v24 = vsel %vm1106_vm3, %v9987_v16, 0  ;;  %v9989_v38 = vld [vmem:[%s12316_s15 + $0x1c] sm:$0xf]  ;;  %s9594_s15 = sld [smem:[%s13415_s0 + %s11754_s1]]  }
0x38ee   :  { %v11565_v16 = vld [vmem:[%s12384_s30 + $0x58] sm:$0xff]  }
0x38ef   :  { %v8848_v39 = vmul.f32 1.442695, %v8842_v27 }
0x38f0   :  { %v8839_v41 = vpop.xlane.xlu0 %8838 }
0x38f1   :  { %11688 = vpow2.f32 %v8848_v39  ;;  %v8843_v40 = vsub.f32 %v8823_v26, %v8839_v41  ;;  %v9214_v39 = vsel %vm1106_vm3, %v9989_v38, 0  ;;  %v4743_v38 = vadd.f32 %v12780_v10, %v12650_v23 }
0x38f3   :  { %v8850_v34 = vmul.f32 1.442695, %v8843_v40  ;;  %v9995_v40 = vld [vmem:[%s12361_s7 + $0x1] ss:$0 sm:$0xff] }
0x38f5   :  { %11690 = vpow2.f32 %v8850_v34 }
0x38f7   :  { %v11687_v42 = vpop.eup %11686 }
0x38f8   :  { %v8855_v45 = vsel %vm866_vm2, %v11687_v42, 0.0 }
0x38f9   :  { %8856 = vadd.xlane.f32.xlu0 %v8855_v45 }
0x38fb   :  { %v11689_v44 = vpop.eup %11688 }
0x38fc   :  { %v8858_v46 = vsel %vm866_vm2, %v11689_v44, 0.0 }
0x38fd   :  { %8859 = vadd.xlane.f32.xlu1 %v8858_v46 }
0x38ff   :  { %v11691_v48 = vpop.eup %11690 }
0x3900   :  { %v8861_v36 = vsel %vm866_vm2, %v11691_v48, 0.0 }
0x3901   :  { %8862 = vadd.xlane.f32.xlu0 %v8861_v36 }
0x3917   :  { %9270 = vrot.lane.b32.xlu0 %v9995_v40, %s13451_s23 }
0x3976   :  { %v8854_v50 = vpop.xlane.xlu1 %8853 }
0x3977   :  { %11692 = vrcp.f32 %v8854_v50 }
0x3981   :  { %v11693_v52 = vpop.eup %11692 }
0x3982   :  { %v8868_v54 = vmul.f32 %v11693_v52, %v11685_v18  ;;  %v9998_v52 = vld [vmem:[%s12405_s18 + $0x1] ss:$0 sm:$0xff] }
0x3984   :  { %v8872_v33 = vpack.c.bf16 %v8868_v54, %v8868_v54 }
0x3986   :  { %11356 = vmatmul.mubr.msk.bf16.vlgmr.msra.gmra.mrb[20].mxu1 %vm866_vm2, %v8872_v33  ;;  %v8857_v57 = vpop.xlane.xlu0 %8856 }
0x3987   :  { %11366 = vmatpush3.bf16.msra.mxu1 %v8976_v56  ;;  %11694 = vrcp.f32 %v8857_v57  ;;  %11367 = vmatprep.mubr.msk.bf16.mxu1 %vm11715_vm1, %v11714_v22 }
0x3988   :  { %11377 = vmatprep.subr.bf16.mxu1 %v11714_v22 }
0x398a   :  { %v8860_v60 = vpop.xlane.xlu1 %8859 }
0x398b   :  { %11696 = vrcp.f32 %v8860_v60  ;;  %v9999_v60 = vld [vmem:[%s12410_s19 + $0x1] ss:$0 sm:$0xff]  ;;  %s11752_s19 = smov 41  }
0x398c   :  { %s9593_s20 = sld [smem:[%s13415_s0 + %s11752_s19]]  }
0x398e   :  { %v8863_v2 = vpop.xlane.xlu0 %8862 }
0x398f   :  { %11698 = vrcp.f32 %v8863_v2 }
0x3991   :  { %v11695_v58 = vpop.eup %11694 }
0x3992   :  { %v8869_v63 = vmul.f32 %v11695_v58, %v11687_v42 }
0x3994   :  { %v8873_v62 = vpack.c.bf16 %v8869_v63, %v8869_v63 }
0x3995   :  { %v11697_v29 = vpop.eup %11696 }
0x3996   :  { %v8870_v8 = vmul.f32 %v11697_v29, %v11689_v44  ;;  %11362 = vmatmul.mubr.msk.bf16.vlgmr.msra.gmra.mrb[28].mxu0 %vm866_vm2, %v8873_v62 }
0x3997   :  { %11372 = vmatpush3.bf16.msra.mxu0 %v9022_v11  ;;  %11373 = vmatprep.mubr.msk.bf16.mxu0 %vm11715_vm1, %v11714_v22 }
0x3998   :  { %v8874_v12 = vpack.c.bf16 %v8870_v8, %v8870_v8  ;;  %11401 = vmatprep.subr.bf16.mxu0 %v11714_v22 }
0x3999   :  { %v11699_v1 = vpop.eup %11698 }
0x399a   :  { %v8871_v13 = vmul.f32 %v11699_v1, %v11691_v48  ;;  %11368 = vmatmul.mubr.msk.bf16.vlgmr.msra.gmra.mrb[24].mxu1 %vm866_vm2, %v8874_v12  ;;  %v9271_v48 = vpop.permute.xlu0 %9270 }
0x399b   :  { %11379 = vmatprep.mubr.msk.bf16.mxu1 %vm11715_vm1, %v11714_v22  ;;  %11378 = vmatpush3.bf16.msra.mxu1 %v9076_v15  ;;  %v11564_v15 = vld [vmem:[%s12384_s30 + $0x50] sm:$0xff]  }
0x399c   :  { %v8875_v55 = vpack.c.bf16 %v8871_v13, %v8871_v13  ;;  %11383 = vmatprep.subr.bf16.mxu1 %v11714_v22  ;;  %v11562_v13 = vld [vmem:[%s12384_s30 + $0x40] sm:$0xff]  }
0x399e   :  { %11374 = vmatmul.mubr.msk.bf16.vlgmr.msra.gmra.mrb[32].mxu0 %vm866_vm2, %v8875_v55 }
0x399f   :  { %11405 = vmatprep.mubr.msk.bf16.mxu0 %vm11715_vm1, %v11714_v22  ;;  %11402 = vmatpush3.bf16.msra.mxu0 %v11560_v0 }
0x39a0   :  { %11403 = vmatprep.subr.bf16.mxu0 %v11714_v22 }
0x39a3   :  { %11404 = vmatpush3.bf16.msra.mxu0 %v11561_v6 }
0x39a4   :  { %11409 = vmatprep.subr.bf16.mxu0 %v11714_v22 }
0x3a59   :  { %v8920_v19 = vpop.f32.mrb[20].mxu1 }
0x3a5a   :  { %v9064_v20 = vpack.c.bf16 %v8920_v19, %v8920_v19  ;;  %v11357_v59 = vpop.f32.mrb[21].mxu1  ;;  %v11566_v19 = vld [vmem:[%s12384_s30 + $0x60] sm:$0xff]  }
0x3a5b   :  { %v8923_v47 = vpop.f32.mrb[22].mxu1  ;;  %v11568_v59 = vld [vmem:[%s12384_s30 + $0x70] sm:$0xff]  }
0x3a5c   :  { %v11358_v7 = vpop.f32.mrb[23].mxu1  ;;  %11380 = vmatmul.mubr.msk.bf16.vlgmr.msra.gmra.mrb[28].mxu1 %vm866_vm2, %v9064_v20  ;;  %v11567_v20 = vld [vmem:[%s12384_s30 + $0x68] sm:$0xff]   ;;  %v10005_v47 = vld [vmem:[%s12420_s27 + $0x1] ss:$0 sm:$0xff] }
0x3a5d   :  { %11384 = vmatpush3.bf16.msra.mxu1 %v9122_v24  ;;  %11385 = vmatprep.mubr.msk.bf16.mxu1 %vm11715_vm1, %v11714_v22  ;;  %v11569_v24 = vld [vmem:[%s12384_s30 + $0x78] sm:$0xff]  }
0x3a5e   :  { %11389 = vmatprep.subr.bf16.mxu1 %v11714_v22 }
0x3a69   :  { %v8966_v25 = vpop.f32.mrb[28].mxu0 }
0x3a6a   :  { %v9065_v26 = vpack.c.bf16 %v8966_v25, %v8966_v25  ;;  %v11363_v28 = vpop.f32.mrb[29].mxu0 }
0x3a6b   :  { %v8969_v9 = vpop.f32.mrb[30].mxu0 }
0x3a6c   :  { %v11364_v30 = vpop.f32.mrb[31].mxu0  ;;  %11386 = vmatmul.mubr.msk.bf16.vlgmr.msra.gmra.mrb[28].mxu1 %vm866_vm2, %v9065_v26 }
0x3a6d   :  { %v9012_v31 = vpop.f32.mrb[24].mxu1  ;;  %11390 = vmatpush3.bf16.msra.mxu1 %v9168_v3  ;;  %11391 = vmatprep.mubr.msk.bf16.mxu1 %vm11715_vm1, %v11714_v22 }
0x3a6e   :  { %v11369_v32 = vpop.f32.mrb[25].mxu1  ;;  %11395 = vmatprep.subr.bf16.mxu1 %v11714_v22  ;;  %v9066_v27 = vpack.c.bf16 %v9012_v31, %v9012_v31 }
0x3a6f   :  { %v9015_v21 = vpop.f32.mrb[26].mxu1 }
0x3a70   :  { %v11370_v18 = vpop.f32.mrb[27].mxu1  ;;  %v10034_v21 = vld [vmem:[%s12467_s24 + $0x1] ss:$0 sm:$0xff] }
0x3a71   :  { %v9058_v35 = vpop.f32.mrb[32].mxu0 }
0x3a72   :  { %v11375_v43 = vpop.f32.mrb[33].mxu0  ;;  %v9067_v41 = vpack.c.bf16 %v9058_v35, %v9058_v35 }
0x3a73   :  { %v9061_v37 = vpop.f32.mrb[34].mxu0 }
0x3a74   :  { %v11376_v61 = vpop.f32.mrb[35].mxu0 }
0x3a75   :  { %v9813_v61 = vld [vmem:[%s12467_s24 + $0x1] ss:$0 sm:$0xff] }
0x3a78   :  { %11392 = vmatmul.mubr.msk.bf16.vlgmr.msra.gmra.mrb[28].mxu1 %vm866_vm2, %v9066_v27  ;;  %v4752_v27 = vadd.f32 %v9813_v61, %v4743_v38 }
0x3a79   :  { %11396 = vmatpush3.bf16.msra.mxu1 %v9214_v39  ;;  %11397 = vmatprep.mubr.msk.bf16.mxu1 %vm11715_vm1, %v11714_v22 }
0x3a7a   :  { %v4755_v39 = vsel %vm194_vm0, %v4752_v27, 0.0 }
0x3a84   :  { %11398 = vmatmul.mubr.msk.bf16.vlgmr.msra.gmra.mrb[28].mxu1 %vm866_vm2, %v9067_v41 }
0x3b57   :  { %v9250_v34 = vpop.f32.mrb[28].mxu1 }
0x3b58   :  { %9260 = vrot.lane.b32.xlu1 %v9250_v34, %s13451_s23  ;;  %v11399_v42 = vpop.f32.mrb[29].mxu1 }
0x3b59   :  { %v9253_v45 = vpop.f32.mrb[30].mxu1 }
0x3b5a   :  { %v11400_v44 = vpop.f32.mrb[31].mxu1 }
0x3bca   :  { %v9261_v46 = vpop.permute.xlu1 %9260 }
0x3bcb   :  { %v9263_v36 = vadd.f32 %v9261_v46, %v13172_v49 }
0x3bcd   :  { %v13354_v50 = vadd.f32 %v9271_v48, %v9263_v36 }
0x3bcf   :  { %9277 = vrot.lane.b32.xlu1 %v13354_v50, %s11751_s9 }
0x3c41   :  { %v9278_v51 = vpop.permute.xlu1 %9277 }
0x3c42   :  { %v9280_v4 = vsel %vm194_vm0, %v9278_v51, 0.0 }
0x3c43   :  { %9281 = vadd.xlane.f32.xlu1 %v9280_v4 }
0x3c54   :  { %9302 = vrot.lane.b32.xlu1 %v9998_v52, %s13451_s23 }
0x3cd0   :  { %v9282_v53 = vpop.xlane.xlu1 %9281 }
0x3cd1   :  { %v9283_v54 = vmul.f32 0.03125, %v9282_v53 }
0x3cd3   :  { %v9284_v33 = vsub.f32 %v13354_v50, %v9283_v54  ;;  %v9814_v54 = vld [vmem:[%s9592_s11] ss:$0 sm:$0xff] }
0x3cd4   :  { %v9303_v62 = vpop.permute.xlu1 %9302 }
0x3cd5   :  { %v9285_v49 = vmul.f32 %v9284_v33, %v9284_v33 }
0x3cd7   :  { %9287 = vrot.lane.b32.xlu0 %v9285_v49, %s11751_s9 }
0x3d49   :  { %v9288_v56 = vpop.permute.xlu0 %9287 }
0x3d4a   :  { %v9290_v57 = vsel %vm194_vm0, %v9288_v56, 0.0 }
0x3d4b   :  { %9291 = vadd.xlane.f32.xlu0 %v9290_v57 }
0x3d61   :  { %9311 = vrot.lane.b32.xlu0 %v9999_v60, %s13451_s23 }
0x3dd8   :  { %v9292_v2 = vpop.xlane.xlu0 %9291 }
0x3dd9   :  { %v9293_v58 = vmul.f32 0.03125, %v9292_v2 }
0x3ddb   :  { %v9294_v5 = vadd.f32 1e-05, %v9293_v58 }
0x3ddc   :  { %v9312_v11 = vpop.permute.xlu0 %9311 }
0x3ddd   :  { %11700 = vrsqrt.f32 %v9294_v5 }
0x3de7   :  { %v11701_v63 = vpop.eup %11700 }
0x3de8   :  { %v9296_v29 = vmul.f32 %v11701_v63, %v9284_v33 }
0x3dea   :  { %v9305_v8 = vmul.f32 %v9303_v62, %v9296_v29 }
0x3dec   :  { %v9314_v12 = vadd.f32 %v9312_v11, %v9305_v8 }
0x3dee   :  { %v9315_v1 = vpack.c.bf16 %v9314_v12, %v9314_v12 }
0x3df0   :  { %9328 = vrot.lane.b32.xlu1 %v9315_v1, %s11751_s9 }
0x3e62   :  { %v9329_v55 = vpop.permute.xlu1 %9328 }
0x3e63   :  { %11406 = vmatmul.mubr.msk.bf16.vlgmr.msra.gmra.mrb[36].mxu0 %vm194_vm0, %v9329_v55 }
0x3e64   :  { %11410 = vmatpush3.bf16.msra.mxu0 %v11562_v13  ;;  %11425 = vmatprep.mubr.msk.bf16.mxu0 %vm11715_vm1, %v11714_v22 }
0x3e65   :  { %11411 = vmatprep.subr.bf16.mxu0 %v11714_v22 }
0x3e68   :  { %11412 = vmatpush3.bf16.msra.mxu0 %v11563_v14 }
0x3e69   :  { %11413 = vmatprep.subr.bf16.mxu0 %v11714_v22 }
0x3e6c   :  { %11414 = vmatpush3.bf16.msra.mxu0 %v11564_v15 }
0x3e6d   :  { %11415 = vmatprep.subr.bf16.mxu0 %v11714_v22 }
0x3e70   :  { %11416 = vmatpush3.bf16.msra.mxu0 %v11565_v16 }
0x3e71   :  { %11417 = vmatprep.subr.bf16.mxu0 %v11714_v22 }
0x3e74   :  { %11418 = vmatpush3.bf16.msra.mxu0 %v11566_v19 }
0x3e75   :  { %11419 = vmatprep.subr.bf16.mxu0 %v11714_v22 }
0x3e78   :  { %11420 = vmatpush3.bf16.msra.mxu0 %v11567_v20 }
0x3e79   :  { %11421 = vmatprep.subr.bf16.mxu0 %v11714_v22 }
0x3e7c   :  { %11422 = vmatpush3.bf16.msra.mxu0 %v11568_v59 }
0x3e7d   :  { %11423 = vmatprep.subr.bf16.mxu0 %v11714_v22 }
0x3e80   :  { %11424 = vmatpush3.bf16.msra.mxu0 %v11569_v24 }
0x3f36   :  { %v9379_v7 = vpop.f32.mrb[36].mxu0 }
0x3f37   :  { %v9380_v17 = vadd.f32 %v10005_v47, %v9379_v7  ;;  %v11407_v25 = vpop.f32.mrb[37].mxu0 }
0x3f38   :  { %v9382_v26 = vpop.f32.mrb[38].mxu0 }
0x3f39   :  { %v9385_v28 = vmax.f32 %v9380_v17, 0.0  ;;  %v11408_v3 = vpop.f32.mrb[39].mxu0 }
0x3f3b   :  { %v9386_v9 = vpack.c.bf16 %v9385_v28, %v9385_v28 }
0x3f3d   :  { %11426 = vmatmul.mubr.bf16.vlgmr.msra.gmra.mrb[40].mxu0 %v9386_v9 }
0x4010   :  { %v9485_v30 = vpop.f32.mrb[40].mxu0 }
0x4011   :  { %9492 = vrot.lane.b32.xlu1 %v9485_v30, %s13451_s23  ;;  %v11427_v31 = vpop.f32.mrb[41].mxu0 }
0x4012   :  { %v9488_v32 = vpop.f32.mrb[42].mxu0 }
0x4013   :  { %v11428_v22 = vpop.f32.mrb[43].mxu0 }
0x4015   :  { %9502 = vrot.lane.b32.xlu1 %v10034_v21, %s13451_s23 }
0x4083   :  { %v9493_v18 = vpop.permute.xlu1 %9492 }
0x4084   :  { %v9495_v35 = vadd.f32 %v9493_v18, %v13354_v50  ;;  %v9815_v50 = vld [vmem:[%s9593_s20] ss:$0 sm:$0xff] }
0x4087   :  { %v9503_v43 = vpop.permute.xlu1 %9502 }
0x4088   :  { %v9505_v37 = vadd.f32 %v9503_v43, %v9495_v35 }
0x408a   :  { %9509 = vrot.lane.b32.xlu0 %v9505_v37, %s11751_s9 }
0x40a9   :  { %4756 = vadd.xlane.f32.xlu0 %v4755_v39 }
0x40fc   :  { %v9510_v41 = vpop.permute.xlu0 %9509 }
0x40fd   :  { %v9512_v40 = vsel %vm194_vm0, %v9510_v41, 0.0 }
0x40fe   :  { %9513 = vadd.xlane.f32.xlu1 %v9512_v40 }
0x4136   :  { %v4757_v34 = vpop.xlane.xlu0 %4756 }
0x4137   :  { %v4758_v42 = vmul.f32 0.03125, %v4757_v34 }
0x4139   :  { %v4759_v45 = vsub.f32 %v4752_v27, %v4758_v42 }
0x413b   :  { %v4760_v44 = vmul.f32 %v4759_v45, %v4759_v45 }
0x413d   :  { %v4761_v46 = vsel %vm194_vm0, %v4760_v44, 0.0 }
0x413e   :  { %4762 = vadd.xlane.f32.xlu1 %v4761_v46 }
0x418b   :  { %v9514_v48 = vpop.xlane.xlu1 %9513 }
0x418c   :  { %v9515_v36 = vmul.f32 0.03125, %v9514_v48 }
0x418e   :  { %v9516_v23 = vsub.f32 %v9505_v37, %v9515_v36 }
0x4190   :  { %v9517_v10 = vmul.f32 %v9516_v23, %v9516_v23 }
0x4192   :  { %9519 = vrot.lane.b32.xlu0 %v9517_v10, %s11751_s9 }
0x4196   :  { %9543 = vrot.lane.b32.xlu0 %v9815_v50, %s13451_s23 }
0x41cb   :  { %v4763_v51 = vpop.xlane.xlu1 %4762 }
0x41cc   :  { %v4764_v4 = vmul.f32 0.03125, %v4763_v51 }
0x41ce   :  { %v4765_v52 = vadd.f32 1e-05, %v4764_v4 }
0x41d0   :  { %11702 = vrsqrt.f32 %v4765_v52 }
0x41da   :  { %v11703_v53 = vpop.eup %11702 }
0x41db   :  { %v4767_v33 = vmul.f32 %v11703_v53, %v4759_v45 }
0x41dd   :  { %v4774_v49 = vmul.f32 %v9814_v54, %v4767_v33 }
0x41df   :  { %v4781_v56 = vadd.f32 %v9815_v50, %v4774_v49 }
0x41e1   :  { %4782 = vst.msk [vmem:[%s9594_s15] sm:$0xff] %vm194_vm0, %v4781_v56 }
0x4204   :  { %v9520_v57 = vpop.permute.xlu0 %9519 }
0x4205   :  { %v9522_v60 = vsel %vm194_vm0, %v9520_v57, 0.0 }
0x4206   :  { %9523 = vadd.xlane.f32.xlu1 %v9522_v60 }
0x4208   :  { %v9544_v62 = vpop.permute.xlu0 %9543 }
0x4217   :  { %9534 = vrot.lane.b32.xlu1 %v9814_v54, %s13451_s23 }
0x4293   :  { %v9524_v0 = vpop.xlane.xlu1 %9523 }
0x4294   :  { %v9525_v6 = vmul.f32 0.03125, %v9524_v0 }
0x4296   :  { %v9526_v2 = vadd.f32 1e-05, %v9525_v6 }
0x4297   :  { %v9535_v5 = vpop.permute.xlu1 %9534 }
0x4298   :  { %11704 = vrsqrt.f32 %v9526_v2 }
0x42a2   :  { %v11705_v58 = vpop.eup %11704 }
0x42a3   :  { %v9528_v63 = vmul.f32 %v11705_v58, %v9516_v23 }
0x42a5   :  { %v9537_v29 = vmul.f32 %v9535_v5, %v9528_v63 }
0x42a7   :  { %v9546_v11 = vadd.f32 %v9544_v62, %v9537_v29 }
0x42a9   :  { %9548 = vst.msk [vmem:[%s9594_s15] sm:$0xff] %vm9547_vm5, %v9546_v11 }

</bundles_post_ra>
